<compile_context>
chip_gen: v7x
topology: tpu7x:2x2x1
jax: 0.10.0
libtpu: 0.0.40
codegen_flags: <defaults>
</compile_context>

<pallas_src>
import jax
import jax.numpy as jnp
from jax.experimental import pallas as pl
from jax.experimental.pallas import tpu as pltpu

EPS = 1e-5          # nn.BatchNorm2d default eps
NEG_SLOPE = 0.2     # nn.LeakyReLU(0.2)
HI = jax.lax.Precision.HIGHEST   # reference (ground truth) only


def _leaky(x):
    return jnp.where(x > 0, x, NEG_SLOPE * x)


def _conv3x3(pad_ref, w_ref, N, H, W, Cin, Cout):
    """3x3 'SAME' conv as 9 per-tap MXU matmuls accumulated in f32.

    pad_ref : (N, H+2, W+2, Cin) f32 VMEM ref, already zero-padded
    w_ref   : (9, Cin, Cout)     bf16 ref, tap-major (k = dy*3 + dx)
    Returns (acc (NHW, Cout) f32, centre window (NHW, Cin) bf16).
    """
    NHW = N * H * W
    acc = jnp.zeros((NHW, Cout), jnp.float32)
    centre = None
    for k in range(9):                                    # static unroll, 9 taps
        dy, dx = k // 3, k % 3
        win = pad_ref[:, dy:dy + H, dx:dx + W, :]         # slice the ref, not a value
        win = win.reshape(NHW, Cin).astype(jnp.bfloat16)  # bf16 MXU operand
        acc = acc + jnp.dot(win, w_ref[k], preferred_element_type=jnp.float32)
        if k == 4:                                        # centre tap (dy=dx=1) == raw input
            centre = win
    return acc, centre


def _batch_norm_train(acc, g, be, inv_n):
    """Training-mode BN folded to per-channel scale/shift (single-pass stats, f32)."""
    s = jnp.sum(acc, axis=0, keepdims=True)
    q = jnp.sum(acc * acc, axis=0, keepdims=True)
    mean = s * inv_n
    var = jnp.maximum(q * inv_n - mean * mean, 0.0)       # clamp cancellation noise
    scale = g * jax.lax.rsqrt(var + EPS)
    shift = be - mean * scale
    return acc * scale + shift


def residual_block_kernel(x_ref, w1_ref, w2_ref, ws_ref, bs_ref,
                          g1_ref, be1_ref, g2_ref, be2_ref,
                          out_ref, xpad_ref, hpad_ref):
    # x_ref   : (N, H, W, Cin)  f32   input (unpadded)
    # w1_ref  : (9, Cin, Cout)  bf16  conv1 taps
    # w2_ref  : (9, Cout, Cout) bf16  conv2 taps
    # ws_ref  : (Cin, Cout)     bf16  1x1 shortcut weight
    # bs_ref  : (1, Cout)       f32   shortcut bias
    # g*/be*  : (1, Cout)       f32   BN gamma / beta
    # out_ref : (N*H*W, Cout)   f32   output slab (wrapper reshapes to NHWC)
    # xpad_ref: (N, H+2, W+2, Cin)  f32 scratch, zero-padded input
    # hpad_ref: (N, H+2, W+2, Cout) f32 scratch, zero-padded conv1 activation
    N, H, W, Cin = x_ref.shape
    Cout = ws_ref.shape[-1]
    NHW = N * H * W
    inv_n = jnp.float32(1.0 / NHW)

    # ---- zero-pad the input in VMEM: one full zero fill, then interior write ----
    xpad_ref[...] = jnp.zeros(xpad_ref.shape, xpad_ref.dtype)
    xpad_ref[:, 1:H + 1, 1:W + 1, :] = x_ref[...]

    # ---- conv1 (9 tap matmuls); 1x1 shortcut reuses the centre-tap window ----
    acc1, centre = _conv3x3(xpad_ref, w1_ref, N, H, W, Cin, Cout)
    identity = jnp.dot(centre, ws_ref[...],
                       preferred_element_type=jnp.float32) + bs_ref[...]

    # ---- BN1 (training mode: conv bias cancels against batch mean) + LeakyReLU ----
    h = _leaky(_batch_norm_train(acc1, g1_ref[...], be1_ref[...], inv_n))

    # ---- zero-pad conv1 activation in VMEM ----
    hpad_ref[...] = jnp.zeros(hpad_ref.shape, hpad_ref.dtype)
    hpad_ref[:, 1:H + 1, 1:W + 1, :] = h.reshape(N, H, W, Cout)

    # ---- conv2 (9 tap matmuls) + BN2 + residual add + LeakyReLU ----
    acc2, _ = _conv3x3(hpad_ref, w2_ref, N, H, W, Cout, Cout)
    y = _leaky(_batch_norm_train(acc2, g2_ref[...], be2_ref[...], inv_n) + identity)

    out_ref[...] = y                                      # flat (NHW, Cout) store


def residual_block(x_nhwc, p):
    """x_nhwc: (N, H, W, Cin) f32.

    Implements the Cin != Cout branch of the PyTorch module (1x1-conv shortcut);
    for Cin == Cout (nn.Identity) pass ws = identity, bs = 0.  Training-mode
    BatchNorm only: conv biases are folded away in-kernel because they cancel
    exactly against the batch-mean subtraction (NOT valid for eval/running stats).
    """
    N, H, W, Cin = x_nhwc.shape
    Cout = p["w1"].shape[-1]

    # weights tap-major (k = dy*3 + dx), pre-cast to the MXU operand dtype
    w1 = p["w1"].reshape(9, Cin, Cout).astype(jnp.bfloat16)
    w2 = p["w2"].reshape(9, Cout, Cout).astype(jnp.bfloat16)
    ws = p["ws"].astype(jnp.bfloat16)

    vmem = pl.BlockSpec(memory_space=pltpu.MemorySpace.VMEM)

    # explicit scoped-VMEM limit sized from the actual resident buffers
    # (the default scoped limit is well below physical VMEM on all generations)
    xpad_bytes = N * (H + 2) * (W + 2) * Cin * 4
    hpad_bytes = N * (H + 2) * (W + 2) * Cout * 4
    io_bytes = N * H * W * (Cin + Cout) * 4
    vmem_limit = int(min(64 * 1024 * 1024,
                         max(32 * 1024 * 1024,
                             4 * (xpad_bytes + hpad_bytes + io_bytes))))

    out2d = pl.pallas_call(
        residual_block_kernel,
        out_shape=jax.ShapeDtypeStruct((N * H * W, Cout), jnp.float32),
        in_specs=[vmem] * 9,
        out_specs=vmem,
        scratch_shapes=[
            pltpu.VMEM((N, H + 2, W + 2, Cin), jnp.float32),   # padded input
            pltpu.VMEM((N, H + 2, W + 2, Cout), jnp.float32),  # padded conv1 act
        ],
        compiler_params=pltpu.CompilerParams(vmem_limit_bytes=vmem_limit),
    )(x_nhwc, w1, w2, ws, p["bs"], p["g1"], p["be1"], p["g2"], p["be2"])
    return out2d.reshape(N, H, W, Cout)      # free: memory layout is already NHWC


def reference(x_nhwc, p):
    """Pure-JAX f32 (HIGHEST precision) reference matching the PyTorch
    training-mode forward, including the conv biases the kernel folds away."""
    dn = ("NHWC", "HWIO", "NHWC")

    def conv3(x, w, b):
        y = jax.lax.conv_general_dilated(x, w, (1, 1), "SAME",
                                         dimension_numbers=dn, precision=HI)
        return y + b.reshape(1, 1, 1, -1)

    def bn(x, g, be):
        m = jnp.mean(x, axis=(0, 1, 2), keepdims=True)
        v = jnp.mean((x - m) ** 2, axis=(0, 1, 2), keepdims=True)
        return (x - m) * jax.lax.rsqrt(v + EPS) * g.reshape(1, 1, 1, -1) \
            + be.reshape(1, 1, 1, -1)

    identity = jnp.einsum("nhwc,cd->nhwd", x_nhwc, p["ws"], precision=HI) \
        + p["bs"].reshape(1, 1, 1, -1)
    out = _leaky(bn(conv3(x_nhwc, p["w1"], p["b1"]), p["g1"], p["be1"]))
    out = bn(conv3(out, p["w2"], p["b2"]), p["g2"], p["be2"])
    return _leaky(out + identity)


def init_params(key, cin, cout):
    ks = jax.random.split(key, 8)
    return {
        "w1": 0.2 * jax.random.normal(ks[0], (3, 3, cin, cout), jnp.float32),
        "b1": 0.1 * jax.random.normal(ks[1], (1, cout), jnp.float32),
        "g1": 1.0 + 0.1 * jax.random.normal(ks[2], (1, cout), jnp.float32),
        "be1": 0.1 * jax.random.normal(ks[3], (1, cout), jnp.float32),
        "w2": 0.2 * jax.random.normal(ks[4], (3, 3, cout, cout), jnp.float32),
        "b2": 0.1 * jax.random.normal(ks[5], (1, cout), jnp.float32),
        "g2": 1.0 + 0.1 * jax.random.normal(ks[6], (1, cout), jnp.float32),
        "be2": 0.1 * jax.random.normal(ks[7], (1, cout), jnp.float32),
        "ws": 0.2 * jax.random.normal(jax.random.fold_in(key, 100),
                                      (cin, cout), jnp.float32),
        "bs": 0.1 * jax.random.normal(jax.random.fold_in(key, 101),
                                      (1, cout), jnp.float32),
    }


if __name__ == "__main__":
    key = jax.random.PRNGKey(0)
    N, Cin, H, W = 2, 4, 16, 16
    Cout = 8

    x_nchw = jax.random.normal(jax.random.fold_in(key, 0),
                               (N, Cin, H, W), jnp.float32)
    x_nhwc = jnp.transpose(x_nchw, (0, 2, 3, 1))   # NCHW (PyTorch) -> NHWC (kernel)
    params = init_params(jax.random.fold_in(key, 1), Cin, Cout)

    out = residual_block(x_nhwc, params)
    out = jax.block_until_ready(out)

    ref = reference(x_nhwc, params)
    assert out.shape == (N, H, W, Cout)
    # Tolerance sized for explicit bf16 MXU operands with f32 accumulation vs.
    # the f32 HIGHEST-precision reference (tightened from the previous 5e-2;
    # semantic bugs would be orders of magnitude larger than this bound).
    err = jnp.max(jnp.abs(out - ref))
    assert jnp.allclose(out, ref, atol=3e-2, rtol=3e-2), f"max abs err {err}"

    print("KERNEL_OK")
</pallas_src>

<mosaic_0001>
module attributes {stable_mosaic.version = 11 : i64} {
  func.func @residual_block_kernel(%arg0: memref<2x16x16x4xf32, #tpu.memory_space<vmem>>, %arg1: memref<9x4x8xbf16, #tpu.memory_space<vmem>>, %arg2: memref<9x8x8xbf16, #tpu.memory_space<vmem>>, %arg3: memref<4x8xbf16, #tpu.memory_space<vmem>>, %arg4: memref<1x8xf32, #tpu.memory_space<vmem>>, %arg5: memref<1x8xf32, #tpu.memory_space<vmem>>, %arg6: memref<1x8xf32, #tpu.memory_space<vmem>>, %arg7: memref<1x8xf32, #tpu.memory_space<vmem>>, %arg8: memref<1x8xf32, #tpu.memory_space<vmem>>, %arg9: memref<512x8xf32, #tpu.memory_space<vmem>>, %arg10: memref<2x18x18x4xf32, #tpu.memory_space<vmem>>, %arg11: memref<2x18x18x8xf32, #tpu.memory_space<vmem>>) attributes {dimension_semantics = [], scalar_prefetch = 0 : i64, scratch_operands = 2 : i64, tpu.core_type = #tpu.core_type<tc>} {
    %cst = arith.constant 0.000000e+00 : f32
    %0 = vector.broadcast %cst : f32 to vector<2x18x18x4xf32>
    %c0 = arith.constant 0 : index
    %c0_0 = arith.constant 0 : index
    %c0_1 = arith.constant 0 : index
    %c0_2 = arith.constant 0 : index
    %1 = vector.load %arg10[%c0, %c0_0, %c0_1, %c0_2] : memref<2x18x18x4xf32, #tpu.memory_space<vmem>>, vector<2x18x18x4xf32>
    tpu.vector_store %arg10[%c0, %c0_0, %c0_1, %c0_2], %0 {strides = array<i32>} : memref<2x18x18x4xf32, #tpu.memory_space<vmem>>, vector<2x18x18x4xf32>,
    %c0_3 = arith.constant 0 : index
    %c0_4 = arith.constant 0 : index
    %c0_5 = arith.constant 0 : index
    %c0_6 = arith.constant 0 : index
    %2 = vector.load %arg0[%c0_3, %c0_4, %c0_5, %c0_6] : memref<2x16x16x4xf32, #tpu.memory_space<vmem>>, vector<2x16x16x4xf32>
    %c0_7 = arith.constant 0 : index
    %c1 = arith.constant 1 : index
    %c1_8 = arith.constant 1 : index
    %c0_9 = arith.constant 0 : index
    %3 = vector.load %arg10[%c0_7, %c1, %c1_8, %c0_9] : memref<2x18x18x4xf32, #tpu.memory_space<vmem>>, vector<2x16x16x4xf32>
    tpu.vector_store %arg10[%c0_7, %c1, %c1_8, %c0_9], %2 {strides = array<i32>} : memref<2x18x18x4xf32, #tpu.memory_space<vmem>>, vector<2x16x16x4xf32>,
    %cst_10 = arith.constant 0.000000e+00 : f32
    %4 = vector.broadcast %cst_10 : f32 to vector<512x8xf32>
    %c0_11 = arith.constant 0 : index
    %c0_12 = arith.constant 0 : index
    %c0_13 = arith.constant 0 : index
    %c0_14 = arith.constant 0 : index
    %5 = vector.load %arg10[%c0_11, %c0_12, %c0_13, %c0_14] : memref<2x18x18x4xf32, #tpu.memory_space<vmem>>, vector<2x16x16x4xf32>
    %6 = vector.shape_cast %5 : vector<2x16x16x4xf32> to vector<512x4xf32>
    %7 = arith.truncf %6 : vector<512x4xf32> to vector<512x4xbf16>
    %c0_15 = arith.constant 0 : index
    %c0_16 = arith.constant 0 : index
    %c0_17 = arith.constant 0 : index
    %8 = vector.load %arg1[%c0_15, %c0_16, %c0_17] : memref<9x4x8xbf16, #tpu.memory_space<vmem>>, vector<1x4x8xbf16>
    %9 = vector.shape_cast %8 : vector<1x4x8xbf16> to vector<4x8xbf16>
    %cst_18 = arith.constant dense<0.000000e+00> : vector<512x8xf32>
    %10 = tpu.matmul %7, %9, %cst_18 {dimension_numbers = #tpu.dot_dimension_numbers<[1], [0], [0], [1], [0, 0, 1, 1], [], []>} : vector<512x4xbf16>, vector<4x8xbf16>, vector<512x8xf32> -> vector<512x8xf32>
    %11 = arith.addf %4, %10 : vector<512x8xf32>
    %c0_19 = arith.constant 0 : index
    %c0_20 = arith.constant 0 : index
    %c1_21 = arith.constant 1 : index
    %c0_22 = arith.constant 0 : index
    %12 = vector.load %arg10[%c0_19, %c0_20, %c1_21, %c0_22] : memref<2x18x18x4xf32, #tpu.memory_space<vmem>>, vector<2x16x16x4xf32>
    %13 = vector.shape_cast %12 : vector<2x16x16x4xf32> to vector<512x4xf32>
    %14 = arith.truncf %13 : vector<512x4xf32> to vector<512x4xbf16>
    %c1_23 = arith.constant 1 : index
    %c0_24 = arith.constant 0 : index
    %c0_25 = arith.constant 0 : index
    %15 = vector.load %arg1[%c1_23, %c0_24, %c0_25] : memref<9x4x8xbf16, #tpu.memory_space<vmem>>, vector<1x4x8xbf16>
    %16 = vector.shape_cast %15 : vector<1x4x8xbf16> to vector<4x8xbf16>
    %cst_26 = arith.constant dense<0.000000e+00> : vector<512x8xf32>
    %17 = tpu.matmul %14, %16, %cst_26 {dimension_numbers = #tpu.dot_dimension_numbers<[1], [0], [0], [1], [0, 0, 1, 1], [], []>} : vector<512x4xbf16>, vector<4x8xbf16>, vector<512x8xf32> -> vector<512x8xf32>
    %18 = arith.addf %11, %17 : vector<512x8xf32>
    %c0_27 = arith.constant 0 : index
    %c0_28 = arith.constant 0 : index
    %c2 = arith.constant 2 : index
    %c0_29 = arith.constant 0 : index
    %19 = vector.load %arg10[%c0_27, %c0_28, %c2, %c0_29] : memref<2x18x18x4xf32, #tpu.memory_space<vmem>>, vector<2x16x16x4xf32>
    %20 = vector.shape_cast %19 : vector<2x16x16x4xf32> to vector<512x4xf32>
    %21 = arith.truncf %20 : vector<512x4xf32> to vector<512x4xbf16>
    %c2_30 = arith.constant 2 : index
    %c0_31 = arith.constant 0 : index
    %c0_32 = arith.constant 0 : index
    %22 = vector.load %arg1[%c2_30, %c0_31, %c0_32] : memref<9x4x8xbf16, #tpu.memory_space<vmem>>, vector<1x4x8xbf16>
    %23 = vector.shape_cast %22 : vector<1x4x8xbf16> to vector<4x8xbf16>
    %cst_33 = arith.constant dense<0.000000e+00> : vector<512x8xf32>
    %24 = tpu.matmul %21, %23, %cst_33 {dimension_numbers = #tpu.dot_dimension_numbers<[1], [0], [0], [1], [0, 0, 1, 1], [], []>} : vector<512x4xbf16>, vector<4x8xbf16>, vector<512x8xf32> -> vector<512x8xf32>
    %25 = arith.addf %18, %24 : vector<512x8xf32>
    %c0_34 = arith.constant 0 : index
    %c1_35 = arith.constant 1 : index
    %c0_36 = arith.constant 0 : index
    %c0_37 = arith.constant 0 : index
    %26 = vector.load %arg10[%c0_34, %c1_35, %c0_36, %c0_37] : memref<2x18x18x4xf32, #tpu.memory_space<vmem>>, vector<2x16x16x4xf32>
    %27 = vector.shape_cast %26 : vector<2x16x16x4xf32> to vector<512x4xf32>
    %28 = arith.truncf %27 : vector<512x4xf32> to vector<512x4xbf16>
    %c3 = arith.constant 3 : index
    %c0_38 = arith.constant 0 : index
    %c0_39 = arith.constant 0 : index
    %29 = vector.load %arg1[%c3, %c0_38, %c0_39] : memref<9x4x8xbf16, #tpu.memory_space<vmem>>, vector<1x4x8xbf16>
    %30 = vector.shape_cast %29 : vector<1x4x8xbf16> to vector<4x8xbf16>
    %cst_40 = arith.constant dense<0.000000e+00> : vector<512x8xf32>
    %31 = tpu.matmul %28, %30, %cst_40 {dimension_numbers = #tpu.dot_dimension_numbers<[1], [0], [0], [1], [0, 0, 1, 1], [], []>} : vector<512x4xbf16>, vector<4x8xbf16>, vector<512x8xf32> -> vector<512x8xf32>
    %32 = arith.addf %25, %31 : vector<512x8xf32>
    %c0_41 = arith.constant 0 : index
    %c1_42 = arith.constant 1 : index
    %c1_43 = arith.constant 1 : index
    %c0_44 = arith.constant 0 : index
    %33 = vector.load %arg10[%c0_41, %c1_42, %c1_43, %c0_44] : memref<2x18x18x4xf32, #tpu.memory_space<vmem>>, vector<2x16x16x4xf32>
    %34 = vector.shape_cast %33 : vector<2x16x16x4xf32> to vector<512x4xf32>
    %35 = arith.truncf %34 : vector<512x4xf32> to vector<512x4xbf16>
    %c4 = arith.constant 4 : index
    %c0_45 = arith.constant 0 : index
    %c0_46 = arith.constant 0 : index
    %36 = vector.load %arg1[%c4, %c0_45, %c0_46] : memref<9x4x8xbf16, #tpu.memory_space<vmem>>, vector<1x4x8xbf16>
    %37 = vector.shape_cast %36 : vector<1x4x8xbf16> to vector<4x8xbf16>
    %cst_47 = arith.constant dense<0.000000e+00> : vector<512x8xf32>
    %38 = tpu.matmul %35, %37, %cst_47 {dimension_numbers = #tpu.dot_dimension_numbers<[1], [0], [0], [1], [0, 0, 1, 1], [], []>} : vector<512x4xbf16>, vector<4x8xbf16>, vector<512x8xf32> -> vector<512x8xf32>
    %39 = arith.addf %32, %38 : vector<512x8xf32>
    %c0_48 = arith.constant 0 : index
    %c1_49 = arith.constant 1 : index
    %c2_50 = arith.constant 2 : index
    %c0_51 = arith.constant 0 : index
    %40 = vector.load %arg10[%c0_48, %c1_49, %c2_50, %c0_51] : memref<2x18x18x4xf32, #tpu.memory_space<vmem>>, vector<2x16x16x4xf32>
    %41 = vector.shape_cast %40 : vector<2x16x16x4xf32> to vector<512x4xf32>
    %42 = arith.truncf %41 : vector<512x4xf32> to vector<512x4xbf16>
    %c5 = arith.constant 5 : index
    %c0_52 = arith.constant 0 : index
    %c0_53 = arith.constant 0 : index
    %43 = vector.load %arg1[%c5, %c0_52, %c0_53] : memref<9x4x8xbf16, #tpu.memory_space<vmem>>, vector<1x4x8xbf16>
    %44 = vector.shape_cast %43 : vector<1x4x8xbf16> to vector<4x8xbf16>
    %cst_54 = arith.constant dense<0.000000e+00> : vector<512x8xf32>
    %45 = tpu.matmul %42, %44, %cst_54 {dimension_numbers = #tpu.dot_dimension_numbers<[1], [0], [0], [1], [0, 0, 1, 1], [], []>} : vector<512x4xbf16>, vector<4x8xbf16>, vector<512x8xf32> -> vector<512x8xf32>
    %46 = arith.addf %39, %45 : vector<512x8xf32>
    %c0_55 = arith.constant 0 : index
    %c2_56 = arith.constant 2 : index
    %c0_57 = arith.constant 0 : index
    %c0_58 = arith.constant 0 : index
    %47 = vector.load %arg10[%c0_55, %c2_56, %c0_57, %c0_58] : memref<2x18x18x4xf32, #tpu.memory_space<vmem>>, vector<2x16x16x4xf32>
    %48 = vector.shape_cast %47 : vector<2x16x16x4xf32> to vector<512x4xf32>
    %49 = arith.truncf %48 : vector<512x4xf32> to vector<512x4xbf16>
    %c6 = arith.constant 6 : index
    %c0_59 = arith.constant 0 : index
    %c0_60 = arith.constant 0 : index
    %50 = vector.load %arg1[%c6, %c0_59, %c0_60] : memref<9x4x8xbf16, #tpu.memory_space<vmem>>, vector<1x4x8xbf16>
    %51 = vector.shape_cast %50 : vector<1x4x8xbf16> to vector<4x8xbf16>
    %cst_61 = arith.constant dense<0.000000e+00> : vector<512x8xf32>
    %52 = tpu.matmul %49, %51, %cst_61 {dimension_numbers = #tpu.dot_dimension_numbers<[1], [0], [0], [1], [0, 0, 1, 1], [], []>} : vector<512x4xbf16>, vector<4x8xbf16>, vector<512x8xf32> -> vector<512x8xf32>
    %53 = arith.addf %46, %52 : vector<512x8xf32>
    %c0_62 = arith.constant 0 : index
    %c2_63 = arith.constant 2 : index
    %c1_64 = arith.constant 1 : index
    %c0_65 = arith.constant 0 : index
    %54 = vector.load %arg10[%c0_62, %c2_63, %c1_64, %c0_65] : memref<2x18x18x4xf32, #tpu.memory_space<vmem>>, vector<2x16x16x4xf32>
    %55 = vector.shape_cast %54 : vector<2x16x16x4xf32> to vector<512x4xf32>
    %56 = arith.truncf %55 : vector<512x4xf32> to vector<512x4xbf16>
    %c7 = arith.constant 7 : index
    %c0_66 = arith.constant 0 : index
    %c0_67 = arith.constant 0 : index
    %57 = vector.load %arg1[%c7, %c0_66, %c0_67] : memref<9x4x8xbf16, #tpu.memory_space<vmem>>, vector<1x4x8xbf16>
    %58 = vector.shape_cast %57 : vector<1x4x8xbf16> to vector<4x8xbf16>
    %cst_68 = arith.constant dense<0.000000e+00> : vector<512x8xf32>
    %59 = tpu.matmul %56, %58, %cst_68 {dimension_numbers = #tpu.dot_dimension_numbers<[1], [0], [0], [1], [0, 0, 1, 1], [], []>} : vector<512x4xbf16>, vector<4x8xbf16>, vector<512x8xf32> -> vector<512x8xf32>
    %60 = arith.addf %53, %59 : vector<512x8xf32>
    %c0_69 = arith.constant 0 : index
    %c2_70 = arith.constant 2 : index
    %c2_71 = arith.constant 2 : index
    %c0_72 = arith.constant 0 : index
    %61 = vector.load %arg10[%c0_69, %c2_70, %c2_71, %c0_72] : memref<2x18x18x4xf32, #tpu.memory_space<vmem>>, vector<2x16x16x4xf32>
    %62 = vector.shape_cast %61 : vector<2x16x16x4xf32> to vector<512x4xf32>
    %63 = arith.truncf %62 : vector<512x4xf32> to vector<512x4xbf16>
    %c8 = arith.constant 8 : index
    %c0_73 = arith.constant 0 : index
    %c0_74 = arith.constant 0 : index
    %64 = vector.load %arg1[%c8, %c0_73, %c0_74] : memref<9x4x8xbf16, #tpu.memory_space<vmem>>, vector<1x4x8xbf16>
    %65 = vector.shape_cast %64 : vector<1x4x8xbf16> to vector<4x8xbf16>
    %cst_75 = arith.constant dense<0.000000e+00> : vector<512x8xf32>
    %66 = tpu.matmul %63, %65, %cst_75 {dimension_numbers = #tpu.dot_dimension_numbers<[1], [0], [0], [1], [0, 0, 1, 1], [], []>} : vector<512x4xbf16>, vector<4x8xbf16>, vector<512x8xf32> -> vector<512x8xf32>
    %67 = arith.addf %60, %66 : vector<512x8xf32>
    %c0_76 = arith.constant 0 : index
    %c0_77 = arith.constant 0 : index
    %68 = vector.load %arg3[%c0_76, %c0_77] : memref<4x8xbf16, #tpu.memory_space<vmem>>, vector<4x8xbf16>
    %cst_78 = arith.constant dense<0.000000e+00> : vector<512x8xf32>
    %69 = tpu.matmul %35, %68, %cst_78 {dimension_numbers = #tpu.dot_dimension_numbers<[1], [0], [0], [1], [0, 0, 1, 1], [], []>} : vector<512x4xbf16>, vector<4x8xbf16>, vector<512x8xf32> -> vector<512x8xf32>
    %c0_79 = arith.constant 0 : index
    %c0_80 = arith.constant 0 : index
    %70 = vector.load %arg4[%c0_79, %c0_80] : memref<1x8xf32, #tpu.memory_space<vmem>>, vector<1x8xf32>
    %71 = vector.broadcast %70 : vector<1x8xf32> to vector<512x8xf32>
    %72 = arith.addf %69, %71 : vector<512x8xf32>
    %c0_81 = arith.constant 0 : index
    %c0_82 = arith.constant 0 : index
    %73 = vector.load %arg5[%c0_81, %c0_82] : memref<1x8xf32, #tpu.memory_space<vmem>>, vector<1x8xf32>
    %c0_83 = arith.constant 0 : index
    %c0_84 = arith.constant 0 : index
    %74 = vector.load %arg6[%c0_83, %c0_84] : memref<1x8xf32, #tpu.memory_space<vmem>>, vector<1x8xf32>
    %cst_85 = arith.constant dense<0.000000e+00> : vector<8xf32>
    %75 = vector.multi_reduction <add>, %67, %cst_85 [0] : vector<512x8xf32> to vector<8xf32>
    %76 = vector.shape_cast %75 : vector<8xf32> to vector<1x8xf32>
    %77 = arith.mulf %67, %67 : vector<512x8xf32>
    %cst_86 = arith.constant dense<0.000000e+00> : vector<8xf32>
    %78 = vector.multi_reduction <add>, %77, %cst_86 [0] : vector<512x8xf32> to vector<8xf32>
    %79 = vector.shape_cast %78 : vector<8xf32> to vector<1x8xf32>
    %cst_87 = arith.constant 0.001953125 : f32
    %80 = vector.broadcast %cst_87 : f32 to vector<1x8xf32>
    %81 = arith.mulf %76, %80 : vector<1x8xf32>
    %cst_88 = arith.constant 0.001953125 : f32
    %82 = vector.broadcast %cst_88 : f32 to vector<1x8xf32>
    %83 = arith.mulf %79, %82 : vector<1x8xf32>
    %84 = arith.mulf %81, %81 : vector<1x8xf32>
    %85 = arith.subf %83, %84 : vector<1x8xf32>
    %cst_89 = arith.constant 0.000000e+00 : f32
    %86 = vector.broadcast %cst_89 : f32 to vector<1x8xf32>
    %87 = arith.maximumf %85, %86 : vector<1x8xf32>
    %cst_90 = arith.constant 9.99999974E-6 : f32
    %88 = vector.broadcast %cst_90 : f32 to vector<1x8xf32>
    %89 = arith.addf %87, %88 : vector<1x8xf32>
    %90 = math.rsqrt %89 : vector<1x8xf32>
    %91 = arith.mulf %73, %90 : vector<1x8xf32>
    %92 = arith.mulf %81, %91 : vector<1x8xf32>
    %93 = arith.subf %74, %92 : vector<1x8xf32>
    %94 = vector.broadcast %91 : vector<1x8xf32> to vector<512x8xf32>
    %95 = arith.mulf %67, %94 : vector<512x8xf32>
    %96 = vector.broadcast %93 : vector<1x8xf32> to vector<512x8xf32>
    %97 = arith.addf %95, %96 : vector<512x8xf32>
    %cst_91 = arith.constant 0.000000e+00 : f32
    %98 = vector.broadcast %cst_91 : f32 to vector<512x8xf32>
    %99 = arith.cmpf ogt, %97, %98 : vector<512x8xf32>
    %cst_92 = arith.constant 2.000000e-01 : f32
    %100 = vector.broadcast %cst_92 : f32 to vector<512x8xf32>
    %101 = arith.mulf %100, %97 : vector<512x8xf32>
    %102 = arith.select %99, %97, %101 : vector<512x8xi1>, vector<512x8xf32>
    %cst_93 = arith.constant 0.000000e+00 : f32
    %103 = vector.broadcast %cst_93 : f32 to vector<2x18x18x8xf32>
    %c0_94 = arith.constant 0 : index
    %c0_95 = arith.constant 0 : index
    %c0_96 = arith.constant 0 : index
    %c0_97 = arith.constant 0 : index
    %104 = vector.load %arg11[%c0_94, %c0_95, %c0_96, %c0_97] : memref<2x18x18x8xf32, #tpu.memory_space<vmem>>, vector<2x18x18x8xf32>
    tpu.vector_store %arg11[%c0_94, %c0_95, %c0_96, %c0_97], %103 {strides = array<i32>} : memref<2x18x18x8xf32, #tpu.memory_space<vmem>>, vector<2x18x18x8xf32>,
    %105 = vector.shape_cast %102 : vector<512x8xf32> to vector<2x16x16x8xf32>
    %c0_98 = arith.constant 0 : index
    %c1_99 = arith.constant 1 : index
    %c1_100 = arith.constant 1 : index
    %c0_101 = arith.constant 0 : index
    %106 = vector.load %arg11[%c0_98, %c1_99, %c1_100, %c0_101] : memref<2x18x18x8xf32, #tpu.memory_space<vmem>>, vector<2x16x16x8xf32>
    tpu.vector_store %arg11[%c0_98, %c1_99, %c1_100, %c0_101], %105 {strides = array<i32>} : memref<2x18x18x8xf32, #tpu.memory_space<vmem>>, vector<2x16x16x8xf32>,
    %cst_102 = arith.constant 0.000000e+00 : f32
    %107 = vector.broadcast %cst_102 : f32 to vector<512x8xf32>
    %c0_103 = arith.constant 0 : index
    %c0_104 = arith.constant 0 : index
    %c0_105 = arith.constant 0 : index
    %c0_106 = arith.constant 0 : index
    %108 = vector.load %arg11[%c0_103, %c0_104, %c0_105, %c0_106] : memref<2x18x18x8xf32, #tpu.memory_space<vmem>>, vector<2x16x16x8xf32>
    %109 = vector.shape_cast %108 : vector<2x16x16x8xf32> to vector<512x8xf32>
    %110 = arith.truncf %109 : vector<512x8xf32> to vector<512x8xbf16>
    %c0_107 = arith.constant 0 : index
    %c0_108 = arith.constant 0 : index
    %c0_109 = arith.constant 0 : index
    %111 = vector.load %arg2[%c0_107, %c0_108, %c0_109] : memref<9x8x8xbf16, #tpu.memory_space<vmem>>, vector<1x8x8xbf16>
    %112 = vector.shape_cast %111 : vector<1x8x8xbf16> to vector<8x8xbf16>
    %cst_110 = arith.constant dense<0.000000e+00> : vector<512x8xf32>
    %113 = tpu.matmul %110, %112, %cst_110 {dimension_numbers = #tpu.dot_dimension_numbers<[1], [0], [0], [1], [0, 0, 1, 1], [], []>} : vector<512x8xbf16>, vector<8x8xbf16>, vector<512x8xf32> -> vector<512x8xf32>
    %114 = arith.addf %107, %113 : vector<512x8xf32>
    %c0_111 = arith.constant 0 : index
    %c0_112 = arith.constant 0 : index
    %c1_113 = arith.constant 1 : index
    %c0_114 = arith.constant 0 : index
    %115 = vector.load %arg11[%c0_111, %c0_112, %c1_113, %c0_114] : memref<2x18x18x8xf32, #tpu.memory_space<vmem>>, vector<2x16x16x8xf32>
    %116 = vector.shape_cast %115 : vector<2x16x16x8xf32> to vector<512x8xf32>
    %117 = arith.truncf %116 : vector<512x8xf32> to vector<512x8xbf16>
    %c1_115 = arith.constant 1 : index
    %c0_116 = arith.constant 0 : index
    %c0_117 = arith.constant 0 : index
    %118 = vector.load %arg2[%c1_115, %c0_116, %c0_117] : memref<9x8x8xbf16, #tpu.memory_space<vmem>>, vector<1x8x8xbf16>
    %119 = vector.shape_cast %118 : vector<1x8x8xbf16> to vector<8x8xbf16>
    %cst_118 = arith.constant dense<0.000000e+00> : vector<512x8xf32>
    %120 = tpu.matmul %117, %119, %cst_118 {dimension_numbers = #tpu.dot_dimension_numbers<[1], [0], [0], [1], [0, 0, 1, 1], [], []>} : vector<512x8xbf16>, vector<8x8xbf16>, vector<512x8xf32> -> vector<512x8xf32>
    %121 = arith.addf %114, %120 : vector<512x8xf32>
    %c0_119 = arith.constant 0 : index
    %c0_120 = arith.constant 0 : index
    %c2_121 = arith.constant 2 : index
    %c0_122 = arith.constant 0 : index
    %122 = vector.load %arg11[%c0_119, %c0_120, %c2_121, %c0_122] : memref<2x18x18x8xf32, #tpu.memory_space<vmem>>, vector<2x16x16x8xf32>
    %123 = vector.shape_cast %122 : vector<2x16x16x8xf32> to vector<512x8xf32>
    %124 = arith.truncf %123 : vector<512x8xf32> to vector<512x8xbf16>
    %c2_123 = arith.constant 2 : index
    %c0_124 = arith.constant 0 : index
    %c0_125 = arith.constant 0 : index
    %125 = vector.load %arg2[%c2_123, %c0_124, %c0_125] : memref<9x8x8xbf16, #tpu.memory_space<vmem>>, vector<1x8x8xbf16>
    %126 = vector.shape_cast %125 : vector<1x8x8xbf16> to vector<8x8xbf16>
    %cst_126 = arith.constant dense<0.000000e+00> : vector<512x8xf32>
    %127 = tpu.matmul %124, %126, %cst_126 {dimension_numbers = #tpu.dot_dimension_numbers<[1], [0], [0], [1], [0, 0, 1, 1], [], []>} : vector<512x8xbf16>, vector<8x8xbf16>, vector<512x8xf32> -> vector<512x8xf32>
    %128 = arith.addf %121, %127 : vector<512x8xf32>
    %c0_127 = arith.constant 0 : index
    %c1_128 = arith.constant 1 : index
    %c0_129 = arith.constant 0 : index
    %c0_130 = arith.constant 0 : index
    %129 = vector.load %arg11[%c0_127, %c1_128, %c0_129, %c0_130] : memref<2x18x18x8xf32, #tpu.memory_space<vmem>>, vector<2x16x16x8xf32>
    %130 = vector.shape_cast %129 : vector<2x16x16x8xf32> to vector<512x8xf32>
    %131 = arith.truncf %130 : vector<512x8xf32> to vector<512x8xbf16>
    %c3_131 = arith.constant 3 : index
    %c0_132 = arith.constant 0 : index
    %c0_133 = arith.constant 0 : index
    %132 = vector.load %arg2[%c3_131, %c0_132, %c0_133] : memref<9x8x8xbf16, #tpu.memory_space<vmem>>, vector<1x8x8xbf16>
    %133 = vector.shape_cast %132 : vector<1x8x8xbf16> to vector<8x8xbf16>
    %cst_134 = arith.constant dense<0.000000e+00> : vector<512x8xf32>
    %134 = tpu.matmul %131, %133, %cst_134 {dimension_numbers = #tpu.dot_dimension_numbers<[1], [0], [0], [1], [0, 0, 1, 1], [], []>} : vector<512x8xbf16>, vector<8x8xbf16>, vector<512x8xf32> -> vector<512x8xf32>
    %135 = arith.addf %128, %134 : vector<512x8xf32>
    %c0_135 = arith.constant 0 : index
    %c1_136 = arith.constant 1 : index
    %c1_137 = arith.constant 1 : index
    %c0_138 = arith.constant 0 : index
    %136 = vector.load %arg11[%c0_135, %c1_136, %c1_137, %c0_138] : memref<2x18x18x8xf32, #tpu.memory_space<vmem>>, vector<2x16x16x8xf32>
    %137 = vector.shape_cast %136 : vector<2x16x16x8xf32> to vector<512x8xf32>
    %138 = arith.truncf %137 : vector<512x8xf32> to vector<512x8xbf16>
    %c4_139 = arith.constant 4 : index
    %c0_140 = arith.constant 0 : index
    %c0_141 = arith.constant 0 : index
    %139 = vector.load %arg2[%c4_139, %c0_140, %c0_141] : memref<9x8x8xbf16, #tpu.memory_space<vmem>>, vector<1x8x8xbf16>
    %140 = vector.shape_cast %139 : vector<1x8x8xbf16> to vector<8x8xbf16>
    %cst_142 = arith.constant dense<0.000000e+00> : vector<512x8xf32>
    %141 = tpu.matmul %138, %140, %cst_142 {dimension_numbers = #tpu.dot_dimension_numbers<[1], [0], [0], [1], [0, 0, 1, 1], [], []>} : vector<512x8xbf16>, vector<8x8xbf16>, vector<512x8xf32> -> vector<512x8xf32>
    %142 = arith.addf %135, %141 : vector<512x8xf32>
    %c0_143 = arith.constant 0 : index
    %c1_144 = arith.constant 1 : index
    %c2_145 = arith.constant 2 : index
    %c0_146 = arith.constant 0 : index
    %143 = vector.load %arg11[%c0_143, %c1_144, %c2_145, %c0_146] : memref<2x18x18x8xf32, #tpu.memory_space<vmem>>, vector<2x16x16x8xf32>
    %144 = vector.shape_cast %143 : vector<2x16x16x8xf32> to vector<512x8xf32>
    %145 = arith.truncf %144 : vector<512x8xf32> to vector<512x8xbf16>
    %c5_147 = arith.constant 5 : index
    %c0_148 = arith.constant 0 : index
    %c0_149 = arith.constant 0 : index
    %146 = vector.load %arg2[%c5_147, %c0_148, %c0_149] : memref<9x8x8xbf16, #tpu.memory_space<vmem>>, vector<1x8x8xbf16>
    %147 = vector.shape_cast %146 : vector<1x8x8xbf16> to vector<8x8xbf16>
    %cst_150 = arith.constant dense<0.000000e+00> : vector<512x8xf32>
    %148 = tpu.matmul %145, %147, %cst_150 {dimension_numbers = #tpu.dot_dimension_numbers<[1], [0], [0], [1], [0, 0, 1, 1], [], []>} : vector<512x8xbf16>, vector<8x8xbf16>, vector<512x8xf32> -> vector<512x8xf32>
    %149 = arith.addf %142, %148 : vector<512x8xf32>
    %c0_151 = arith.constant 0 : index
    %c2_152 = arith.constant 2 : index
    %c0_153 = arith.constant 0 : index
    %c0_154 = arith.constant 0 : index
    %150 = vector.load %arg11[%c0_151, %c2_152, %c0_153, %c0_154] : memref<2x18x18x8xf32, #tpu.memory_space<vmem>>, vector<2x16x16x8xf32>
    %151 = vector.shape_cast %150 : vector<2x16x16x8xf32> to vector<512x8xf32>
    %152 = arith.truncf %151 : vector<512x8xf32> to vector<512x8xbf16>
    %c6_155 = arith.constant 6 : index
    %c0_156 = arith.constant 0 : index
    %c0_157 = arith.constant 0 : index
    %153 = vector.load %arg2[%c6_155, %c0_156, %c0_157] : memref<9x8x8xbf16, #tpu.memory_space<vmem>>, vector<1x8x8xbf16>
    %154 = vector.shape_cast %153 : vector<1x8x8xbf16> to vector<8x8xbf16>
    %cst_158 = arith.constant dense<0.000000e+00> : vector<512x8xf32>
    %155 = tpu.matmul %152, %154, %cst_158 {dimension_numbers = #tpu.dot_dimension_numbers<[1], [0], [0], [1], [0, 0, 1, 1], [], []>} : vector<512x8xbf16>, vector<8x8xbf16>, vector<512x8xf32> -> vector<512x8xf32>
    %156 = arith.addf %149, %155 : vector<512x8xf32>
    %c0_159 = arith.constant 0 : index
    %c2_160 = arith.constant 2 : index
    %c1_161 = arith.constant 1 : index
    %c0_162 = arith.constant 0 : index
    %157 = vector.load %arg11[%c0_159, %c2_160, %c1_161, %c0_162] : memref<2x18x18x8xf32, #tpu.memory_space<vmem>>, vector<2x16x16x8xf32>
    %158 = vector.shape_cast %157 : vector<2x16x16x8xf32> to vector<512x8xf32>
    %159 = arith.truncf %158 : vector<512x8xf32> to vector<512x8xbf16>
    %c7_163 = arith.constant 7 : index
    %c0_164 = arith.constant 0 : index
    %c0_165 = arith.constant 0 : index
    %160 = vector.load %arg2[%c7_163, %c0_164, %c0_165] : memref<9x8x8xbf16, #tpu.memory_space<vmem>>, vector<1x8x8xbf16>
    %161 = vector.shape_cast %160 : vector<1x8x8xbf16> to vector<8x8xbf16>
    %cst_166 = arith.constant dense<0.000000e+00> : vector<512x8xf32>
    %162 = tpu.matmul %159, %161, %cst_166 {dimension_numbers = #tpu.dot_dimension_numbers<[1], [0], [0], [1], [0, 0, 1, 1], [], []>} : vector<512x8xbf16>, vector<8x8xbf16>, vector<512x8xf32> -> vector<512x8xf32>
    %163 = arith.addf %156, %162 : vector<512x8xf32>
    %c0_167 = arith.constant 0 : index
    %c2_168 = arith.constant 2 : index
    %c2_169 = arith.constant 2 : index
    %c0_170 = arith.constant 0 : index
    %164 = vector.load %arg11[%c0_167, %c2_168, %c2_169, %c0_170] : memref<2x18x18x8xf32, #tpu.memory_space<vmem>>, vector<2x16x16x8xf32>
    %165 = vector.shape_cast %164 : vector<2x16x16x8xf32> to vector<512x8xf32>
    %166 = arith.truncf %165 : vector<512x8xf32> to vector<512x8xbf16>
    %c8_171 = arith.constant 8 : index
    %c0_172 = arith.constant 0 : index
    %c0_173 = arith.constant 0 : index
    %167 = vector.load %arg2[%c8_171, %c0_172, %c0_173] : memref<9x8x8xbf16, #tpu.memory_space<vmem>>, vector<1x8x8xbf16>
    %168 = vector.shape_cast %167 : vector<1x8x8xbf16> to vector<8x8xbf16>
    %cst_174 = arith.constant dense<0.000000e+00> : vector<512x8xf32>
    %169 = tpu.matmul %166, %168, %cst_174 {dimension_numbers = #tpu.dot_dimension_numbers<[1], [0], [0], [1], [0, 0, 1, 1], [], []>} : vector<512x8xbf16>, vector<8x8xbf16>, vector<512x8xf32> -> vector<512x8xf32>
    %170 = arith.addf %163, %169 : vector<512x8xf32>
    %c0_175 = arith.constant 0 : index
    %c0_176 = arith.constant 0 : index
    %171 = vector.load %arg7[%c0_175, %c0_176] : memref<1x8xf32, #tpu.memory_space<vmem>>, vector<1x8xf32>
    %c0_177 = arith.constant 0 : index
    %c0_178 = arith.constant 0 : index
    %172 = vector.load %arg8[%c0_177, %c0_178] : memref<1x8xf32, #tpu.memory_space<vmem>>, vector<1x8xf32>
    %cst_179 = arith.constant dense<0.000000e+00> : vector<8xf32>
    %173 = vector.multi_reduction <add>, %170, %cst_179 [0] : vector<512x8xf32> to vector<8xf32>
    %174 = vector.shape_cast %173 : vector<8xf32> to vector<1x8xf32>
    %175 = arith.mulf %170, %170 : vector<512x8xf32>
    %cst_180 = arith.constant dense<0.000000e+00> : vector<8xf32>
    %176 = vector.multi_reduction <add>, %175, %cst_180 [0] : vector<512x8xf32> to vector<8xf32>
    %177 = vector.shape_cast %176 : vector<8xf32> to vector<1x8xf32>
    %cst_181 = arith.constant 0.001953125 : f32
    %178 = vector.broadcast %cst_181 : f32 to vector<1x8xf32>
    %179 = arith.mulf %174, %178 : vector<1x8xf32>
    %cst_182 = arith.constant 0.001953125 : f32
    %180 = vector.broadcast %cst_182 : f32 to vector<1x8xf32>
    %181 = arith.mulf %177, %180 : vector<1x8xf32>
    %182 = arith.mulf %179, %179 : vector<1x8xf32>
    %183 = arith.subf %181, %182 : vector<1x8xf32>
    %cst_183 = arith.constant 0.000000e+00 : f32
    %184 = vector.broadcast %cst_183 : f32 to vector<1x8xf32>
    %185 = arith.maximumf %183, %184 : vector<1x8xf32>
    %cst_184 = arith.constant 9.99999974E-6 : f32
    %186 = vector.broadcast %cst_184 : f32 to vector<1x8xf32>
    %187 = arith.addf %185, %186 : vector<1x8xf32>
    %188 = math.rsqrt %187 : vector<1x8xf32>
    %189 = arith.mulf %171, %188 : vector<1x8xf32>
    %190 = arith.mulf %179, %189 : vector<1x8xf32>
    %191 = arith.subf %172, %190 : vector<1x8xf32>
    %192 = vector.broadcast %189 : vector<1x8xf32> to vector<512x8xf32>
    %193 = arith.mulf %170, %192 : vector<512x8xf32>
    %194 = vector.broadcast %191 : vector<1x8xf32> to vector<512x8xf32>
    %195 = arith.addf %193, %194 : vector<512x8xf32>
    %196 = arith.addf %195, %72 : vector<512x8xf32>
    %cst_185 = arith.constant 0.000000e+00 : f32
    %197 = vector.broadcast %cst_185 : f32 to vector<512x8xf32>
    %198 = arith.cmpf ogt, %196, %197 : vector<512x8xf32>
    %cst_186 = arith.constant 2.000000e-01 : f32
    %199 = vector.broadcast %cst_186 : f32 to vector<512x8xf32>
    %200 = arith.mulf %199, %196 : vector<512x8xf32>
    %201 = arith.select %198, %196, %200 : vector<512x8xi1>, vector<512x8xf32>
    %c0_187 = arith.constant 0 : index
    %c0_188 = arith.constant 0 : index
    %202 = vector.load %arg9[%c0_187, %c0_188] : memref<512x8xf32, #tpu.memory_space<vmem>>, vector<512x8xf32>
    tpu.vector_store %arg9[%c0_187, %c0_188], %201 {strides = array<i32>} : memref<512x8xf32, #tpu.memory_space<vmem>>, vector<512x8xf32>,
    return
  }
}

</mosaic_0001>

<bundles_post_ra>
// kernel: tpu_custom_call.1
= control target key start
LH: loop header
LB: loop body
LE: loop exit
PB: predicated region body
PF: predicated region fallthrough
CT: control target
= control target key end

     0   :  { %vm563_vm0 = vcmask 1041408   ;;  %vm33_vm1 = vcmask 31744   ;;  %vm36_vm2 = vcmask 25600   ;;  %v20930_v1 = vmov 0.0   ;;  %s20920_s1 = inlined_call_operand.vmem [shape: bf16[9,4,8], index: 1, kind: input, shape index: {}]   ;;  %s20921_s0 = inlined_call_operand.vmem [shape: f32[2,16,16,4], index: 0, kind: input, shape index: {}]   ;;  %s20922_s3 = inlined_call_operand.vmem [shape: bf16[4,8], index: 3, kind: input, shape index: {}]   ;;  %s20923_s2 = inlined_call_operand.vmem [shape: bf16[9,8,8], index: 2, kind: input, shape index: {}]   ;;  %s20924_s5 = inlined_call_operand.vmem [shape: f32[1,8], index: 5, kind: input, shape index: {}]   ;;  %s20925_s6 = inlined_call_operand.vmem [shape: f32[1,8], index: 6, kind: input, shape index: {}]   ;;  %s20926_s4 = inlined_call_operand.vmem [shape: f32[1,8], index: 4, kind: input, shape index: {}]   ;;  %s20927_s7 = inlined_call_operand.vmem [shape: f32[1,8], index: 7, kind: input, shape index: {}]   ;;  %s20928_s8 = inlined_call_operand.vmem [shape: f32[1,8], index: 8, kind: input, shape index: {}]   ;;  %s20929_s9 = inlined_call_operand.vmem [shape: f32[512,8], index: 9, kind: output, shape index: {}]  }
   0x1   :  { %v15484_v0 = vld [vmem:[%s20920_s1 + $0x2] sm:$0x3]  ;;  %34 = vst.msk [vmem:[#allocation2] sm:$0xff] %vm33_vm1, %v20930_v1  ;;  %35 = vst.msk [vmem:[#allocation2 + $0x8] sm:$0xff] %vm33_vm1, %v20930_v1  ;;  %v368_v2 = vld [vmem:[%s20920_s1] sm:$0x3] }
   0x2   :  { %37 = vst.msk [vmem:[#allocation2 + $0x10] sm:$0x3] %vm36_vm2, %v20930_v1  ;;  %40 = vst.msk [vmem:[#allocation2 + $0x28] sm:$0x3] %vm36_vm2, %v20930_v1  ;;  %v143_v3 = vld [vmem:[%s20921_s0] sm:$0xff]  ;;  %15405 = vmatprep.subr.msk.bf16.mxu0 %vm563_vm0, %v15484_v0  ;;  %v565_v4 = vsel %vm563_vm0, %v15484_v0, 0 }
   0x3   :  { %38 = vst.msk [vmem:[#allocation2 + $0x18] sm:$0xff] %vm33_vm1, %v20930_v1  ;;  %39 = vst.msk [vmem:[#allocation2 + $0x20] sm:$0xff] %vm33_vm1, %v20930_v1  ;;  %v144_v5 = vld [vmem:[%s20921_s0 + $0x8] sm:$0xff]  ;;  %v145_v6 = vld [vmem:[%s20921_s0 + $0x10] sm:$0xff]  ;;  %13126 = vmatpush3.bf16.msra.mxu0 %v565_v4  ;;  %v953_v34 = vsel %vm563_vm0, %v368_v2, 0  ;;  %vm5397_vm3 = vcmask 64512  }
   0x4   :  { %41 = vst.msk [vmem:[#allocation2 + $0x30] sm:$0xff] %vm33_vm1, %v20930_v1  ;;  %42 = vst.msk [vmem:[#allocation2 + $0x38] sm:$0xff] %vm33_vm1, %v20930_v1  ;;  %v146_v7 = vld [vmem:[%s20921_s0 + $0x18] sm:$0xff]  ;;  %v147_v8 = vld [vmem:[%s20921_s0 + $0x20] sm:$0xff]  ;;  %15406 = vmatprep.subr.msk.bf16.mxu0 %vm563_vm0, %v368_v2  ;;  %vm6072_vm4 = vcmask 58368   ;;  %vm20984_vm5 = vcmask 1043456  }
   0x5   :  { %43 = vst.msk [vmem:[#allocation2 + $0x40] sm:$0x3] %vm36_vm2, %v20930_v1  ;;  %46 = vst.msk [vmem:[#allocation2 + $0x58] sm:$0x3] %vm36_vm2, %v20930_v1  ;;  %v148_v9 = vld [vmem:[%s20921_s0 + $0x28] sm:$0xff]  ;;  %v149_v10 = vld [vmem:[%s20921_s0 + $0x30] sm:$0xff] }
   0x6   :  { %44 = vst.msk [vmem:[#allocation2 + $0x48] sm:$0xff] %vm33_vm1, %v20930_v1  ;;  %45 = vst.msk [vmem:[#allocation2 + $0x50] sm:$0xff] %vm33_vm1, %v20930_v1  ;;  %v150_v11 = vld [vmem:[%s20921_s0 + $0x38] sm:$0xff]  ;;  %v151_v12 = vld [vmem:[%s20921_s0 + $0x40] sm:$0xff] }
   0x7   :  { %47 = vst.msk [vmem:[#allocation2 + $0x60] sm:$0xff] %vm33_vm1, %v20930_v1  ;;  %48 = vst.msk [vmem:[#allocation2 + $0x68] sm:$0xff] %vm33_vm1, %v20930_v1  ;;  %v152_v13 = vld [vmem:[%s20921_s0 + $0x48] sm:$0xff]  ;;  %v153_v14 = vld [vmem:[%s20921_s0 + $0x50] sm:$0xff] }
   0x8   :  { %49 = vst.msk [vmem:[#allocation2 + $0x70] sm:$0x3] %vm36_vm2, %v20930_v1  ;;  %52 = vst.msk [vmem:[#allocation2 + $0x88] sm:$0x3] %vm36_vm2, %v20930_v1  ;;  %v154_v15 = vld [vmem:[%s20921_s0 + $0x58] sm:$0xff]  ;;  %v155_v16 = vld [vmem:[%s20921_s0 + $0x60] sm:$0xff] }
   0x9   :  { %50 = vst.msk [vmem:[#allocation2 + $0x78] sm:$0xff] %vm33_vm1, %v20930_v1  ;;  %51 = vst.msk [vmem:[#allocation2 + $0x80] sm:$0xff] %vm33_vm1, %v20930_v1  ;;  %v156_v17 = vld [vmem:[%s20921_s0 + $0x68] sm:$0xff]  ;;  %v157_v18 = vld [vmem:[%s20921_s0 + $0x70] sm:$0xff] }
   0xa   :  { %53 = vst.msk [vmem:[#allocation2 + $0x90] sm:$0xff] %vm33_vm1, %v20930_v1  ;;  %54 = vst.msk [vmem:[#allocation2 + $0x98] sm:$0xff] %vm33_vm1, %v20930_v1  ;;  %v158_v19 = vld [vmem:[%s20921_s0 + $0x78] sm:$0xff]  ;;  %v159_v20 = vld [vmem:[%s20921_s0 + $0x80] sm:$0xff] }
   0xb   :  { %55 = vst.msk [vmem:[#allocation2 + $0xa0] sm:$0x3] %vm36_vm2, %v20930_v1  ;;  %58 = vst.msk [vmem:[#allocation2 + $0xb8] sm:$0x3] %vm36_vm2, %v20930_v1  ;;  %v160_v21 = vld [vmem:[%s20921_s0 + $0x88] sm:$0xff]  ;;  %v161_v22 = vld [vmem:[%s20921_s0 + $0x90] sm:$0xff] }
   0xc   :  { %56 = vst.msk [vmem:[#allocation2 + $0xa8] sm:$0xff] %vm33_vm1, %v20930_v1  ;;  %57 = vst.msk [vmem:[#allocation2 + $0xb0] sm:$0xff] %vm33_vm1, %v20930_v1  ;;  %v369_v23 = vld [vmem:[#allocation2 + $0x1] sm:$0xff]  ;;  %v370_v24 = vld [vmem:[#allocation2 + $0x9] sm:$0xff] }
   0xd   :  { %59 = vst.msk [vmem:[#allocation2 + $0xc0] sm:$0xff] %vm33_vm1, %v20930_v1  ;;  %60 = vst.msk [vmem:[#allocation2 + $0xc8] sm:$0xff] %vm33_vm1, %v20930_v1  ;;  %v162_v25 = vld [vmem:[%s20921_s0 + $0x98] sm:$0xff]  ;;  %v433_v26 = vpack.c.bf16 %v370_v24, %v369_v23  ;;  %v163_v28 = vld [vmem:[%s20921_s0 + $0xa0] sm:$0xff] }
   0xe   :  { %61 = vst.msk [vmem:[#allocation2 + $0xd0] sm:$0x3] %vm36_vm2, %v20930_v1  ;;  %64 = vst.msk [vmem:[#allocation2 + $0xe8] sm:$0x3] %vm36_vm2, %v20930_v1  ;;  %v164_v29 = vld [vmem:[%s20921_s0 + $0xa8] sm:$0xff]  ;;  %v165_v40 = vld [vmem:[%s20921_s0 + $0xb0] sm:$0xff] }
   0xf   :  { %62 = vst.msk [vmem:[#allocation2 + $0xd8] sm:$0xff] %vm33_vm1, %v20930_v1  ;;  %63 = vst.msk [vmem:[#allocation2 + $0xe0] sm:$0xff] %vm33_vm1, %v20930_v1  ;;  %13127 = vmatprep.mubr.msk.bf16.mxu0 %vm33_vm1, %v433_v26  ;;  %v166_v41 = vld [vmem:[%s20921_s0 + $0xb8] sm:$0xff]  ;;  %v167_v43 = vld [vmem:[%s20921_s0 + $0xc0] sm:$0xff] }
  0x10   :  { %65 = vst.msk [vmem:[#allocation2 + $0xf0] sm:$0xff] %vm33_vm1, %v20930_v1  ;;  %66 = vst.msk [vmem:[#allocation2 + $0xf8] sm:$0xff] %vm33_vm1, %v20930_v1  ;;  %v168_v45 = vld [vmem:[%s20921_s0 + $0xc8] sm:$0xff]  ;;  %v169_v46 = vld [vmem:[%s20921_s0 + $0xd0] sm:$0xff] }
  0x11   :  { %67 = vst.msk [vmem:[#allocation2 + $0x100] sm:$0x3] %vm36_vm2, %v20930_v1  ;;  %70 = vst.msk [vmem:[#allocation2 + $0x118] sm:$0x3] %vm36_vm2, %v20930_v1  ;;  %v170_v47 = vld [vmem:[%s20921_s0 + $0xd8] sm:$0xff]  ;;  %v171_v48 = vld [vmem:[%s20921_s0 + $0xe0] sm:$0xff] }
  0x12   :  { %68 = vst.msk [vmem:[#allocation2 + $0x108] sm:$0xff] %vm33_vm1, %v20930_v1  ;;  %69 = vst.msk [vmem:[#allocation2 + $0x110] sm:$0xff] %vm33_vm1, %v20930_v1  ;;  %v172_v49 = vld [vmem:[%s20921_s0 + $0xe8] sm:$0xff]  ;;  %v175_v52 = vld [vmem:[%s20921_s0 + $0x100] sm:$0xff] }
  0x13   :  { %71 = vst.msk [vmem:[#allocation2 + $0x120] sm:$0xff] %vm33_vm1, %v20930_v1  ;;  %72 = vst.msk [vmem:[#allocation2 + $0x128] sm:$0xff] %vm33_vm1, %v20930_v1  ;;  %v176_v53 = vld [vmem:[%s20921_s0 + $0x108] sm:$0xff]  ;;  %v177_v56 = vld [vmem:[%s20921_s0 + $0x110] sm:$0xff] }
  0x14   :  { %73 = vst.msk [vmem:[#allocation2 + $0x130] sm:$0x3] %vm36_vm2, %v20930_v1  ;;  %76 = vst.msk [vmem:[#allocation2 + $0x148] sm:$0x3] %vm36_vm2, %v20930_v1  ;;  %v178_v57 = vld [vmem:[%s20921_s0 + $0x118] sm:$0xff]  ;;  %v179_v58 = vld [vmem:[%s20921_s0 + $0x120] sm:$0xff] }
  0x15   :  { %74 = vst.msk [vmem:[#allocation2 + $0x138] sm:$0xff] %vm33_vm1, %v20930_v1  ;;  %75 = vst.msk [vmem:[#allocation2 + $0x140] sm:$0xff] %vm33_vm1, %v20930_v1  ;;  %v180_v59 = vld [vmem:[%s20921_s0 + $0x128] sm:$0xff]  ;;  %v181_v60 = vld [vmem:[%s20921_s0 + $0x130] sm:$0xff] }
  0x16   :  { %77 = vst.msk [vmem:[#allocation2 + $0x150] sm:$0xff] %vm33_vm1, %v20930_v1  ;;  %78 = vst.msk [vmem:[#allocation2 + $0x158] sm:$0xff] %vm33_vm1, %v20930_v1  ;;  %v182_v61 = vld [vmem:[%s20921_s0 + $0x138] sm:$0xff]  ;;  %v183_v62 = vld [vmem:[%s20921_s0 + $0x140] sm:$0xff] }
  0x17   :  { %79 = vst.msk [vmem:[#allocation2 + $0x160] sm:$0x3] %vm36_vm2, %v20930_v1  ;;  %82 = vst.msk [vmem:[#allocation2 + $0x178] sm:$0x3] %vm36_vm2, %v20930_v1  ;;  %v184_v63 = vld [vmem:[%s20921_s0 + $0x148] sm:$0xff]  ;;  %v185_v0 = vld [vmem:[%s20921_s0 + $0x150] sm:$0xff] }
  0x18   :  { %80 = vst.msk [vmem:[#allocation2 + $0x168] sm:$0xff] %vm33_vm1, %v20930_v1  ;;  %81 = vst.msk [vmem:[#allocation2 + $0x170] sm:$0xff] %vm33_vm1, %v20930_v1  ;;  %v186_v2 = vld [vmem:[%s20921_s0 + $0x158] sm:$0xff]  ;;  %v187_v4 = vld [vmem:[%s20921_s0 + $0x160] sm:$0xff] }
  0x19   :  { %83 = vst.msk [vmem:[#allocation2 + $0x180] sm:$0xff] %vm33_vm1, %v20930_v1  ;;  %84 = vst.msk [vmem:[#allocation2 + $0x188] sm:$0xff] %vm33_vm1, %v20930_v1  ;;  %v199_v23 = vld [vmem:[%s20921_s0 + $0x1c0] sm:$0xff]  ;;  %v200_v24 = vld [vmem:[%s20921_s0 + $0x1c8] sm:$0xff] }
  0x1a   :  { %85 = vst.msk [vmem:[#allocation2 + $0x190] sm:$0x3] %vm36_vm2, %v20930_v1  ;;  %88 = vst.msk [vmem:[#allocation2 + $0x1a8] sm:$0x3] %vm36_vm2, %v20930_v1  ;;  %v202_v26 = vld [vmem:[%s20921_s0 + $0x1d8] sm:$0xff] }
  0x1b   :  { %86 = vst.msk [vmem:[#allocation2 + $0x198] sm:$0xff] %vm33_vm1, %v20930_v1  ;;  %87 = vst.msk [vmem:[#allocation2 + $0x1a0] sm:$0xff] %vm33_vm1, %v20930_v1 }
  0x1c   :  { %89 = vst.msk [vmem:[#allocation2 + $0x1b0] sm:$0xff] %vm33_vm1, %v20930_v1  ;;  %90 = vst.msk [vmem:[#allocation2 + $0x1b8] sm:$0xff] %vm33_vm1, %v20930_v1 }
  0x1d   :  { %91 = vst.msk [vmem:[#allocation2 + $0x1c0] sm:$0x3] %vm36_vm2, %v20930_v1  ;;  %94 = vst.msk [vmem:[#allocation2 + $0x1d8] sm:$0x3] %vm36_vm2, %v20930_v1 }
  0x1e   :  { %92 = vst.msk [vmem:[#allocation2 + $0x1c8] sm:$0xff] %vm33_vm1, %v20930_v1  ;;  %93 = vst.msk [vmem:[#allocation2 + $0x1d0] sm:$0xff] %vm33_vm1, %v20930_v1 }
  0x1f   :  { %95 = vst.msk [vmem:[#allocation2 + $0x1e0] sm:$0xff] %vm33_vm1, %v20930_v1  ;;  %96 = vst.msk [vmem:[#allocation2 + $0x1e8] sm:$0xff] %vm33_vm1, %v20930_v1 }
  0x20   :  { %97 = vst.msk [vmem:[#allocation2 + $0x1f0] sm:$0x3] %vm36_vm2, %v20930_v1  ;;  %100 = vst.msk [vmem:[#allocation2 + $0x208] sm:$0x3] %vm36_vm2, %v20930_v1 }
  0x21   :  { %98 = vst.msk [vmem:[#allocation2 + $0x1f8] sm:$0xff] %vm33_vm1, %v20930_v1  ;;  %99 = vst.msk [vmem:[#allocation2 + $0x200] sm:$0xff] %vm33_vm1, %v20930_v1 }
  0x22   :  { %101 = vst.msk [vmem:[#allocation2 + $0x210] sm:$0xff] %vm33_vm1, %v20930_v1  ;;  %102 = vst.msk [vmem:[#allocation2 + $0x218] sm:$0xff] %vm33_vm1, %v20930_v1 }
  0x23   :  { %103 = vst.msk [vmem:[#allocation2 + $0x220] sm:$0x3] %vm36_vm2, %v20930_v1  ;;  %106 = vst.msk [vmem:[#allocation2 + $0x238] sm:$0x3] %vm36_vm2, %v20930_v1 }
  0x24   :  { %104 = vst.msk [vmem:[#allocation2 + $0x228] sm:$0xff] %vm33_vm1, %v20930_v1  ;;  %105 = vst.msk [vmem:[#allocation2 + $0x230] sm:$0xff] %vm33_vm1, %v20930_v1 }
  0x25   :  { %107 = vst.msk [vmem:[#allocation2 + $0x240] sm:$0xff] %vm33_vm1, %v20930_v1  ;;  %108 = vst.msk [vmem:[#allocation2 + $0x248] sm:$0xff] %vm33_vm1, %v20930_v1 }
  0x26   :  { %109 = vst.msk [vmem:[#allocation2 + $0x250] sm:$0x3] %vm36_vm2, %v20930_v1  ;;  %112 = vst.msk [vmem:[#allocation2 + $0x268] sm:$0x3] %vm36_vm2, %v20930_v1 }
  0x27   :  { %110 = vst.msk [vmem:[#allocation2 + $0x258] sm:$0xff] %vm33_vm1, %v20930_v1  ;;  %111 = vst.msk [vmem:[#allocation2 + $0x260] sm:$0xff] %vm33_vm1, %v20930_v1 }
  0x28   :  { %113 = vst.msk [vmem:[#allocation2 + $0x270] sm:$0xff] %vm33_vm1, %v20930_v1  ;;  %114 = vst.msk [vmem:[#allocation2 + $0x278] sm:$0xff] %vm33_vm1, %v20930_v1 }
  0x29   :  { %115 = vst.msk [vmem:[#allocation2 + $0x280] sm:$0x3] %vm36_vm2, %v20930_v1  ;;  %118 = vst.msk [vmem:[#allocation2 + $0x298] sm:$0x3] %vm36_vm2, %v20930_v1 }
  0x2a   :  { %116 = vst.msk [vmem:[#allocation2 + $0x288] sm:$0xff] %vm33_vm1, %v20930_v1  ;;  %117 = vst.msk [vmem:[#allocation2 + $0x290] sm:$0xff] %vm33_vm1, %v20930_v1 }
  0x2b   :  { %119 = vst.msk [vmem:[#allocation2 + $0x2a0] sm:$0xff] %vm33_vm1, %v20930_v1  ;;  %120 = vst.msk [vmem:[#allocation2 + $0x2a8] sm:$0xff] %vm33_vm1, %v20930_v1 }
  0x2c   :  { %121 = vst.msk [vmem:[#allocation2 + $0x2b0] sm:$0x3] %vm36_vm2, %v20930_v1  ;;  %124 = vst.msk [vmem:[#allocation2 + $0x2c8] sm:$0x3] %vm36_vm2, %v20930_v1 }
  0x2d   :  { %122 = vst.msk [vmem:[#allocation2 + $0x2b8] sm:$0xff] %vm33_vm1, %v20930_v1  ;;  %123 = vst.msk [vmem:[#allocation2 + $0x2c0] sm:$0xff] %vm33_vm1, %v20930_v1 }
  0x2e   :  { %125 = vst.msk [vmem:[#allocation2 + $0x2d0] sm:$0xff] %vm33_vm1, %v20930_v1  ;;  %126 = vst.msk [vmem:[#allocation2 + $0x2d8] sm:$0xff] %vm33_vm1, %v20930_v1 }
  0x2f   :  { %127 = vst.msk [vmem:[#allocation2 + $0x2e0] sm:$0x3] %vm36_vm2, %v20930_v1  ;;  %130 = vst.msk [vmem:[#allocation2 + $0x2f8] sm:$0x3] %vm36_vm2, %v20930_v1 }
  0x30   :  { %128 = vst.msk [vmem:[#allocation2 + $0x2e8] sm:$0xff] %vm33_vm1, %v20930_v1  ;;  %129 = vst.msk [vmem:[#allocation2 + $0x2f0] sm:$0xff] %vm33_vm1, %v20930_v1 }
  0x31   :  { %131 = vst.msk [vmem:[#allocation2 + $0x300] sm:$0xff] %vm33_vm1, %v20930_v1  ;;  %132 = vst.msk [vmem:[#allocation2 + $0x308] sm:$0xff] %vm33_vm1, %v20930_v1 }
  0x32   :  { %133 = vst.msk [vmem:[#allocation2 + $0x310] sm:$0x3] %vm36_vm2, %v20930_v1  ;;  %136 = vst.msk [vmem:[#allocation2 + $0x328] sm:$0x3] %vm36_vm2, %v20930_v1 }
  0x33   :  { %134 = vst.msk [vmem:[#allocation2 + $0x318] sm:$0xff] %vm33_vm1, %v20930_v1  ;;  %135 = vst.msk [vmem:[#allocation2 + $0x320] sm:$0xff] %vm33_vm1, %v20930_v1 }
  0x34   :  { %137 = vst.msk [vmem:[#allocation2 + $0x330] sm:$0xff] %vm33_vm1, %v20930_v1  ;;  %138 = vst.msk [vmem:[#allocation2 + $0x338] sm:$0xff] %vm33_vm1, %v20930_v1 }
  0x35   :  { %139 = vst.msk [vmem:[#allocation2 + $0x340] sm:$0x3] %vm36_vm2, %v20930_v1  ;;  %142 = vst.msk [vmem:[#allocation2 + $0x358] sm:$0x3] %vm36_vm2, %v20930_v1 }
  0x36   :  { %140 = vst.msk [vmem:[#allocation2 + $0x348] sm:$0xff] %vm33_vm1, %v20930_v1  ;;  %141 = vst.msk [vmem:[#allocation2 + $0x350] sm:$0xff] %vm33_vm1, %v20930_v1 }
  0x37   :  { %208 = vst.msk [vmem:[#allocation2 + $0x19] sm:$0xff] %vm33_vm1, %v143_v3  ;;  %209 = vst.msk [vmem:[#allocation2 + $0x21] sm:$0xff] %vm33_vm1, %v144_v5  ;;  %v188_v5 = vld [vmem:[%s20921_s0 + $0x168] sm:$0xff] }
  0x38   :  { %210 = vst.msk [vmem:[#allocation2 + $0x31] sm:$0xff] %vm33_vm1, %v145_v6  ;;  %211 = vst.msk [vmem:[#allocation2 + $0x39] sm:$0xff] %vm33_vm1, %v146_v7  ;;  %v189_v7 = vld [vmem:[%s20921_s0 + $0x170] sm:$0xff] }
  0x39   :  { %212 = vst.msk [vmem:[#allocation2 + $0x49] sm:$0xff] %vm33_vm1, %v147_v8  ;;  %213 = vst.msk [vmem:[#allocation2 + $0x51] sm:$0xff] %vm33_vm1, %v148_v9  ;;  %v190_v8 = vld [vmem:[%s20921_s0 + $0x178] sm:$0xff] }
  0x3a   :  { %214 = vst.msk [vmem:[#allocation2 + $0x61] sm:$0xff] %vm33_vm1, %v149_v10  ;;  %215 = vst.msk [vmem:[#allocation2 + $0x69] sm:$0xff] %vm33_vm1, %v150_v11 }
  0x3b   :  { %216 = vst.msk [vmem:[#allocation2 + $0x79] sm:$0xff] %vm33_vm1, %v151_v12  ;;  %217 = vst.msk [vmem:[#allocation2 + $0x81] sm:$0xff] %vm33_vm1, %v152_v13  ;;  %v191_v13 = vld [vmem:[%s20921_s0 + $0x180] sm:$0xff] }
  0x3c   :  { %218 = vst.msk [vmem:[#allocation2 + $0x91] sm:$0xff] %vm33_vm1, %v153_v14  ;;  %219 = vst.msk [vmem:[#allocation2 + $0x99] sm:$0xff] %vm33_vm1, %v154_v15  ;;  %v192_v14 = vld [vmem:[%s20921_s0 + $0x188] sm:$0xff] }
  0x3d   :  { %220 = vst.msk [vmem:[#allocation2 + $0xa9] sm:$0xff] %vm33_vm1, %v155_v16  ;;  %221 = vst.msk [vmem:[#allocation2 + $0xb1] sm:$0xff] %vm33_vm1, %v156_v17  ;;  %v193_v16 = vld [vmem:[%s20921_s0 + $0x190] sm:$0xff] }
  0x3e   :  { %222 = vst.msk [vmem:[#allocation2 + $0xc1] sm:$0xff] %vm33_vm1, %v157_v18  ;;  %223 = vst.msk [vmem:[#allocation2 + $0xc9] sm:$0xff] %vm33_vm1, %v158_v19  ;;  %v371_v27 = vld [vmem:[#allocation2 + $0x19] sm:$0xff]  ;;  %v372_v30 = vld [vmem:[#allocation2 + $0x21] sm:$0xff] }
  0x3f   :  { %224 = vst.msk [vmem:[#allocation2 + $0xd9] sm:$0xff] %vm33_vm1, %v159_v20  ;;  %225 = vst.msk [vmem:[#allocation2 + $0xe1] sm:$0xff] %vm33_vm1, %v160_v21  ;;  %v373_v31 = vld [vmem:[#allocation2 + $0x31] sm:$0xff]  ;;  %v374_v32 = vld [vmem:[#allocation2 + $0x39] sm:$0xff]  ;;  %v434_v33 = vpack.c.bf16 %v372_v30, %v371_v27 }
  0x40   :  { %226 = vst.msk [vmem:[#allocation2 + $0xf1] sm:$0xff] %vm33_vm1, %v161_v22  ;;  %227 = vst.msk [vmem:[#allocation2 + $0xf9] sm:$0xff] %vm33_vm1, %v162_v25  ;;  %v435_v35 = vpack.c.bf16 %v374_v32, %v373_v31  ;;  %v375_v36 = vld [vmem:[#allocation2 + $0x49] sm:$0xff]  ;;  %v376_v37 = vld [vmem:[#allocation2 + $0x51] sm:$0xff] }
  0x41   :  { %228 = vst.msk [vmem:[#allocation2 + $0x109] sm:$0xff] %vm33_vm1, %v163_v28  ;;  %229 = vst.msk [vmem:[#allocation2 + $0x111] sm:$0xff] %vm33_vm1, %v164_v29  ;;  %13128 = vmatmul.mubr.msk.bf16.vlgmr.msra.gmra.mrb[0].mxu0 %vm33_vm1, %v434_v33  ;;  %v377_v38 = vld [vmem:[#allocation2 + $0x61] sm:$0xff]  ;;  %v378_v39 = vld [vmem:[#allocation2 + $0x69] sm:$0xff]  ;;  %v436_v42 = vpack.c.bf16 %v376_v37, %v375_v36 }
  0x42   :  { %13192 = vmatpush3.bf16.msra.mxu0 %v953_v34  ;;  %13131 = vmatprep.mubr.msk.bf16.mxu0 %vm33_vm1, %v435_v35  ;;  %230 = vst.msk [vmem:[#allocation2 + $0x121] sm:$0xff] %vm33_vm1, %v165_v40  ;;  %231 = vst.msk [vmem:[#allocation2 + $0x129] sm:$0xff] %vm33_vm1, %v166_v41  ;;  %v437_v44 = vpack.c.bf16 %v378_v39, %v377_v38  ;;  %v379_v50 = vld [vmem:[#allocation2 + $0x79] sm:$0xff]  ;;  %v380_v51 = vld [vmem:[#allocation2 + $0x81] sm:$0xff] }
  0x43   :  { %232 = vst.msk [vmem:[#allocation2 + $0x139] sm:$0xff] %vm33_vm1, %v167_v43  ;;  %233 = vst.msk [vmem:[#allocation2 + $0x141] sm:$0xff] %vm33_vm1, %v168_v45  ;;  %v381_v54 = vld [vmem:[#allocation2 + $0x91] sm:$0xff]  ;;  %v382_v55 = vld [vmem:[#allocation2 + $0x99] sm:$0xff]  ;;  %v438_v3 = vpack.c.bf16 %v380_v51, %v379_v50 }
  0x44   :  { %234 = vst.msk [vmem:[#allocation2 + $0x151] sm:$0xff] %vm33_vm1, %v169_v46  ;;  %235 = vst.msk [vmem:[#allocation2 + $0x159] sm:$0xff] %vm33_vm1, %v170_v47  ;;  %v439_v6 = vpack.c.bf16 %v382_v55, %v381_v54  ;;  %v383_v9 = vld [vmem:[#allocation2 + $0xa9] sm:$0xff]  ;;  %v384_v10 = vld [vmem:[#allocation2 + $0xb1] sm:$0xff] }
  0x45   :  { %236 = vst.msk [vmem:[#allocation2 + $0x169] sm:$0xff] %vm33_vm1, %v171_v48  ;;  %237 = vst.msk [vmem:[#allocation2 + $0x171] sm:$0xff] %vm33_vm1, %v172_v49  ;;  %v385_v11 = vld [vmem:[#allocation2 + $0xc1] sm:$0xff]  ;;  %v386_v12 = vld [vmem:[#allocation2 + $0xc9] sm:$0xff]  ;;  %v440_v15 = vpack.c.bf16 %v384_v10, %v383_v9 }
  0x46   :  { %240 = vst.msk [vmem:[#allocation2 + $0x1c9] sm:$0xff] %vm33_vm1, %v175_v52  ;;  %241 = vst.msk [vmem:[#allocation2 + $0x1d1] sm:$0xff] %vm33_vm1, %v176_v53  ;;  %v441_v17 = vpack.c.bf16 %v386_v12, %v385_v11  ;;  %v194_v18 = vld [vmem:[%s20921_s0 + $0x198] sm:$0xff]  ;;  %v195_v19 = vld [vmem:[%s20921_s0 + $0x1a0] sm:$0xff] }
  0x47   :  { %242 = vst.msk [vmem:[#allocation2 + $0x1e1] sm:$0xff] %vm33_vm1, %v177_v56  ;;  %243 = vst.msk [vmem:[#allocation2 + $0x1e9] sm:$0xff] %vm33_vm1, %v178_v57  ;;  %v196_v20 = vld [vmem:[%s20921_s0 + $0x1a8] sm:$0xff]  ;;  %v197_v21 = vld [vmem:[%s20921_s0 + $0x1b0] sm:$0xff] }
  0x48   :  { %244 = vst.msk [vmem:[#allocation2 + $0x1f9] sm:$0xff] %vm33_vm1, %v179_v58  ;;  %245 = vst.msk [vmem:[#allocation2 + $0x201] sm:$0xff] %vm33_vm1, %v180_v59  ;;  %v198_v22 = vld [vmem:[%s20921_s0 + $0x1b8] sm:$0xff]  ;;  %v201_v25 = vld [vmem:[%s20921_s0 + $0x1d0] sm:$0xff] }
  0x49   :  { %13132 = vmatmul.mubr.msk.bf16.gmra.mrb[4].mxu0 %vm33_vm1, %v436_v42  ;;  %246 = vst.msk [vmem:[#allocation2 + $0x211] sm:$0xff] %vm33_vm1, %v181_v60  ;;  %247 = vst.msk [vmem:[#allocation2 + $0x219] sm:$0xff] %vm33_vm1, %v182_v61  ;;  %v203_v27 = vld [vmem:[%s20921_s0 + $0x1e0] sm:$0xff]  ;;  %v204_v30 = vld [vmem:[%s20921_s0 + $0x1e8] sm:$0xff] }
  0x4a   :  { %13135 = vmatprep.mubr.msk.bf16.mxu0 %vm33_vm1, %v437_v44  ;;  %248 = vst.msk [vmem:[#allocation2 + $0x229] sm:$0xff] %vm33_vm1, %v183_v62  ;;  %249 = vst.msk [vmem:[#allocation2 + $0x231] sm:$0xff] %vm33_vm1, %v184_v63  ;;  %v387_v28 = vld [vmem:[#allocation2 + $0xd9] sm:$0xff]  ;;  %v388_v29 = vld [vmem:[#allocation2 + $0xe1] sm:$0xff] }
  0x4b   :  { %250 = vst.msk [vmem:[#allocation2 + $0x241] sm:$0xff] %vm33_vm1, %v185_v0  ;;  %251 = vst.msk [vmem:[#allocation2 + $0x249] sm:$0xff] %vm33_vm1, %v186_v2  ;;  %v389_v31 = vld [vmem:[#allocation2 + $0xf1] sm:$0xff]  ;;  %v390_v32 = vld [vmem:[#allocation2 + $0xf9] sm:$0xff]  ;;  %v442_v34 = vpack.c.bf16 %v388_v29, %v387_v28 }
  0x4c   :  { %252 = vst.msk [vmem:[#allocation2 + $0x259] sm:$0xff] %vm33_vm1, %v187_v4  ;;  %253 = vst.msk [vmem:[#allocation2 + $0x261] sm:$0xff] %vm33_vm1, %v188_v5  ;;  %v15963_v33 = vld [vmem:[%s20920_s1 + $0x4] sm:$0x3]  ;;  %v443_v35 = vpack.c.bf16 %v390_v32, %v389_v31  ;;  %v391_v36 = vld [vmem:[#allocation2 + $0x109] sm:$0xff] }
  0x4d   :  { %254 = vst.msk [vmem:[#allocation2 + $0x271] sm:$0xff] %vm33_vm1, %v189_v7  ;;  %255 = vst.msk [vmem:[#allocation2 + $0x279] sm:$0xff] %vm33_vm1, %v190_v8  ;;  %15407 = vmatprep.subr.msk.bf16.mxu0 %vm563_vm0, %v15963_v33  ;;  %v392_v37 = vld [vmem:[#allocation2 + $0x111] sm:$0xff]  ;;  %v393_v38 = vld [vmem:[#allocation2 + $0x121] sm:$0xff] }
  0x4e   :  { %256 = vst.msk [vmem:[#allocation2 + $0x289] sm:$0xff] %vm33_vm1, %v191_v13  ;;  %257 = vst.msk [vmem:[#allocation2 + $0x291] sm:$0xff] %vm33_vm1, %v192_v14  ;;  %v394_v39 = vld [vmem:[#allocation2 + $0x129] sm:$0xff]  ;;  %v444_v40 = vpack.c.bf16 %v392_v37, %v391_v36  ;;  %v395_v42 = vld [vmem:[#allocation2 + $0x139] sm:$0xff] }
  0x4f   :  { %258 = vst.msk [vmem:[#allocation2 + $0x2a1] sm:$0xff] %vm33_vm1, %v193_v16  ;;  %259 = vst.msk [vmem:[#allocation2 + $0x2a9] sm:$0xff] %vm33_vm1, %v194_v18  ;;  %v445_v41 = vpack.c.bf16 %v394_v39, %v393_v38  ;;  %v396_v43 = vld [vmem:[#allocation2 + $0x141] sm:$0xff]  ;;  %v397_v44 = vld [vmem:[#allocation2 + $0x151] sm:$0xff] }
  0x50   :  { %260 = vst.msk [vmem:[#allocation2 + $0x2b9] sm:$0xff] %vm33_vm1, %v195_v19  ;;  %261 = vst.msk [vmem:[#allocation2 + $0x2c1] sm:$0xff] %vm33_vm1, %v196_v20  ;;  %v398_v45 = vld [vmem:[#allocation2 + $0x159] sm:$0xff]  ;;  %v446_v46 = vpack.c.bf16 %v396_v43, %v395_v42  ;;  %v399_v48 = vld [vmem:[#allocation2 + $0x169] sm:$0xff] }
  0x51   :  { %13136 = vmatmul.mubr.msk.bf16.gmra.mrb[8].mxu0 %vm33_vm1, %v438_v3  ;;  %262 = vst.msk [vmem:[#allocation2 + $0x2d1] sm:$0xff] %vm33_vm1, %v197_v21  ;;  %263 = vst.msk [vmem:[#allocation2 + $0x2d9] sm:$0xff] %vm33_vm1, %v198_v22  ;;  %v447_v47 = vpack.c.bf16 %v398_v45, %v397_v44  ;;  %v400_v49 = vld [vmem:[#allocation2 + $0x171] sm:$0xff]  ;;  %v402_v51 = vld [vmem:[#allocation2 + $0x1b9] sm:$0xff] }
  0x52   :  { %13139 = vmatprep.mubr.msk.bf16.mxu0 %vm33_vm1, %v439_v6  ;;  %264 = vst.msk [vmem:[#allocation2 + $0x2e9] sm:$0xff] %vm33_vm1, %v199_v23  ;;  %265 = vst.msk [vmem:[#allocation2 + $0x2f1] sm:$0xff] %vm33_vm1, %v200_v24  ;;  %v401_v50 = vld [vmem:[#allocation2 + $0x1b1] sm:$0xff]  ;;  %v448_v52 = vpack.c.bf16 %v400_v49, %v399_v48  ;;  %v403_v54 = vld [vmem:[#allocation2 + $0x1c9] sm:$0xff] }
  0x53   :  { %266 = vst.msk [vmem:[#allocation2 + $0x301] sm:$0xff] %vm33_vm1, %v201_v25  ;;  %267 = vst.msk [vmem:[#allocation2 + $0x309] sm:$0xff] %vm33_vm1, %v202_v26  ;;  %v449_v53 = vpack.c.bf16 %v402_v51, %v401_v50  ;;  %v404_v55 = vld [vmem:[#allocation2 + $0x1d1] sm:$0xff]  ;;  %v405_v56 = vld [vmem:[#allocation2 + $0x1e1] sm:$0xff] }
  0x54   :  { %268 = vst.msk [vmem:[#allocation2 + $0x319] sm:$0xff] %vm33_vm1, %v203_v27  ;;  %269 = vst.msk [vmem:[#allocation2 + $0x321] sm:$0xff] %vm33_vm1, %v204_v30  ;;  %v406_v57 = vld [vmem:[#allocation2 + $0x1e9] sm:$0xff]  ;;  %v450_v58 = vpack.c.bf16 %v404_v55, %v403_v54  ;;  %v407_v60 = vld [vmem:[#allocation2 + $0x1f9] sm:$0xff] }
  0x55   :  { %v451_v59 = vpack.c.bf16 %v406_v57, %v405_v56  ;;  %v408_v61 = vld [vmem:[#allocation2 + $0x201] sm:$0xff]  ;;  %v409_v62 = vld [vmem:[#allocation2 + $0x211] sm:$0xff]  ;;  %v410_v63 = vld [vmem:[#allocation2 + $0x219] sm:$0xff] }
  0x56   :  { %v452_v0 = vpack.c.bf16 %v408_v61, %v407_v60  ;;  %v453_v2 = vpack.c.bf16 %v410_v63, %v409_v62  ;;  %v411_v3 = vld [vmem:[#allocation2 + $0x229] sm:$0xff]  ;;  %v412_v4 = vld [vmem:[#allocation2 + $0x231] sm:$0xff]  ;;  %v413_v5 = vld [vmem:[#allocation2 + $0x241] sm:$0xff] }
  0x57   :  { %v414_v6 = vld [vmem:[#allocation2 + $0x249] sm:$0xff]  ;;  %v454_v7 = vpack.c.bf16 %v412_v4, %v411_v3  ;;  %v415_v9 = vld [vmem:[#allocation2 + $0x259] sm:$0xff]  ;;  %v416_v10 = vld [vmem:[#allocation2 + $0x261] sm:$0xff] }
  0x58   :  { %v455_v8 = vpack.c.bf16 %v414_v6, %v413_v5  ;;  %v417_v11 = vld [vmem:[#allocation2 + $0x271] sm:$0xff]  ;;  %v418_v12 = vld [vmem:[#allocation2 + $0x279] sm:$0xff]  ;;  %v456_v13 = vpack.c.bf16 %v416_v10, %v415_v9  ;;  %v422_v18 = vld [vmem:[#allocation2 + $0x2a9] sm:$0xff] }
  0x59   :  { %13140 = vmatmul.mubr.msk.bf16.gmra.mrb[12].mxu0 %vm33_vm1, %v440_v15  ;;  %v457_v14 = vpack.c.bf16 %v418_v12, %v417_v11  ;;  %v419_v15 = vld [vmem:[#allocation2 + $0x289] sm:$0xff]  ;;  %v420_v16 = vld [vmem:[#allocation2 + $0x291] sm:$0xff]  ;;  %v423_v21 = vld [vmem:[#allocation2 + $0x2b9] sm:$0xff] }
  0x5a   :  { %13143 = vmatprep.mubr.msk.bf16.mxu0 %vm33_vm1, %v441_v17  ;;  %v421_v17 = vld [vmem:[#allocation2 + $0x2a1] sm:$0xff]  ;;  %v458_v19 = vpack.c.bf16 %v420_v16, %v419_v15  ;;  %v425_v23 = vld [vmem:[#allocation2 + $0x2d1] sm:$0xff]  ;;  %v426_v24 = vld [vmem:[#allocation2 + $0x2d9] sm:$0xff] }
  0x5b   :  { %v459_v20 = vpack.c.bf16 %v422_v18, %v421_v17  ;;  %v424_v22 = vld [vmem:[#allocation2 + $0x2c1] sm:$0xff]  ;;  %v461_v26 = vpack.c.bf16 %v426_v24, %v425_v23  ;;  %v427_v27 = vld [vmem:[#allocation2 + $0x2e9] sm:$0xff]  ;;  %v428_v28 = vld [vmem:[#allocation2 + $0x2f1] sm:$0xff] }
  0x5c   :  { %v460_v25 = vpack.c.bf16 %v424_v22, %v423_v21  ;;  %v429_v29 = vld [vmem:[#allocation2 + $0x301] sm:$0xff]  ;;  %v430_v30 = vld [vmem:[#allocation2 + $0x309] sm:$0xff]  ;;  %v462_v31 = vpack.c.bf16 %v428_v28, %v427_v27  ;;  %v277_v43 = vld [vmem:[#allocation2 + $0x38] sm:$0xff] }
  0x5d   :  { %v463_v32 = vpack.c.bf16 %v430_v30, %v429_v29  ;;  %v272_v36 = vld [vmem:[#allocation2] sm:$0xff]  ;;  %v273_v37 = vld [vmem:[#allocation2 + $0x8] sm:$0xff]  ;;  %v276_v42 = vld [vmem:[#allocation2 + $0x30] sm:$0xff] }
  0x5e   :  { %v336_v39 = vpack.c.bf16 %v273_v37, %v272_v36  ;;  %v15993_v45 = vpack.c.bf16 %v277_v43, %v276_v42  ;;  %v278_v48 = vld [vmem:[#allocation2 + $0x48] sm:$0xff]  ;;  %v279_v49 = vld [vmem:[#allocation2 + $0x50] sm:$0xff]  ;;  %v280_v50 = vld [vmem:[#allocation2 + $0x60] sm:$0xff] }
  0x5f   :  { %v281_v51 = vld [vmem:[#allocation2 + $0x68] sm:$0xff]  ;;  %v283_v54 = vld [vmem:[#allocation2 + $0x80] sm:$0xff]  ;;  %v284_v55 = vld [vmem:[#allocation2 + $0x90] sm:$0xff] }
  0x60   :  { %v285_v56 = vld [vmem:[#allocation2 + $0x98] sm:$0xff]  ;;  %v287_v60 = vld [vmem:[#allocation2 + $0xb0] sm:$0xff]  ;;  %v288_v61 = vld [vmem:[#allocation2 + $0xc0] sm:$0xff] }
  0x61   :  { %13144 = vmatmul.mubr.msk.bf16.gmra.mrb[16].mxu0 %vm33_vm1, %v442_v34  ;;  %v431_v34 = vld [vmem:[#allocation2 + $0x319] sm:$0xff]  ;;  %v289_v62 = vld [vmem:[#allocation2 + $0xc8] sm:$0xff]  ;;  %v292_v4 = vld [vmem:[#allocation2 + $0xf0] sm:$0xff] }
  0x62   :  { %13147 = vmatprep.mubr.msk.bf16.mxu0 %vm33_vm1, %v443_v35  ;;  %v432_v35 = vld [vmem:[#allocation2 + $0x321] sm:$0xff]  ;;  %v293_v5 = vld [vmem:[#allocation2 + $0xf8] sm:$0xff]  ;;  %v295_v9 = vld [vmem:[#allocation2 + $0x110] sm:$0xff] }
  0x63   :  { %v464_v38 = vpack.c.bf16 %v432_v35, %v431_v34  ;;  %v291_v3 = vld [vmem:[#allocation2 + $0xe0] sm:$0xff]  ;;  %v297_v11 = vld [vmem:[#allocation2 + $0x128] sm:$0xff]  ;;  %v300_v16 = vld [vmem:[#allocation2 + $0x150] sm:$0xff] }
  0x64   :  { %v296_v10 = vld [vmem:[#allocation2 + $0x120] sm:$0xff]  ;;  %v301_v17 = vld [vmem:[#allocation2 + $0x158] sm:$0xff]  ;;  %v303_v21 = vld [vmem:[#allocation2 + $0x170] sm:$0xff] }
  0x65   :  { %v299_v15 = vld [vmem:[#allocation2 + $0x140] sm:$0xff]  ;;  %v304_v22 = vld [vmem:[#allocation2 + $0x1b0] sm:$0xff]  ;;  %v305_v23 = vld [vmem:[#allocation2 + $0x1b8] sm:$0xff] }
  0x66   :  { %v307_v27 = vld [vmem:[#allocation2 + $0x1d0] sm:$0xff]  ;;  %v308_v28 = vld [vmem:[#allocation2 + $0x1e0] sm:$0xff]  ;;  %v309_v29 = vld [vmem:[#allocation2 + $0x1e8] sm:$0xff] }
  0x67   :  { %v311_v34 = vld [vmem:[#allocation2 + $0x200] sm:$0xff]  ;;  %v312_v35 = vld [vmem:[#allocation2 + $0x210] sm:$0xff]  ;;  %v313_v36 = vld [vmem:[#allocation2 + $0x218] sm:$0xff] }
  0x68   :  { %v317_v42 = vld [vmem:[#allocation2 + $0x248] sm:$0xff] }
  0x69   :  { %13148 = vmatmul.mubr.msk.bf16.gmra.mrb[20].mxu0 %vm33_vm1, %v444_v40  ;;  %v274_v40 = vld [vmem:[#allocation2 + $0x18] sm:$0xff] }
  0x6a   :  { %13151 = vmatprep.mubr.msk.bf16.mxu0 %vm33_vm1, %v445_v41  ;;  %v275_v41 = vld [vmem:[#allocation2 + $0x20] sm:$0xff] }
  0x6b   :  { %v15991_v44 = vpack.c.bf16 %v275_v41, %v274_v40  ;;  %v315_v40 = vld [vmem:[#allocation2 + $0x230] sm:$0xff]  ;;  %v316_v41 = vld [vmem:[#allocation2 + $0x240] sm:$0xff] }
  0x71   :  { %13152 = vmatmul.mubr.msk.bf16.gmra.mrb[24].mxu0 %vm33_vm1, %v446_v46  ;;  %v1439_v46 = vsel %vm563_vm0, %v15963_v33, 0  ;;  %v16008_v33 = vpack.c.bf16 %v279_v49, %v278_v48  ;;  %v318_v48 = vld [vmem:[#allocation2 + $0x258] sm:$0xff]  ;;  %v319_v49 = vld [vmem:[#allocation2 + $0x260] sm:$0xff] }
  0x72   :  { %13155 = vmatprep.mubr.msk.bf16.mxu0 %vm33_vm1, %v447_v47  ;;  %v16000_v47 = vld [vmem:[%s20920_s1 + $0x6] sm:$0x3] }
  0x79   :  { %13156 = vmatmul.mubr.msk.bf16.gmra.mrb[28].mxu0 %vm33_vm1, %v448_v52  ;;  %v16010_v52 = vpack.c.bf16 %v281_v51, %v280_v50  ;;  %v320_v50 = vld [vmem:[#allocation2 + $0x270] sm:$0xff]  ;;  %v321_v51 = vld [vmem:[#allocation2 + $0x278] sm:$0xff] }
  0x7a   :  { %13159 = vmatprep.mubr.msk.bf16.mxu0 %vm33_vm1, %v449_v53  ;;  %v282_v53 = vld [vmem:[#allocation2 + $0x78] sm:$0xff] }
  0x7b   :  { %v16016_v57 = vpack.c.bf16 %v283_v54, %v282_v53  ;;  %v16085_v53 = vpack.c.bf16 %v319_v49, %v318_v48  ;;  %v16087_v54 = vpack.c.bf16 %v321_v51, %v320_v50  ;;  %v1253_v48 = vld [vmem:[#allocation2 + $0x6a] sm:$0xff]  ;;  %v1254_v50 = vld [vmem:[#allocation2 + $0x7a] sm:$0xff]  ;;  %v1255_v51 = vld [vmem:[#allocation2 + $0x82] sm:$0xff] }
  0x81   :  { %13160 = vmatmul.mubr.msk.bf16.gmra.mrb[32].mxu0 %vm33_vm1, %v450_v58  ;;  %v16018_v58 = vpack.c.bf16 %v285_v56, %v284_v55  ;;  %v322_v55 = vld [vmem:[#allocation2 + $0x288] sm:$0xff]  ;;  %v323_v56 = vld [vmem:[#allocation2 + $0x290] sm:$0xff] }
  0x82   :  { %13163 = vmatprep.mubr.msk.bf16.mxu0 %vm33_vm1, %v451_v59  ;;  %v286_v59 = vld [vmem:[#allocation2 + $0xa8] sm:$0xff] }
  0x83   :  { %v16024_v63 = vpack.c.bf16 %v287_v60, %v286_v59  ;;  %v324_v59 = vld [vmem:[#allocation2 + $0x2a0] sm:$0xff]  ;;  %v325_v60 = vld [vmem:[#allocation2 + $0x2a8] sm:$0xff] }
  0x89   :  { %13164 = vmatmul.mubr.msk.bf16.gmra.mrb[36].mxu0 %vm33_vm1, %v452_v0  ;;  %v16026_v0 = vpack.c.bf16 %v289_v62, %v288_v61  ;;  %v16093_v61 = vpack.c.bf16 %v323_v56, %v322_v55  ;;  %v16095_v62 = vpack.c.bf16 %v325_v60, %v324_v59  ;;  %v1256_v55 = vld [vmem:[#allocation2 + $0x92] sm:$0xff]  ;;  %v1257_v56 = vld [vmem:[#allocation2 + $0x9a] sm:$0xff]  ;;  %v16147_v59 = vpack.c.bf16 %v1255_v51, %v1254_v50 }
  0x8a   :  { %13167 = vmatprep.mubr.msk.bf16.mxu0 %vm33_vm1, %v453_v2  ;;  %v290_v2 = vld [vmem:[#allocation2 + $0xd8] sm:$0xff]  ;;  %v16149_v60 = vpack.c.bf16 %v1257_v56, %v1256_v55  ;;  %v173_v55 = vld [vmem:[%s20921_s0 + $0xf0] sm:$0xff] }
  0x8b   :  { %v16032_v6 = vpack.c.bf16 %v291_v3, %v290_v2  ;;  %v326_v2 = vld [vmem:[#allocation2 + $0x2b8] sm:$0xff]  ;;  %v327_v3 = vld [vmem:[#allocation2 + $0x2c0] sm:$0xff]  ;;  %238 = vst.msk [vmem:[#allocation2 + $0x181] sm:$0xff] %vm33_vm1, %v173_v55 }
  0x8c   :  { %v174_v56 = vld [vmem:[%s20921_s0 + $0xf8] sm:$0xff] }
  0x8d   :  { %239 = vst.msk [vmem:[#allocation2 + $0x189] sm:$0xff] %vm33_vm1, %v174_v56 }
  0x91   :  { %13168 = vmatmul.mubr.msk.bf16.gmra.mrb[40].mxu0 %vm33_vm1, %v454_v7  ;;  %v16034_v7 = vpack.c.bf16 %v293_v5, %v292_v4  ;;  %v328_v4 = vld [vmem:[#allocation2 + $0x2d0] sm:$0xff]  ;;  %v329_v5 = vld [vmem:[#allocation2 + $0x2d8] sm:$0xff] }
  0x92   :  { %13171 = vmatprep.mubr.msk.bf16.mxu0 %vm33_vm1, %v455_v8  ;;  %v294_v8 = vld [vmem:[#allocation2 + $0x108] sm:$0xff] }
  0x93   :  { %v16040_v12 = vpack.c.bf16 %v295_v9, %v294_v8  ;;  %v16101_v8 = vpack.c.bf16 %v327_v3, %v326_v2  ;;  %v16103_v9 = vpack.c.bf16 %v329_v5, %v328_v4  ;;  %v1258_v2 = vld [vmem:[#allocation2 + $0xaa] sm:$0xff]  ;;  %v1259_v3 = vld [vmem:[#allocation2 + $0xb2] sm:$0xff]  ;;  %v1260_v4 = vld [vmem:[#allocation2 + $0xc2] sm:$0xff] }
  0x94   :  { %v1261_v5 = vld [vmem:[#allocation2 + $0xca] sm:$0xff] }
  0x99   :  { %13172 = vmatmul.mubr.msk.bf16.gmra.mrb[44].mxu0 %vm33_vm1, %v456_v13  ;;  %v16042_v13 = vpack.c.bf16 %v297_v11, %v296_v10  ;;  %v330_v10 = vld [vmem:[#allocation2 + $0x2e8] sm:$0xff]  ;;  %v331_v11 = vld [vmem:[#allocation2 + $0x2f0] sm:$0xff] }
  0x9a   :  { %13175 = vmatprep.mubr.msk.bf16.mxu0 %vm33_vm1, %v457_v14  ;;  %v298_v14 = vld [vmem:[#allocation2 + $0x138] sm:$0xff] }
  0x9b   :  { %v16048_v18 = vpack.c.bf16 %v299_v15, %v298_v14  ;;  %v332_v14 = vld [vmem:[#allocation2 + $0x300] sm:$0xff]  ;;  %v333_v15 = vld [vmem:[#allocation2 + $0x308] sm:$0xff] }
  0xa1   :  { %13176 = vmatmul.mubr.msk.bf16.gmra.mrb[48].mxu0 %vm33_vm1, %v458_v19  ;;  %v16050_v19 = vpack.c.bf16 %v301_v17, %v300_v16  ;;  %v16109_v16 = vpack.c.bf16 %v331_v11, %v330_v10  ;;  %v16111_v17 = vpack.c.bf16 %v333_v15, %v332_v14  ;;  %v16155_v10 = vpack.c.bf16 %v1259_v3, %v1258_v2  ;;  %v1262_v14 = vld [vmem:[#allocation2 + $0xda] sm:$0xff]  ;;  %v1263_v15 = vld [vmem:[#allocation2 + $0xe2] sm:$0xff]  ;;  %v1274_v2 = vld [vmem:[#allocation2 + $0x16a] sm:$0xff] }
  0xa2   :  { %13179 = vmatprep.mubr.msk.bf16.mxu0 %vm33_vm1, %v459_v20  ;;  %v302_v20 = vld [vmem:[#allocation2 + $0x168] sm:$0xff]  ;;  %v16157_v11 = vpack.c.bf16 %v1261_v5, %v1260_v4  ;;  %v1275_v3 = vld [vmem:[#allocation2 + $0x172] sm:$0xff]  ;;  %v1277_v5 = vld [vmem:[#allocation2 + $0x1ba] sm:$0xff] }
  0xa3   :  { %v16056_v24 = vpack.c.bf16 %v303_v21, %v302_v20  ;;  %v334_v20 = vld [vmem:[#allocation2 + $0x318] sm:$0xff]  ;;  %v335_v21 = vld [vmem:[#allocation2 + $0x320] sm:$0xff] }
  0xa4   :  { %v1276_v4 = vld [vmem:[#allocation2 + $0x1b2] sm:$0xff] }
  0xa9   :  { %13180 = vmatmul.mubr.msk.bf16.gmra.mrb[52].mxu0 %vm33_vm1, %v460_v25  ;;  %v352_v25 = vpack.c.bf16 %v305_v23, %v304_v22  ;;  %v1244_v22 = vld [vmem:[#allocation2 + $0x2] sm:$0xff]  ;;  %v1245_v23 = vld [vmem:[#allocation2 + $0xa] sm:$0xff] }
  0xaa   :  { %13183 = vmatprep.mubr.msk.bf16.mxu0 %vm33_vm1, %v461_v26  ;;  %v306_v26 = vld [vmem:[#allocation2 + $0x1c8] sm:$0xff] }
  0xab   :  { %v16061_v30 = vpack.c.bf16 %v307_v27, %v306_v26  ;;  %v1308_v26 = vpack.c.bf16 %v1245_v23, %v1244_v22  ;;  %v1246_v27 = vld [vmem:[#allocation2 + $0x1a] sm:$0xff]  ;;  %v16163_v22 = vpack.c.bf16 %v1263_v15, %v1262_v14  ;;  %v16195_v14 = vpack.c.bf16 %v1275_v3, %v1274_v2  ;;  %v1286_v2 = vld [vmem:[#allocation2 + $0x22a] sm:$0xff]  ;;  %v1287_v3 = vld [vmem:[#allocation2 + $0x232] sm:$0xff] }
  0xac   :  { %v1324_v15 = vpack.c.bf16 %v1277_v5, %v1276_v4  ;;  %v1288_v4 = vld [vmem:[#allocation2 + $0x242] sm:$0xff]  ;;  %v1289_v5 = vld [vmem:[#allocation2 + $0x24a] sm:$0xff] }
  0xb1   :  { %13184 = vmatmul.mubr.msk.bf16.gmra.mrb[56].mxu0 %vm33_vm1, %v462_v31  ;;  %v16063_v31 = vpack.c.bf16 %v309_v29, %v308_v28  ;;  %v1247_v28 = vld [vmem:[#allocation2 + $0x22] sm:$0xff]  ;;  %v1248_v29 = vld [vmem:[#allocation2 + $0x32] sm:$0xff] }
  0xb2   :  { %13187 = vmatprep.mubr.msk.bf16.mxu0 %vm33_vm1, %v463_v32  ;;  %v310_v32 = vld [vmem:[#allocation2 + $0x1f8] sm:$0xff] }
  0xb3   :  { %v16069_v37 = vpack.c.bf16 %v311_v34, %v310_v32  ;;  %v1249_v32 = vld [vmem:[#allocation2 + $0x3a] sm:$0xff]  ;;  %v16122_v34 = vpack.c.bf16 %v1247_v28, %v1246_v27  ;;  %v1267_v27 = vld [vmem:[#allocation2 + $0x112] sm:$0xff]  ;;  %v1268_v28 = vld [vmem:[#allocation2 + $0x122] sm:$0xff] }
  0xb9   :  { %13188 = vmatmul.mubr.msk.bf16.gmra.mrb[60].mxu0 %vm33_vm1, %v464_v38  ;;  %v16071_v38 = vpack.c.bf16 %v313_v36, %v312_v35  ;;  %v16124_v35 = vpack.c.bf16 %v1249_v32, %v1248_v29  ;;  %v1989_v36 = vsel %vm563_vm0, %v16000_v47, 0  ;;  %v1269_v29 = vld [vmem:[#allocation2 + $0x12a] sm:$0xff] }
  0xba   :  { %13193 = vmatprep.mubr.msk.bf16.mxu0 %vm33_vm1, %v336_v39  ;;  %v314_v39 = vld [vmem:[#allocation2 + $0x228] sm:$0xff] }
  0xbb   :  { %v16077_v43 = vpack.c.bf16 %v315_v40, %v314_v39  ;;  %v16131_v39 = vld [vmem:[%s20920_s1 + $0x8] sm:$0x3]  ;;  %v1250_v40 = vld [vmem:[#allocation2 + $0x4a] sm:$0xff] }
  0xc1   :  { %13194 = vmatmul.mubr.msk.bf16.vlgmr.msra.gmra.mrb[0].mxu0 %vm33_vm1, %v15991_v44 }
  0xc2   :  { %13258 = vmatpush3.bf16.msra.mxu0 %v1439_v46  ;;  %13197 = vmatprep.mubr.msk.bf16.mxu0 %vm33_vm1, %v15993_v45  ;;  %v16079_v46 = vpack.c.bf16 %v317_v42, %v316_v41  ;;  %v1251_v41 = vld [vmem:[#allocation2 + $0x52] sm:$0xff]  ;;  %v1252_v42 = vld [vmem:[#allocation2 + $0x62] sm:$0xff] }
  0xc3   :  { %15408 = vmatprep.subr.msk.bf16.mxu0 %vm563_vm0, %v16000_v47  ;;  %v16139_v47 = vpack.c.bf16 %v1251_v41, %v1250_v40  ;;  %v16141_v49 = vpack.c.bf16 %v1253_v48, %v1252_v42  ;;  %v1270_v40 = vld [vmem:[#allocation2 + $0x13a] sm:$0xff]  ;;  %v1271_v41 = vld [vmem:[#allocation2 + $0x142] sm:$0xff]  ;;  %v1272_v42 = vld [vmem:[#allocation2 + $0x152] sm:$0xff] }
  0xc4   :  { %v1273_v48 = vld [vmem:[#allocation2 + $0x15a] sm:$0xff]  ;;  %v16179_v50 = vpack.c.bf16 %v1271_v41, %v1270_v40  ;;  %v1283_v41 = vld [vmem:[#allocation2 + $0x202] sm:$0xff] }
  0xc5   :  { %v16181_v51 = vpack.c.bf16 %v1273_v48, %v1272_v42  ;;  %v1282_v40 = vld [vmem:[#allocation2 + $0x1fa] sm:$0xff]  ;;  %v1284_v42 = vld [vmem:[#allocation2 + $0x212] sm:$0xff] }
  0xc6   :  { %v1285_v48 = vld [vmem:[#allocation2 + $0x21a] sm:$0xff]  ;;  %v16208_v55 = vpack.c.bf16 %v1283_v41, %v1282_v40 }
  0xc7   :  { %v16210_v56 = vpack.c.bf16 %v1285_v48, %v1284_v42  ;;  %v1293_v40 = vld [vmem:[#allocation2 + $0x27a] sm:$0xff]  ;;  %v1294_v48 = vld [vmem:[#allocation2 + $0x28a] sm:$0xff] }
  0xc9   :  { %13198 = vmatmul.mubr.msk.bf16.gmra.mrb[4].mxu0 %vm33_vm1, %v16008_v33 }
  0xca   :  { %13201 = vmatprep.mubr.msk.bf16.mxu0 %vm33_vm1, %v16010_v52 }
  0xd1   :  { %13202 = vmatmul.mubr.msk.bf16.gmra.mrb[8].mxu0 %vm33_vm1, %v16016_v57 }
  0xd2   :  { %13205 = vmatprep.mubr.msk.bf16.mxu0 %vm33_vm1, %v16018_v58 }
  0xd9   :  { %13206 = vmatmul.mubr.msk.bf16.gmra.mrb[12].mxu0 %vm33_vm1, %v16024_v63 }
  0xda   :  { %13209 = vmatprep.mubr.msk.bf16.mxu0 %vm33_vm1, %v16026_v0 }
  0xe1   :  { %13210 = vmatmul.mubr.msk.bf16.gmra.mrb[16].mxu0 %vm33_vm1, %v16032_v6 }
  0xe2   :  { %13213 = vmatprep.mubr.msk.bf16.mxu0 %vm33_vm1, %v16034_v7 }
  0xe9   :  { %13214 = vmatmul.mubr.msk.bf16.gmra.mrb[20].mxu0 %vm33_vm1, %v16040_v12 }
  0xea   :  { %13217 = vmatprep.mubr.msk.bf16.mxu0 %vm33_vm1, %v16042_v13 }
  0xf1   :  { %13218 = vmatmul.mubr.msk.bf16.gmra.mrb[24].mxu0 %vm33_vm1, %v16048_v18 }
  0xf2   :  { %13221 = vmatprep.mubr.msk.bf16.mxu0 %vm33_vm1, %v16050_v19 }
  0xf9   :  { %13222 = vmatmul.mubr.msk.bf16.gmra.mrb[28].mxu0 %vm33_vm1, %v16056_v24 }
  0xfa   :  { %13225 = vmatprep.mubr.msk.bf16.mxu0 %vm33_vm1, %v352_v25  ;;  %v16117_v25 = vpack.c.bf16 %v335_v21, %v334_v20  ;;  %v1264_v20 = vld [vmem:[#allocation2 + $0xf2] sm:$0xff]  ;;  %v1265_v21 = vld [vmem:[#allocation2 + $0xfa] sm:$0xff] }
  0xfb   :  { %v16165_v23 = vpack.c.bf16 %v1265_v21, %v1264_v20  ;;  %v1278_v20 = vld [vmem:[#allocation2 + $0x1ca] sm:$0xff]  ;;  %v1279_v21 = vld [vmem:[#allocation2 + $0x1d2] sm:$0xff] }
 0x101   :  { %13226 = vmatmul.mubr.msk.bf16.gmra.mrb[32].mxu0 %vm33_vm1, %v16061_v30 }
 0x102   :  { %13229 = vmatprep.mubr.msk.bf16.mxu0 %vm33_vm1, %v16063_v31 }
 0x109   :  { %13230 = vmatmul.mubr.msk.bf16.gmra.mrb[36].mxu0 %vm33_vm1, %v16069_v37 }
 0x10a   :  { %13233 = vmatprep.mubr.msk.bf16.mxu0 %vm33_vm1, %v16071_v38 }
 0x111   :  { %13234 = vmatmul.mubr.msk.bf16.gmra.mrb[40].mxu0 %vm33_vm1, %v16077_v43 }
 0x112   :  { %13237 = vmatprep.mubr.msk.bf16.mxu0 %vm33_vm1, %v16079_v46 }
 0x119   :  { %13238 = vmatmul.mubr.msk.bf16.gmra.mrb[44].mxu0 %vm33_vm1, %v16085_v53 }
 0x11a   :  { %13241 = vmatprep.mubr.msk.bf16.mxu0 %vm33_vm1, %v16087_v54 }
 0x121   :  { %13242 = vmatmul.mubr.msk.bf16.gmra.mrb[48].mxu0 %vm33_vm1, %v16093_v61 }
 0x122   :  { %13245 = vmatprep.mubr.msk.bf16.mxu0 %vm33_vm1, %v16095_v62 }
 0x129   :  { %13246 = vmatmul.mubr.msk.bf16.gmra.mrb[52].mxu0 %vm33_vm1, %v16101_v8 }
 0x12a   :  { %13249 = vmatprep.mubr.msk.bf16.mxu0 %vm33_vm1, %v16103_v9 }
 0x131   :  { %13250 = vmatmul.mubr.msk.bf16.gmra.mrb[56].mxu0 %vm33_vm1, %v16109_v16 }
 0x132   :  { %13253 = vmatprep.mubr.msk.bf16.mxu0 %vm33_vm1, %v16111_v17 }
 0x139   :  { %13254 = vmatmul.mubr.msk.bf16.gmra.mrb[60].mxu0 %vm33_vm1, %v16117_v25 }
 0x13a   :  { %13259 = vmatprep.mubr.msk.bf16.mxu0 %vm33_vm1, %v1308_v26  ;;  %v1266_v26 = vld [vmem:[#allocation2 + $0x10a] sm:$0xff] }
 0x13b   :  { %v16171_v32 = vpack.c.bf16 %v1267_v27, %v1266_v26  ;;  %v1280_v26 = vld [vmem:[#allocation2 + $0x1e2] sm:$0xff]  ;;  %v1281_v27 = vld [vmem:[#allocation2 + $0x1ea] sm:$0xff] }
 0x141   :  { %13260 = vmatmul.mubr.msk.bf16.vlgmr.msra.gmra.mrb[0].mxu0 %vm33_vm1, %v16122_v34 }
 0x142   :  { %13324 = vmatpush3.bf16.msra.mxu0 %v1989_v36  ;;  %13263 = vmatprep.mubr.msk.bf16.mxu0 %vm33_vm1, %v16124_v35  ;;  %v16173_v36 = vpack.c.bf16 %v1269_v29, %v1268_v28  ;;  %v16200_v28 = vpack.c.bf16 %v1279_v21, %v1278_v20  ;;  %v16202_v29 = vpack.c.bf16 %v1281_v27, %v1280_v26  ;;  %v1290_v21 = vld [vmem:[#allocation2 + $0x25a] sm:$0xff]  ;;  %v1291_v26 = vld [vmem:[#allocation2 + $0x262] sm:$0xff]  ;;  %v1292_v27 = vld [vmem:[#allocation2 + $0x272] sm:$0xff] }
 0x143   :  { %15409 = vmatprep.subr.msk.bf16.mxu0 %vm563_vm0, %v16131_v39  ;;  %v16218_v20 = vpack.c.bf16 %v1289_v5, %v1288_v4  ;;  %v16224_v41 = vpack.c.bf16 %v1291_v26, %v1290_v21  ;;  %v16226_v42 = vpack.c.bf16 %v1293_v40, %v1292_v27  ;;  %v1297_v4 = vld [vmem:[#allocation2 + $0x2aa] sm:$0xff]  ;;  %v1298_v21 = vld [vmem:[#allocation2 + $0x2ba] sm:$0xff]  ;;  %v1299_v26 = vld [vmem:[#allocation2 + $0x2c2] sm:$0xff] }
 0x144   :  { %v1300_v27 = vld [vmem:[#allocation2 + $0x2d2] sm:$0xff]  ;;  %v1301_v40 = vld [vmem:[#allocation2 + $0x2da] sm:$0xff] }
 0x145   :  { %21034 = vst [vmem:[#allocation4_spill] sm:$0xff] %v16224_v41  ;;  %21035 = vst [vmem:[#allocation5_spill] sm:$0xff] %v16226_v42 }
 0x149   :  { %13264 = vmatmul.mubr.msk.bf16.gmra.mrb[4].mxu0 %vm33_vm1, %v16139_v47 }
 0x14a   :  { %13267 = vmatprep.mubr.msk.bf16.mxu0 %vm33_vm1, %v16141_v49 }
 0x151   :  { %13268 = vmatmul.mubr.msk.bf16.gmra.mrb[8].mxu0 %vm33_vm1, %v16147_v59 }
 0x152   :  { %13271 = vmatprep.mubr.msk.bf16.mxu0 %vm33_vm1, %v16149_v60 }
 0x159   :  { %13272 = vmatmul.mubr.msk.bf16.gmra.mrb[12].mxu0 %vm33_vm1, %v16155_v10 }
 0x15a   :  { %13275 = vmatprep.mubr.msk.bf16.mxu0 %vm33_vm1, %v16157_v11 }
 0x161   :  { %13276 = vmatmul.mubr.msk.bf16.gmra.mrb[16].mxu0 %vm33_vm1, %v16163_v22 }
 0x162   :  { %13279 = vmatprep.mubr.msk.bf16.mxu0 %vm33_vm1, %v16165_v23 }
 0x169   :  { %13280 = vmatmul.mubr.msk.bf16.gmra.mrb[20].mxu0 %vm33_vm1, %v16171_v32 }
 0x16a   :  { %13283 = vmatprep.mubr.msk.bf16.mxu0 %vm33_vm1, %v16173_v36 }
 0x171   :  { %13284 = vmatmul.mubr.msk.bf16.gmra.mrb[24].mxu0 %vm33_vm1, %v16179_v50 }
 0x172   :  { %13287 = vmatprep.mubr.msk.bf16.mxu0 %vm33_vm1, %v16181_v51 }
 0x179   :  { %13288 = vmatmul.mubr.msk.bf16.gmra.mrb[28].mxu0 %vm33_vm1, %v16195_v14 }
 0x17a   :  { %13291 = vmatprep.mubr.msk.bf16.mxu0 %vm33_vm1, %v1324_v15  ;;  %v16216_v15 = vpack.c.bf16 %v1287_v3, %v1286_v2  ;;  %v1295_v2 = vld [vmem:[#allocation2 + $0x292] sm:$0xff]  ;;  %v1296_v3 = vld [vmem:[#allocation2 + $0x2a2] sm:$0xff] }
 0x17b   :  { %v16232_v5 = vpack.c.bf16 %v1295_v2, %v1294_v48  ;;  %v16234_v1 = vpack.c.bf16 %v1297_v4, %v1296_v3  ;;  %v1302_v48 = vld [vmem:[#allocation2 + $0x2ea] sm:$0xff]  ;;  %v1303_v2 = vld [vmem:[#allocation2 + $0x2f2] sm:$0xff]  ;;  %v1304_v3 = vld [vmem:[#allocation2 + $0x302] sm:$0xff] }
 0x17c   :  { %v1305_v4 = vld [vmem:[#allocation2 + $0x30a] sm:$0xff] }
 0x17d   :  { %21036 = vst [vmem:[#allocation6_spill] sm:$0xff] %v16232_v5  ;;  %21037 = vst [vmem:[#allocation7_spill] sm:$0xff] %v16234_v1 }
 0x181   :  { %13292 = vmatmul.mubr.msk.bf16.gmra.mrb[32].mxu0 %vm33_vm1, %v16200_v28 }
 0x182   :  { %13295 = vmatprep.mubr.msk.bf16.mxu0 %vm33_vm1, %v16202_v29 }
 0x189   :  { %13296 = vmatmul.mubr.msk.bf16.gmra.mrb[36].mxu0 %vm33_vm1, %v16208_v55 }
 0x18a   :  { %13299 = vmatprep.mubr.msk.bf16.mxu0 %vm33_vm1, %v16210_v56 }
 0x191   :  { %13300 = vmatmul.mubr.msk.bf16.gmra.mrb[40].mxu0 %vm33_vm1, %v16216_v15 }
 0x192   :  { %13303 = vmatprep.mubr.msk.bf16.mxu0 %vm33_vm1, %v16218_v20 }
 0x199   :  { %13304 = vmatmul.mubr.msk.bf16.gmra.mrb[44].mxu0 %vm33_vm1, %v16224_v41  ;;  %v16240_v41 = vpack.c.bf16 %v1299_v26, %v1298_v21  ;;  %v205_v21 = vld [vmem:[%s20921_s0 + $0x1f0] sm:$0xff]  ;;  %v206_v26 = vld [vmem:[%s20921_s0 + $0x1f8] sm:$0xff] }
 0x19a   :  { %13307 = vmatprep.mubr.msk.bf16.mxu0 %vm33_vm1, %v16226_v42  ;;  %v16242_v42 = vpack.c.bf16 %v1301_v40, %v1300_v27  ;;  %270 = vst.msk [vmem:[#allocation2 + $0x331] sm:$0xff] %vm33_vm1, %v205_v21  ;;  %271 = vst.msk [vmem:[#allocation2 + $0x339] sm:$0xff] %vm33_vm1, %v206_v26  ;;  %v1306_v27 = vld [vmem:[#allocation2 + $0x31a] sm:$0xff]  ;;  %v1307_v40 = vld [vmem:[#allocation2 + $0x322] sm:$0xff] }
 0x19b   :  { %v2358_v21 = vld [vmem:[#allocation2 + $0xc1] sm:$0xff]  ;;  %v2359_v26 = vld [vmem:[#allocation2 + $0xc9] sm:$0xff] }
 0x1a1   :  { %13308 = vmatmul.mubr.msk.bf16.gmra.mrb[48].mxu0 %vm33_vm1, %v16232_v5  ;;  %v16248_v5 = vpack.c.bf16 %v1303_v2, %v1302_v48  ;;  %v16264_v48 = vpack.c.bf16 %v1307_v40, %v1306_v27  ;;  %v2539_v2 = vsel %vm563_vm0, %v16131_v39, 0  ;;  %v2360_v27 = vld [vmem:[#allocation2 + $0xd9] sm:$0xff]  ;;  %v2361_v40 = vld [vmem:[#allocation2 + $0xe1] sm:$0xff] }
 0x1a2   :  { %13311 = vmatprep.mubr.msk.bf16.mxu0 %vm33_vm1, %v16234_v1  ;;  %v16250_v1 = vpack.c.bf16 %v1305_v4, %v1304_v3  ;;  %v12037_v3 = vld [vmem:[%s20920_s1 + $0xa] sm:$0x3] }
 0x1a9   :  { %13312 = vmatmul.mubr.msk.bf16.gmra.mrb[52].mxu0 %vm33_vm1, %v16240_v41 }
 0x1aa   :  { %13315 = vmatprep.mubr.msk.bf16.mxu0 %vm33_vm1, %v16242_v42 }
 0x1b1   :  { %13316 = vmatmul.mubr.msk.bf16.gmra.mrb[56].mxu0 %vm33_vm1, %v16248_v5 }
 0x1b2   :  { %13319 = vmatprep.mubr.msk.bf16.mxu0 %vm33_vm1, %v16250_v1 }
 0x1b9   :  { %13320 = vmatmul.mubr.msk.bf16.gmra.mrb[60].mxu0 %vm33_vm1, %v16264_v48 }
 0x1ba   :  { %13325 = vmatprep.mubr.msk.bf16.mxu0 %vm33_vm1, %v15991_v44  ;;  %v1824_v44 = vld [vmem:[#allocation2 + $0x180] sm:$0xff] }
 0x1c1   :  { %13326 = vmatmul.mubr.msk.bf16.vlgmr.msra.gmra.mrb[0].mxu0 %vm33_vm1, %v15993_v45  ;;  %v1825_v45 = vld [vmem:[#allocation2 + $0x188] sm:$0xff] }
 0x1c2   :  { %13390 = vmatpush3.bf16.msra.mxu0 %v2539_v2  ;;  %13329 = vmatprep.mubr.msk.bf16.mxu0 %vm33_vm1, %v16008_v33  ;;  %v16304_v33 = vpack.c.bf16 %v1825_v45, %v1824_v44  ;;  %v16382_v2 = vpack.c.bf16 %v2359_v26, %v2358_v21  ;;  %v2362_v44 = vld [vmem:[#allocation2 + $0xf1] sm:$0xff]  ;;  %v2363_v45 = vld [vmem:[#allocation2 + $0xf9] sm:$0xff]  ;;  %v2378_v21 = vld [vmem:[#allocation2 + $0x1e1] sm:$0xff] }
 0x1c3   :  { %15410 = vmatprep.subr.msk.bf16.mxu0 %vm563_vm0, %v12037_v3  ;;  %v2379_v26 = vld [vmem:[#allocation2 + $0x1e9] sm:$0xff] }
 0x1c9   :  { %13330 = vmatmul.mubr.msk.bf16.gmra.mrb[4].mxu0 %vm33_vm1, %v16010_v52  ;;  %v2376_v52 = vld [vmem:[#allocation2 + $0x1c9] sm:$0xff] }
 0x1ca   :  { %13333 = vmatprep.mubr.msk.bf16.mxu0 %vm33_vm1, %v16016_v57  ;;  %v2377_v57 = vld [vmem:[#allocation2 + $0x1d1] sm:$0xff] }
 0x1d1   :  { %13334 = vmatmul.mubr.msk.bf16.gmra.mrb[8].mxu0 %vm33_vm1, %v16018_v58  ;;  %v16310_v58 = vpack.c.bf16 %v2377_v57, %v2376_v52  ;;  %v2364_v52 = vld [vmem:[#allocation2 + $0x109] sm:$0xff]  ;;  %v2365_v57 = vld [vmem:[#allocation2 + $0x111] sm:$0xff] }
 0x1d2   :  { %13337 = vmatprep.mubr.msk.bf16.mxu0 %vm33_vm1, %v16024_v63  ;;  %v1856_v63 = vld [vmem:[#allocation2 + $0x330] sm:$0xff] }
 0x1d3   :  { %13753 = vmatprep.mubr.msk.bf16.mxu1 %vm33_vm1, %v16310_v58 }
 0x1d9   :  { %13338 = vmatmul.mubr.msk.bf16.gmra.mrb[12].mxu0 %vm33_vm1, %v16026_v0  ;;  %v1857_v0 = vld [vmem:[#allocation2 + $0x338] sm:$0xff] }
 0x1da   :  { %13341 = vmatprep.mubr.msk.bf16.mxu0 %vm33_vm1, %v16032_v6  ;;  %v2344_v6 = vld [vmem:[#allocation2 + $0x19] sm:$0xff] }
 0x1e1   :  { %13342 = vmatmul.mubr.msk.bf16.gmra.mrb[16].mxu0 %vm33_vm1, %v16034_v7  ;;  %v2345_v7 = vld [vmem:[#allocation2 + $0x21] sm:$0xff] }
 0x1e2   :  { %13345 = vmatprep.mubr.msk.bf16.mxu0 %vm33_vm1, %v16040_v12  ;;  %v16342_v12 = vpack.c.bf16 %v1857_v0, %v1856_v63  ;;  %v16390_v63 = vpack.c.bf16 %v2363_v45, %v2362_v44  ;;  %v16392_v0 = vpack.c.bf16 %v2365_v57, %v2364_v52  ;;  %v16420_v44 = vpack.c.bf16 %v2379_v26, %v2378_v21  ;;  %v2382_v52 = vld [vmem:[#allocation2 + $0x211] sm:$0xff]  ;;  %v2383_v57 = vld [vmem:[#allocation2 + $0x219] sm:$0xff]  ;;  %v2392_v26 = vld [vmem:[#allocation2 + $0x289] sm:$0xff] }
 0x1e3   :  { %v2391_v21 = vld [vmem:[#allocation2 + $0x279] sm:$0xff] }
 0x1e9   :  { %13346 = vmatmul.mubr.msk.bf16.gmra.mrb[20].mxu0 %vm33_vm1, %v16042_v13  ;;  %v16344_v13 = vpack.c.bf16 %v2345_v7, %v2344_v6  ;;  %v2366_v6 = vld [vmem:[#allocation2 + $0x121] sm:$0xff]  ;;  %v2367_v7 = vld [vmem:[#allocation2 + $0x129] sm:$0xff] }
 0x1ea   :  { %13349 = vmatprep.mubr.msk.bf16.mxu0 %vm33_vm1, %v16048_v18  ;;  %v2346_v18 = vld [vmem:[#allocation2 + $0x31] sm:$0xff] }
 0x1eb   :  { %21038 = vst [vmem:[#allocation8_spill] sm:$0xff] %v16344_v13 }
 0x1f1   :  { %13350 = vmatmul.mubr.msk.bf16.gmra.mrb[24].mxu0 %vm33_vm1, %v16050_v19  ;;  %v2347_v19 = vld [vmem:[#allocation2 + $0x39] sm:$0xff] }
 0x1f2   :  { %13353 = vmatprep.mubr.msk.bf16.mxu0 %vm33_vm1, %v16056_v24  ;;  %v2348_v24 = vld [vmem:[#allocation2 + $0x49] sm:$0xff] }
 0x1f9   :  { %13354 = vmatmul.mubr.msk.bf16.gmra.mrb[28].mxu0 %vm33_vm1, %v16304_v33 }
 0x1fa   :  { %13357 = vmatprep.mubr.msk.bf16.mxu0 %vm33_vm1, %v16061_v30  ;;  %v2349_v30 = vld [vmem:[#allocation2 + $0x51] sm:$0xff] }
 0x201   :  { %13358 = vmatmul.mubr.msk.bf16.gmra.mrb[32].mxu0 %vm33_vm1, %v16063_v31  ;;  %v16350_v31 = vpack.c.bf16 %v2347_v19, %v2346_v18  ;;  %v2368_v18 = vld [vmem:[#allocation2 + $0x139] sm:$0xff]  ;;  %v2369_v19 = vld [vmem:[#allocation2 + $0x141] sm:$0xff] }
 0x202   :  { %13361 = vmatprep.mubr.msk.bf16.mxu0 %vm33_vm1, %v16069_v37  ;;  %v16352_v37 = vpack.c.bf16 %v2349_v30, %v2348_v24  ;;  %v16398_v24 = vpack.c.bf16 %v2367_v7, %v2366_v6  ;;  %v16400_v30 = vpack.c.bf16 %v2369_v19, %v2368_v18  ;;  %v2384_v6 = vld [vmem:[#allocation2 + $0x229] sm:$0xff]  ;;  %v2385_v7 = vld [vmem:[#allocation2 + $0x231] sm:$0xff]  ;;  %v16428_v18 = vpack.c.bf16 %v2383_v57, %v2382_v52  ;;  %v2386_v19 = vld [vmem:[#allocation2 + $0x241] sm:$0xff] }
 0x203   :  { %v2394_v57 = vld [vmem:[#allocation2 + $0x2a1] sm:$0xff] }
 0x209   :  { %13362 = vmatmul.mubr.msk.bf16.gmra.mrb[36].mxu0 %vm33_vm1, %v16071_v38  ;;  %v3089_v38 = vsel %vm563_vm0, %v12037_v3, 0  ;;  %v16384_v3 = vpack.c.bf16 %v2361_v40, %v2360_v27  ;;  %v2380_v27 = vld [vmem:[#allocation2 + $0x1f9] sm:$0xff]  ;;  %v2381_v40 = vld [vmem:[#allocation2 + $0x201] sm:$0xff] }
 0x20a   :  { %13365 = vmatprep.mubr.msk.bf16.mxu0 %vm33_vm1, %v16077_v43  ;;  %v16358_v43 = vld [vmem:[%s20920_s1 + $0xc] sm:$0x3]  ;;  %v16422_v45 = vpack.c.bf16 %v2381_v40, %v2380_v27  ;;  %v2393_v27 = vld [vmem:[#allocation2 + $0x291] sm:$0xff] }
 0x20b   :  { %v16446_v52 = vpack.c.bf16 %v2393_v27, %v2392_v26  ;;  %v2401_v26 = vld [vmem:[#allocation2 + $0x2f1] sm:$0xff] }
 0x211   :  { %13366 = vmatmul.mubr.msk.bf16.gmra.mrb[40].mxu0 %vm33_vm1, %v16079_v46  ;;  %v2350_v46 = vld [vmem:[#allocation2 + $0x61] sm:$0xff] }
 0x212   :  { %13369 = vmatprep.mubr.msk.bf16.mxu0 %vm33_vm1, %v16085_v53  ;;  %v2351_v53 = vld [vmem:[#allocation2 + $0x69] sm:$0xff] }
 0x219   :  { %13370 = vmatmul.mubr.msk.bf16.gmra.mrb[44].mxu0 %vm33_vm1, %v16087_v54  ;;  %v2352_v54 = vld [vmem:[#allocation2 + $0x79] sm:$0xff] }
 0x21a   :  { %13373 = vmatprep.mubr.msk.bf16.mxu0 %vm33_vm1, %v16093_v61  ;;  %v2353_v61 = vld [vmem:[#allocation2 + $0x81] sm:$0xff] }
 0x221   :  { %13374 = vmatmul.mubr.msk.bf16.gmra.mrb[48].mxu0 %vm33_vm1, %v16095_v62  ;;  %v16366_v62 = vpack.c.bf16 %v2351_v53, %v2350_v46  ;;  %v2371_v46 = vld [vmem:[#allocation2 + $0x159] sm:$0xff]  ;;  %v2372_v53 = vld [vmem:[#allocation2 + $0x169] sm:$0xff] }
 0x222   :  { %13377 = vmatprep.mubr.msk.bf16.mxu0 %vm33_vm1, %v16101_v8  ;;  %v16368_v8 = vpack.c.bf16 %v2353_v61, %v2352_v54  ;;  %v2373_v54 = vld [vmem:[#allocation2 + $0x171] sm:$0xff] }
 0x229   :  { %13378 = vmatmul.mubr.msk.bf16.gmra.mrb[52].mxu0 %vm33_vm1, %v16103_v9  ;;  %v2354_v9 = vld [vmem:[#allocation2 + $0x91] sm:$0xff] }
 0x22a   :  { %13381 = vmatprep.mubr.msk.bf16.mxu0 %vm33_vm1, %v16109_v16  ;;  %v2355_v16 = vld [vmem:[#allocation2 + $0x99] sm:$0xff] }
 0x22b   :  { %v16374_v39 = vpack.c.bf16 %v2355_v16, %v2354_v9  ;;  %v16408_v9 = vpack.c.bf16 %v2373_v54, %v2372_v53  ;;  %v2374_v16 = vld [vmem:[#allocation2 + $0x181] sm:$0xff] }
 0x22c   :  { %v2389_v53 = vld [vmem:[#allocation2 + $0x261] sm:$0xff] }
 0x231   :  { %13382 = vmatmul.mubr.msk.bf16.gmra.mrb[56].mxu0 %vm33_vm1, %v16111_v17  ;;  %v2356_v17 = vld [vmem:[#allocation2 + $0xa9] sm:$0xff] }
 0x232   :  { %13385 = vmatprep.mubr.msk.bf16.mxu0 %vm33_vm1, %v16117_v25  ;;  %v2357_v25 = vld [vmem:[#allocation2 + $0xb1] sm:$0xff] }
 0x233   :  { %v16376_v4 = vpack.c.bf16 %v2357_v25, %v2356_v17  ;;  %v2375_v17 = vld [vmem:[#allocation2 + $0x189] sm:$0xff] }
 0x234   :  { %v16414_v25 = vpack.c.bf16 %v2375_v17, %v2374_v16  ;;  %v2390_v17 = vld [vmem:[#allocation2 + $0x271] sm:$0xff] }
 0x235   :  { %v16444_v40 = vpack.c.bf16 %v2391_v21, %v2390_v17  ;;  %v2399_v17 = vld [vmem:[#allocation2 + $0x2d9] sm:$0xff]  ;;  %v2400_v21 = vld [vmem:[#allocation2 + $0x2e9] sm:$0xff] }
 0x239   :  { %13386 = vmatmul.mubr.msk.bf16.gmra.mrb[60].mxu0 %vm33_vm1, %v16342_v12 }
 0x23a   :  { %13391 = vmatprep.mubr.msk.bf16.mxu0 %vm33_vm1, %v16344_v13  ;;  %v16462_v13 = vpack.c.bf16 %v2401_v26, %v2400_v21  ;;  %v3640_v26 = vsel %vm563_vm0, %v16358_v43, 0 }
 0x241   :  { %13392 = vmatmul.mubr.msk.bf16.vlgmr.msra.gmra.mrb[0].mxu0 %vm33_vm1, %v16350_v31 }
 0x242   :  { %13456 = vmatpush3.bf16.msra.mxu0 %v3089_v38  ;;  %13395 = vmatprep.mubr.msk.bf16.mxu0 %vm33_vm1, %v16352_v37  ;;  %v2370_v38 = vld [vmem:[#allocation2 + $0x151] sm:$0xff] }
 0x243   :  { %15411 = vmatprep.subr.msk.bf16.mxu0 %vm563_vm0, %v16358_v43  ;;  %v16406_v61 = vpack.c.bf16 %v2371_v46, %v2370_v38  ;;  %v2387_v38 = vld [vmem:[#allocation2 + $0x249] sm:$0xff]  ;;  %v2388_v46 = vld [vmem:[#allocation2 + $0x259] sm:$0xff] }
 0x244   :  { %v16436_v54 = vpack.c.bf16 %v2387_v38, %v2386_v19  ;;  %v16438_v16 = vpack.c.bf16 %v2389_v53, %v2388_v46  ;;  %v2397_v19 = vld [vmem:[#allocation2 + $0x2c1] sm:$0xff]  ;;  %v2398_v53 = vld [vmem:[#allocation2 + $0x2d1] sm:$0xff] }
 0x245   :  { %v16460_v27 = vpack.c.bf16 %v2399_v17, %v2398_v53  ;;  %v2406_v53 = vld [vmem:[#allocation2 + $0x331] sm:$0xff]  ;;  %v2407_v17 = vld [vmem:[#allocation2 + $0x339] sm:$0xff] }
 0x246   :  { %v16476_v21 = vpack.c.bf16 %v2407_v17, %v2406_v53  ;;  %v3458_v53 = vld [vmem:[#allocation2 + $0xc8] sm:$0xff] }
 0x249   :  { %13396 = vmatmul.mubr.msk.bf16.gmra.mrb[4].mxu0 %vm33_vm1, %v16366_v62 }
 0x24a   :  { %13399 = vmatprep.mubr.msk.bf16.mxu0 %vm33_vm1, %v16368_v8 }
 0x251   :  { %13400 = vmatmul.mubr.msk.bf16.gmra.mrb[8].mxu0 %vm33_vm1, %v16374_v39 }
 0x252   :  { %13403 = vmatprep.mubr.msk.bf16.mxu0 %vm33_vm1, %v16376_v4 }
 0x259   :  { %13404 = vmatmul.mubr.msk.bf16.gmra.mrb[12].mxu0 %vm33_vm1, %v16382_v2 }
 0x25a   :  { %13407 = vmatprep.mubr.msk.bf16.mxu0 %vm33_vm1, %v16384_v3 }
 0x261   :  { %13408 = vmatmul.mubr.msk.bf16.gmra.mrb[16].mxu0 %vm33_vm1, %v16390_v63 }
 0x262   :  { %13411 = vmatprep.mubr.msk.bf16.mxu0 %vm33_vm1, %v16392_v0 }
 0x269   :  { %13412 = vmatmul.mubr.msk.bf16.gmra.mrb[20].mxu0 %vm33_vm1, %v16398_v24 }
 0x26a   :  { %13415 = vmatprep.mubr.msk.bf16.mxu0 %vm33_vm1, %v16400_v30 }
 0x271   :  { %13416 = vmatmul.mubr.msk.bf16.gmra.mrb[24].mxu0 %vm33_vm1, %v16406_v61 }
 0x272   :  { %13419 = vmatprep.mubr.msk.bf16.mxu0 %vm33_vm1, %v16408_v9 }
 0x279   :  { %13420 = vmatmul.mubr.msk.bf16.gmra.mrb[28].mxu0 %vm33_vm1, %v16414_v25 }
 0x27a   :  { %13423 = vmatprep.mubr.msk.bf16.mxu0 %vm33_vm1, %v16310_v58  ;;  %v16430_v58 = vpack.c.bf16 %v2385_v7, %v2384_v6  ;;  %v2395_v6 = vld [vmem:[#allocation2 + $0x2a9] sm:$0xff]  ;;  %v2396_v7 = vld [vmem:[#allocation2 + $0x2b9] sm:$0xff] }
 0x27b   :  { %v16452_v38 = vpack.c.bf16 %v2395_v6, %v2394_v57  ;;  %v16454_v46 = vpack.c.bf16 %v2397_v19, %v2396_v7  ;;  %v2402_v57 = vld [vmem:[#allocation2 + $0x301] sm:$0xff]  ;;  %v2403_v6 = vld [vmem:[#allocation2 + $0x309] sm:$0xff]  ;;  %v2404_v7 = vld [vmem:[#allocation2 + $0x319] sm:$0xff] }
 0x27c   :  { %v2405_v19 = vld [vmem:[#allocation2 + $0x321] sm:$0xff] }
 0x27d   :  { %21039 = vst [vmem:[#allocation9_spill] sm:$0xff] %v16452_v38  ;;  %21040 = vst [vmem:[#allocation10_spill] sm:$0xff] %v16454_v46 }
 0x281   :  { %13424 = vmatmul.mubr.msk.bf16.gmra.mrb[32].mxu0 %vm33_vm1, %v16420_v44 }
 0x282   :  { %13427 = vmatprep.mubr.msk.bf16.mxu0 %vm33_vm1, %v16422_v45 }
 0x289   :  { %13428 = vmatmul.mubr.msk.bf16.gmra.mrb[36].mxu0 %vm33_vm1, %v16428_v18 }
 0x28a   :  { %13431 = vmatprep.mubr.msk.bf16.mxu0 %vm33_vm1, %v16430_v58 }
 0x291   :  { %13432 = vmatmul.mubr.msk.bf16.gmra.mrb[40].mxu0 %vm33_vm1, %v16436_v54 }
 0x292   :  { %13435 = vmatprep.mubr.msk.bf16.mxu0 %vm33_vm1, %v16438_v16 }
 0x299   :  { %13436 = vmatmul.mubr.msk.bf16.gmra.mrb[44].mxu0 %vm33_vm1, %v16444_v40 }
 0x29a   :  { %13439 = vmatprep.mubr.msk.bf16.mxu0 %vm33_vm1, %v16446_v52 }
 0x2a1   :  { %13440 = vmatmul.mubr.msk.bf16.gmra.mrb[48].mxu0 %vm33_vm1, %v16452_v38  ;;  %v16468_v38 = vpack.c.bf16 %v2403_v6, %v2402_v57  ;;  %v12103_v57 = vld [vmem:[%s20920_s1 + $0xe] sm:$0x3] }
 0x2a2   :  { %13443 = vmatprep.mubr.msk.bf16.mxu0 %vm33_vm1, %v16454_v46  ;;  %v16470_v46 = vpack.c.bf16 %v2405_v19, %v2404_v7  ;;  %v3455_v6 = vld [vmem:[#allocation2 + $0xa8] sm:$0xff]  ;;  %v3456_v7 = vld [vmem:[#allocation2 + $0xb0] sm:$0xff]  ;;  %v3457_v19 = vld [vmem:[#allocation2 + $0xc0] sm:$0xff] }
 0x2a3   :  { %v3514_v17 = vpack.c.bf16 %v3456_v7, %v3455_v6 }
 0x2a9   :  { %13444 = vmatmul.mubr.msk.bf16.gmra.mrb[52].mxu0 %vm33_vm1, %v16460_v27 }
 0x2aa   :  { %13447 = vmatprep.mubr.msk.bf16.mxu0 %vm33_vm1, %v16462_v13 }
 0x2b1   :  { %13448 = vmatmul.mubr.msk.bf16.gmra.mrb[56].mxu0 %vm33_vm1, %v16468_v38 }
 0x2b2   :  { %13451 = vmatprep.mubr.msk.bf16.mxu0 %vm33_vm1, %v16470_v46 }
 0x2b9   :  { %13452 = vmatmul.mubr.msk.bf16.gmra.mrb[60].mxu0 %vm33_vm1, %v16476_v21 }
 0x2ba   :  { %13457 = vmatprep.mubr.msk.bf16.mxu0 %vm33_vm1, %v16122_v34  ;;  %v2924_v34 = vld [vmem:[#allocation2 + $0x182] sm:$0xff] }
 0x2c1   :  { %13458 = vmatmul.mubr.msk.bf16.vlgmr.msra.gmra.mrb[0].mxu0 %vm33_vm1, %v16124_v35  ;;  %v2925_v35 = vld [vmem:[#allocation2 + $0x18a] sm:$0xff] }
 0x2c2   :  { %13522 = vmatpush3.bf16.msra.mxu0 %v3640_v26  ;;  %13461 = vmatprep.mubr.msk.bf16.mxu0 %vm33_vm1, %v16139_v47  ;;  %v16516_v47 = vpack.c.bf16 %v2925_v35, %v2924_v34  ;;  %v3515_v26 = vpack.c.bf16 %v3458_v53, %v3457_v19  ;;  %v3460_v34 = vld [vmem:[#allocation2 + $0xe0] sm:$0xff]  ;;  %v3461_v35 = vld [vmem:[#allocation2 + $0xf0] sm:$0xff]  ;;  %v3479_v19 = vld [vmem:[#allocation2 + $0x1f8] sm:$0xff] }
 0x2c3   :  { %15412 = vmatprep.subr.msk.bf16.mxu0 %vm563_vm0, %v12103_v57  ;;  %v3480_v53 = vld [vmem:[#allocation2 + $0x200] sm:$0xff] }
 0x2c9   :  { %13462 = vmatmul.mubr.msk.bf16.gmra.mrb[4].mxu0 %vm33_vm1, %v16141_v49  ;;  %v21041_v49 = vld [vmem:[#allocation4_spill] sm:$0xff] }
 0x2ca   :  { %13465 = vmatprep.mubr.msk.bf16.mxu0 %vm33_vm1, %v16147_v59  ;;  %v21042_v59 = vld [vmem:[#allocation5_spill] sm:$0xff] }
 0x2d1   :  { %13466 = vmatmul.mubr.msk.bf16.gmra.mrb[8].mxu0 %vm33_vm1, %v16149_v60  ;;  %v21043_v60 = vld [vmem:[#allocation6_spill] sm:$0xff] }
 0x2d2   :  { %13469 = vmatprep.mubr.msk.bf16.mxu0 %vm33_vm1, %v16155_v10  ;;  %v21044_v10 = vld [vmem:[#allocation7_spill] sm:$0xff] }
 0x2d9   :  { %13470 = vmatmul.mubr.msk.bf16.gmra.mrb[12].mxu0 %vm33_vm1, %v16157_v11  ;;  %v2956_v11 = vld [vmem:[#allocation2 + $0x332] sm:$0xff] }
 0x2da   :  { %13473 = vmatprep.mubr.msk.bf16.mxu0 %vm33_vm1, %v16163_v22  ;;  %v2957_v22 = vld [vmem:[#allocation2 + $0x33a] sm:$0xff] }
 0x2e1   :  { %13474 = vmatmul.mubr.msk.bf16.gmra.mrb[16].mxu0 %vm33_vm1, %v16165_v23  ;;  %v3445_v23 = vld [vmem:[#allocation2 + $0x30] sm:$0xff] }
 0x2e2   :  { %13477 = vmatprep.mubr.msk.bf16.mxu0 %vm33_vm1, %v16171_v32  ;;  %v3446_v32 = vld [vmem:[#allocation2 + $0x38] sm:$0xff] }
 0x2e9   :  { %13478 = vmatmul.mubr.msk.bf16.gmra.mrb[20].mxu0 %vm33_vm1, %v16173_v36  ;;  %v16550_v36 = vpack.c.bf16 %v2957_v22, %v2956_v11  ;;  %v3464_v11 = vld [vmem:[#allocation2 + $0x110] sm:$0xff]  ;;  %v3465_v22 = vld [vmem:[#allocation2 + $0x120] sm:$0xff] }
 0x2ea   :  { %13481 = vmatprep.mubr.msk.bf16.mxu0 %vm33_vm1, %v16179_v50  ;;  %v3509_v50 = vpack.c.bf16 %v3446_v32, %v3445_v23  ;;  %v3466_v23 = vld [vmem:[#allocation2 + $0x128] sm:$0xff] }
 0x2f1   :  { %13482 = vmatmul.mubr.msk.bf16.gmra.mrb[24].mxu0 %vm33_vm1, %v16181_v51  ;;  %v3447_v51 = vld [vmem:[#allocation2 + $0x48] sm:$0xff] }
 0x2f2   :  { %13485 = vmatprep.mubr.msk.bf16.mxu0 %vm33_vm1, %v16195_v14  ;;  %v3448_v14 = vld [vmem:[#allocation2 + $0x50] sm:$0xff] }
 0x2f9   :  { %13486 = vmatmul.mubr.msk.bf16.gmra.mrb[28].mxu0 %vm33_vm1, %v16516_v47 }
 0x2fa   :  { %13489 = vmatprep.mubr.msk.bf16.mxu0 %vm33_vm1, %v16200_v28  ;;  %v3449_v28 = vld [vmem:[#allocation2 + $0x60] sm:$0xff] }
 0x301   :  { %13490 = vmatmul.mubr.msk.bf16.gmra.mrb[32].mxu0 %vm33_vm1, %v16202_v29  ;;  %v3450_v29 = vld [vmem:[#allocation2 + $0x68] sm:$0xff] }
 0x302   :  { %13493 = vmatprep.mubr.msk.bf16.mxu0 %vm33_vm1, %v16208_v55  ;;  %v3511_v55 = vpack.c.bf16 %v3450_v29, %v3449_v28  ;;  %v3469_v28 = vld [vmem:[#allocation2 + $0x150] sm:$0xff]  ;;  %v3470_v29 = vld [vmem:[#allocation2 + $0x158] sm:$0xff] }
 0x309   :  { %13494 = vmatmul.mubr.msk.bf16.gmra.mrb[36].mxu0 %vm33_vm1, %v16210_v56  ;;  %v4190_v56 = vsel %vm563_vm0, %v12103_v57, 0  ;;  %v3459_v57 = vld [vmem:[#allocation2 + $0xd8] sm:$0xff] }
 0x30a   :  { %13497 = vmatprep.mubr.msk.bf16.mxu0 %vm33_vm1, %v16216_v15  ;;  %v16559_v15 = vld [vmem:[%s20920_s1 + $0x10] sm:$0x3] }
 0x311   :  { %13498 = vmatmul.mubr.msk.bf16.gmra.mrb[40].mxu0 %vm33_vm1, %v16218_v20  ;;  %v3451_v20 = vld [vmem:[#allocation2 + $0x78] sm:$0xff] }
 0x312   :  { %13501 = vmatprep.mubr.msk.bf16.mxu0 %vm33_vm1, %v21041_v49  ;;  %v3462_v49 = vld [vmem:[#allocation2 + $0xf8] sm:$0xff] }
 0x319   :  { %13502 = vmatmul.mubr.msk.bf16.gmra.mrb[44].mxu0 %vm33_vm1, %v21042_v59  ;;  %v3516_v59 = vpack.c.bf16 %v3460_v34, %v3459_v57  ;;  %v3526_v57 = vpack.c.bf16 %v3480_v53, %v3479_v19  ;;  %v3501_v19 = vld [vmem:[#allocation2 + $0x300] sm:$0xff]  ;;  %v3502_v53 = vld [vmem:[#allocation2 + $0x308] sm:$0xff] }
 0x31a   :  { %13505 = vmatprep.mubr.msk.bf16.mxu0 %vm33_vm1, %v21043_v60  ;;  %v3517_v60 = vpack.c.bf16 %v3462_v49, %v3461_v35  ;;  %v3484_v35 = vld [vmem:[#allocation2 + $0x230] sm:$0xff]  ;;  %v3485_v49 = vld [vmem:[#allocation2 + $0x240] sm:$0xff] }
 0x321   :  { %13506 = vmatmul.mubr.msk.bf16.gmra.mrb[48].mxu0 %vm33_vm1, %v21044_v10  ;;  %v3463_v10 = vld [vmem:[#allocation2 + $0x108] sm:$0xff] }
 0x322   :  { %13509 = vmatprep.mubr.msk.bf16.mxu0 %vm33_vm1, %v16240_v41  ;;  %v3452_v41 = vld [vmem:[#allocation2 + $0x80] sm:$0xff]  ;;  %v3518_v32 = vpack.c.bf16 %v3464_v11, %v3463_v10  ;;  %v3487_v11 = vld [vmem:[#allocation2 + $0x258] sm:$0xff] }
 0x329   :  { %13510 = vmatmul.mubr.msk.bf16.gmra.mrb[52].mxu0 %vm33_vm1, %v16242_v42  ;;  %v3453_v42 = vld [vmem:[#allocation2 + $0x90] sm:$0xff] }
 0x32a   :  { %13513 = vmatprep.mubr.msk.bf16.mxu0 %vm33_vm1, %v16248_v5  ;;  %v3454_v5 = vld [vmem:[#allocation2 + $0x98] sm:$0xff] }
 0x32b   :  { %v3513_v43 = vpack.c.bf16 %v3454_v5, %v3453_v42  ;;  %v3475_v42 = vld [vmem:[#allocation2 + $0x198] sm:$0xff]  ;;  %v3476_v5 = vld [vmem:[#allocation2 + $0x1a0] sm:$0xff] }
 0x32c   :  { %v3524_v6 = vpack.c.bf16 %v3476_v5, %v3475_v42  ;;  %v3497_v42 = vld [vmem:[#allocation2 + $0x2d0] sm:$0xff]  ;;  %v3498_v5 = vld [vmem:[#allocation2 + $0x2d8] sm:$0xff] }
 0x331   :  { %13514 = vmatmul.mubr.msk.bf16.gmra.mrb[56].mxu0 %vm33_vm1, %v16250_v1  ;;  %v3510_v1 = vpack.c.bf16 %v3448_v14, %v3447_v51  ;;  %v3467_v51 = vld [vmem:[#allocation2 + $0x138] sm:$0xff]  ;;  %v3468_v14 = vld [vmem:[#allocation2 + $0x140] sm:$0xff] }
 0x332   :  { %13517 = vmatprep.mubr.msk.bf16.mxu0 %vm33_vm1, %v16264_v48  ;;  %v3512_v48 = vpack.c.bf16 %v3452_v41, %v3451_v20  ;;  %v3472_v20 = vld [vmem:[#allocation2 + $0x170] sm:$0xff] }
 0x339   :  { %13518 = vmatmul.mubr.msk.bf16.gmra.mrb[60].mxu0 %vm33_vm1, %v16550_v36 }
 0x33a   :  { %13523 = vmatprep.mubr.msk.bf16.mxu0 %vm33_vm1, %v3509_v50  ;;  %v3519_v50 = vpack.c.bf16 %v3466_v23, %v3465_v22  ;;  %v3488_v22 = vld [vmem:[#allocation2 + $0x260] sm:$0xff]  ;;  %v3489_v23 = vld [vmem:[#allocation2 + $0x270] sm:$0xff] }
 0x341   :  { %13524 = vmatmul.mubr.msk.bf16.vlgmr.msra.gmra.mrb[0].mxu0 %vm33_vm1, %v3510_v1  ;;  %v3520_v1 = vpack.c.bf16 %v3468_v14, %v3467_v51  ;;  %v3491_v14 = vld [vmem:[#allocation2 + $0x288] sm:$0xff] }
 0x342   :  { %13588 = vmatpush3.bf16.msra.mxu0 %v4190_v56  ;;  %13527 = vmatprep.mubr.msk.bf16.mxu0 %vm33_vm1, %v3511_v55  ;;  %v3521_v55 = vpack.c.bf16 %v3470_v29, %v3469_v28  ;;  %v3471_v56 = vld [vmem:[#allocation2 + $0x168] sm:$0xff]  ;;  %v3492_v28 = vld [vmem:[#allocation2 + $0x290] sm:$0xff]  ;;  %v3493_v29 = vld [vmem:[#allocation2 + $0x2a0] sm:$0xff] }
 0x343   :  { %15413 = vmatprep.subr.msk.bf16.mxu0 %vm563_vm0, %v16559_v15  ;;  %v3522_v41 = vpack.c.bf16 %v3472_v20, %v3471_v56  ;;  %v3495_v20 = vld [vmem:[#allocation2 + $0x2b8] sm:$0xff] }
 0x349   :  { %13528 = vmatmul.mubr.msk.bf16.gmra.mrb[4].mxu0 %vm33_vm1, %v3512_v48  ;;  %v3477_v48 = vld [vmem:[#allocation2 + $0x1e0] sm:$0xff] }
 0x34a   :  { %13531 = vmatprep.mubr.msk.bf16.mxu0 %vm33_vm1, %v3513_v43  ;;  %v3478_v43 = vld [vmem:[#allocation2 + $0x1e8] sm:$0xff] }
 0x34b   :  { %v3525_v7 = vpack.c.bf16 %v3478_v43, %v3477_v48  ;;  %v3535_v43 = vpack.c.bf16 %v3498_v5, %v3497_v42  ;;  %v4551_v42 = vld [vmem:[#allocation2 + $0x7a] sm:$0xff]  ;;  %v4552_v5 = vld [vmem:[#allocation2 + $0x82] sm:$0xff] }
 0x351   :  { %13532 = vmatmul.mubr.msk.bf16.gmra.mrb[8].mxu0 %vm33_vm1, %v3514_v17  ;;  %v3481_v17 = vld [vmem:[#allocation2 + $0x210] sm:$0xff] }
 0x352   :  { %13535 = vmatprep.mubr.msk.bf16.mxu0 %vm33_vm1, %v3515_v26  ;;  %v3482_v26 = vld [vmem:[#allocation2 + $0x218] sm:$0xff] }
 0x353   :  { %v3527_v34 = vpack.c.bf16 %v3482_v26, %v3481_v17  ;;  %v3537_v26 = vpack.c.bf16 %v3502_v53, %v3501_v19  ;;  %v4555_v19 = vld [vmem:[#allocation2 + $0xaa] sm:$0xff]  ;;  %v4556_v53 = vld [vmem:[#allocation2 + $0xb2] sm:$0xff] }
 0x359   :  { %13536 = vmatmul.mubr.msk.bf16.gmra.mrb[12].mxu0 %vm33_vm1, %v3516_v59  ;;  %v3486_v59 = vld [vmem:[#allocation2 + $0x248] sm:$0xff] }
 0x35a   :  { %13539 = vmatprep.mubr.msk.bf16.mxu0 %vm33_vm1, %v3517_v60  ;;  %v3529_v10 = vpack.c.bf16 %v3486_v59, %v3485_v49  ;;  %v3508_v49 = vld [vmem:[#allocation2 + $0x350] sm:$0xff] }
 0x361   :  { %13540 = vmatmul.mubr.msk.bf16.gmra.mrb[16].mxu0 %vm33_vm1, %v3518_v32  ;;  %v3490_v32 = vld [vmem:[#allocation2 + $0x278] sm:$0xff] }
 0x362   :  { %13543 = vmatprep.mubr.msk.bf16.mxu0 %vm33_vm1, %v3519_v50  ;;  %v3530_v50 = vpack.c.bf16 %v3488_v22, %v3487_v11  ;;  %v3531_v51 = vpack.c.bf16 %v3490_v32, %v3489_v23  ;;  %v21045_v11 = vld [vmem:[#allocation9_spill] sm:$0xff]  ;;  %v21046_v22 = vld [vmem:[#allocation10_spill] sm:$0xff] }
 0x363   :  { %v4057_v23 = vld [vmem:[#allocation2 + $0x349] sm:$0xff]  ;;  %v4058_v32 = vld [vmem:[#allocation2 + $0x351] sm:$0xff] }
 0x369   :  { %13544 = vmatmul.mubr.msk.bf16.gmra.mrb[20].mxu0 %vm33_vm1, %v3520_v1  ;;  %v3494_v1 = vld [vmem:[#allocation2 + $0x2a8] sm:$0xff] }
 0x36a   :  { %13547 = vmatprep.mubr.msk.bf16.mxu0 %vm33_vm1, %v3521_v55  ;;  %v3532_v55 = vpack.c.bf16 %v3492_v28, %v3491_v14  ;;  %v3533_v56 = vpack.c.bf16 %v3494_v1, %v3493_v29  ;;  %v4090_v14 = vpack.c.bf16 %v4058_v32, %v4057_v23  ;;  %v4547_v29 = vld [vmem:[#allocation2 + $0x4a] sm:$0xff]  ;;  %v4548_v1 = vld [vmem:[#allocation2 + $0x52] sm:$0xff]  ;;  %v4565_v23 = vld [vmem:[#allocation2 + $0x122] sm:$0xff] }
 0x36b   :  { %v4566_v32 = vld [vmem:[#allocation2 + $0x12a] sm:$0xff] }
 0x371   :  { %13548 = vmatmul.mubr.msk.bf16.gmra.mrb[24].mxu0 %vm33_vm1, %v3522_v41  ;;  %v3496_v41 = vld [vmem:[#allocation2 + $0x2c0] sm:$0xff] }
 0x372   :  { %13551 = vmatprep.mubr.msk.bf16.mxu0 %vm33_vm1, %v16304_v33  ;;  %v3483_v33 = vld [vmem:[#allocation2 + $0x228] sm:$0xff]  ;;  %v3534_v48 = vpack.c.bf16 %v3496_v41, %v3495_v20  ;;  %v4610_v20 = vpack.c.bf16 %v4548_v1, %v4547_v29  ;;  %v4569_v29 = vld [vmem:[#allocation2 + $0x152] sm:$0xff]  ;;  %v4570_v1 = vld [vmem:[#allocation2 + $0x15a] sm:$0xff] }
 0x373   :  { %v3528_v60 = vpack.c.bf16 %v3484_v35, %v3483_v33  ;;  %v3507_v35 = vld [vmem:[#allocation2 + $0x348] sm:$0xff] }
 0x374   :  { %v3540_v59 = vpack.c.bf16 %v3508_v49, %v3507_v35  ;;  %v4560_v35 = vld [vmem:[#allocation2 + $0xe2] sm:$0xff]  ;;  %v4561_v49 = vld [vmem:[#allocation2 + $0xf2] sm:$0xff] }
 0x379   :  { %13552 = vmatmul.mubr.msk.bf16.gmra.mrb[28].mxu0 %vm33_vm1, %v3524_v6  ;;  %v3499_v6 = vld [vmem:[#allocation2 + $0x2e8] sm:$0xff] }
 0x37a   :  { %13555 = vmatprep.mubr.msk.bf16.mxu0 %vm33_vm1, %v3525_v7  ;;  %v3500_v7 = vld [vmem:[#allocation2 + $0x2f0] sm:$0xff] }
 0x37b   :  { %v3536_v17 = vpack.c.bf16 %v3500_v7, %v3499_v6  ;;  %v4612_v6 = vpack.c.bf16 %v4552_v5, %v4551_v42  ;;  %v4575_v5 = vld [vmem:[#allocation2 + $0x19a] sm:$0xff] }
 0x381   :  { %13556 = vmatmul.mubr.msk.bf16.gmra.mrb[32].mxu0 %vm33_vm1, %v3526_v57  ;;  %v3503_v57 = vld [vmem:[#allocation2 + $0x318] sm:$0xff] }
 0x382   :  { %13559 = vmatprep.mubr.msk.bf16.mxu0 %vm33_vm1, %v3527_v34  ;;  %v3504_v34 = vld [vmem:[#allocation2 + $0x320] sm:$0xff] }
 0x383   :  { %v3538_v33 = vpack.c.bf16 %v3504_v34, %v3503_v57  ;;  %v4614_v57 = vpack.c.bf16 %v4556_v53, %v4555_v19  ;;  %v4579_v53 = vld [vmem:[#allocation2 + $0x1fa] sm:$0xff] }
 0x389   :  { %13560 = vmatmul.mubr.msk.bf16.gmra.mrb[36].mxu0 %vm33_vm1, %v3528_v60  ;;  %v4740_v60 = vsel %vm563_vm0, %v16559_v15, 0  ;;  %v4026_v15 = vld [vmem:[#allocation2 + $0x1a1] sm:$0xff] }
 0x38a   :  { %13563 = vmatprep.mubr.msk.bf16.mxu0 %vm33_vm1, %v3529_v10 }
 0x391   :  { %13564 = vmatmul.mubr.msk.bf16.gmra.mrb[40].mxu0 %vm33_vm1, %v3530_v50  ;;  %v4545_v50 = vld [vmem:[#allocation2 + $0x32] sm:$0xff] }
 0x392   :  { %13567 = vmatprep.mubr.msk.bf16.mxu0 %vm33_vm1, %v3531_v51  ;;  %v4546_v51 = vld [vmem:[#allocation2 + $0x3a] sm:$0xff] }
 0x393   :  { %v4609_v28 = vpack.c.bf16 %v4546_v51, %v4545_v50  ;;  %v4619_v51 = vpack.c.bf16 %v4566_v32, %v4565_v23  ;;  %v4589_v23 = vld [vmem:[#allocation2 + $0x272] sm:$0xff]  ;;  %v4590_v32 = vld [vmem:[#allocation2 + $0x27a] sm:$0xff] }
 0x399   :  { %13568 = vmatmul.mubr.msk.bf16.gmra.mrb[44].mxu0 %vm33_vm1, %v3532_v55  ;;  %v4549_v55 = vld [vmem:[#allocation2 + $0x62] sm:$0xff] }
 0x39a   :  { %13571 = vmatprep.mubr.msk.bf16.mxu0 %vm33_vm1, %v3533_v56  ;;  %v4550_v56 = vld [vmem:[#allocation2 + $0x6a] sm:$0xff] }
 0x39b   :  { %v4611_v41 = vpack.c.bf16 %v4550_v56, %v4549_v55  ;;  %v4621_v56 = vpack.c.bf16 %v4570_v1, %v4569_v29  ;;  %v16688_v29 = vld [vmem:[#allocation2 + $0x2a2] sm:$0xff]  ;;  %v16690_v1 = vld [vmem:[#allocation2 + $0x2aa] sm:$0xff] }
 0x3a1   :  { %13572 = vmatmul.mubr.msk.bf16.gmra.mrb[48].mxu0 %vm33_vm1, %v3534_v48  ;;  %v4553_v48 = vld [vmem:[#allocation2 + $0x92] sm:$0xff] }
 0x3a2   :  { %13575 = vmatprep.mubr.msk.bf16.mxu0 %vm33_vm1, %v3535_v43  ;;  %v4554_v43 = vld [vmem:[#allocation2 + $0x9a] sm:$0xff] }
 0x3a3   :  { %v4613_v7 = vpack.c.bf16 %v4554_v43, %v4553_v48  ;;  %v4576_v48 = vld [vmem:[#allocation2 + $0x1a2] sm:$0xff] }
 0x3a4   :  { %v4577_v43 = vld [vmem:[#allocation2 + $0x1e2] sm:$0xff] }
 0x3a9   :  { %13576 = vmatmul.mubr.msk.bf16.gmra.mrb[52].mxu0 %vm33_vm1, %v3536_v17  ;;  %v4557_v17 = vld [vmem:[#allocation2 + $0xc2] sm:$0xff] }
 0x3aa   :  { %13579 = vmatprep.mubr.msk.bf16.mxu0 %vm33_vm1, %v3537_v26  ;;  %v4558_v26 = vld [vmem:[#allocation2 + $0xca] sm:$0xff] }
 0x3ab   :  { %v4615_v34 = vpack.c.bf16 %v4558_v26, %v4557_v17  ;;  %v4580_v17 = vld [vmem:[#allocation2 + $0x202] sm:$0xff]  ;;  %v4581_v26 = vld [vmem:[#allocation2 + $0x212] sm:$0xff] }
 0x3b1   :  { %13580 = vmatmul.mubr.msk.bf16.gmra.mrb[56].mxu0 %vm33_vm1, %v3538_v33  ;;  %v4559_v33 = vld [vmem:[#allocation2 + $0xda] sm:$0xff] }
 0x3b2   :  { %13583 = vmatprep.mubr.msk.bf16.mxu0 %vm33_vm1, %v16342_v12  ;;  %v4025_v12 = vld [vmem:[#allocation2 + $0x199] sm:$0xff] }
 0x3b3   :  { %v4074_v10 = vpack.c.bf16 %v4026_v15, %v4025_v12  ;;  %v4563_v15 = vld [vmem:[#allocation2 + $0x10a] sm:$0xff] }
 0x3b9   :  { %13584 = vmatmul.mubr.msk.bf16.gmra.mrb[60].mxu0 %vm33_vm1, %v3540_v59  ;;  %v4562_v59 = vld [vmem:[#allocation2 + $0xfa] sm:$0xff] }
 0x3ba   :  { %13589 = vmatprep.mubr.msk.bf16.mxu0 %vm33_vm1, %v16350_v31  ;;  %v4617_v12 = vpack.c.bf16 %v4562_v59, %v4561_v49  ;;  %v4585_v49 = vld [vmem:[#allocation2 + $0x242] sm:$0xff]  ;;  %v4586_v59 = vld [vmem:[#allocation2 + $0x24a] sm:$0xff] }
 0x3c1   :  { %13590 = vmatmul.mubr.msk.bf16.vlgmr.msra.gmra.mrb[0].mxu0 %vm33_vm1, %v16352_v37 }
 0x3c2   :  { %13654 = vmatpush3.bf16.msra.mxu0 %v4740_v60  ;;  %13593 = vmatprep.mubr.msk.bf16.mxu0 %vm33_vm1, %v16366_v62  ;;  %v4616_v60 = vpack.c.bf16 %v4560_v35, %v4559_v33  ;;  %v4584_v35 = vld [vmem:[#allocation2 + $0x232] sm:$0xff] }
 0x3c9   :  { %13594 = vmatmul.mubr.msk.bf16.gmra.mrb[4].mxu0 %vm33_vm1, %v16368_v8 }
 0x3ca   :  { %13597 = vmatprep.mubr.msk.bf16.mxu0 %vm33_vm1, %v16374_v39 }
 0x3d1   :  { %13598 = vmatmul.mubr.msk.bf16.gmra.mrb[8].mxu0 %vm33_vm1, %v16376_v4 }
 0x3d2   :  { %13601 = vmatprep.mubr.msk.bf16.mxu0 %vm33_vm1, %v16382_v2 }
 0x3d9   :  { %13602 = vmatmul.mubr.msk.bf16.gmra.mrb[12].mxu0 %vm33_vm1, %v16384_v3 }
 0x3da   :  { %13605 = vmatprep.mubr.msk.bf16.mxu0 %vm33_vm1, %v16390_v63 }
 0x3e1   :  { %13606 = vmatmul.mubr.msk.bf16.gmra.mrb[16].mxu0 %vm33_vm1, %v16392_v0 }
 0x3e2   :  { %13609 = vmatprep.mubr.msk.bf16.mxu0 %vm33_vm1, %v16398_v24 }
 0x3e9   :  { %13610 = vmatmul.mubr.msk.bf16.gmra.mrb[20].mxu0 %vm33_vm1, %v16400_v30 }
 0x3ea   :  { %13613 = vmatprep.mubr.msk.bf16.mxu0 %vm33_vm1, %v16406_v61 }
 0x3f1   :  { %13614 = vmatmul.mubr.msk.bf16.gmra.mrb[24].mxu0 %vm33_vm1, %v16408_v9 }
 0x3f2   :  { %13617 = vmatprep.mubr.msk.bf16.mxu0 %vm33_vm1, %v16414_v25 }
 0x3f9   :  { %13618 = vmatmul.mubr.msk.bf16.gmra.mrb[28].mxu0 %vm33_vm1, %v4074_v10  ;;  %v4564_v10 = vld [vmem:[#allocation2 + $0x112] sm:$0xff] }
 0x3fa   :  { %13621 = vmatprep.mubr.msk.bf16.mxu0 %vm33_vm1, %v16420_v44  ;;  %v4618_v50 = vpack.c.bf16 %v4564_v10, %v4563_v15  ;;  %v4587_v15 = vld [vmem:[#allocation2 + $0x25a] sm:$0xff]  ;;  %v4588_v10 = vld [vmem:[#allocation2 + $0x262] sm:$0xff] }
 0x401   :  { %13622 = vmatmul.mubr.msk.bf16.gmra.mrb[32].mxu0 %vm33_vm1, %v16422_v45 }
 0x402   :  { %13625 = vmatprep.mubr.msk.bf16.mxu0 %vm33_vm1, %v16428_v18 }
 0x409   :  { %13626 = vmatmul.mubr.msk.bf16.gmra.mrb[36].mxu0 %vm33_vm1, %v16430_v58 }
 0x40a   :  { %13629 = vmatprep.mubr.msk.bf16.mxu0 %vm33_vm1, %v16436_v54 }
 0x411   :  { %13630 = vmatmul.mubr.msk.bf16.gmra.mrb[40].mxu0 %vm33_vm1, %v16438_v16 }
 0x412   :  { %13633 = vmatprep.mubr.msk.bf16.mxu0 %vm33_vm1, %v16444_v40 }
 0x419   :  { %13634 = vmatmul.mubr.msk.bf16.gmra.mrb[44].mxu0 %vm33_vm1, %v16446_v52 }
 0x41a   :  { %13637 = vmatprep.mubr.msk.bf16.mxu0 %vm33_vm1, %v21045_v11 }
 0x421   :  { %13638 = vmatmul.mubr.msk.bf16.gmra.mrb[48].mxu0 %vm33_vm1, %v21046_v22 }
 0x422   :  { %13641 = vmatprep.mubr.msk.bf16.mxu0 %vm33_vm1, %v16460_v27 }
 0x429   :  { %13642 = vmatmul.mubr.msk.bf16.gmra.mrb[52].mxu0 %vm33_vm1, %v16462_v13 }
 0x42a   :  { %13645 = vmatprep.mubr.msk.bf16.mxu0 %vm33_vm1, %v16468_v38 }
 0x431   :  { %13646 = vmatmul.mubr.msk.bf16.gmra.mrb[56].mxu0 %vm33_vm1, %v16470_v46 }
 0x432   :  { %13649 = vmatprep.mubr.msk.bf16.mxu0 %vm33_vm1, %v16476_v21 }
 0x439   :  { %13650 = vmatmul.mubr.msk.bf16.gmra.mrb[60].mxu0 %vm33_vm1, %v4090_v14  ;;  %v4567_v14 = vld [vmem:[#allocation2 + $0x13a] sm:$0xff] }
 0x43a   :  { %13655 = vmatprep.mubr.msk.bf16.mxu0 %vm33_vm1, %v4609_v28  ;;  %v4568_v28 = vld [vmem:[#allocation2 + $0x142] sm:$0xff] }
 0x43b   :  { %v4620_v55 = vpack.c.bf16 %v4568_v28, %v4567_v14  ;;  %v16684_v14 = vld [vmem:[#allocation2 + $0x28a] sm:$0xff]  ;;  %v16686_v28 = vld [vmem:[#allocation2 + $0x292] sm:$0xff] }
 0x441   :  { %13656 = vmatmul.mubr.msk.bf16.vlgmr.msra.gmra.mrb[0].mxu0 %vm33_vm1, %v4610_v20  ;;  %v4571_v20 = vld [vmem:[#allocation2 + $0x16a] sm:$0xff] }
 0x442   :  { %13659 = vmatprep.mubr.msk.bf16.mxu0 %vm33_vm1, %v4611_v41  ;;  %v4572_v41 = vld [vmem:[#allocation2 + $0x172] sm:$0xff] }
 0x443   :  { %v4622_v42 = vpack.c.bf16 %v4572_v41, %v4571_v20  ;;  %v4633_v20 = vpack.c.bf16 %v16690_v1, %v16688_v29  ;;  %v4595_v41 = vld [vmem:[#allocation2 + $0x2ba] sm:$0xff] }
 0x449   :  { %13660 = vmatmul.mubr.msk.bf16.gmra.mrb[4].mxu0 %vm33_vm1, %v4612_v6  ;;  %v4578_v6 = vld [vmem:[#allocation2 + $0x1ea] sm:$0xff] }
 0x44a   :  { %13663 = vmatprep.mubr.msk.bf16.mxu0 %vm33_vm1, %v4613_v7  ;;  %v4624_v7 = vpack.c.bf16 %v4576_v48, %v4575_v5  ;;  %v4625_v19 = vpack.c.bf16 %v4578_v6, %v4577_v43  ;;  %v4597_v5 = vld [vmem:[#allocation2 + $0x2d2] sm:$0xff]  ;;  %v4598_v48 = vld [vmem:[#allocation2 + $0x2da] sm:$0xff] }
 0x44b   :  { %v4635_v6 = vpack.c.bf16 %v4598_v48, %v4597_v5 }
 0x451   :  { %13664 = vmatmul.mubr.msk.bf16.gmra.mrb[8].mxu0 %vm33_vm1, %v4614_v57  ;;  %v4582_v57 = vld [vmem:[#allocation2 + $0x21a] sm:$0xff] }
 0x452   :  { %13667 = vmatprep.mubr.msk.bf16.mxu0 %vm33_vm1, %v4615_v34  ;;  %v4626_v34 = vpack.c.bf16 %v4580_v17, %v4579_v53  ;;  %v4627_v33 = vpack.c.bf16 %v4582_v57, %v4581_v26  ;;  %v4601_v53 = vld [vmem:[#allocation2 + $0x302] sm:$0xff]  ;;  %v4602_v17 = vld [vmem:[#allocation2 + $0x30a] sm:$0xff] }
 0x453   :  { %v4637_v57 = vpack.c.bf16 %v4602_v17, %v4601_v53 }
 0x459   :  { %13668 = vmatmul.mubr.msk.bf16.gmra.mrb[12].mxu0 %vm33_vm1, %v4616_v60 }
 0x45a   :  { %13671 = vmatprep.mubr.msk.bf16.mxu0 %vm33_vm1, %v4617_v12  ;;  %v4629_v12 = vpack.c.bf16 %v4586_v59, %v4585_v49  ;;  %v4608_v49 = vld [vmem:[#allocation2 + $0x352] sm:$0xff] }
 0x461   :  { %13672 = vmatmul.mubr.msk.bf16.gmra.mrb[16].mxu0 %vm33_vm1, %v4618_v50  ;;  %v4630_v50 = vpack.c.bf16 %v4588_v10, %v4587_v15 }
 0x462   :  { %13675 = vmatprep.mubr.msk.bf16.mxu0 %vm33_vm1, %v4619_v51  ;;  %v4631_v51 = vpack.c.bf16 %v4590_v32, %v4589_v23 }
 0x469   :  { %13676 = vmatmul.mubr.msk.bf16.gmra.mrb[20].mxu0 %vm33_vm1, %v4620_v55  ;;  %v4632_v55 = vpack.c.bf16 %v16686_v28, %v16684_v14 }
 0x46a   :  { %13679 = vmatprep.mubr.msk.bf16.mxu0 %vm33_vm1, %v4621_v56  ;;  %v21047_v56 = vmov 0.0  }
 0x46b   :  { %6077 = vst.msk [vmem:[#allocation3 + $0x30] sm:$0xff] %vm5397_vm3, %v21047_v56  ;;  %6078 = vst.msk [vmem:[#allocation3 + $0x38] sm:$0xff] %vm5397_vm3, %v21047_v56 }
 0x46c   :  { %6070 = vst.msk [vmem:[#allocation3] sm:$0xff] %vm5397_vm3, %v21047_v56  ;;  %6071 = vst.msk [vmem:[#allocation3 + $0x8] sm:$0xff] %vm5397_vm3, %v21047_v56 }
 0x46d   :  { %6074 = vst.msk [vmem:[#allocation3 + $0x18] sm:$0xff] %vm5397_vm3, %v21047_v56  ;;  %6075 = vst.msk [vmem:[#allocation3 + $0x20] sm:$0xff] %vm5397_vm3, %v21047_v56 }
 0x46e   :  { %6080 = vst.msk [vmem:[#allocation3 + $0x48] sm:$0xff] %vm5397_vm3, %v21047_v56  ;;  %6081 = vst.msk [vmem:[#allocation3 + $0x50] sm:$0xff] %vm5397_vm3, %v21047_v56 }
 0x46f   :  { %6083 = vst.msk [vmem:[#allocation3 + $0x60] sm:$0xff] %vm5397_vm3, %v21047_v56  ;;  %6084 = vst.msk [vmem:[#allocation3 + $0x68] sm:$0xff] %vm5397_vm3, %v21047_v56 }
 0x470   :  { %6086 = vst.msk [vmem:[#allocation3 + $0x78] sm:$0xff] %vm5397_vm3, %v21047_v56  ;;  %6087 = vst.msk [vmem:[#allocation3 + $0x80] sm:$0xff] %vm5397_vm3, %v21047_v56 }
 0x471   :  { %13680 = vmatmul.mubr.msk.bf16.gmra.mrb[24].mxu0 %vm33_vm1, %v4622_v42  ;;  %6089 = vst.msk [vmem:[#allocation3 + $0x90] sm:$0xff] %vm5397_vm3, %v21047_v56  ;;  %6090 = vst.msk [vmem:[#allocation3 + $0x98] sm:$0xff] %vm5397_vm3, %v21047_v56  ;;  %v4596_v42 = vld [vmem:[#allocation2 + $0x2c2] sm:$0xff] }
 0x472   :  { %13683 = vmatprep.mubr.msk.bf16.mxu0 %vm33_vm1, %v16516_v47  ;;  %v4583_v47 = vld [vmem:[#allocation2 + $0x22a] sm:$0xff]  ;;  %6092 = vst.msk [vmem:[#allocation3 + $0xa8] sm:$0xff] %vm5397_vm3, %v21047_v56  ;;  %6093 = vst.msk [vmem:[#allocation3 + $0xb0] sm:$0xff] %vm5397_vm3, %v21047_v56  ;;  %v4634_v43 = vpack.c.bf16 %v4596_v42, %v4595_v41 }
 0x473   :  { %v4628_v60 = vpack.c.bf16 %v4584_v35, %v4583_v47  ;;  %6095 = vst.msk [vmem:[#allocation3 + $0xc0] sm:$0xff] %vm5397_vm3, %v21047_v56  ;;  %6096 = vst.msk [vmem:[#allocation3 + $0xc8] sm:$0xff] %vm5397_vm3, %v21047_v56  ;;  %v4607_v35 = vld [vmem:[#allocation2 + $0x34a] sm:$0xff] }
 0x474   :  { %6098 = vst.msk [vmem:[#allocation3 + $0xd8] sm:$0xff] %vm5397_vm3, %v21047_v56  ;;  %6099 = vst.msk [vmem:[#allocation3 + $0xe0] sm:$0xff] %vm5397_vm3, %v21047_v56  ;;  %v4640_v59 = vpack.c.bf16 %v4608_v49, %v4607_v35 }
 0x475   :  { %6101 = vst.msk [vmem:[#allocation3 + $0xf0] sm:$0xff] %vm5397_vm3, %v21047_v56  ;;  %6102 = vst.msk [vmem:[#allocation3 + $0xf8] sm:$0xff] %vm5397_vm3, %v21047_v56 }
 0x476   :  { %6104 = vst.msk [vmem:[#allocation3 + $0x108] sm:$0xff] %vm5397_vm3, %v21047_v56  ;;  %6105 = vst.msk [vmem:[#allocation3 + $0x110] sm:$0xff] %vm5397_vm3, %v21047_v56 }
 0x477   :  { %6107 = vst.msk [vmem:[#allocation3 + $0x120] sm:$0xff] %vm5397_vm3, %v21047_v56  ;;  %6108 = vst.msk [vmem:[#allocation3 + $0x128] sm:$0xff] %vm5397_vm3, %v21047_v56 }
 0x478   :  { %6110 = vst.msk [vmem:[#allocation3 + $0x138] sm:$0xff] %vm5397_vm3, %v21047_v56  ;;  %6111 = vst.msk [vmem:[#allocation3 + $0x140] sm:$0xff] %vm5397_vm3, %v21047_v56 }
 0x479   :  { %13684 = vmatmul.mubr.msk.bf16.gmra.mrb[28].mxu0 %vm33_vm1, %v4624_v7  ;;  %6113 = vst.msk [vmem:[#allocation3 + $0x150] sm:$0xff] %vm5397_vm3, %v21047_v56  ;;  %6114 = vst.msk [vmem:[#allocation3 + $0x158] sm:$0xff] %vm5397_vm3, %v21047_v56  ;;  %v4599_v7 = vld [vmem:[#allocation2 + $0x2ea] sm:$0xff] }
 0x47a   :  { %13687 = vmatprep.mubr.msk.bf16.mxu0 %vm33_vm1, %v4625_v19  ;;  %6116 = vst.msk [vmem:[#allocation3 + $0x168] sm:$0xff] %vm5397_vm3, %v21047_v56  ;;  %6117 = vst.msk [vmem:[#allocation3 + $0x170] sm:$0xff] %vm5397_vm3, %v21047_v56  ;;  %v4600_v19 = vld [vmem:[#allocation2 + $0x2f2] sm:$0xff] }
 0x47b   :  { %6119 = vst.msk [vmem:[#allocation3 + $0x180] sm:$0xff] %vm5397_vm3, %v21047_v56  ;;  %6120 = vst.msk [vmem:[#allocation3 + $0x188] sm:$0xff] %vm5397_vm3, %v21047_v56  ;;  %v4636_v26 = vpack.c.bf16 %v4600_v19, %v4599_v7 }
 0x47c   :  { %6122 = vst.msk [vmem:[#allocation3 + $0x198] sm:$0xff] %vm5397_vm3, %v21047_v56  ;;  %6123 = vst.msk [vmem:[#allocation3 + $0x1a0] sm:$0xff] %vm5397_vm3, %v21047_v56 }
 0x47d   :  { %6125 = vst.msk [vmem:[#allocation3 + $0x1b0] sm:$0xff] %vm5397_vm3, %v21047_v56  ;;  %6126 = vst.msk [vmem:[#allocation3 + $0x1b8] sm:$0xff] %vm5397_vm3, %v21047_v56 }
 0x47e   :  { %6128 = vst.msk [vmem:[#allocation3 + $0x1c8] sm:$0xff] %vm5397_vm3, %v21047_v56  ;;  %6129 = vst.msk [vmem:[#allocation3 + $0x1d0] sm:$0xff] %vm5397_vm3, %v21047_v56 }
 0x47f   :  { %6131 = vst.msk [vmem:[#allocation3 + $0x1e0] sm:$0xff] %vm5397_vm3, %v21047_v56  ;;  %6132 = vst.msk [vmem:[#allocation3 + $0x1e8] sm:$0xff] %vm5397_vm3, %v21047_v56 }
 0x480   :  { %6134 = vst.msk [vmem:[#allocation3 + $0x1f8] sm:$0xff] %vm5397_vm3, %v21047_v56  ;;  %6135 = vst.msk [vmem:[#allocation3 + $0x200] sm:$0xff] %vm5397_vm3, %v21047_v56 }
 0x481   :  { %13688 = vmatmul.mubr.msk.bf16.gmra.mrb[32].mxu0 %vm33_vm1, %v4626_v34  ;;  %6137 = vst.msk [vmem:[#allocation3 + $0x210] sm:$0xff] %vm5397_vm3, %v21047_v56  ;;  %6138 = vst.msk [vmem:[#allocation3 + $0x218] sm:$0xff] %vm5397_vm3, %v21047_v56  ;;  %v4603_v34 = vld [vmem:[#allocation2 + $0x31a] sm:$0xff] }
 0x482   :  { %13691 = vmatprep.mubr.msk.bf16.mxu0 %vm33_vm1, %v4627_v33  ;;  %6140 = vst.msk [vmem:[#allocation3 + $0x228] sm:$0xff] %vm5397_vm3, %v21047_v56  ;;  %6141 = vst.msk [vmem:[#allocation3 + $0x230] sm:$0xff] %vm5397_vm3, %v21047_v56  ;;  %v4604_v33 = vld [vmem:[#allocation2 + $0x322] sm:$0xff] }
 0x483   :  { %6143 = vst.msk [vmem:[#allocation3 + $0x240] sm:$0xff] %vm5397_vm3, %v21047_v56  ;;  %6144 = vst.msk [vmem:[#allocation3 + $0x248] sm:$0xff] %vm5397_vm3, %v21047_v56  ;;  %v4638_v47 = vpack.c.bf16 %v4604_v33, %v4603_v34 }
 0x484   :  { %6146 = vst.msk [vmem:[#allocation3 + $0x258] sm:$0xff] %vm5397_vm3, %v21047_v56  ;;  %6147 = vst.msk [vmem:[#allocation3 + $0x260] sm:$0xff] %vm5397_vm3, %v21047_v56 }
 0x485   :  { %6149 = vst.msk [vmem:[#allocation3 + $0x270] sm:$0xff] %vm5397_vm3, %v21047_v56  ;;  %6150 = vst.msk [vmem:[#allocation3 + $0x278] sm:$0xff] %vm5397_vm3, %v21047_v56 }
 0x486   :  { %6152 = vst.msk [vmem:[#allocation3 + $0x288] sm:$0xff] %vm5397_vm3, %v21047_v56  ;;  %6153 = vst.msk [vmem:[#allocation3 + $0x290] sm:$0xff] %vm5397_vm3, %v21047_v56 }
 0x487   :  { %6155 = vst.msk [vmem:[#allocation3 + $0x2a0] sm:$0xff] %vm5397_vm3, %v21047_v56  ;;  %6156 = vst.msk [vmem:[#allocation3 + $0x2a8] sm:$0xff] %vm5397_vm3, %v21047_v56 }
 0x488   :  { %6158 = vst.msk [vmem:[#allocation3 + $0x2b8] sm:$0xff] %vm5397_vm3, %v21047_v56  ;;  %6159 = vst.msk [vmem:[#allocation3 + $0x2c0] sm:$0xff] %vm5397_vm3, %v21047_v56 }
 0x489   :  { %13692 = vmatmul.mubr.msk.bf16.gmra.mrb[36].mxu0 %vm33_vm1, %v4628_v60  ;;  %6161 = vst.msk [vmem:[#allocation3 + $0x2d0] sm:$0xff] %vm5397_vm3, %v21047_v56  ;;  %6162 = vst.msk [vmem:[#allocation3 + $0x2d8] sm:$0xff] %vm5397_vm3, %v21047_v56  ;;  %v21048_v60 = vld [vmem:[#allocation8_spill] sm:$0xff] }
 0x48a   :  { %13695 = vmatprep.mubr.msk.bf16.mxu0 %vm33_vm1, %v4629_v12  ;;  %6164 = vst.msk [vmem:[#allocation3 + $0x2e8] sm:$0xff] %vm5397_vm3, %v21047_v56  ;;  %6165 = vst.msk [vmem:[#allocation3 + $0x2f0] sm:$0xff] %vm5397_vm3, %v21047_v56  ;;  %v5095_v12 = vld [vmem:[%s20922_s3] sm:$0x3] }
 0x48b   :  { %6167 = vst.msk [vmem:[#allocation3 + $0x300] sm:$0xff] %vm5397_vm3, %v21047_v56  ;;  %6168 = vst.msk [vmem:[#allocation3 + $0x308] sm:$0xff] %vm5397_vm3, %v21047_v56  ;;  %15415 = vmatprep.subr.msk.bf16.mxu1 %vm563_vm0, %v5095_v12  ;;  %v5104_v15 = vsel %vm563_vm0, %v5095_v12, 0  ;;  %15414 = vmatprep.subr.msk.bf16.mxu0 %vm563_vm0, %v5095_v12 }
 0x48c   :  { %6170 = vst.msk [vmem:[#allocation3 + $0x318] sm:$0xff] %vm5397_vm3, %v21047_v56  ;;  %6171 = vst.msk [vmem:[#allocation3 + $0x320] sm:$0xff] %vm5397_vm3, %v21047_v56  ;;  %14380 = vmatpush3.bf16.msra.mxu1 %v5104_v15  ;;  %13720 = vmatpush3.bf16.msra.mxu0 %v5104_v15 }
 0x48d   :  { %6173 = vst.msk [vmem:[#allocation3 + $0x330] sm:$0xff] %vm5397_vm3, %v21047_v56  ;;  %6174 = vst.msk [vmem:[#allocation3 + $0x338] sm:$0xff] %vm5397_vm3, %v21047_v56 }
 0x48e   :  { %6176 = vst.msk [vmem:[#allocation3 + $0x348] sm:$0xff] %vm5397_vm3, %v21047_v56  ;;  %6177 = vst.msk [vmem:[#allocation3 + $0x350] sm:$0xff] %vm5397_vm3, %v21047_v56 }
 0x48f   :  { %6079 = vst.msk [vmem:[#allocation3 + $0x40] sm:$0x3] %vm6072_vm4, %v21047_v56  ;;  %6073 = vst.msk [vmem:[#allocation3 + $0x10] sm:$0x3] %vm6072_vm4, %v21047_v56  ;;  %13754 = vmatmul.mubr.msk.bf16.vlgmr.msra.gmra.mrb[0].mxu1 %vm33_vm1, %v16420_v44 }
 0x490   :  { %6076 = vst.msk [vmem:[#allocation3 + $0x28] sm:$0x3] %vm6072_vm4, %v21047_v56  ;;  %6082 = vst.msk [vmem:[#allocation3 + $0x58] sm:$0x3] %vm6072_vm4, %v21047_v56  ;;  %13757 = vmatprep.mubr.msk.bf16.mxu1 %vm33_vm1, %v16422_v45 }
 0x491   :  { %13696 = vmatmul.mubr.msk.bf16.gmra.mrb[40].mxu0 %vm33_vm1, %v4630_v50  ;;  %6085 = vst.msk [vmem:[#allocation3 + $0x70] sm:$0x3] %vm6072_vm4, %v21047_v56  ;;  %6088 = vst.msk [vmem:[#allocation3 + $0x88] sm:$0x3] %vm6072_vm4, %v21047_v56 }
 0x492   :  { %13699 = vmatprep.mubr.msk.bf16.mxu0 %vm33_vm1, %v4631_v51  ;;  %6091 = vst.msk [vmem:[#allocation3 + $0xa0] sm:$0x3] %vm6072_vm4, %v21047_v56  ;;  %6094 = vst.msk [vmem:[#allocation3 + $0xb8] sm:$0x3] %vm6072_vm4, %v21047_v56 }
 0x493   :  { %6097 = vst.msk [vmem:[#allocation3 + $0xd0] sm:$0x3] %vm6072_vm4, %v21047_v56  ;;  %6100 = vst.msk [vmem:[#allocation3 + $0xe8] sm:$0x3] %vm6072_vm4, %v21047_v56 }
 0x494   :  { %6103 = vst.msk [vmem:[#allocation3 + $0x100] sm:$0x3] %vm6072_vm4, %v21047_v56  ;;  %6106 = vst.msk [vmem:[#allocation3 + $0x118] sm:$0x3] %vm6072_vm4, %v21047_v56 }
 0x495   :  { %6109 = vst.msk [vmem:[#allocation3 + $0x130] sm:$0x3] %vm6072_vm4, %v21047_v56  ;;  %6112 = vst.msk [vmem:[#allocation3 + $0x148] sm:$0x3] %vm6072_vm4, %v21047_v56 }
 0x496   :  { %6115 = vst.msk [vmem:[#allocation3 + $0x160] sm:$0x3] %vm6072_vm4, %v21047_v56  ;;  %6118 = vst.msk [vmem:[#allocation3 + $0x178] sm:$0x3] %vm6072_vm4, %v21047_v56 }
 0x497   :  { %6121 = vst.msk [vmem:[#allocation3 + $0x190] sm:$0x3] %vm6072_vm4, %v21047_v56  ;;  %6124 = vst.msk [vmem:[#allocation3 + $0x1a8] sm:$0x3] %vm6072_vm4, %v21047_v56  ;;  %13758 = vmatmul.mubr.msk.bf16.gmra.mrb[4].mxu1 %vm33_vm1, %v16428_v18 }
 0x498   :  { %6127 = vst.msk [vmem:[#allocation3 + $0x1c0] sm:$0x3] %vm6072_vm4, %v21047_v56  ;;  %6130 = vst.msk [vmem:[#allocation3 + $0x1d8] sm:$0x3] %vm6072_vm4, %v21047_v56  ;;  %13761 = vmatprep.mubr.msk.bf16.mxu1 %vm33_vm1, %v16430_v58 }
 0x499   :  { %13700 = vmatmul.mubr.msk.bf16.gmra.mrb[44].mxu0 %vm33_vm1, %v4632_v55  ;;  %6133 = vst.msk [vmem:[#allocation3 + $0x1f0] sm:$0x3] %vm6072_vm4, %v21047_v56  ;;  %6136 = vst.msk [vmem:[#allocation3 + $0x208] sm:$0x3] %vm6072_vm4, %v21047_v56 }
 0x49a   :  { %13703 = vmatprep.mubr.msk.bf16.mxu0 %vm33_vm1, %v4633_v20  ;;  %6139 = vst.msk [vmem:[#allocation3 + $0x220] sm:$0x3] %vm6072_vm4, %v21047_v56  ;;  %6142 = vst.msk [vmem:[#allocation3 + $0x238] sm:$0x3] %vm6072_vm4, %v21047_v56 }
 0x49b   :  { %6145 = vst.msk [vmem:[#allocation3 + $0x250] sm:$0x3] %vm6072_vm4, %v21047_v56  ;;  %6148 = vst.msk [vmem:[#allocation3 + $0x268] sm:$0x3] %vm6072_vm4, %v21047_v56 }
 0x49c   :  { %6151 = vst.msk [vmem:[#allocation3 + $0x280] sm:$0x3] %vm6072_vm4, %v21047_v56  ;;  %6154 = vst.msk [vmem:[#allocation3 + $0x298] sm:$0x3] %vm6072_vm4, %v21047_v56 }
 0x49d   :  { %6157 = vst.msk [vmem:[#allocation3 + $0x2b0] sm:$0x3] %vm6072_vm4, %v21047_v56  ;;  %6160 = vst.msk [vmem:[#allocation3 + $0x2c8] sm:$0x3] %vm6072_vm4, %v21047_v56 }
 0x49e   :  { %6163 = vst.msk [vmem:[#allocation3 + $0x2e0] sm:$0x3] %vm6072_vm4, %v21047_v56  ;;  %6166 = vst.msk [vmem:[#allocation3 + $0x2f8] sm:$0x3] %vm6072_vm4, %v21047_v56 }
 0x49f   :  { %6169 = vst.msk [vmem:[#allocation3 + $0x310] sm:$0x3] %vm6072_vm4, %v21047_v56  ;;  %6172 = vst.msk [vmem:[#allocation3 + $0x328] sm:$0x3] %vm6072_vm4, %v21047_v56  ;;  %13762 = vmatmul.mubr.msk.bf16.gmra.mrb[8].mxu1 %vm33_vm1, %v16436_v54 }
 0x4a0   :  { %6175 = vst.msk [vmem:[#allocation3 + $0x340] sm:$0x3] %vm6072_vm4, %v21047_v56  ;;  %6178 = vst.msk [vmem:[#allocation3 + $0x358] sm:$0x3] %vm6072_vm4, %v21047_v56  ;;  %13765 = vmatprep.mubr.msk.bf16.mxu1 %vm33_vm1, %v16438_v16 }
 0x4a1   :  { %13704 = vmatmul.mubr.msk.bf16.gmra.mrb[48].mxu0 %vm33_vm1, %v4634_v43 }
 0x4a2   :  { %13707 = vmatprep.mubr.msk.bf16.mxu0 %vm33_vm1, %v4635_v6 }
 0x4a7   :  { %13766 = vmatmul.mubr.msk.bf16.gmra.mrb[12].mxu1 %vm33_vm1, %v16444_v40 }
 0x4a8   :  { %13769 = vmatprep.mubr.msk.bf16.mxu1 %vm33_vm1, %v16446_v52 }
 0x4a9   :  { %13708 = vmatmul.mubr.msk.bf16.gmra.mrb[52].mxu0 %vm33_vm1, %v4636_v26 }
 0x4aa   :  { %13711 = vmatprep.mubr.msk.bf16.mxu0 %vm33_vm1, %v4637_v57 }
 0x4af   :  { %13770 = vmatmul.mubr.msk.bf16.gmra.mrb[16].mxu1 %vm33_vm1, %v21045_v11 }
 0x4b0   :  { %13773 = vmatprep.mubr.msk.bf16.mxu1 %vm33_vm1, %v21046_v22 }
 0x4b1   :  { %13712 = vmatmul.mubr.msk.bf16.gmra.mrb[56].mxu0 %vm33_vm1, %v4638_v47 }
 0x4b2   :  { %13715 = vmatprep.mubr.msk.bf16.mxu0 %vm33_vm1, %v16550_v36  ;;  %v16944_v36 = vld [vmem:[%s20923_s2 + $0x4] sm:$0xf] }
 0x4b3   :  { %15416 = vmatprep.subr.msk.bf16.mxu1 %vm20984_vm5, %v16944_v36 }
 0x4b7   :  { %13774 = vmatmul.mubr.msk.bf16.gmra.mrb[20].mxu1 %vm33_vm1, %v16460_v27 }
 0x4b8   :  { %13777 = vmatprep.mubr.msk.bf16.mxu1 %vm33_vm1, %v16462_v13 }
 0x4b9   :  { %13716 = vmatmul.mubr.msk.bf16.gmra.mrb[60].mxu0 %vm33_vm1, %v4640_v59 }
 0x4ba   :  { %13721 = vmatprep.mubr.msk.bf16.mxu0 %vm33_vm1, %v21048_v60 }
 0x4bf   :  { %13778 = vmatmul.mubr.msk.bf16.gmra.mrb[24].mxu1 %vm33_vm1, %v16468_v38 }
 0x4c0   :  { %13781 = vmatprep.mubr.msk.bf16.mxu1 %vm33_vm1, %v16470_v46 }
 0x4c1   :  { %13722 = vmatmul.mubr.msk.bf16.vlgmr.msra.gmra.mrb[64].mxu0 %vm33_vm1, %v16350_v31 }
 0x4c2   :  { %13725 = vmatprep.mubr.msk.bf16.mxu0 %vm33_vm1, %v16352_v37 }
 0x4c7   :  { %13782 = vmatmul.mubr.msk.bf16.gmra.mrb[28].mxu1 %vm33_vm1, %v16476_v21 }
 0x4c9   :  { %13726 = vmatmul.mubr.msk.bf16.gmra.mrb[68].mxu0 %vm33_vm1, %v16366_v62 }
 0x4ca   :  { %13729 = vmatprep.mubr.msk.bf16.mxu0 %vm33_vm1, %v16368_v8 }
 0x4d1   :  { %13730 = vmatmul.mubr.msk.bf16.gmra.mrb[72].mxu0 %vm33_vm1, %v16374_v39 }
 0x4d2   :  { %13733 = vmatprep.mubr.msk.bf16.mxu0 %vm33_vm1, %v16376_v4 }
 0x4d9   :  { %13734 = vmatmul.mubr.msk.bf16.gmra.mrb[76].mxu0 %vm33_vm1, %v16382_v2 }
 0x4da   :  { %13737 = vmatprep.mubr.msk.bf16.mxu0 %vm33_vm1, %v16384_v3 }
 0x4e1   :  { %13738 = vmatmul.mubr.msk.bf16.gmra.mrb[80].mxu0 %vm33_vm1, %v16390_v63 }
 0x4e2   :  { %13741 = vmatprep.mubr.msk.bf16.mxu0 %vm33_vm1, %v16392_v0 }
 0x4e9   :  { %13742 = vmatmul.mubr.msk.bf16.gmra.mrb[84].mxu0 %vm33_vm1, %v16398_v24 }
 0x4ea   :  { %13745 = vmatprep.mubr.msk.bf16.mxu0 %vm33_vm1, %v16400_v30 }
 0x4f1   :  { %13746 = vmatmul.mubr.msk.bf16.gmra.mrb[88].mxu0 %vm33_vm1, %v16406_v61 }
 0x4f2   :  { %13749 = vmatprep.mubr.msk.bf16.mxu0 %vm33_vm1, %v16408_v9 }
 0x4f9   :  { %13750 = vmatmul.mubr.msk.bf16.gmra.mrb[92].mxu0 %vm33_vm1, %v16414_v25 }
 0x514   :  { %v16946_v10 = vpop.f32.mrb[0].mxu0 }
 0x515   :  { %v16950_v44 = vpop.f32.mrb[1].mxu0  ;;  %v5533_v23 = vmul.f32 %v16946_v10, %v16946_v10  ;;  %v5401_v58 = vsel %vm5397_vm3, %v16946_v10, 0.0 }
 0x516   :  { %v5531_v31 = vmul.f32 %v16950_v44, %v16950_v44  ;;  %v16958_v37 = vpop.f32.mrb[2].mxu0  ;;  %v5398_v18 = vsel %vm5397_vm3, %v16950_v44, 0.0 }
 0x517   :  { %v16964_v45 = vpop.f32.mrb[3].mxu0  ;;  %v5534_v51 = vmul.f32 %v16958_v37, %v16958_v37  ;;  %v5598_v1 = vsel %vm5397_vm3, %v5533_v23, 0.0  ;;  %v5403_v55 = vsel %vm5397_vm3, %v16958_v37, 0.0 }
 0x518   :  { %v5399_v62 = vsel %vm5397_vm3, %v16964_v45, 0.0  ;;  %v5532_v32 = vmul.f32 %v16964_v45, %v16964_v45  ;;  %v5595_v8 = vsel %vm5397_vm3, %v5531_v31, 0.0 }
 0x519   :  { %v5400_v50 = vadd.f32 %v5399_v62, %v5398_v18  ;;  %v5600_v5 = vsel %vm5397_vm3, %v5534_v51, 0.0 }
 0x51a   :  { %v5596_v14 = vsel %vm5397_vm3, %v5532_v32, 0.0 }
 0x51b   :  { %v5402_v28 = vadd.f32 %v5401_v58, %v5400_v50  ;;  %v5597_v29 = vadd.f32 %v5596_v14, %v5595_v8 }
 0x51c   :  { %v16983_v56 = vpop.f32.mrb[4].mxu0 }
 0x51d   :  { %v5599_v20 = vadd.f32 %v5598_v1, %v5597_v29  ;;  %v16985_v41 = vpop.f32.mrb[5].mxu0  ;;  %v5404_v42 = vadd.f32 %v5403_v55, %v5402_v28  ;;  %v5537_v39 = vmul.f32 %v16983_v56, %v16983_v56  ;;  %v5409_v4 = vsel %vm5397_vm3, %v16983_v56, 0.0 }
 0x51e   :  { %v5405_v48 = vsel %vm5397_vm3, %v16985_v41, 0.0  ;;  %v5535_v43 = vmul.f32 %v16985_v41, %v16985_v41  ;;  %v16996_v6 = vpop.f32.mrb[6].mxu0 }
 0x51f   :  { %v5406_v54 = vadd.f32 %v5405_v48, %v5404_v42  ;;  %v5601_v7 = vadd.f32 %v5600_v5, %v5599_v20  ;;  %v17002_v19 = vpop.f32.mrb[7].mxu0  ;;  %v5538_v34 = vmul.f32 %v16996_v6, %v16996_v6  ;;  %v5606_v49 = vsel %vm5397_vm3, %v5537_v39, 0.0 }
 0x520   :  { %v5602_v53 = vsel %vm5397_vm3, %v5535_v43, 0.0  ;;  %v5407_v17 = vsel %vm5397_vm3, %v17002_v19, 0.0  ;;  %v5536_v26 = vmul.f32 %v17002_v19, %v17002_v19  ;;  %v5411_v59 = vsel %vm5397_vm3, %v16996_v6, 0.0 }
 0x521   :  { %v5603_v57 = vadd.f32 %v5602_v53, %v5601_v7  ;;  %v5408_v16 = vadd.f32 %v5407_v17, %v5406_v54  ;;  %v5608_v23 = vsel %vm5397_vm3, %v5538_v34, 0.0 }
 0x522   :  { %v5604_v33 = vsel %vm5397_vm3, %v5536_v26, 0.0 }
 0x523   :  { %v5410_v47 = vadd.f32 %v5409_v4, %v5408_v16  ;;  %v5605_v35 = vadd.f32 %v5604_v33, %v5603_v57 }
 0x524   :  { %v17019_v60 = vpop.f32.mrb[8].mxu0 }
 0x525   :  { %v5607_v12 = vadd.f32 %v5606_v49, %v5605_v35  ;;  %v17021_v15 = vpop.f32.mrb[9].mxu0  ;;  %v5412_v31 = vadd.f32 %v5411_v59, %v5410_v47  ;;  %v5541_v2 = vmul.f32 %v17019_v60, %v17019_v60  ;;  %v5417_v3 = vsel %vm5397_vm3, %v17019_v60, 0.0 }
 0x526   :  { %v5413_v18 = vsel %vm5397_vm3, %v17021_v15, 0.0  ;;  %v5539_v62 = vmul.f32 %v17021_v15, %v17021_v15  ;;  %v17032_v32 = vpop.f32.mrb[10].mxu0 }
 0x527   :  { %v5414_v40 = vadd.f32 %v5413_v18, %v5412_v31  ;;  %v5609_v50 = vadd.f32 %v5608_v23, %v5607_v12  ;;  %v17038_v58 = vpop.f32.mrb[11].mxu0  ;;  %v5542_v29 = vmul.f32 %v17032_v32, %v17032_v32  ;;  %v5614_v42 = vsel %vm5397_vm3, %v5541_v2, 0.0 }
 0x528   :  { %v5610_v8 = vsel %vm5397_vm3, %v5539_v62, 0.0  ;;  %v5415_v51 = vsel %vm5397_vm3, %v17038_v58, 0.0  ;;  %v5540_v14 = vmul.f32 %v17038_v58, %v17038_v58  ;;  %v5419_v5 = vsel %vm5397_vm3, %v17032_v32, 0.0 }
 0x529   :  { %v5611_v28 = vadd.f32 %v5610_v8, %v5609_v50  ;;  %v5416_v52 = vadd.f32 %v5415_v51, %v5414_v40  ;;  %v5616_v39 = vsel %vm5397_vm3, %v5542_v29, 0.0 }
 0x52a   :  { %v5612_v1 = vsel %vm5397_vm3, %v5540_v14, 0.0 }
 0x52b   :  { %v5418_v55 = vadd.f32 %v5417_v3, %v5416_v52  ;;  %v5613_v20 = vadd.f32 %v5612_v1, %v5611_v28 }
 0x52c   :  { %v17055_v48 = vpop.f32.mrb[12].mxu0 }
 0x52d   :  { %v5615_v43 = vadd.f32 %v5614_v42, %v5613_v20  ;;  %v17057_v54 = vpop.f32.mrb[13].mxu0  ;;  %v5420_v7 = vadd.f32 %v5419_v5, %v5418_v55  ;;  %v5545_v63 = vmul.f32 %v17055_v48, %v17055_v48  ;;  %v5425_v0 = vsel %vm5397_vm3, %v17055_v48, 0.0 }
 0x52e   :  { %v5421_v53 = vsel %vm5397_vm3, %v17057_v54, 0.0  ;;  %v5543_v17 = vmul.f32 %v17057_v54, %v17057_v54  ;;  %v17068_v26 = vpop.f32.mrb[14].mxu0 }
 0x52f   :  { %v5422_v11 = vadd.f32 %v5421_v53, %v5420_v7  ;;  %v5617_v57 = vadd.f32 %v5616_v39, %v5615_v43  ;;  %v17074_v16 = vpop.f32.mrb[15].mxu0  ;;  %v5546_v35 = vmul.f32 %v17068_v26, %v17068_v26  ;;  %v5622_v31 = vsel %vm5397_vm3, %v5545_v63, 0.0 }
 0x530   :  { %v5618_v4 = vsel %vm5397_vm3, %v5543_v17, 0.0  ;;  %v5423_v34 = vsel %vm5397_vm3, %v17074_v16, 0.0  ;;  %v5544_v33 = vmul.f32 %v17074_v16, %v17074_v16  ;;  %v5427_v23 = vsel %vm5397_vm3, %v17068_v26, 0.0 }
 0x531   :  { %v5619_v47 = vadd.f32 %v5618_v4, %v5617_v57  ;;  %v5424_v22 = vadd.f32 %v5423_v34, %v5422_v11  ;;  %v5624_v2 = vsel %vm5397_vm3, %v5546_v35, 0.0 }
 0x532   :  { %v5620_v49 = vsel %vm5397_vm3, %v5544_v33, 0.0 }
 0x533   :  { %v5426_v59 = vadd.f32 %v5425_v0, %v5424_v22  ;;  %v5621_v12 = vadd.f32 %v5620_v49, %v5619_v47 }
 0x534   :  { %v17091_v18 = vpop.f32.mrb[16].mxu0 }
 0x535   :  { %v5623_v62 = vadd.f32 %v5622_v31, %v5621_v12  ;;  %v17093_v40 = vpop.f32.mrb[17].mxu0  ;;  %v5428_v50 = vadd.f32 %v5427_v23, %v5426_v59  ;;  %v5549_v24 = vmul.f32 %v17091_v18, %v17091_v18  ;;  %v5433_v30 = vsel %vm5397_vm3, %v17091_v18, 0.0 }
 0x536   :  { %v5429_v8 = vsel %vm5397_vm3, %v17093_v40, 0.0  ;;  %v5547_v51 = vmul.f32 %v17093_v40, %v17093_v40  ;;  %v17104_v14 = vpop.f32.mrb[18].mxu0 }
 0x537   :  { %v5430_v27 = vadd.f32 %v5429_v8, %v5428_v50  ;;  %v5625_v28 = vadd.f32 %v5624_v2, %v5623_v62  ;;  %v17110_v52 = vpop.f32.mrb[19].mxu0  ;;  %v5550_v20 = vmul.f32 %v17104_v14, %v17104_v14  ;;  %v5630_v7 = vsel %vm5397_vm3, %v5549_v24, 0.0 }
 0x538   :  { %v5626_v3 = vsel %vm5397_vm3, %v5547_v51, 0.0  ;;  %v5431_v29 = vsel %vm5397_vm3, %v17110_v52, 0.0  ;;  %v5548_v1 = vmul.f32 %v17110_v52, %v17110_v52  ;;  %v5435_v39 = vsel %vm5397_vm3, %v17104_v14, 0.0 }
 0x539   :  { %v5627_v55 = vadd.f32 %v5626_v3, %v5625_v28  ;;  %v5432_v13 = vadd.f32 %v5431_v29, %v5430_v27  ;;  %v5632_v63 = vsel %vm5397_vm3, %v5550_v20, 0.0 }
 0x53a   :  { %v5628_v42 = vsel %vm5397_vm3, %v5548_v1, 0.0 }
 0x53b   :  { %v5434_v5 = vadd.f32 %v5433_v30, %v5432_v13  ;;  %v5629_v43 = vadd.f32 %v5628_v42, %v5627_v55 }
 0x53c   :  { %v17127_v53 = vpop.f32.mrb[20].mxu0 }
 0x53d   :  { %v5631_v17 = vadd.f32 %v5630_v7, %v5629_v43  ;;  %v17129_v11 = vpop.f32.mrb[21].mxu0  ;;  %v5436_v57 = vadd.f32 %v5435_v39, %v5434_v5  ;;  %v5553_v61 = vmul.f32 %v17127_v53, %v17127_v53  ;;  %v5441_v9 = vsel %vm5397_vm3, %v17127_v53, 0.0 }
 0x53e   :  { %v5437_v4 = vsel %vm5397_vm3, %v17129_v11, 0.0  ;;  %v5551_v34 = vmul.f32 %v17129_v11, %v17129_v11  ;;  %v17140_v33 = vpop.f32.mrb[22].mxu0 }
 0x53f   :  { %v5438_v38 = vadd.f32 %v5437_v4, %v5436_v57  ;;  %v5633_v47 = vadd.f32 %v5632_v63, %v5631_v17  ;;  %v17146_v22 = vpop.f32.mrb[23].mxu0  ;;  %v5554_v12 = vmul.f32 %v17140_v33, %v17140_v33  ;;  %v5638_v50 = vsel %vm5397_vm3, %v5553_v61, 0.0 }
 0x540   :  { %v5634_v0 = vsel %vm5397_vm3, %v5551_v34, 0.0  ;;  %v5439_v35 = vsel %vm5397_vm3, %v17146_v22, 0.0  ;;  %v5552_v49 = vmul.f32 %v17146_v22, %v17146_v22  ;;  %v5443_v2 = vsel %vm5397_vm3, %v17140_v33, 0.0 }
 0x541   :  { %v5635_v59 = vadd.f32 %v5634_v0, %v5633_v47  ;;  %v5440_v46 = vadd.f32 %v5439_v35, %v5438_v38  ;;  %v5640_v24 = vsel %vm5397_vm3, %v5554_v12, 0.0 }
 0x542   :  { %v5636_v31 = vsel %vm5397_vm3, %v5552_v49, 0.0 }
 0x543   :  { %v5442_v23 = vadd.f32 %v5441_v9, %v5440_v46  ;;  %v5637_v62 = vadd.f32 %v5636_v31, %v5635_v59 }
 0x544   :  { %v17163_v8 = vpop.f32.mrb[24].mxu0 }
 0x545   :  { %v5639_v51 = vadd.f32 %v5638_v50, %v5637_v62  ;;  %v17165_v27 = vpop.f32.mrb[25].mxu0  ;;  %v5444_v28 = vadd.f32 %v5443_v2, %v5442_v23  ;;  %v5557_v21 = vmul.f32 %v17163_v8, %v17163_v8  ;;  %v5449_v7 = vsel %vm5397_vm3, %v17163_v8, 0.0 }
 0x546   :  { %v5445_v3 = vsel %vm5397_vm3, %v17165_v27, 0.0  ;;  %v5555_v29 = vmul.f32 %v17165_v27, %v17165_v27  ;;  %v17176_v1 = vpop.f32.mrb[26].mxu0 }
 0x547   :  { %v5446_v55 = vadd.f32 %v5445_v3, %v5444_v28  ;;  %v5641_v13 = vadd.f32 %v5640_v24, %v5639_v51  ;;  %v17178_v30 = vpop.f32.mrb[27].mxu0  ;;  %v5558_v39 = vmul.f32 %v17176_v1, %v17176_v1  ;;  %v5646_v4 = vsel %vm5397_vm3, %v5557_v21, 0.0 }
 0x548   :  { %v5642_v20 = vsel %vm5397_vm3, %v5555_v29, 0.0  ;;  %v5447_v25 = vsel %vm5397_vm3, %v17178_v30, 0.0  ;;  %v5556_v42 = vmul.f32 %v17178_v30, %v17178_v30  ;;  %v5451_v34 = vsel %vm5397_vm3, %v17176_v1, 0.0 }
 0x549   :  { %v5643_v5 = vadd.f32 %v5642_v20, %v5641_v13  ;;  %v5448_v43 = vadd.f32 %v5447_v25, %v5446_v55  ;;  %v5648_v35 = vsel %vm5397_vm3, %v5558_v39, 0.0 }
 0x54a   :  { %v5644_v17 = vsel %vm5397_vm3, %v5556_v42, 0.0 }
 0x54b   :  { %v5450_v57 = vadd.f32 %v5449_v7, %v5448_v43  ;;  %v5645_v63 = vadd.f32 %v5644_v17, %v5643_v5 }
 0x54c   :  { %v17195_v38 = vpop.f32.mrb[28].mxu0 }
 0x54d   :  { %v5647_v47 = vadd.f32 %v5646_v4, %v5645_v63  ;;  %v17197_v61 = vpop.f32.mrb[29].mxu0  ;;  %v5452_v0 = vadd.f32 %v5451_v34, %v5450_v57  ;;  %v5561_v23 = vmul.f32 %v17195_v38, %v17195_v38  ;;  %v5457_v24 = vsel %vm5397_vm3, %v17195_v38, 0.0 }
 0x54e   :  { %v5453_v49 = vsel %vm5397_vm3, %v17197_v61, 0.0  ;;  %v5559_v59 = vmul.f32 %v17197_v61, %v17197_v61  ;;  %v17204_v46 = vpop.f32.mrb[30].mxu0 }
 0x54f   :  { %v5454_v9 = vadd.f32 %v5453_v49, %v5452_v0  ;;  %v5649_v12 = vadd.f32 %v5648_v35, %v5647_v47  ;;  %v17206_v31 = vpop.f32.mrb[31].mxu0  ;;  %v5562_v3 = vmul.f32 %v17204_v46, %v17204_v46  ;;  %v5654_v21 = vsel %vm5397_vm3, %v5561_v23, 0.0 }
 0x550   :  { %v5650_v62 = vsel %vm5397_vm3, %v5559_v59, 0.0  ;;  %v5455_v50 = vsel %vm5397_vm3, %v17206_v31, 0.0  ;;  %v5560_v2 = vmul.f32 %v17206_v31, %v17206_v31  ;;  %v5459_v20 = vsel %vm5397_vm3, %v17204_v46, 0.0 }
 0x551   :  { %v5651_v51 = vadd.f32 %v5650_v62, %v5649_v12  ;;  %v5456_v28 = vadd.f32 %v5455_v50, %v5454_v9  ;;  %v5656_v7 = vsel %vm5397_vm3, %v5562_v3, 0.0 }
 0x552   :  { %v5652_v29 = vsel %vm5397_vm3, %v5560_v2, 0.0 }
 0x553   :  { %v5458_v55 = vadd.f32 %v5457_v24, %v5456_v28  ;;  %v5653_v13 = vadd.f32 %v5652_v29, %v5651_v51 }
 0x554   :  { %v17223_v25 = vpop.f32.mrb[32].mxu0 }
 0x555   :  { %v5655_v42 = vadd.f32 %v5654_v21, %v5653_v13  ;;  %v17225_v5 = vpop.f32.mrb[33].mxu0  ;;  %v5460_v43 = vadd.f32 %v5459_v20, %v5458_v55  ;;  %v5565_v47 = vmul.f32 %v17223_v25, %v17223_v25  ;;  %v5465_v12 = vsel %vm5397_vm3, %v17223_v25, 0.0 }
 0x556   :  { %v5461_v39 = vsel %vm5397_vm3, %v17225_v5, 0.0  ;;  %v5563_v17 = vmul.f32 %v17225_v5, %v17225_v5  ;;  %v17232_v57 = vpop.f32.mrb[34].mxu0 }
 0x557   :  { %v5462_v63 = vadd.f32 %v5461_v39, %v5460_v43  ;;  %v5657_v4 = vadd.f32 %v5656_v7, %v5655_v42  ;;  %v17234_v34 = vpop.f32.mrb[35].mxu0  ;;  %v5566_v23 = vmul.f32 %v17232_v57, %v17232_v57  ;;  %v5662_v51 = vsel %vm5397_vm3, %v5565_v47, 0.0 }
 0x558   :  { %v5658_v0 = vsel %vm5397_vm3, %v5563_v17, 0.0  ;;  %v5463_v35 = vsel %vm5397_vm3, %v17234_v34, 0.0  ;;  %v5564_v49 = vmul.f32 %v17234_v34, %v17234_v34  ;;  %v5467_v28 = vsel %vm5397_vm3, %v17232_v57, 0.0 }
 0x559   :  { %v5659_v59 = vadd.f32 %v5658_v0, %v5657_v4  ;;  %v5464_v9 = vadd.f32 %v5463_v35, %v5462_v63  ;;  %v5664_v13 = vsel %vm5397_vm3, %v5566_v23, 0.0 }
 0x55a   :  { %v5660_v62 = vsel %vm5397_vm3, %v5564_v49, 0.0 }
 0x55b   :  { %v5466_v50 = vadd.f32 %v5465_v12, %v5464_v9  ;;  %v5661_v2 = vadd.f32 %v5660_v62, %v5659_v59 }
 0x55c   :  { %v17251_v24 = vpop.f32.mrb[36].mxu0 }
 0x55d   :  { %v5663_v3 = vadd.f32 %v5662_v51, %v5661_v2  ;;  %v17253_v29 = vpop.f32.mrb[37].mxu0  ;;  %v5468_v55 = vadd.f32 %v5467_v28, %v5466_v50  ;;  %v5569_v17 = vmul.f32 %v17251_v24, %v17251_v24  ;;  %v5473_v49 = vsel %vm5397_vm3, %v17251_v24, 0.0 }
 0x55e   :  { %v5469_v21 = vsel %vm5397_vm3, %v17253_v29, 0.0  ;;  %v5567_v20 = vmul.f32 %v17253_v29, %v17253_v29  ;;  %v17260_v42 = vpop.f32.mrb[38].mxu0 }
 0x55f   :  { %21049 = vst [vmem:[#allocation4_spill] sm:$0xff] %v17260_v42  ;;  %v5470_v43 = vadd.f32 %v5469_v21, %v5468_v55  ;;  %v5665_v7 = vadd.f32 %v5664_v13, %v5663_v3  ;;  %v17262_v39 = vpop.f32.mrb[39].mxu0  ;;  %v5570_v59 = vmul.f32 %v17260_v42, %v17260_v42  ;;  %v5670_v62 = vsel %vm5397_vm3, %v5569_v17, 0.0 }
 0x560   :  { %v5666_v63 = vsel %vm5397_vm3, %v5567_v20, 0.0  ;;  %v5471_v4 = vsel %vm5397_vm3, %v17262_v39, 0.0  ;;  %v5568_v47 = vmul.f32 %v17262_v39, %v17262_v39  ;;  %v5475_v50 = vsel %vm5397_vm3, %v17260_v42, 0.0 }
 0x561   :  { %v5667_v0 = vadd.f32 %v5666_v63, %v5665_v7  ;;  %v5472_v35 = vadd.f32 %v5471_v4, %v5470_v43  ;;  %v5672_v55 = vsel %vm5397_vm3, %v5570_v59, 0.0 }
 0x562   :  { %v5668_v9 = vsel %vm5397_vm3, %v5568_v47, 0.0 }
 0x563   :  { %v5474_v12 = vadd.f32 %v5473_v49, %v5472_v35  ;;  %v5669_v23 = vadd.f32 %v5668_v9, %v5667_v0 }
 0x564   :  { %v17279_v2 = vpop.f32.mrb[40].mxu0 }
 0x565   :  { %21050 = vst [vmem:[#allocation5_spill] sm:$0xff] %v17279_v2  ;;  %v5671_v51 = vadd.f32 %v5670_v62, %v5669_v23  ;;  %v17281_v28 = vpop.f32.mrb[41].mxu0  ;;  %v5476_v3 = vadd.f32 %v5475_v50, %v5474_v12  ;;  %v5573_v63 = vmul.f32 %v17279_v2, %v17279_v2  ;;  %v5481_v59 = vsel %vm5397_vm3, %v17279_v2, 0.0 }
 0x566   :  { %21051 = vst [vmem:[#allocation6_spill] sm:$0xff] %v17281_v28  ;;  %v5477_v13 = vsel %vm5397_vm3, %v17281_v28, 0.0  ;;  %v5571_v21 = vmul.f32 %v17281_v28, %v17281_v28  ;;  %v17288_v20 = vpop.f32.mrb[42].mxu0 }
 0x567   :  { %21052 = vst [vmem:[#allocation7_spill] sm:$0xff] %v17288_v20  ;;  %v5478_v43 = vadd.f32 %v5477_v13, %v5476_v3  ;;  %v5673_v7 = vadd.f32 %v5672_v55, %v5671_v51  ;;  %v17290_v17 = vpop.f32.mrb[43].mxu0  ;;  %v5574_v9 = vmul.f32 %v17288_v20, %v17288_v20  ;;  %v5678_v50 = vsel %vm5397_vm3, %v5573_v63, 0.0 }
 0x568   :  { %21053 = vst [vmem:[#allocation9_spill] sm:$0xff] %v17290_v17  ;;  %v5674_v4 = vsel %vm5397_vm3, %v5571_v21, 0.0  ;;  %v5479_v47 = vsel %vm5397_vm3, %v17290_v17, 0.0  ;;  %v5572_v0 = vmul.f32 %v17290_v17, %v17290_v17  ;;  %v5483_v51 = vsel %vm5397_vm3, %v17288_v20, 0.0  ;;  %v6342_v20 = vld [vmem:[#allocation3 + $0x9] sm:$0xff] }
 0x569   :  { %v5675_v35 = vadd.f32 %v5674_v4, %v5673_v7  ;;  %v5480_v49 = vadd.f32 %v5479_v47, %v5478_v43  ;;  %v5680_v43 = vsel %vm5397_vm3, %v5574_v9, 0.0 }
 0x56a   :  { %v5676_v12 = vsel %vm5397_vm3, %v5572_v0, 0.0 }
 0x56b   :  { %v5482_v23 = vadd.f32 %v5481_v59, %v5480_v49  ;;  %v5677_v62 = vadd.f32 %v5676_v12, %v5675_v35 }
 0x56c   :  { %v17307_v3 = vpop.f32.mrb[44].mxu0 }
 0x56d   :  { %21054 = vst [vmem:[#allocation10_spill] sm:$0xff] %v17307_v3  ;;  %v5679_v55 = vadd.f32 %v5678_v50, %v5677_v62  ;;  %v17309_v13 = vpop.f32.mrb[45].mxu0  ;;  %v5484_v21 = vadd.f32 %v5483_v51, %v5482_v23  ;;  %v5577_v49 = vmul.f32 %v17307_v3, %v17307_v3  ;;  %v5489_v50 = vsel %vm5397_vm3, %v17307_v3, 0.0 }
 0x56e   :  { %21055 = vst [vmem:[#allocation8_spill] sm:$0xff] %v17309_v13  ;;  %v5485_v7 = vsel %vm5397_vm3, %v17309_v13, 0.0  ;;  %v5575_v4 = vmul.f32 %v17309_v13, %v17309_v13  ;;  %v17316_v47 = vpop.f32.mrb[46].mxu0 }
 0x56f   :  { %21056 = vst [vmem:[#allocation11_spill] sm:$0xff] %v17316_v47  ;;  %v5486_v63 = vadd.f32 %v5485_v7, %v5484_v21  ;;  %v5681_v0 = vadd.f32 %v5680_v43, %v5679_v55  ;;  %v17318_v35 = vpop.f32.mrb[47].mxu0  ;;  %v5578_v51 = vmul.f32 %v17316_v47, %v17316_v47  ;;  %v5686_v7 = vsel %vm5397_vm3, %v5577_v49, 0.0 }
 0x570   :  { %21057 = vst [vmem:[#allocation12_spill] sm:$0xff] %v17318_v35  ;;  %v5682_v59 = vsel %vm5397_vm3, %v5575_v4, 0.0  ;;  %v5487_v9 = vsel %vm5397_vm3, %v17318_v35, 0.0  ;;  %v5576_v12 = vmul.f32 %v17318_v35, %v17318_v35  ;;  %v5491_v4 = vsel %vm5397_vm3, %v17316_v47, 0.0 }
 0x571   :  { %v5683_v23 = vadd.f32 %v5682_v59, %v5681_v0  ;;  %v5488_v62 = vadd.f32 %v5487_v9, %v5486_v63  ;;  %v5688_v59 = vsel %vm5397_vm3, %v5578_v51, 0.0 }
 0x572   :  { %v5684_v55 = vsel %vm5397_vm3, %v5576_v12, 0.0 }
 0x573   :  { %v5490_v21 = vadd.f32 %v5489_v50, %v5488_v62  ;;  %v5685_v43 = vadd.f32 %v5684_v55, %v5683_v23 }
 0x574   :  { %v17335_v13 = vpop.f32.mrb[48].mxu0 }
 0x575   :  { %21058 = vst [vmem:[#allocation13_spill] sm:$0xff] %v17335_v13  ;;  %v5687_v35 = vadd.f32 %v5686_v7, %v5685_v43  ;;  %v17337_v0 = vpop.f32.mrb[49].mxu0  ;;  %v5492_v63 = vadd.f32 %v5491_v4, %v5490_v21  ;;  %v5581_v55 = vmul.f32 %v17335_v13, %v17335_v13 }
 0x576   :  { %21059 = vst [vmem:[#allocation14_spill] sm:$0xff] %v17337_v0  ;;  %v5493_v9 = vsel %vm5397_vm3, %v17337_v0, 0.0  ;;  %v5579_v12 = vmul.f32 %v17337_v0, %v17337_v0  ;;  %v17344_v23 = vpop.f32.mrb[50].mxu0  ;;  %v5497_v0 = vsel %vm5397_vm3, %v17335_v13, 0.0 }
 0x577   :  { %21060 = vst [vmem:[#allocation15_spill] sm:$0xff] %v17344_v23  ;;  %v5494_v49 = vadd.f32 %v5493_v9, %v5492_v63  ;;  %v5689_v62 = vadd.f32 %v5688_v59, %v5687_v35  ;;  %v17346_v50 = vpop.f32.mrb[51].mxu0  ;;  %v5582_v35 = vmul.f32 %v17344_v23, %v17344_v23  ;;  %v5499_v47 = vsel %vm5397_vm3, %v17344_v23, 0.0 }
 0x578   :  { %21061 = vst [vmem:[#allocation16_spill] sm:$0xff] %v17346_v50  ;;  %v5690_v43 = vsel %vm5397_vm3, %v5579_v12, 0.0  ;;  %v5495_v51 = vsel %vm5397_vm3, %v17346_v50, 0.0  ;;  %v5580_v21 = vmul.f32 %v17346_v50, %v17346_v50  ;;  %v5694_v12 = vsel %vm5397_vm3, %v5581_v55, 0.0 }
 0x579   :  { %v5691_v7 = vadd.f32 %v5690_v43, %v5689_v62  ;;  %v5496_v4 = vadd.f32 %v5495_v51, %v5494_v49  ;;  %v5696_v43 = vsel %vm5397_vm3, %v5582_v35, 0.0 }
 0x57a   :  { %v5692_v63 = vsel %vm5397_vm3, %v5580_v21, 0.0 }
 0x57b   :  { %v5498_v59 = vadd.f32 %v5497_v0, %v5496_v4  ;;  %v5693_v9 = vadd.f32 %v5692_v63, %v5691_v7 }
 0x57c   :  { %v17363_v3 = vpop.f32.mrb[52].mxu0 }
 0x57d   :  { %21062 = vst [vmem:[#allocation17_spill] sm:$0xff] %v17363_v3  ;;  %v5695_v50 = vadd.f32 %v5694_v12, %v5693_v9  ;;  %v17365_v62 = vpop.f32.mrb[53].mxu0  ;;  %v5500_v49 = vadd.f32 %v5499_v47, %v5498_v59  ;;  %v5585_v63 = vmul.f32 %v17363_v3, %v17363_v3 }
 0x57e   :  { %21063 = vst [vmem:[#allocation18_spill] sm:$0xff] %v17365_v62  ;;  %v5501_v51 = vsel %vm5397_vm3, %v17365_v62, 0.0  ;;  %v5583_v0 = vmul.f32 %v17365_v62, %v17365_v62  ;;  %v17372_v21 = vpop.f32.mrb[54].mxu0  ;;  %v5505_v62 = vsel %vm5397_vm3, %v17363_v3, 0.0 }
 0x57f   :  { %21064 = vst [vmem:[#allocation19_spill] sm:$0xff] %v17372_v21  ;;  %v5502_v55 = vadd.f32 %v5501_v51, %v5500_v49  ;;  %v5697_v7 = vadd.f32 %v5696_v43, %v5695_v50  ;;  %v17374_v4 = vpop.f32.mrb[55].mxu0  ;;  %v5586_v50 = vmul.f32 %v17372_v21, %v17372_v21  ;;  %v5507_v23 = vsel %vm5397_vm3, %v17372_v21, 0.0 }
 0x580   :  { %21065 = vst [vmem:[#allocation20_spill] sm:$0xff] %v17374_v4  ;;  %v5698_v9 = vsel %vm5397_vm3, %v5583_v0, 0.0  ;;  %v5503_v47 = vsel %vm5397_vm3, %v17374_v4, 0.0  ;;  %v5584_v35 = vmul.f32 %v17374_v4, %v17374_v4  ;;  %v5702_v0 = vsel %vm5397_vm3, %v5585_v63, 0.0 }
 0x581   :  { %v5699_v59 = vadd.f32 %v5698_v9, %v5697_v7  ;;  %v5504_v12 = vadd.f32 %v5503_v47, %v5502_v55  ;;  %v5704_v9 = vsel %vm5397_vm3, %v5586_v50, 0.0 }
 0x582   :  { %v5700_v49 = vsel %vm5397_vm3, %v5584_v35, 0.0 }
 0x583   :  { %v5506_v43 = vadd.f32 %v5505_v62, %v5504_v12  ;;  %v5701_v51 = vadd.f32 %v5700_v49, %v5699_v59 }
 0x584   :  { %v17391_v13 = vpop.f32.mrb[56].mxu0 }
 0x585   :  { %21066 = vst [vmem:[#allocation21_spill] sm:$0xff] %v17391_v13  ;;  %v5703_v4 = vadd.f32 %v5702_v0, %v5701_v51  ;;  %v17393_v7 = vpop.f32.mrb[57].mxu0  ;;  %v5508_v55 = vadd.f32 %v5507_v23, %v5506_v43  ;;  %v5589_v49 = vmul.f32 %v17391_v13, %v17391_v13 }
 0x586   :  { %21067 = vst [vmem:[#allocation22_spill] sm:$0xff] %v17393_v7  ;;  %v5509_v47 = vsel %vm5397_vm3, %v17393_v7, 0.0  ;;  %v5587_v62 = vmul.f32 %v17393_v7, %v17393_v7  ;;  %v17400_v35 = vpop.f32.mrb[58].mxu0 }
 0x587   :  { %21068 = vst [vmem:[#allocation23_spill] sm:$0xff] %v17400_v35  ;;  %v5510_v63 = vadd.f32 %v5509_v47, %v5508_v55  ;;  %v5705_v59 = vadd.f32 %v5704_v9, %v5703_v4  ;;  %v17402_v12 = vpop.f32.mrb[59].mxu0  ;;  %v5590_v0 = vmul.f32 %v17400_v35, %v17400_v35  ;;  %v5513_v4 = vsel %vm5397_vm3, %v17391_v13, 0.0 }
 0x588   :  { %21069 = vst [vmem:[#allocation24_spill] sm:$0xff] %v17402_v12  ;;  %v5706_v51 = vsel %vm5397_vm3, %v5587_v62, 0.0  ;;  %v5511_v23 = vsel %vm5397_vm3, %v17402_v12, 0.0  ;;  %v5588_v50 = vmul.f32 %v17402_v12, %v17402_v12  ;;  %v5710_v62 = vsel %vm5397_vm3, %v5589_v49, 0.0 }
 0x589   :  { %v5707_v43 = vadd.f32 %v5706_v51, %v5705_v59  ;;  %v5512_v7 = vadd.f32 %v5511_v23, %v5510_v63  ;;  %v5515_v21 = vsel %vm5397_vm3, %v17400_v35, 0.0  ;;  %v5712_v59 = vsel %vm5397_vm3, %v5590_v0, 0.0  ;;  %v6341_v23 = vld [vmem:[#allocation3 + $0x1] sm:$0xff] }
 0x58a   :  { %v5708_v55 = vsel %vm5397_vm3, %v5588_v50, 0.0  ;;  %v6537_v0 = vsel %vm20984_vm5, %v16944_v36, 0 }
 0x58b   :  { %v5514_v9 = vadd.f32 %v5513_v4, %v5512_v7  ;;  %v5709_v47 = vadd.f32 %v5708_v55, %v5707_v43  ;;  %v17427_v7 = vld [vmem:[%s20923_s2] sm:$0xf]  ;;  %v6405_v4 = vpack.c.bf16 %v6342_v20, %v6341_v23  ;;  %13786 = vmatpush3.bf16.msra.mxu1 %v6537_v0 }
 0x58c   :  { %v17419_v3 = vpop.f32.mrb[60].mxu0  ;;  %21072 = vst [vmem:[#allocation27_spill] sm:$0xff] %v17427_v7  ;;  %15417 = vmatprep.subr.msk.bf16.mxu1 %vm20984_vm5, %v17427_v7 }
 0x58d   :  { %21070 = vst [vmem:[#allocation25_spill] sm:$0xff] %v17419_v3  ;;  %v5711_v51 = vadd.f32 %v5710_v62, %v5709_v47  ;;  %v17422_v12 = vpop.f32.mrb[61].mxu0  ;;  %v5516_v63 = vadd.f32 %v5515_v21, %v5514_v9  ;;  %v5593_v47 = vmul.f32 %v17419_v3, %v17419_v3  ;;  %13787 = vmatprep.mubr.msk.bf16.mxu1 %vm5397_vm3, %v6405_v4  ;;  %v5521_v20 = vsel %vm5397_vm3, %v17419_v3, 0.0 }
 0x58e   :  { %21071 = vst [vmem:[#allocation26_spill] sm:$0xff] %v17422_v12  ;;  %v5517_v49 = vsel %vm5397_vm3, %v17422_v12, 0.0  ;;  %v5591_v50 = vmul.f32 %v17422_v12, %v17422_v12  ;;  %v17433_v43 = vpop.f32.mrb[62].mxu0 }
 0x58f   :  { %21073 = vst [vmem:[#allocation28_spill] sm:$0xff] %v17433_v43  ;;  %v5518_v21 = vadd.f32 %v5517_v49, %v5516_v63  ;;  %v5713_v55 = vadd.f32 %v5712_v59, %v5711_v51  ;;  %v5019_v9 = vpop.f32.mrb[63].mxu0  ;;  %v5594_v59 = vmul.f32 %v17433_v43, %v17433_v43  ;;  %v5718_v49 = vsel %vm5397_vm3, %v5593_v47, 0.0 }
 0x590   :  { %v5714_v62 = vsel %vm5397_vm3, %v5591_v50, 0.0  ;;  %v5519_v35 = vsel %vm5397_vm3, %v5019_v9, 0.0  ;;  %v5592_v13 = vmul.f32 %v5019_v9, %v5019_v9  ;;  %v5523_v50 = vsel %vm5397_vm3, %v17433_v43, 0.0 }
 0x591   :  { %v5715_v12 = vadd.f32 %v5714_v62, %v5713_v55  ;;  %v5520_v36 = vadd.f32 %v5519_v35, %v5518_v21  ;;  %v5720_v55 = vsel %vm5397_vm3, %v5594_v59, 0.0  ;;  %v5739_v59 = vlaneseq }
 0x592   :  { %v5716_v51 = vsel %vm5397_vm3, %v5592_v13, 0.0 }
 0x593   :  { %v5522_v63 = vadd.f32 %v5521_v20, %v5520_v36  ;;  %v5717_v23 = vadd.f32 %v5716_v51, %v5715_v12 }
 0x595   :  { %v5524_v0 = vadd.f32 %v5523_v50, %v5522_v63  ;;  %v5719_v4 = vadd.f32 %v5718_v49, %v5717_v23  ;;  %v5740_v50 = vshrl.u32 %v5739_v59, 7  ;;  %v21080_v59 = vld [vmem:[#allocation8_spill] sm:$0xff] }
 0x597   :  { %v5525_v35 = vrot.slane %v5524_v0, 4  ;;  %v5721_v21 = vadd.f32 %v5720_v55, %v5719_v4 }
 0x599   :  { %v5526_v62 = vadd.f32 %v5525_v35, %v5524_v0  ;;  %v5722_v7 = vrot.slane %v5721_v21, 4 }
 0x59b   :  { %v5527_v3 = vrot.slane %v5526_v62, 2  ;;  %v5723_v2 = vadd.f32 %v5722_v7, %v5721_v21  ;;  %v5395_v7 = vld [vmem:[%s20924_s5] sm:$0x1] }
 0x59d   :  { %v5528_v17 = vadd.f32 %v5527_v3, %v5526_v62  ;;  %v5724_v28 = vrot.slane %v5723_v2, 2  ;;  %v17456_v3 = vsub.s32 0, %v5740_v50 }
 0x59f   :  { %v5529_v13 = vrot.slane %v5528_v17, 1  ;;  %v5725_v36 = vadd.f32 %v5724_v28, %v5723_v2  ;;  %21074 = vst [vmem:[#allocation29_spill] sm:$0xff] %v17456_v3  ;;  %v5396_v28 = vld [vmem:[%s20925_s6] sm:$0x1] }
 0x5a1   :  { %v5530_v12 = vadd.f32 %v5529_v13, %v5528_v17  ;;  %v5726_v20 = vrot.slane %v5725_v36, 1 }
 0x5a3   :  { %v5727_v47 = vadd.f32 %v5726_v20, %v5725_v36  ;;  %v5728_v51 = vmul.f32 0.001953125, %v5530_v12 }
 0x5a5   :  { %v5729_v42 = vmul.f32 0.001953125, %v5727_v47  ;;  %v5730_v43 = vmul.f32 %v5728_v51, %v5728_v51  ;;  %v21075_v47 = vld [vmem:[#allocation4_spill] sm:$0xff] }
 0x5a7   :  { %v5731_v63 = vsub.f32 %v5729_v42, %v5730_v43 }
 0x5a9   :  { %v5732_v23 = vmax.f32 %v5731_v63, 0.0  ;;  %v21077_v63 = vld [vmem:[#allocation9_spill] sm:$0xff] }
 0x5ab   :  { %v5733_v49 = vadd.f32 1e-05, %v5732_v23  ;;  %v21078_v23 = vld [vmem:[#allocation5_spill] sm:$0xff] }
 0x5ad   :  { %15426 = vrsqrt.f32 %v5733_v49  ;;  %v21079_v49 = vld [vmem:[#allocation7_spill] sm:$0xff] }
 0x5b7   :  { %v15427_v0 = vpop.eup %15426 }
 0x5b8   :  { %v5735_v2 = vmul.f32 %v15427_v0, %v5395_v7  ;;  %v21081_v7 = vld [vmem:[#allocation12_spill] sm:$0xff] }
 0x5ba   :  { %v5736_v17 = vmul.f32 %v5735_v2, %v5728_v51  ;;  %v17462_v42 = vrot.slane %v5735_v2, %v17456_v3  ;;  %v21076_v51 = vld [vmem:[#allocation6_spill] sm:$0xff] }
 0x5bb   :  { %v21082_v2 = vld [vmem:[#allocation10_spill] sm:$0xff] }
 0x5bc   :  { %v5737_v43 = vsub.f32 %v5396_v28, %v5736_v17  ;;  %v5805_v4 = vmul.f32 %v17462_v42, %v5019_v9  ;;  %v17467_v55 = vmul.f32 %v17462_v42, %v16950_v44  ;;  %v17471_v35 = vmul.f32 %v17462_v42, %v16964_v45  ;;  %v21083_v17 = vld [vmem:[#allocation11_spill] sm:$0xff] }
 0x5bd   :  { %v17475_v21 = vmul.f32 %v16946_v10, %v17462_v42  ;;  %v17479_v62 = vmul.f32 %v16958_v37, %v17462_v42  ;;  %v17483_v13 = vmul.f32 %v17462_v42, %v16985_v41  ;;  %v17487_v44 = vmul.f32 %v17462_v42, %v17002_v19 }
 0x5be   :  { %v17490_v9 = vrot.slane %v5737_v43, %v17456_v3  ;;  %v17494_v45 = vmul.f32 %v16983_v56, %v17462_v42  ;;  %v17498_v10 = vmul.f32 %v16996_v6, %v17462_v42  ;;  %v17502_v37 = vmul.f32 %v17462_v42, %v17021_v15  ;;  %v21097_v3 = vld [vmem:[#allocation22_spill] sm:$0xff] }
 0x5bf   :  { %v17506_v41 = vmul.f32 %v17462_v42, %v17038_v58  ;;  %v17510_v19 = vmul.f32 %v17019_v60, %v17462_v42  ;;  %v17514_v56 = vmul.f32 %v17032_v32, %v17462_v42  ;;  %v17518_v6 = vmul.f32 %v17462_v42, %v17057_v54 }
 0x5c0   :  { %v5875_v36 = vadd.f32 %v17490_v9, %v5805_v4  ;;  %v17523_v15 = vmul.f32 %v17462_v42, %v17074_v16  ;;  %v17527_v58 = vmul.f32 %v17055_v48, %v17462_v42  ;;  %v17531_v60 = vmul.f32 %v17068_v26, %v17462_v42  ;;  %v21084_v4 = vld [vmem:[#allocation14_spill] sm:$0xff] }
 0x5c1   :  { %v17535_v32 = vmul.f32 %v17462_v42, %v17093_v40  ;;  %v17539_v54 = vmul.f32 %v17462_v42, %v17110_v52  ;;  %v17543_v16 = vmul.f32 %v17091_v18, %v17462_v42  ;;  %v17547_v48 = vmul.f32 %v17104_v14, %v17462_v42 }
 0x5c2   :  { %vm5939_vm6 = vcmp.gt.f32.partialorder %v5875_v36, 0.0  ;;  %v6003_v12 = vmul.f32 0.2, %v5875_v36  ;;  %v17551_v26 = vmul.f32 %v17462_v42, %v17129_v11  ;;  %v17555_v40 = vmul.f32 %v17462_v42, %v17146_v22 }
 0x5c3   :  { %v17559_v52 = vmul.f32 %v17127_v53, %v17462_v42  ;;  %v17563_v18 = vmul.f32 %v17140_v33, %v17462_v42  ;;  %v17567_v14 = vmul.f32 %v17462_v42, %v17165_v27  ;;  %v17571_v11 = vmul.f32 %v17462_v42, %v17178_v30 }
 0x5c4   :  { %v6067_v20 = vsel %vm5939_vm6, %v5875_v36, %v6003_v12  ;;  %v17575_v22 = vmul.f32 %v17163_v8, %v17462_v42  ;;  %v17579_v53 = vmul.f32 %v17176_v1, %v17462_v42  ;;  %v17583_v33 = vmul.f32 %v17462_v42, %v17197_v61  ;;  %v21085_v12 = vld [vmem:[#allocation16_spill] sm:$0xff] }
 0x5c5   :  { %6241 = vst.msk [vmem:[#allocation3 + $0x321] sm:$0xff] %vm5397_vm3, %v6067_v20  ;;  %v17588_v27 = vmul.f32 %v17462_v42, %v17206_v31  ;;  %v17592_v30 = vmul.f32 %v17195_v38, %v17462_v42  ;;  %v17596_v8 = vmul.f32 %v17204_v46, %v17462_v42  ;;  %v17600_v1 = vmul.f32 %v17462_v42, %v17225_v5 }
 0x5c6   :  { %v17604_v61 = vmul.f32 %v17462_v42, %v17234_v34  ;;  %v17608_v31 = vmul.f32 %v17223_v25, %v17462_v42  ;;  %v17612_v38 = vmul.f32 %v17232_v57, %v17462_v42  ;;  %v17616_v46 = vmul.f32 %v17462_v42, %v17253_v29 }
 0x5c7   :  { %v17620_v5 = vmul.f32 %v17462_v42, %v17262_v39  ;;  %v17624_v34 = vmul.f32 %v17251_v24, %v17462_v42  ;;  %v17628_v25 = vmul.f32 %v21075_v47, %v17462_v42  ;;  %v17632_v57 = vmul.f32 %v17462_v42, %v21076_v51  ;;  %v21086_v47 = vld [vmem:[#allocation13_spill] sm:$0xff] }
 0x5c8   :  { %v17636_v29 = vmul.f32 %v17462_v42, %v21077_v63  ;;  %v17640_v39 = vmul.f32 %v21078_v23, %v17462_v42  ;;  %v17644_v24 = vmul.f32 %v21079_v49, %v17462_v42  ;;  %v17648_v50 = vmul.f32 %v17462_v42, %v21080_v59  ;;  %v21087_v63 = vld [vmem:[#allocation15_spill] sm:$0xff]  ;;  %v21089_v49 = vld [vmem:[#allocation18_spill] sm:$0xff] }
 0x5c9   :  { %v17652_v0 = vmul.f32 %v17462_v42, %v21081_v7  ;;  %v17656_v28 = vmul.f32 %v21082_v2, %v17462_v42  ;;  %v17660_v43 = vmul.f32 %v21083_v17, %v17462_v42  ;;  %v17664_v36 = vmul.f32 %v17462_v42, %v21084_v4  ;;  %v21091_v7 = vld [vmem:[#allocation20_spill] sm:$0xff]  ;;  %v21093_v17 = vld [vmem:[#allocation17_spill] sm:$0xff] }
 0x5ca   :  { %v17668_v20 = vmul.f32 %v17462_v42, %v21085_v12  ;;  %v17672_v51 = vmul.f32 %v21086_v47, %v17462_v42  ;;  %v17676_v23 = vmul.f32 %v21087_v63, %v17462_v42  ;;  %v17680_v59 = vmul.f32 %v17462_v42, %v21089_v49  ;;  %v21095_v12 = vld [vmem:[#allocation19_spill] sm:$0xff] }
 0x5cb   :  { %v17684_v2 = vmul.f32 %v17462_v42, %v21091_v7  ;;  %v17688_v4 = vmul.f32 %v21093_v17, %v17462_v42  ;;  %v17692_v47 = vmul.f32 %v21095_v12, %v17462_v42  ;;  %v17696_v63 = vmul.f32 %v17462_v42, %v21097_v3 }
 0x5cc   :  { %21088 = vst [vmem:[#allocation4_spill] sm:$0xff] %v17676_v23  ;;  %21090 = vst [vmem:[#allocation6_spill] sm:$0xff] %v17680_v59  ;;  %v21099_v23 = vld [vmem:[#allocation24_spill] sm:$0xff]  ;;  %v21100_v59 = vld [vmem:[#allocation21_spill] sm:$0xff] }
 0x5cd   :  { %21092 = vst [vmem:[#allocation9_spill] sm:$0xff] %v17684_v2  ;;  %21094 = vst [vmem:[#allocation5_spill] sm:$0xff] %v17688_v4  ;;  %v17700_v49 = vmul.f32 %v17462_v42, %v21099_v23  ;;  %v17704_v7 = vmul.f32 %v21100_v59, %v17462_v42  ;;  %v21101_v2 = vld [vmem:[#allocation23_spill] sm:$0xff]  ;;  %v21102_v4 = vld [vmem:[#allocation26_spill] sm:$0xff]  ;;  %v17724_v59 = vadd.f32 %v17490_v9, %v17467_v55 }
 0x5ce   :  { %21096 = vst [vmem:[#allocation7_spill] sm:$0xff] %v17692_v47  ;;  %21098 = vst [vmem:[#allocation8_spill] sm:$0xff] %v17696_v63  ;;  %v17708_v17 = vmul.f32 %v21101_v2, %v17462_v42  ;;  %v17712_v12 = vmul.f32 %v17462_v42, %v21102_v4  ;;  %v21103_v47 = vld [vmem:[#allocation25_spill] sm:$0xff]  ;;  %v21104_v63 = vld [vmem:[#allocation28_spill] sm:$0xff]  ;;  %v17728_v2 = vadd.f32 %v17490_v9, %v17471_v35 }
 0x5cf   :  { %v17716_v3 = vmul.f32 %v21103_v47, %v17462_v42  ;;  %v17720_v23 = vmul.f32 %v21104_v63, %v17462_v42  ;;  %v17732_v4 = vadd.f32 %v17490_v9, %v17475_v21  ;;  %v17736_v47 = vadd.f32 %v17490_v9, %v17479_v62 }
 0x5d0   :  { %v17740_v42 = vadd.f32 %v17490_v9, %v17483_v13  ;;  %v17744_v55 = vadd.f32 %v17490_v9, %v17487_v44  ;;  %v17748_v35 = vadd.f32 %v17490_v9, %v17494_v45  ;;  %v17752_v21 = vadd.f32 %v17490_v9, %v17498_v10 }
 0x5d1   :  { %v17756_v62 = vadd.f32 %v17490_v9, %v17502_v37  ;;  %v17760_v13 = vadd.f32 %v17490_v9, %v17506_v41  ;;  %v17764_v44 = vadd.f32 %v17490_v9, %v17510_v19  ;;  %v17768_v45 = vadd.f32 %v17490_v9, %v17514_v56 }
 0x5d2   :  { %v17772_v10 = vadd.f32 %v17490_v9, %v17518_v6  ;;  %v17776_v37 = vadd.f32 %v17490_v9, %v17523_v15  ;;  %v17780_v41 = vadd.f32 %v17490_v9, %v17527_v58  ;;  %v17784_v19 = vadd.f32 %v17490_v9, %v17531_v60 }
 0x5d3   :  { %v17788_v56 = vadd.f32 %v17490_v9, %v17535_v32  ;;  %v17792_v6 = vadd.f32 %v17490_v9, %v17539_v54  ;;  %v17796_v15 = vadd.f32 %v17490_v9, %v17543_v16  ;;  %v17800_v58 = vadd.f32 %v17490_v9, %v17547_v48  ;;  %v21111_v63 = vld [vmem:[#allocation4_spill] sm:$0xff] }
 0x5d4   :  { %v17804_v60 = vadd.f32 %v17490_v9, %v17551_v26  ;;  %v17808_v32 = vadd.f32 %v17490_v9, %v17555_v40  ;;  %v17812_v54 = vadd.f32 %v17490_v9, %v17559_v52  ;;  %v17816_v16 = vadd.f32 %v17490_v9, %v17563_v18 }
 0x5d5   :  { %v17820_v48 = vadd.f32 %v17490_v9, %v17567_v14  ;;  %v17824_v26 = vadd.f32 %v17490_v9, %v17571_v11  ;;  %v17828_v40 = vadd.f32 %v17490_v9, %v17575_v22  ;;  %v17832_v52 = vadd.f32 %v17490_v9, %v17579_v53 }
 0x5d6   :  { %v17836_v18 = vadd.f32 %v17490_v9, %v17583_v33  ;;  %v17840_v14 = vadd.f32 %v17490_v9, %v17588_v27  ;;  %v17844_v11 = vadd.f32 %v17490_v9, %v17592_v30  ;;  %v17848_v22 = vadd.f32 %v17490_v9, %v17596_v8 }
 0x5d7   :  { %v17852_v53 = vadd.f32 %v17490_v9, %v17600_v1  ;;  %v17856_v33 = vadd.f32 %v17490_v9, %v17604_v61  ;;  %v17860_v27 = vadd.f32 %v17490_v9, %v17608_v31  ;;  %v17864_v30 = vadd.f32 %v17490_v9, %v17612_v38 }
 0x5d8   :  { %v17868_v8 = vadd.f32 %v17490_v9, %v17616_v46  ;;  %v17872_v1 = vadd.f32 %v17490_v9, %v17620_v5  ;;  %v17876_v61 = vadd.f32 %v17490_v9, %v17624_v34  ;;  %v17880_v31 = vadd.f32 %v17490_v9, %v17628_v25 }
 0x5d9   :  { %v17884_v38 = vadd.f32 %v17490_v9, %v17632_v57  ;;  %v17888_v46 = vadd.f32 %v17490_v9, %v17636_v29  ;;  %v17892_v5 = vadd.f32 %v17490_v9, %v17640_v39  ;;  %v17896_v34 = vadd.f32 %v17490_v9, %v17644_v24 }
 0x5da   :  { %v17900_v25 = vadd.f32 %v17490_v9, %v17648_v50  ;;  %v17904_v57 = vadd.f32 %v17490_v9, %v17652_v0  ;;  %v17908_v29 = vadd.f32 %v17490_v9, %v17656_v28  ;;  %v17912_v39 = vadd.f32 %v17490_v9, %v17660_v43 }
 0x5db   :  { %21105 = vst [vmem:[#allocation12_spill] sm:$0xff] %v17892_v5  ;;  %v17916_v24 = vadd.f32 %v17490_v9, %v17664_v36  ;;  %v17920_v50 = vadd.f32 %v17490_v9, %v17668_v20  ;;  %v17924_v0 = vadd.f32 %v17490_v9, %v17672_v51  ;;  %v17928_v28 = vadd.f32 %v17490_v9, %v21111_v63 }
 0x5dc   :  { %21106 = vst [vmem:[#allocation10_spill] sm:$0xff] %v17908_v29  ;;  %21107 = vst [vmem:[#allocation11_spill] sm:$0xff] %v17912_v39  ;;  %v21112_v29 = vld [vmem:[#allocation6_spill] sm:$0xff]  ;;  %v21114_v39 = vld [vmem:[#allocation9_spill] sm:$0xff]  ;;  %vm5878_vm7 = vcmp.gt.f32.partialorder %v17724_v59, 0.0  ;;  %vm5879_vm8 = vcmp.gt.f32.partialorder %v17728_v2, 0.0 }
 0x5dd   :  { %21108 = vst [vmem:[#allocation14_spill] sm:$0xff] %v17916_v24  ;;  %21109 = vst [vmem:[#allocation16_spill] sm:$0xff] %v17920_v50  ;;  %v17932_v43 = vadd.f32 %v17490_v9, %v21112_v29  ;;  %v17936_v36 = vadd.f32 %v17490_v9, %v21114_v39  ;;  %v21116_v24 = vld [vmem:[#allocation5_spill] sm:$0xff]  ;;  %v21118_v50 = vld [vmem:[#allocation7_spill] sm:$0xff]  ;;  %v17952_v29 = vadd.f32 %v17490_v9, %v17700_v49  ;;  %vm5880_vm9 = vcmp.gt.f32.partialorder %v17732_v4, 0.0 }
 0x5de   :  { %21110 = vst [vmem:[#allocation13_spill] sm:$0xff] %v17924_v0  ;;  %v17940_v20 = vadd.f32 %v17490_v9, %v21116_v24  ;;  %v17944_v51 = vadd.f32 %v17490_v9, %v21118_v50  ;;  %v21120_v0 = vld [vmem:[#allocation8_spill] sm:$0xff]  ;;  %v17956_v39 = vadd.f32 %v17490_v9, %v17704_v7  ;;  %v17960_v24 = vadd.f32 %v17490_v9, %v17708_v17 }
 0x5df   :  { %21113 = vst [vmem:[#allocation15_spill] sm:$0xff] %v17932_v43  ;;  %21115 = vst [vmem:[#allocation18_spill] sm:$0xff] %v17936_v36  ;;  %v17948_v63 = vadd.f32 %v17490_v9, %v21120_v0  ;;  %v17964_v50 = vadd.f32 %v17490_v9, %v17712_v12  ;;  %v17968_v0 = vadd.f32 %v17490_v9, %v17716_v3  ;;  %vm5881_vm10 = vcmp.gt.f32.partialorder %v17736_v47, 0.0 }
 0x5e0   :  { %21117 = vst [vmem:[#allocation20_spill] sm:$0xff] %v17940_v20  ;;  %21119 = vst [vmem:[#allocation17_spill] sm:$0xff] %v17944_v51  ;;  %v17972_v49 = vadd.f32 %v17490_v9, %v17720_v23  ;;  %vm5882_vm11 = vcmp.gt.f32.partialorder %v17740_v42, 0.0  ;;  %vm5883_vm12 = vcmp.gt.f32.partialorder %v17744_v55, 0.0  ;;  %vm5884_vm13 = vcmp.gt.f32.partialorder %v17748_v35, 0.0 }
 0x5e1   :  { %21121 = vst [vmem:[#allocation19_spill] sm:$0xff] %v17948_v63  ;;  %21122 = vst [vmem:[#allocation22_spill] sm:$0xff] %v17952_v29  ;;  %vm5885_vm14 = vcmp.gt.f32.partialorder %v17752_v21, 0.0  ;;  %vm5886_vm15 = vcmp.gt.f32.partialorder %v17756_v62, 0.0  ;;  %vm5887_vm0 = vcmp.gt.f32.partialorder %v17760_v13, 0.0  ;;  %vm5888_vm1 = vcmp.gt.f32.partialorder %v17764_v44, 0.0 }
 0x5e2   :  { %21123 = vst [vmem:[#allocation24_spill] sm:$0xff] %v17956_v39  ;;  %21124 = vst [vmem:[#allocation21_spill] sm:$0xff] %v17960_v24  ;;  %v5942_v9 = vmul.f32 0.2, %v17724_v59  ;;  %v5943_v7 = vmul.f32 0.2, %v17728_v2 }
 0x5e3   :  { %21125 = vst [vmem:[#allocation23_spill] sm:$0xff] %v17964_v50  ;;  %21126 = vst [vmem:[#allocation26_spill] sm:$0xff] %v17968_v0  ;;  %v5944_v17 = vmul.f32 0.2, %v17732_v4  ;;  %v5945_v12 = vmul.f32 0.2, %v17736_v47 }
 0x5e4   :  { %21127 = vst [vmem:[#allocation25_spill] sm:$0xff] %v17972_v49  ;;  %v5946_v3 = vmul.f32 0.2, %v17740_v42  ;;  %v5947_v23 = vmul.f32 0.2, %v17744_v55  ;;  %vm5889_vm2 = vcmp.gt.f32.partialorder %v17768_v45, 0.0  ;;  %v6006_v24 = vsel %vm5878_vm7, %v17724_v59, %v5942_v9 }
 0x5e5   :  { %v5948_v49 = vmul.f32 0.2, %v17748_v35  ;;  %v5949_v0 = vmul.f32 0.2, %v17752_v21  ;;  %v5950_v50 = vmul.f32 0.2, %v17756_v62  ;;  %v6007_v51 = vsel %vm5879_vm8, %v17728_v2, %v5943_v7 }
 0x5e6   :  { %vm5890_vm4 = vcmp.gt.f32.partialorder %v17772_v10, 0.0  ;;  %v5951_v39 = vmul.f32 0.2, %v17760_v13  ;;  %v18001_v29 = vmul.f32 0.2, %v17764_v44  ;;  %6180 = vst.msk [vmem:[#allocation3 + $0x19] sm:$0xff] %vm5397_vm3, %v6006_v24  ;;  %v6008_v36 = vsel %vm5880_vm9, %v17732_v4, %v5944_v17 }
 0x5e7   :  { %v18004_v63 = vmul.f32 0.2, %v17768_v45  ;;  %vm5891_vm6 = vcmp.gt.f32.partialorder %v17776_v37, 0.0  ;;  %v18012_v59 = vmul.f32 0.2, %v17772_v10  ;;  %6181 = vst.msk [vmem:[#allocation3 + $0x21] sm:$0xff] %vm5397_vm3, %v6007_v51  ;;  %v6009_v43 = vsel %vm5881_vm10, %v17736_v47, %v5945_v12 }
 0x5e8   :  { %v18015_v9 = vmul.f32 0.2, %v17776_v37  ;;  %v18018_v20 = vmul.f32 0.2, %v17780_v41  ;;  %vm5892_vm7 = vcmp.gt.f32.partialorder %v17780_v41, 0.0  ;;  %6182 = vst.msk [vmem:[#allocation3 + $0x31] sm:$0xff] %vm5397_vm3, %v6008_v36 }
 0x5e9   :  { %v18026_v2 = vmul.f32 0.2, %v17784_v19  ;;  %v18029_v24 = vmul.f32 0.2, %v17788_v56  ;;  %v18032_v7 = vmul.f32 0.2, %v17792_v6 }
 0x5ea   :  { %vm5893_vm8 = vcmp.gt.f32.partialorder %v17784_v19, 0.0  ;;  %v18040_v4 = vmul.f32 0.2, %v17796_v15  ;;  %v18043_v51 = vmul.f32 0.2, %v17800_v58  ;;  %6183 = vst.msk [vmem:[#allocation3 + $0x39] sm:$0xff] %vm5397_vm3, %v6009_v43 }
 0x5eb   :  { %21128 = vst [vmem:[#allocation28_spill] sm:$0xff] %v18032_v7  ;;  %v18046_v17 = vmul.f32 0.2, %v17804_v60  ;;  %v6010_v7 = vsel %vm5882_vm11, %v17740_v42, %v5946_v3  ;;  %vm5894_vm9 = vcmp.gt.f32.partialorder %v17788_v56, 0.0  ;;  %v18054_v47 = vmul.f32 0.2, %v17808_v32 }
 0x5ec   :  { %v18057_v36 = vmul.f32 0.2, %v17812_v54  ;;  %v18060_v12 = vmul.f32 0.2, %v17816_v16  ;;  %6184 = vst.msk [vmem:[#allocation3 + $0x49] sm:$0xff] %vm5397_vm3, %v6010_v7  ;;  %vm5895_vm10 = vcmp.gt.f32.partialorder %v17792_v6, 0.0 }
 0x5ed   :  { %21129 = vst [vmem:[#allocation4_spill] sm:$0xff] %v18046_v17  ;;  %v6011_v17 = vsel %vm5883_vm12, %v17744_v55, %v5947_v23  ;;  %v18068_v42 = vmul.f32 0.2, %v17820_v48  ;;  %v18071_v43 = vmul.f32 0.2, %v17824_v26  ;;  %vm5897_vm12 = vcmp.gt.f32.partialorder %v17800_v58, 0.0 }
 0x5ee   :  { %21130 = vst [vmem:[#allocation6_spill] sm:$0xff] %v18060_v12  ;;  %v18074_v3 = vmul.f32 0.2, %v17828_v40  ;;  %v6012_v12 = vsel %vm5884_vm13, %v17748_v35, %v5948_v49  ;;  %6185 = vst.msk [vmem:[#allocation3 + $0x51] sm:$0xff] %vm5397_vm3, %v6011_v17  ;;  %v18082_v55 = vmul.f32 0.2, %v17832_v52 }
 0x5ef   :  { %v18085_v23 = vmul.f32 0.2, %v17836_v18  ;;  %v18088_v7 = vmul.f32 0.2, %v17840_v14  ;;  %6186 = vst.msk [vmem:[#allocation3 + $0x61] sm:$0xff] %vm5397_vm3, %v6012_v12  ;;  %vm21172_vm5 = vcmp.gt.f32.partialorder %v17804_v60, 0.0 }
 0x5f0   :  { %21131 = vst [vmem:[#allocation9_spill] sm:$0xff] %v18074_v3  ;;  %v6013_v3 = vsel %vm5885_vm14, %v17752_v21, %v5949_v0  ;;  %v18099_v35 = vmul.f32 0.2, %v17844_v11  ;;  %v18102_v49 = vmul.f32 0.2, %v17848_v22  ;;  %v6014_v21 = vsel %vm5886_vm15, %v17756_v62, %v5950_v50 }
 0x5f1   :  { %v18105_v17 = vmul.f32 0.2, %v17852_v53  ;;  %6187 = vst.msk [vmem:[#allocation3 + $0x69] sm:$0xff] %vm5397_vm3, %v6013_v3  ;;  %vm5901_vm14 = vcmp.gt.f32.partialorder %v17816_v16, 0.0  ;;  %v18116_v0 = vmul.f32 0.2, %v17856_v33  ;;  %v6015_v62 = vsel %vm5887_vm0, %v17760_v13, %v5951_v39 }
 0x5f2   :  { %v18119_v12 = vmul.f32 0.2, %v17860_v27  ;;  %6188 = vst.msk [vmem:[#allocation3 + $0x79] sm:$0xff] %vm5397_vm3, %v6014_v21  ;;  %vm5905_vm15 = vcmp.gt.f32.partialorder %v17832_v52, 0.0  ;;  %v18133_v50 = vmul.f32 0.2, %v17868_v8  ;;  %v6016_v13 = vsel %vm5888_vm1, %v17764_v44, %v18001_v29 }
 0x5f3   :  { %21132 = vst [vmem:[#allocation5_spill] sm:$0xff] %v18105_v17  ;;  %v18122_v17 = vmul.f32 0.2, %v17864_v30  ;;  %v18136_v3 = vmul.f32 0.2, %v17872_v1  ;;  %6189 = vst.msk [vmem:[#allocation3 + $0x81] sm:$0xff] %vm5397_vm3, %v6015_v62  ;;  %v6017_v44 = vsel %vm5889_vm2, %v17768_v45, %v18004_v63  ;;  %v6018_v45 = vsel %vm5890_vm4, %v17772_v10, %v18012_v59 }
 0x5f4   :  { %vm5909_vm0 = vcmp.gt.f32.partialorder %v17848_v22, 0.0  ;;  %v18151_v39 = vmul.f32 0.2, %v17880_v31  ;;  %v18154_v21 = vmul.f32 0.2, %v17884_v38  ;;  %6190 = vst.msk [vmem:[#allocation3 + $0x91] sm:$0xff] %vm5397_vm3, %v6016_v13  ;;  %v6019_v10 = vsel %vm5891_vm6, %v17776_v37, %v18015_v9 }
 0x5f5   :  { %21133 = vst [vmem:[#allocation7_spill] sm:$0xff] %v18122_v17  ;;  %v18139_v17 = vmul.f32 0.2, %v17876_v61  ;;  %vm5913_vm1 = vcmp.gt.f32.partialorder %v17864_v30, 0.0  ;;  %v18169_v29 = vmul.f32 0.2, %v17892_v5  ;;  %v6020_v37 = vsel %vm5892_vm7, %v17780_v41, %v18018_v20 }
 0x5f6   :  { %v18172_v62 = vmul.f32 0.2, %v17896_v34  ;;  %6191 = vst.msk [vmem:[#allocation3 + $0x99] sm:$0xff] %vm5397_vm3, %v6017_v44  ;;  %vm5917_vm2 = vcmp.gt.f32.partialorder %v17880_v31, 0.0  ;;  %v18187_v63 = vmul.f32 0.2, %v17904_v57  ;;  %v6021_v41 = vsel %vm5893_vm8, %v17784_v19, %v18026_v2 }
 0x5f7   :  { %21134 = vst [vmem:[#allocation8_spill] sm:$0xff] %v18139_v17  ;;  %v18157_v17 = vmul.f32 0.2, %v17888_v46  ;;  %21136 = vst [vmem:[#allocation31_spill] sm:$0xff] %v18169_v29  ;;  %v21140_v13 = vld [vmem:[#allocation10_spill] sm:$0xff]  ;;  %vm5921_vm4 = vcmp.gt.f32.partialorder %v17896_v34, 0.0  ;;  %v6022_v19 = vsel %vm5894_vm9, %v17788_v56, %v18029_v24 }
 0x5f8   :  { %21137 = vst [vmem:[#allocation32_spill] sm:$0xff] %v18172_v62  ;;  %21139 = vst [vmem:[#allocation34_spill] sm:$0xff] %v18187_v63  ;;  %v21142_v62 = vld [vmem:[#allocation11_spill] sm:$0xff]  ;;  %v21144_v59 = vld [vmem:[#allocation14_spill] sm:$0xff]  ;;  %v18223_v9 = vmul.f32 0.2, %v17928_v28 }
 0x5f9   :  { %21135 = vst [vmem:[#allocation30_spill] sm:$0xff] %v18157_v17  ;;  %v18175_v17 = vmul.f32 0.2, %v17900_v25  ;;  %v18193_v29 = vmul.f32 0.2, %v21142_v62  ;;  %6192 = vst.msk [vmem:[#allocation3 + $0xa9] sm:$0xff] %vm5397_vm3, %v6018_v45 }
 0x5fa   :  { %v18205_v44 = vmul.f32 0.2, %v21144_v59  ;;  %v21148_v63 = vld [vmem:[#allocation13_spill] sm:$0xff]  ;;  %6193 = vst.msk [vmem:[#allocation3 + $0xb1] sm:$0xff] %vm5397_vm3, %v6019_v10  ;;  %vm5925_vm6 = vcmp.gt.f32.partialorder %v21142_v62, 0.0  ;;  %21150 = vst [vmem:[#allocation36_spill] sm:$0xff] %v18223_v9 }
 0x5fb   :  { %21138 = vst [vmem:[#allocation33_spill] sm:$0xff] %v18175_v17  ;;  %v18190_v17 = vmul.f32 0.2, %v21140_v13  ;;  %21143 = vst [vmem:[#allocation11_spill] sm:$0xff] %v18193_v29  ;;  %v18211_v5 = vmul.f32 0.2, %v21148_v63 }
 0x5fc   :  { %21145 = vst [vmem:[#allocation14_spill] sm:$0xff] %v18205_v44  ;;  %v21151_v45 = vld [vmem:[#allocation15_spill] sm:$0xff]  ;;  %6194 = vst.msk [vmem:[#allocation3 + $0xc1] sm:$0xff] %vm5397_vm3, %v6020_v37  ;;  %vm5929_vm7 = vcmp.gt.f32.partialorder %v17928_v28, 0.0  ;;  %v21155_v20 = vld [vmem:[#allocation20_spill] sm:$0xff]  ;;  %vm21173_vm13 = vcmp.gt.f32.partialorder %v17808_v32, 0.0 }
 0x5fd   :  { %21141 = vst [vmem:[#allocation10_spill] sm:$0xff] %v18190_v17  ;;  %v21146_v17 = vld [vmem:[#allocation16_spill] sm:$0xff]  ;;  %21149 = vst [vmem:[#allocation35_spill] sm:$0xff] %v18211_v5  ;;  %v18226_v5 = vmul.f32 0.2, %v21151_v45  ;;  %v21159_v9 = vld [vmem:[#allocation19_spill] sm:$0xff] }
 0x5fe   :  { %v18208_v29 = vmul.f32 0.2, %v21146_v17  ;;  %v18241_v10 = vmul.f32 0.2, %v21155_v20  ;;  %v18247_v63 = vmul.f32 0.2, %v21159_v9 }
 0x5ff   :  { %21152 = vst [vmem:[#allocation15_spill] sm:$0xff] %v18226_v5  ;;  %v21157_v5 = vld [vmem:[#allocation17_spill] sm:$0xff]  ;;  %6195 = vst.msk [vmem:[#allocation3 + $0xc9] sm:$0xff] %vm5397_vm3, %v6021_v41  ;;  %v21161_v2 = vld [vmem:[#allocation22_spill] sm:$0xff] }
 0x600   :  { %21147 = vst [vmem:[#allocation16_spill] sm:$0xff] %v18208_v29  ;;  %v21153_v29 = vld [vmem:[#allocation18_spill] sm:$0xff]  ;;  %21156 = vst [vmem:[#allocation37_spill] sm:$0xff] %v18241_v10  ;;  %vm5933_vm8 = vcmp.gt.f32.partialorder %v21157_v5, 0.0  ;;  %v21162_v37 = vld [vmem:[#allocation24_spill] sm:$0xff] }
 0x601   :  { %v18229_v44 = vmul.f32 0.2, %v21153_v29  ;;  %21160 = vst [vmem:[#allocation38_spill] sm:$0xff] %v18247_v63  ;;  %v18262_v63 = vmul.f32 0.2, %v21162_v37  ;;  %v21164_v20 = vld [vmem:[#allocation21_spill] sm:$0xff] }
 0x602   :  { %v18265_v10 = vmul.f32 0.2, %v21164_v20  ;;  %v21166_v56 = vld [vmem:[#allocation28_spill] sm:$0xff]  ;;  %6196 = vst.msk [vmem:[#allocation3 + $0xd9] sm:$0xff] %vm5397_vm3, %v6022_v19  ;;  %vm5937_vm9 = vcmp.gt.f32.partialorder %v21164_v20, 0.0  ;;  %v21167_v41 = vld [vmem:[#allocation23_spill] sm:$0xff]  ;;  %v6025_v19 = vsel %vm5897_vm12, %v17800_v58, %v18043_v51 }
 0x603   :  { %21154 = vst [vmem:[#allocation18_spill] sm:$0xff] %v18229_v44  ;;  %v18244_v44 = vmul.f32 0.2, %v21157_v5  ;;  %21163 = vst [vmem:[#allocation39_spill] sm:$0xff] %v18262_v63  ;;  %v6023_v24 = vsel %vm5895_vm10, %v17792_v6, %v21166_v56  ;;  %vm5938_vm11 = vcmp.gt.f32.partialorder %v21167_v41, 0.0  ;;  %v21168_v9 = vld [vmem:[#allocation26_spill] sm:$0xff] }
 0x604   :  { %21165 = vst [vmem:[#allocation21_spill] sm:$0xff] %v18265_v10  ;;  %v18277_v37 = vmul.f32 0.2, %v21167_v41  ;;  %v18280_v10 = vmul.f32 0.2, %v21168_v9  ;;  %vm21170_vm10 = vcmp.gt.f32.partialorder %v17796_v15, 0.0 }
 0x605   :  { %21158 = vst [vmem:[#allocation17_spill] sm:$0xff] %v18244_v44  ;;  %v18259_v44 = vmul.f32 0.2, %v21161_v2  ;;  %v21169_v2 = vld [vmem:[#allocation25_spill] sm:$0xff]  ;;  %v6024_v6 = vsel %vm21170_vm10, %v17796_v15, %v18040_v4  ;;  %6197 = vst.msk [vmem:[#allocation3 + $0xe1] sm:$0xff] %vm5397_vm3, %v6023_v24  ;;  %v21171_v56 = vld [vmem:[#allocation4_spill] sm:$0xff] }
 0x606   :  { %v18283_v63 = vmul.f32 0.2, %v21169_v2  ;;  %v6026_v9 = vsel %vm21172_vm5, %v17804_v60, %v21171_v56  ;;  %v6027_v2 = vsel %vm21173_vm13, %v17808_v32, %v18054_v47  ;;  %vm21174_vm10 = vcmp.gt.f32.partialorder %v17812_v54, 0.0  ;;  %6198 = vst.msk [vmem:[#allocation3 + $0xf1] sm:$0xff] %vm5397_vm3, %v6024_v6  ;;  %v21175_v4 = vld [vmem:[#allocation6_spill] sm:$0xff]  ;;  %v21178_v51 = vld [vmem:[#allocation9_spill] sm:$0xff] }
 0x607   :  { %v6028_v15 = vsel %vm21174_vm10, %v17812_v54, %v18057_v36  ;;  %v6029_v58 = vsel %vm5901_vm14, %v17816_v16, %v21175_v4  ;;  %vm21176_vm5 = vcmp.gt.f32.partialorder %v17820_v48, 0.0  ;;  %vm21177_vm12 = vcmp.gt.f32.partialorder %v17824_v26, 0.0  ;;  %6199 = vst.msk [vmem:[#allocation3 + $0xf9] sm:$0xff] %vm5397_vm3, %v6025_v19  ;;  %6200 = vst.msk [vmem:[#allocation3 + $0x109] sm:$0xff] %vm5397_vm3, %v6026_v9  ;;  %v21190_v36 = vld [vmem:[#allocation8_spill] sm:$0xff]  ;;  %v21218_v56 = vld [vmem:[#allocation37_spill] sm:$0xff] }
 0x608   :  { %v6030_v60 = vsel %vm21176_vm5, %v17820_v48, %v18068_v42  ;;  %v6031_v32 = vsel %vm21177_vm12, %v17824_v26, %v18071_v43  ;;  %vm21179_vm13 = vcmp.gt.f32.partialorder %v17828_v40, 0.0  ;;  %6201 = vst.msk [vmem:[#allocation3 + $0x111] sm:$0xff] %vm5397_vm3, %v6027_v2  ;;  %6202 = vst.msk [vmem:[#allocation3 + $0x121] sm:$0xff] %vm5397_vm3, %v6028_v15  ;;  %v6033_v16 = vsel %vm5905_vm15, %v17832_v52, %v18082_v55  ;;  %v21195_v43 = vld [vmem:[#allocation31_spill] sm:$0xff]  ;;  %v21196_v55 = vld [vmem:[#allocation12_spill] sm:$0xff] }
 0x609   :  { %v6032_v54 = vsel %vm21179_vm13, %v17828_v40, %v21178_v51  ;;  %vm21180_vm14 = vcmp.gt.f32.partialorder %v17836_v18, 0.0  ;;  %vm21181_vm10 = vcmp.gt.f32.partialorder %v17840_v14, 0.0  ;;  %vm21182_vm5 = vcmp.gt.f32.partialorder %v17844_v11, 0.0  ;;  %6203 = vst.msk [vmem:[#allocation3 + $0x129] sm:$0xff] %vm5397_vm3, %v6029_v58  ;;  %6204 = vst.msk [vmem:[#allocation3 + $0x139] sm:$0xff] %vm5397_vm3, %v6030_v60  ;;  %v21219_v15 = vld [vmem:[#allocation20_spill] sm:$0xff] }
 0x60a   :  { %v6034_v48 = vsel %vm21180_vm14, %v17836_v18, %v18085_v23  ;;  %v6035_v26 = vsel %vm21181_vm10, %v17840_v14, %v18088_v7  ;;  %v6036_v40 = vsel %vm21182_vm5, %v17844_v11, %v18099_v35  ;;  %6205 = vst.msk [vmem:[#allocation3 + $0x141] sm:$0xff] %vm5397_vm3, %v6031_v32  ;;  %6206 = vst.msk [vmem:[#allocation3 + $0x151] sm:$0xff] %vm5397_vm3, %v6032_v54  ;;  %v21183_v18 = vld [vmem:[#allocation5_spill] sm:$0xff]  ;;  %vm21184_vm15 = vcmp.gt.f32.partialorder %v17852_v53, 0.0  ;;  %v21201_v35 = vld [vmem:[#allocation34_spill] sm:$0xff] }
 0x60b   :  { %v6037_v52 = vsel %vm5909_vm0, %v17848_v22, %v18102_v49  ;;  %v6038_v14 = vsel %vm21184_vm15, %v17852_v53, %v21183_v18  ;;  %vm21185_vm12 = vcmp.gt.f32.partialorder %v17856_v33, 0.0  ;;  %vm21186_vm13 = vcmp.gt.f32.partialorder %v17860_v27, 0.0  ;;  %6207 = vst.msk [vmem:[#allocation3 + $0x159] sm:$0xff] %vm5397_vm3, %v6033_v16  ;;  %6208 = vst.msk [vmem:[#allocation3 + $0x169] sm:$0xff] %vm5397_vm3, %v6034_v48  ;;  %v21187_v22 = vld [vmem:[#allocation7_spill] sm:$0xff]  ;;  %v21199_v7 = vld [vmem:[#allocation33_spill] sm:$0xff] }
 0x60c   :  { %v6039_v11 = vsel %vm21185_vm12, %v17856_v33, %v18116_v0  ;;  %v6040_v47 = vsel %vm21186_vm13, %v17860_v27, %v18119_v12  ;;  %6209 = vst.msk [vmem:[#allocation3 + $0x171] sm:$0xff] %vm5397_vm3, %v6035_v26  ;;  %6210 = vst.msk [vmem:[#allocation3 + $0x181] sm:$0xff] %vm5397_vm3, %v6036_v40  ;;  %v6041_v53 = vsel %vm5913_vm1, %v17864_v30, %v21187_v22  ;;  %vm21188_vm0 = vcmp.gt.f32.partialorder %v17868_v8, 0.0  ;;  %v21203_v0 = vld [vmem:[#allocation10_spill] sm:$0xff]  ;;  %v6346_v58 = vld [vmem:[#allocation3 + $0x39] sm:$0xff] }
 0x60d   :  { %v6042_v33 = vsel %vm21188_vm0, %v17868_v8, %v18133_v50  ;;  %vm21189_vm14 = vcmp.gt.f32.partialorder %v17872_v1, 0.0  ;;  %vm21191_vm10 = vcmp.gt.f32.partialorder %v17876_v61, 0.0  ;;  %6211 = vst.msk [vmem:[#allocation3 + $0x189] sm:$0xff] %vm5397_vm3, %v6037_v52  ;;  %6212 = vst.msk [vmem:[#allocation3 + $0x1c9] sm:$0xff] %vm5397_vm3, %v6038_v14  ;;  %v6045_v30 = vsel %vm5917_vm2, %v17880_v31, %v18151_v39  ;;  %v21198_v31 = vld [vmem:[#allocation32_spill] sm:$0xff]  ;;  %v21206_v50 = vld [vmem:[#allocation14_spill] sm:$0xff] }
 0x60e   :  { %v6043_v27 = vsel %vm21189_vm14, %v17872_v1, %v18136_v3  ;;  %v6044_v42 = vsel %vm21191_vm10, %v17876_v61, %v21190_v36  ;;  %6213 = vst.msk [vmem:[#allocation3 + $0x1d1] sm:$0xff] %vm5397_vm3, %v6039_v11  ;;  %6214 = vst.msk [vmem:[#allocation3 + $0x1e1] sm:$0xff] %vm5397_vm3, %v6040_v47  ;;  %vm21192_vm1 = vcmp.gt.f32.partialorder %v17884_v38, 0.0  ;;  %v21193_v1 = vld [vmem:[#allocation30_spill] sm:$0xff]  ;;  %vm21194_vm5 = vcmp.gt.f32.partialorder %v17888_v46, 0.0  ;;  %v21208_v3 = vld [vmem:[#allocation16_spill] sm:$0xff] }
 0x60f   :  { %v6046_v8 = vsel %vm21192_vm1, %v17884_v38, %v18154_v21  ;;  %v6047_v61 = vsel %vm21194_vm5, %v17888_v46, %v21193_v1  ;;  %vm21197_vm15 = vcmp.gt.f32.partialorder %v21196_v55, 0.0  ;;  %6215 = vst.msk [vmem:[#allocation3 + $0x1e9] sm:$0xff] %vm5397_vm3, %v6041_v53  ;;  %6216 = vst.msk [vmem:[#allocation3 + $0x1f9] sm:$0xff] %vm5397_vm3, %v6042_v33  ;;  %v6049_v38 = vsel %vm5921_vm4, %v17896_v34, %v21198_v31  ;;  %v21205_v34 = vld [vmem:[#allocation11_spill] sm:$0xff]  ;;  %v21216_v6 = vld [vmem:[#allocation18_spill] sm:$0xff] }
 0x610   :  { %v6048_v23 = vsel %vm21197_vm15, %v21196_v55, %v21195_v43  ;;  %6217 = vst.msk [vmem:[#allocation3 + $0x201] sm:$0xff] %vm5397_vm3, %v6043_v27  ;;  %6218 = vst.msk [vmem:[#allocation3 + $0x211] sm:$0xff] %vm5397_vm3, %v6044_v42  ;;  %vm21200_vm2 = vcmp.gt.f32.partialorder %v17900_v25, 0.0  ;;  %vm21202_vm12 = vcmp.gt.f32.partialorder %v17904_v57, 0.0  ;;  %vm21204_vm13 = vcmp.gt.f32.partialorder %v21140_v13, 0.0  ;;  %v21210_v21 = vld [vmem:[#allocation35_spill] sm:$0xff] }
 0x611   :  { %v6050_v46 = vsel %vm21200_vm2, %v17900_v25, %v21199_v7  ;;  %v6051_v49 = vsel %vm21202_vm12, %v17904_v57, %v21201_v35  ;;  %v6052_v12 = vsel %vm21204_vm13, %v21140_v13, %v21203_v0  ;;  %6219 = vst.msk [vmem:[#allocation3 + $0x219] sm:$0xff] %vm5397_vm3, %v6045_v30  ;;  %6220 = vst.msk [vmem:[#allocation3 + $0x229] sm:$0xff] %vm5397_vm3, %v6046_v8  ;;  %vm21207_vm4 = vcmp.gt.f32.partialorder %v21144_v59, 0.0  ;;  %v21211_v13 = vld [vmem:[#allocation13_spill] sm:$0xff]  ;;  %v21222_v32 = vld [vmem:[#allocation38_spill] sm:$0xff]  ;;  %v18524_v8 = vpop.f32.mrb[0].mxu1 }
 0x612   :  { %6221 = vst.msk [vmem:[#allocation3 + $0x231] sm:$0xff] %vm5397_vm3, %v6047_v61  ;;  %6222 = vst.msk [vmem:[#allocation3 + $0x241] sm:$0xff] %vm5397_vm3, %v6048_v23  ;;  %v6053_v25 = vsel %vm5925_vm6, %v21142_v62, %v21205_v34  ;;  %v6054_v57 = vsel %vm21207_vm4, %v21144_v59, %v21206_v50  ;;  %vm21209_vm0 = vcmp.gt.f32.partialorder %v21146_v17, 0.0  ;;  %vm21212_vm14 = vcmp.gt.f32.partialorder %v21211_v13, 0.0  ;;  %v6343_v62 = vld [vmem:[#allocation3 + $0x19] sm:$0xff]  ;;  %v21221_v60 = vld [vmem:[#allocation17_spill] sm:$0xff] }
 0x613   :  { %v6055_v39 = vsel %vm21209_vm0, %v21146_v17, %v21208_v3  ;;  %v6056_v9 = vsel %vm21212_vm14, %v21211_v13, %v21210_v21  ;;  %6223 = vst.msk [vmem:[#allocation3 + $0x249] sm:$0xff] %vm5397_vm3, %v6049_v38  ;;  %6224 = vst.msk [vmem:[#allocation3 + $0x259] sm:$0xff] %vm5397_vm3, %v6050_v46  ;;  %v21213_v59 = vld [vmem:[#allocation36_spill] sm:$0xff]  ;;  %v21214_v17 = vld [vmem:[#allocation15_spill] sm:$0xff]  ;;  %vm21215_vm6 = vcmp.gt.f32.partialorder %v21151_v45, 0.0  ;;  %vm21217_vm10 = vcmp.gt.f32.partialorder %v21153_v29, 0.0 }
 0x614   :  { %6225 = vst.msk [vmem:[#allocation3 + $0x261] sm:$0xff] %vm5397_vm3, %v6051_v49  ;;  %6226 = vst.msk [vmem:[#allocation3 + $0x271] sm:$0xff] %vm5397_vm3, %v6052_v12  ;;  %v6057_v2 = vsel %vm5929_vm7, %v17928_v28, %v21213_v59  ;;  %v6058_v24 = vsel %vm21215_vm6, %v21151_v45, %v21214_v17  ;;  %v6059_v19 = vsel %vm21217_vm10, %v21153_v29, %v21216_v6  ;;  %vm21220_vm1 = vcmp.gt.f32.partialorder %v21219_v15, 0.0  ;;  %v6344_v28 = vld [vmem:[#allocation3 + $0x21] sm:$0xff]  ;;  %v6345_v45 = vld [vmem:[#allocation3 + $0x31] sm:$0xff]  ;;  %v18527_v38 = vpop.f32.mrb[1].mxu1 }
 0x615   :  { %v6060_v4 = vsel %vm21220_vm1, %v21219_v15, %v21218_v56  ;;  %6227 = vst.msk [vmem:[#allocation3 + $0x279] sm:$0xff] %vm5397_vm3, %v6053_v25  ;;  %6228 = vst.msk [vmem:[#allocation3 + $0x289] sm:$0xff] %vm5397_vm3, %v6054_v57  ;;  %v6061_v29 = vsel %vm5933_vm8, %v21157_v5, %v21221_v60  ;;  %v21223_v51 = vld [vmem:[#allocation19_spill] sm:$0xff]  ;;  %v21225_v16 = vld [vmem:[#allocation22_spill] sm:$0xff]  ;;  %v18530_v7 = vpop.f32.mrb[2].mxu1 }
 0x616   :  { %6229 = vst.msk [vmem:[#allocation3 + $0x291] sm:$0xff] %vm5397_vm3, %v6055_v39  ;;  %6230 = vst.msk [vmem:[#allocation3 + $0x2a1] sm:$0xff] %vm5397_vm3, %v6056_v9  ;;  %vm21224_vm7 = vcmp.gt.f32.partialorder %v21223_v51, 0.0  ;;  %vm21226_vm5 = vcmp.gt.f32.partialorder %v21225_v16, 0.0  ;;  %v21227_v26 = vld [vmem:[#allocation39_spill] sm:$0xff]  ;;  %v21228_v40 = vld [vmem:[#allocation24_spill] sm:$0xff] }
 0x617   :  { %v6062_v54 = vsel %vm21224_vm7, %v21223_v51, %v21222_v32  ;;  %v6063_v48 = vsel %vm21226_vm5, %v21225_v16, %v18259_v44  ;;  %vm21229_vm15 = vcmp.gt.f32.partialorder %v21228_v40, 0.0  ;;  %6231 = vst.msk [vmem:[#allocation3 + $0x2a9] sm:$0xff] %vm5397_vm3, %v6057_v2  ;;  %6232 = vst.msk [vmem:[#allocation3 + $0x2b9] sm:$0xff] %vm5397_vm3, %v6058_v24  ;;  %v21230_v5 = vld [vmem:[#allocation21_spill] sm:$0xff]  ;;  %v6066_v44 = vsel %vm5938_vm11, %v21167_v41, %v18277_v37  ;;  %v21231_v14 = vld [vmem:[#allocation26_spill] sm:$0xff]  ;;  %v18532_v46 = vpop.f32.mrb[3].mxu1 }
 0x618   :  { %v6064_v52 = vsel %vm21229_vm15, %v21228_v40, %v21227_v26  ;;  %6233 = vst.msk [vmem:[#allocation3 + $0x2c1] sm:$0xff] %vm5397_vm3, %v6059_v19  ;;  %6234 = vst.msk [vmem:[#allocation3 + $0x2d1] sm:$0xff] %vm5397_vm3, %v6060_v4  ;;  %v6065_v18 = vsel %vm5937_vm9, %v21164_v20, %v21230_v5  ;;  %vm21232_vm8 = vcmp.gt.f32.partialorder %v21231_v14, 0.0  ;;  %v21233_v47 = vld [vmem:[#allocation25_spill] sm:$0xff]  ;;  %v6406_v20 = vpack.c.bf16 %v6344_v28, %v6343_v62  ;;  %v6348_v33 = vld [vmem:[#allocation3 + $0x51] sm:$0xff]  ;;  %v18534_v0 = vpop.f32.mrb[4].mxu1 }
 0x619   :  { %v6068_v11 = vsel %vm21232_vm8, %v21231_v14, %v18280_v10  ;;  %vm21234_vm2 = vcmp.gt.f32.partialorder %v21233_v47, 0.0  ;;  %6235 = vst.msk [vmem:[#allocation3 + $0x2d9] sm:$0xff] %vm5397_vm3, %v6061_v29  ;;  %6236 = vst.msk [vmem:[#allocation3 + $0x2e9] sm:$0xff] %vm5397_vm3, %v6062_v54  ;;  %v21235_v10 = vld [vmem:[#allocation27_spill] sm:$0xff]  ;;  %vm21236_vm11 = vcmask 1043456   ;;  %v6407_v37 = vpack.c.bf16 %v6346_v58, %v6345_v45  ;;  %v6347_v53 = vld [vmem:[#allocation3 + $0x49] sm:$0xff] }
 0x61a   :  { %v6069_v22 = vsel %vm21234_vm2, %v21233_v47, %v18283_v63  ;;  %6237 = vst.msk [vmem:[#allocation3 + $0x2f1] sm:$0xff] %vm5397_vm3, %v6063_v48  ;;  %6238 = vst.msk [vmem:[#allocation3 + $0x301] sm:$0xff] %vm5397_vm3, %v6064_v52  ;;  %v6925_v63 = vsel %vm21236_vm11, %v21235_v10, 0  ;;  %v18516_v41 = vld [vmem:[%s20923_s2 + $0x8] sm:$0xf]  ;;  %13788 = vmatmul.mubr.msk.bf16.vlgmr.msra.gmra.mrb[32].mxu1 %vm5397_vm3, %v6406_v20  ;;  %v6408_v42 = vpack.c.bf16 %v6348_v33, %v6347_v53  ;;  %v6351_v1 = vld [vmem:[#allocation3 + $0x79] sm:$0xff] }
 0x61b   :  { %6239 = vst.msk [vmem:[#allocation3 + $0x309] sm:$0xff] %vm5397_vm3, %v6065_v18  ;;  %6240 = vst.msk [vmem:[#allocation3 + $0x319] sm:$0xff] %vm5397_vm3, %v6066_v44  ;;  %13852 = vmatpush3.bf16.msra.mxu1 %v6925_v63  ;;  %13791 = vmatprep.mubr.msk.bf16.mxu1 %vm5397_vm3, %v6407_v37  ;;  %v6349_v27 = vld [vmem:[#allocation3 + $0x61] sm:$0xff]  ;;  %v6350_v36 = vld [vmem:[#allocation3 + $0x69] sm:$0xff]  ;;  %v18537_v57 = vpop.f32.mrb[5].mxu1 }
 0x61c   :  { %6242 = vst.msk [vmem:[#allocation3 + $0x331] sm:$0xff] %vm5397_vm3, %v6068_v11  ;;  %6243 = vst.msk [vmem:[#allocation3 + $0x339] sm:$0xff] %vm5397_vm3, %v6069_v22  ;;  %v6409_v30 = vpack.c.bf16 %v6350_v36, %v6349_v27  ;;  %v6352_v61 = vld [vmem:[#allocation3 + $0x81] sm:$0xff]  ;;  %v6353_v43 = vld [vmem:[#allocation3 + $0x91] sm:$0xff]  ;;  %v18540_v3 = vpop.f32.mrb[6].mxu1 }
 0x61d   :  { %vm21237_vm9 = vmmov %vm21236_vm11  ;;  %21238 = vst [vmem:[#allocation28_spill] sm:$0xff] %v18524_v8  ;;  %v6354_v55 = vld [vmem:[#allocation3 + $0x99] sm:$0xff]  ;;  %v6410_v23 = vpack.c.bf16 %v6352_v61, %v6351_v1  ;;  %v6355_v35 = vld [vmem:[#allocation3 + $0xa9] sm:$0xff]  ;;  %v18542_v39 = vpop.f32.mrb[7].mxu1 }
 0x61e   :  { %15418 = vmatprep.subr.msk.bf16.mxu1 %vm21237_vm9, %v18516_v41  ;;  %v6411_v31 = vpack.c.bf16 %v6354_v55, %v6353_v43  ;;  %21239 = vst [vmem:[#allocation23_spill] sm:$0xff] %v18527_v38  ;;  %21240 = vst [vmem:[#allocation4_spill] sm:$0xff] %v18530_v7  ;;  %v6356_v49 = vld [vmem:[#allocation3 + $0xb1] sm:$0xff]  ;;  %v6357_v12 = vld [vmem:[#allocation3 + $0xc1] sm:$0xff]  ;;  %v18544_v9 = vpop.f32.mrb[8].mxu1 }
 0x61f   :  { %21241 = vst [vmem:[#allocation6_spill] sm:$0xff] %v18532_v46  ;;  %21242 = vst [vmem:[#allocation9_spill] sm:$0xff] %v18534_v0  ;;  %v6358_v34 = vld [vmem:[#allocation3 + $0xc9] sm:$0xff]  ;;  %v6412_v25 = vpack.c.bf16 %v6356_v49, %v6355_v35  ;;  %v6359_v21 = vld [vmem:[#allocation3 + $0xd9] sm:$0xff]  ;;  %v18547_v24 = vpop.f32.mrb[9].mxu1 }
 0x620   :  { %v6413_v50 = vpack.c.bf16 %v6358_v34, %v6357_v12  ;;  %21243 = vst [vmem:[#allocation5_spill] sm:$0xff] %v18537_v57  ;;  %21244 = vst [vmem:[#allocation7_spill] sm:$0xff] %v18540_v3  ;;  %v6360_v13 = vld [vmem:[#allocation3 + $0xe1] sm:$0xff]  ;;  %v6361_v62 = vld [vmem:[#allocation3 + $0xf1] sm:$0xff]  ;;  %v18550_v6 = vpop.f32.mrb[10].mxu1 }
 0x621   :  { %21245 = vst [vmem:[#allocation8_spill] sm:$0xff] %v18542_v39  ;;  %21246 = vst [vmem:[#allocation30_spill] sm:$0xff] %v18544_v9  ;;  %v6362_v59 = vld [vmem:[#allocation3 + $0xf9] sm:$0xff]  ;;  %v6414_v2 = vpack.c.bf16 %v6360_v13, %v6359_v21  ;;  %v18552_v19 = vpop.f32.mrb[11].mxu1  ;;  %v6363_v56 = vld [vmem:[#allocation3 + $0x109] sm:$0xff] }
 0x622   :  { %13792 = vmatmul.mubr.msk.bf16.gmra.mrb[36].mxu1 %vm5397_vm3, %v6408_v42  ;;  %v6415_v17 = vpack.c.bf16 %v6362_v59, %v6361_v62  ;;  %21247 = vst [vmem:[#allocation31_spill] sm:$0xff] %v18547_v24  ;;  %21248 = vst [vmem:[#allocation12_spill] sm:$0xff] %v18550_v6  ;;  %v6364_v15 = vld [vmem:[#allocation3 + $0x111] sm:$0xff]  ;;  %v18554_v4 = vpop.f32.mrb[12].mxu1  ;;  %v6365_v28 = vld [vmem:[#allocation3 + $0x121] sm:$0xff] }
 0x623   :  { %13795 = vmatprep.mubr.msk.bf16.mxu1 %vm5397_vm3, %v6409_v30  ;;  %21249 = vst [vmem:[#allocation32_spill] sm:$0xff] %v18552_v19  ;;  %21250 = vst [vmem:[#allocation33_spill] sm:$0xff] %v18554_v4  ;;  %v6366_v45 = vld [vmem:[#allocation3 + $0x129] sm:$0xff]  ;;  %v6416_v58 = vpack.c.bf16 %v6364_v15, %v6363_v56  ;;  %v18557_v29 = vpop.f32.mrb[13].mxu1  ;;  %v6367_v54 = vld [vmem:[#allocation3 + $0x139] sm:$0xff] }
 0x624   :  { %v6417_v60 = vpack.c.bf16 %v6366_v45, %v6365_v28  ;;  %21251 = vst [vmem:[#allocation34_spill] sm:$0xff] %v18557_v29  ;;  %v18560_v32 = vpop.f32.mrb[14].mxu1  ;;  %v6368_v16 = vld [vmem:[#allocation3 + $0x141] sm:$0xff]  ;;  %v6369_v26 = vld [vmem:[#allocation3 + $0x151] sm:$0xff]  ;;  %v6370_v40 = vld [vmem:[#allocation3 + $0x159] sm:$0xff] }
 0x625   :  { %21252 = vst [vmem:[#allocation10_spill] sm:$0xff] %v18560_v32  ;;  %v18562_v51 = vpop.f32.mrb[15].mxu1  ;;  %v6418_v52 = vpack.c.bf16 %v6368_v16, %v6367_v54  ;;  %v6419_v5 = vpack.c.bf16 %v6370_v40, %v6369_v26  ;;  %v6373_v14 = vld [vmem:[#allocation3 + $0x1b1] sm:$0xff]  ;;  %v6374_v11 = vld [vmem:[#allocation3 + $0x1b9] sm:$0xff]  ;;  %v6371_v22 = vld [vmem:[#allocation3 + $0x169] sm:$0xff] }
 0x626   :  { %21253 = vst [vmem:[#allocation11_spill] sm:$0xff] %v18562_v51  ;;  %v18564_v48 = vpop.f32.mrb[16].mxu1  ;;  %v6372_v20 = vld [vmem:[#allocation3 + $0x171] sm:$0xff]  ;;  %v6421_v63 = vpack.c.bf16 %v6374_v11, %v6373_v14  ;;  %v6375_v36 = vld [vmem:[#allocation3 + $0x1c9] sm:$0xff]  ;;  %v6377_v1 = vld [vmem:[#allocation3 + $0x1e1] sm:$0xff] }
 0x627   :  { %21254 = vst [vmem:[#allocation14_spill] sm:$0xff] %v18564_v48  ;;  %v18567_v18 = vpop.f32.mrb[17].mxu1  ;;  %v6420_v37 = vpack.c.bf16 %v6372_v20, %v6371_v22  ;;  %v6376_v42 = vld [vmem:[#allocation3 + $0x1d1] sm:$0xff]  ;;  %v6378_v61 = vld [vmem:[#allocation3 + $0x1e9] sm:$0xff]  ;;  %v6379_v49 = vld [vmem:[#allocation3 + $0x1f9] sm:$0xff] }
 0x628   :  { %21255 = vst [vmem:[#allocation16_spill] sm:$0xff] %v18567_v18  ;;  %v18570_v44 = vpop.f32.mrb[18].mxu1  ;;  %v6422_v43 = vpack.c.bf16 %v6376_v42, %v6375_v36  ;;  %v6423_v55 = vpack.c.bf16 %v6378_v61, %v6377_v1  ;;  %v6380_v12 = vld [vmem:[#allocation3 + $0x201] sm:$0xff]  ;;  %v6384_v56 = vld [vmem:[#allocation3 + $0x231] sm:$0xff]  ;;  %v6386_v28 = vld [vmem:[#allocation3 + $0x249] sm:$0xff] }
 0x629   :  { %21256 = vst [vmem:[#allocation35_spill] sm:$0xff] %v18570_v44  ;;  %v18572_v47 = vpop.f32.mrb[19].mxu1  ;;  %v6424_v21 = vpack.c.bf16 %v6380_v12, %v6379_v49  ;;  %v6385_v15 = vld [vmem:[#allocation3 + $0x241] sm:$0xff]  ;;  %v6389_v16 = vld [vmem:[#allocation3 + $0x271] sm:$0xff]  ;;  %v6390_v26 = vld [vmem:[#allocation3 + $0x279] sm:$0xff] }
 0x62a   :  { %13796 = vmatmul.mubr.msk.bf16.gmra.mrb[40].mxu1 %vm5397_vm3, %v6410_v23  ;;  %21257 = vst [vmem:[#allocation13_spill] sm:$0xff] %v18572_v47  ;;  %v18574_v10 = vpop.f32.mrb[20].mxu1  ;;  %v6388_v54 = vld [vmem:[#allocation3 + $0x261] sm:$0xff]  ;;  %v6392_v14 = vld [vmem:[#allocation3 + $0x291] sm:$0xff]  ;;  %v6394_v22 = vld [vmem:[#allocation3 + $0x2a9] sm:$0xff] }
 0x62b   :  { %13799 = vmatprep.mubr.msk.bf16.mxu1 %vm5397_vm3, %v6411_v31  ;;  %21258 = vst [vmem:[#allocation36_spill] sm:$0xff] %v18574_v10  ;;  %v18577_v53 = vpop.f32.mrb[21].mxu1  ;;  %v6393_v11 = vld [vmem:[#allocation3 + $0x2a1] sm:$0xff]  ;;  %v6397_v42 = vld [vmem:[#allocation3 + $0x2d1] sm:$0xff]  ;;  %v6398_v1 = vld [vmem:[#allocation3 + $0x2d9] sm:$0xff] }
 0x62c   :  { %21259 = vst [vmem:[#allocation15_spill] sm:$0xff] %v18577_v53  ;;  %v18580_v33 = vpop.f32.mrb[22].mxu1  ;;  %v6396_v36 = vld [vmem:[#allocation3 + $0x2c1] sm:$0xff]  ;;  %v6400_v49 = vld [vmem:[#allocation3 + $0x2f1] sm:$0xff]  ;;  %vm21270_vm12 = vmmov %vm21237_vm9 }
 0x62d   :  { %21260 = vst [vmem:[#allocation18_spill] sm:$0xff] %v18580_v33  ;;  %v18582_v27 = vpop.f32.mrb[23].mxu1  ;;  %v6401_v12 = vld [vmem:[#allocation3 + $0x301] sm:$0xff]  ;;  %vm21271_vm13 = vmmov %vm21237_vm9 }
 0x62e   :  { %21261 = vst [vmem:[#allocation37_spill] sm:$0xff] %v18582_v27  ;;  %v18584_v30 = vpop.f32.mrb[24].mxu1  ;;  %vm21272_vm4 = vmmov %vm21237_vm9 }
 0x62f   :  { %21262 = vst [vmem:[#allocation20_spill] sm:$0xff] %v18584_v30  ;;  %v18587_v23 = vpop.f32.mrb[25].mxu1  ;;  %vm21273_vm0 = vmmov %vm21272_vm4 }
 0x630   :  { %21263 = vst [vmem:[#allocation17_spill] sm:$0xff] %v18587_v23  ;;  %v18590_v31 = vpop.f32.mrb[26].mxu1  ;;  %vm21278_vm14 = vmmov %vm21273_vm0 }
 0x631   :  { %21264 = vst [vmem:[#allocation38_spill] sm:$0xff] %v18590_v31  ;;  %v18592_v35 = vpop.f32.mrb[27].mxu1  ;;  %vm21279_vm6 = vmmov %vm21273_vm0 }
 0x632   :  { %13800 = vmatmul.mubr.msk.bf16.gmra.mrb[44].mxu1 %vm5397_vm3, %v6412_v25  ;;  %21265 = vst [vmem:[#allocation19_spill] sm:$0xff] %v18592_v35  ;;  %v18594_v34 = vpop.f32.mrb[28].mxu1  ;;  %v6381_v25 = vld [vmem:[#allocation3 + $0x211] sm:$0xff]  ;;  %vm21280_vm10 = vmmov %vm21273_vm0 }
 0x633   :  { %13803 = vmatprep.mubr.msk.bf16.mxu1 %vm5397_vm3, %v6413_v50  ;;  %21266 = vst [vmem:[#allocation22_spill] sm:$0xff] %v18594_v34  ;;  %v6382_v50 = vld [vmem:[#allocation3 + $0x219] sm:$0xff]  ;;  %v18597_v62 = vpop.f32.mrb[29].mxu1  ;;  %vm21281_vm1 = vmmov %vm21273_vm0 }
 0x634   :  { %v6425_v13 = vpack.c.bf16 %v6382_v50, %v6381_v25  ;;  %21267 = vst [vmem:[#allocation39_spill] sm:$0xff] %v18597_v62  ;;  %v18600_v59 = vpop.f32.mrb[30].mxu1  ;;  %v6402_v25 = vld [vmem:[#allocation3 + $0x309] sm:$0xff]  ;;  %vm21284_vm7 = vmmov %vm21273_vm0 }
 0x635   :  { %21268 = vst [vmem:[#allocation24_spill] sm:$0xff] %v18600_v59  ;;  %vm21285_vm5 = vmmov %vm21273_vm0 }
 0x636   :  { %vm21290_vm15 = vmmov %vm21273_vm0 }
 0x637   :  { %vm21291_vm8 = vmmov %vm21273_vm0 }
 0x638   :  { %vm21292_vm2 = vmmov %vm21273_vm0 }
 0x63a   :  { %13804 = vmatmul.mubr.msk.bf16.gmra.mrb[48].mxu1 %vm5397_vm3, %v6414_v2  ;;  %v18602_v2 = vpop.f32.mrb[31].mxu1 }
 0x63b   :  { %13807 = vmatprep.mubr.msk.bf16.mxu1 %vm5397_vm3, %v6415_v17  ;;  %21269 = vst [vmem:[#allocation21_spill] sm:$0xff] %v18602_v2  ;;  %v6383_v17 = vld [vmem:[#allocation3 + $0x229] sm:$0xff] }
 0x63c   :  { %v6426_v45 = vpack.c.bf16 %v6384_v56, %v6383_v17  ;;  %v6245_v17 = vld [vmem:[#allocation3 + $0x8] sm:$0xff]  ;;  %v6403_v56 = vld [vmem:[#allocation3 + $0x319] sm:$0xff] }
 0x642   :  { %13808 = vmatmul.mubr.msk.bf16.gmra.mrb[52].mxu1 %vm5397_vm3, %v6416_v58  ;;  %v6427_v58 = vpack.c.bf16 %v6386_v28, %v6385_v15  ;;  %v6404_v15 = vld [vmem:[#allocation3 + $0x321] sm:$0xff] }
 0x643   :  { %13811 = vmatprep.mubr.msk.bf16.mxu1 %vm5397_vm3, %v6417_v60  ;;  %v6387_v60 = vld [vmem:[#allocation3 + $0x259] sm:$0xff] }
 0x644   :  { %v6428_v40 = vpack.c.bf16 %v6388_v54, %v6387_v60  ;;  %v6247_v60 = vld [vmem:[#allocation3 + $0x20] sm:$0xff]  ;;  %v6248_v54 = vld [vmem:[#allocation3 + $0x30] sm:$0xff] }
 0x64a   :  { %13812 = vmatmul.mubr.msk.bf16.gmra.mrb[56].mxu1 %vm5397_vm3, %v6418_v52  ;;  %v6429_v52 = vpack.c.bf16 %v6390_v26, %v6389_v16  ;;  %v6249_v16 = vld [vmem:[#allocation3 + $0x38] sm:$0xff] }
 0x64b   :  { %13815 = vmatprep.mubr.msk.bf16.mxu1 %vm5397_vm3, %v6419_v5  ;;  %v6391_v5 = vld [vmem:[#allocation3 + $0x289] sm:$0xff] }
 0x64c   :  { %v6430_v20 = vpack.c.bf16 %v6392_v14, %v6391_v5  ;;  %v18625_v5 = vld [vmem:[%s20923_s2 + $0xc] sm:$0xf] }
 0x64d   :  { %v6250_v14 = vld [vmem:[#allocation3 + $0x48] sm:$0xff]  ;;  %v7961_v33 = vsel %vm21272_vm4, %v18625_v5, 0 }
 0x652   :  { %13816 = vmatmul.mubr.msk.bf16.gmra.mrb[60].mxu1 %vm5397_vm3, %v6420_v37  ;;  %v6395_v37 = vld [vmem:[#allocation3 + $0x2b9] sm:$0xff] }
 0x653   :  { %13819 = vmatprep.mubr.msk.bf16.mxu1 %vm5397_vm3, %v6421_v63  ;;  %v6431_v63 = vpack.c.bf16 %v6394_v22, %v6393_v11  ;;  %v6432_v61 = vpack.c.bf16 %v6396_v36, %v6395_v37  ;;  %v6251_v11 = vld [vmem:[#allocation3 + $0x50] sm:$0xff]  ;;  %v6253_v22 = vld [vmem:[#allocation3 + $0x68] sm:$0xff]  ;;  %v6254_v37 = vld [vmem:[#allocation3 + $0x78] sm:$0xff] }
 0x654   :  { %v6255_v36 = vld [vmem:[#allocation3 + $0x80] sm:$0xff] }
 0x65a   :  { %13820 = vmatmul.mubr.msk.bf16.gmra.mrb[64].mxu1 %vm5397_vm3, %v6422_v43  ;;  %v6433_v43 = vpack.c.bf16 %v6398_v1, %v6397_v42  ;;  %v6256_v42 = vld [vmem:[#allocation3 + $0x90] sm:$0xff]  ;;  %v6257_v1 = vld [vmem:[#allocation3 + $0x98] sm:$0xff] }
 0x65b   :  { %13823 = vmatprep.mubr.msk.bf16.mxu1 %vm5397_vm3, %v6423_v55  ;;  %v6399_v55 = vld [vmem:[#allocation3 + $0x2e9] sm:$0xff] }
 0x65c   :  { %v6434_v50 = vpack.c.bf16 %v6400_v49, %v6399_v55  ;;  %v6258_v55 = vld [vmem:[#allocation3 + $0xa8] sm:$0xff]  ;;  %v6259_v49 = vld [vmem:[#allocation3 + $0xb0] sm:$0xff] }
 0x662   :  { %13824 = vmatmul.mubr.msk.bf16.gmra.mrb[68].mxu1 %vm5397_vm3, %v6424_v21  ;;  %v6435_v21 = vpack.c.bf16 %v6402_v25, %v6401_v12  ;;  %v6260_v12 = vld [vmem:[#allocation3 + $0xc0] sm:$0xff]  ;;  %v6261_v25 = vld [vmem:[#allocation3 + $0xc8] sm:$0xff] }
 0x663   :  { %13827 = vmatprep.mubr.msk.bf16.mxu1 %vm5397_vm3, %v6425_v13  ;;  %v6244_v13 = vld [vmem:[#allocation3] sm:$0xff] }
 0x664   :  { %v6308_v28 = vpack.c.bf16 %v6245_v17, %v6244_v13  ;;  %v6262_v13 = vld [vmem:[#allocation3 + $0xd8] sm:$0xff]  ;;  %v6263_v17 = vld [vmem:[#allocation3 + $0xe0] sm:$0xff] }
 0x66a   :  { %13828 = vmatmul.mubr.msk.bf16.gmra.mrb[72].mxu1 %vm5397_vm3, %v6426_v45  ;;  %v6436_v45 = vpack.c.bf16 %v6404_v15, %v6403_v56  ;;  %v6264_v56 = vld [vmem:[#allocation3 + $0xf0] sm:$0xff]  ;;  %v6265_v15 = vld [vmem:[#allocation3 + $0xf8] sm:$0xff] }
 0x66b   :  { %13831 = vmatprep.mubr.msk.bf16.mxu1 %vm5397_vm3, %v6427_v58  ;;  %v6246_v58 = vld [vmem:[#allocation3 + $0x18] sm:$0xff] }
 0x66c   :  { %v18616_v26 = vpack.c.bf16 %v6247_v60, %v6246_v58  ;;  %v6266_v58 = vld [vmem:[#allocation3 + $0x108] sm:$0xff]  ;;  %v6267_v60 = vld [vmem:[#allocation3 + $0x110] sm:$0xff] }
 0x672   :  { %13832 = vmatmul.mubr.msk.bf16.gmra.mrb[76].mxu1 %vm5397_vm3, %v6428_v40  ;;  %v7411_v40 = vsel %vm21270_vm12, %v18516_v41, 0  ;;  %v6252_v41 = vld [vmem:[#allocation3 + $0x60] sm:$0xff] }
 0x673   :  { %13835 = vmatprep.mubr.msk.bf16.mxu1 %vm5397_vm3, %v6429_v52  ;;  %v18620_v52 = vpack.c.bf16 %v6249_v16, %v6248_v54  ;;  %v6268_v54 = vld [vmem:[#allocation3 + $0x120] sm:$0xff]  ;;  %v6269_v16 = vld [vmem:[#allocation3 + $0x128] sm:$0xff] }
 0x67a   :  { %13836 = vmatmul.mubr.msk.bf16.gmra.mrb[80].mxu1 %vm5397_vm3, %v6430_v20  ;;  %v18633_v20 = vpack.c.bf16 %v6251_v11, %v6250_v14  ;;  %v18667_v14 = vpack.c.bf16 %v6269_v16, %v6268_v54  ;;  %v6270_v11 = vld [vmem:[#allocation3 + $0x138] sm:$0xff] }
 0x67b   :  { %13839 = vmatprep.mubr.msk.bf16.mxu1 %vm5397_vm3, %v6431_v63  ;;  %v18635_v63 = vpack.c.bf16 %v6253_v22, %v6252_v41  ;;  %v6271_v41 = vld [vmem:[#allocation3 + $0x140] sm:$0xff]  ;;  %v6272_v22 = vld [vmem:[#allocation3 + $0x150] sm:$0xff]  ;;  %v6282_v16 = vld [vmem:[#allocation3 + $0x1f8] sm:$0xff] }
 0x682   :  { %13840 = vmatmul.mubr.msk.bf16.gmra.mrb[84].mxu1 %vm5397_vm3, %v6432_v61  ;;  %v18641_v61 = vpack.c.bf16 %v6255_v36, %v6254_v37  ;;  %v6273_v37 = vld [vmem:[#allocation3 + $0x158] sm:$0xff]  ;;  %v18673_v36 = vpack.c.bf16 %v6271_v41, %v6270_v11  ;;  %v6283_v11 = vld [vmem:[#allocation3 + $0x200] sm:$0xff]  ;;  %v6284_v41 = vld [vmem:[#allocation3 + $0x210] sm:$0xff] }
 0x683   :  { %13843 = vmatprep.mubr.msk.bf16.mxu1 %vm5397_vm3, %v6433_v43  ;;  %v18643_v43 = vpack.c.bf16 %v6257_v1, %v6256_v42  ;;  %v18675_v42 = vpack.c.bf16 %v6273_v37, %v6272_v22  ;;  %v6276_v1 = vld [vmem:[#allocation3 + $0x1b0] sm:$0xff]  ;;  %v6285_v22 = vld [vmem:[#allocation3 + $0x218] sm:$0xff]  ;;  %v18694_v37 = vpack.c.bf16 %v6283_v11, %v6282_v16 }
 0x684   :  { %v6292_v16 = vld [vmem:[#allocation3 + $0x270] sm:$0xff]  ;;  %v6293_v11 = vld [vmem:[#allocation3 + $0x278] sm:$0xff] }
 0x68a   :  { %13844 = vmatmul.mubr.msk.bf16.gmra.mrb[88].mxu1 %vm5397_vm3, %v6434_v50  ;;  %v18649_v50 = vpack.c.bf16 %v6259_v49, %v6258_v55  ;;  %v6277_v55 = vld [vmem:[#allocation3 + $0x1b8] sm:$0xff]  ;;  %v6274_v49 = vld [vmem:[#allocation3 + $0x168] sm:$0xff] }
 0x68b   :  { %13847 = vmatprep.mubr.msk.bf16.mxu1 %vm5397_vm3, %v6435_v21  ;;  %v18651_v21 = vpack.c.bf16 %v6261_v25, %v6260_v12  ;;  %v6275_v12 = vld [vmem:[#allocation3 + $0x170] sm:$0xff]  ;;  %v6324_v25 = vpack.c.bf16 %v6277_v55, %v6276_v1  ;;  %v18696_v1 = vpack.c.bf16 %v6285_v22, %v6284_v41  ;;  %v6286_v55 = vld [vmem:[#allocation3 + $0x228] sm:$0xff]  ;;  %v18712_v22 = vpack.c.bf16 %v6293_v11, %v6292_v16  ;;  %v6301_v11 = vld [vmem:[#allocation3 + $0x2d8] sm:$0xff] }
 0x68c   :  { %v6300_v16 = vld [vmem:[#allocation3 + $0x2d0] sm:$0xff] }
 0x68d   :  { %v18728_v34 = vpack.c.bf16 %v6301_v11, %v6300_v16  ;;  %v6306_v16 = vld [vmem:[#allocation3 + $0x318] sm:$0xff]  ;;  %v6307_v11 = vld [vmem:[#allocation3 + $0x320] sm:$0xff] }
 0x68e   :  { %v18742_v30 = vpack.c.bf16 %v6307_v11, %v6306_v16  ;;  %v7225_v16 = vld [vmem:[#allocation3 + $0x6a] sm:$0xff] }
 0x692   :  { %13848 = vmatmul.mubr.msk.bf16.gmra.mrb[92].mxu1 %vm5397_vm3, %v6436_v45  ;;  %v18659_v45 = vpack.c.bf16 %v6265_v15, %v6264_v56  ;;  %v6279_v56 = vld [vmem:[#allocation3 + $0x1d0] sm:$0xff]  ;;  %v6280_v15 = vld [vmem:[#allocation3 + $0x1e0] sm:$0xff] }
 0x693   :  { %13853 = vmatprep.mubr.msk.bf16.mxu1 %vm5397_vm3, %v6308_v28  ;;  %v18657_v28 = vpack.c.bf16 %v6263_v17, %v6262_v13  ;;  %v18681_v13 = vpack.c.bf16 %v6275_v12, %v6274_v49  ;;  %v6278_v17 = vld [vmem:[#allocation3 + $0x1c8] sm:$0xff]  ;;  %v6287_v49 = vld [vmem:[#allocation3 + $0x230] sm:$0xff]  ;;  %v6288_v12 = vld [vmem:[#allocation3 + $0x240] sm:$0xff] }
 0x69a   :  { %13854 = vmatmul.mubr.msk.bf16.vlgmr.msra.gmra.mrb[32].mxu1 %vm5397_vm3, %v18616_v26 }
 0x69b   :  { %13918 = vmatpush3.bf16.msra.mxu1 %v7411_v40  ;;  %13857 = vmatprep.mubr.msk.bf16.mxu1 %vm5397_vm3, %v18620_v52  ;;  %v18665_v40 = vpack.c.bf16 %v6267_v60, %v6266_v58  ;;  %v6281_v58 = vld [vmem:[#allocation3 + $0x1e8] sm:$0xff]  ;;  %v18686_v60 = vpack.c.bf16 %v6279_v56, %v6278_v17  ;;  %v18702_v17 = vpack.c.bf16 %v6287_v49, %v6286_v55  ;;  %v6295_v49 = vld [vmem:[#allocation3 + $0x290] sm:$0xff] }
 0x69c   :  { %15419 = vmatprep.subr.msk.bf16.mxu1 %vm21271_vm13, %v18625_v5  ;;  %v18688_v54 = vpack.c.bf16 %v6281_v58, %v6280_v15  ;;  %v6290_v15 = vld [vmem:[#allocation3 + $0x258] sm:$0xff]  ;;  %v6291_v58 = vld [vmem:[#allocation3 + $0x260] sm:$0xff]  ;;  %v6294_v55 = vld [vmem:[#allocation3 + $0x288] sm:$0xff] }
 0x69d   :  { %v18710_v41 = vpack.c.bf16 %v6291_v58, %v6290_v15  ;;  %v18718_v2 = vpack.c.bf16 %v6295_v49, %v6294_v55  ;;  %v6298_v15 = vld [vmem:[#allocation3 + $0x2b8] sm:$0xff]  ;;  %v6299_v58 = vld [vmem:[#allocation3 + $0x2c0] sm:$0xff]  ;;  %v6302_v55 = vld [vmem:[#allocation3 + $0x2e8] sm:$0xff] }
 0x69e   :  { %v18726_v62 = vpack.c.bf16 %v6299_v58, %v6298_v15  ;;  %v6303_v49 = vld [vmem:[#allocation3 + $0x2f0] sm:$0xff]  ;;  %v7216_v15 = vld [vmem:[#allocation3 + $0x2] sm:$0xff] }
 0x69f   :  { %v18734_v35 = vpack.c.bf16 %v6303_v49, %v6302_v55  ;;  %v7217_v58 = vld [vmem:[#allocation3 + $0xa] sm:$0xff]  ;;  %v7218_v55 = vld [vmem:[#allocation3 + $0x1a] sm:$0xff]  ;;  %v7219_v49 = vld [vmem:[#allocation3 + $0x22] sm:$0xff] }
 0x6a0   :  { %v7280_v23 = vpack.c.bf16 %v7217_v58, %v7216_v15  ;;  %v18747_v27 = vpack.c.bf16 %v7219_v49, %v7218_v55  ;;  %v18756_v15 = vld [vmem:[%s20923_s2 + $0x10] sm:$0xf]  ;;  %v7224_v5 = vld [vmem:[#allocation3 + $0x62] sm:$0xff] }
 0x6a1   :  { %v7223_v58 = vld [vmem:[#allocation3 + $0x52] sm:$0xff]  ;;  %v18766_v55 = vpack.c.bf16 %v7225_v16, %v7224_v5  ;;  %v7227_v49 = vld [vmem:[#allocation3 + $0x82] sm:$0xff]  ;;  %v7233_v16 = vld [vmem:[#allocation3 + $0xca] sm:$0xff] }
 0x6a2   :  { %13858 = vmatmul.mubr.msk.bf16.gmra.mrb[36].mxu1 %vm5397_vm3, %v18633_v20  ;;  %v7232_v5 = vld [vmem:[#allocation3 + $0xc2] sm:$0xff] }
 0x6a3   :  { %13861 = vmatprep.mubr.msk.bf16.mxu1 %vm5397_vm3, %v18635_v63  ;;  %v18782_v18 = vpack.c.bf16 %v7233_v16, %v7232_v5  ;;  %v7240_v5 = vld [vmem:[#allocation3 + $0x122] sm:$0xff]  ;;  %v7241_v16 = vld [vmem:[#allocation3 + $0x12a] sm:$0xff] }
 0x6a4   :  { %v18798_v29 = vpack.c.bf16 %v7241_v16, %v7240_v5  ;;  %v7246_v5 = vld [vmem:[#allocation3 + $0x16a] sm:$0xff]  ;;  %v7247_v16 = vld [vmem:[#allocation3 + $0x172] sm:$0xff] }
 0x6a5   :  { %v18812_v24 = vpack.c.bf16 %v7247_v16, %v7246_v5  ;;  %v7256_v5 = vld [vmem:[#allocation3 + $0x212] sm:$0xff]  ;;  %v7257_v16 = vld [vmem:[#allocation3 + $0x21a] sm:$0xff] }
 0x6aa   :  { %13862 = vmatmul.mubr.msk.bf16.gmra.mrb[40].mxu1 %vm5397_vm3, %v18641_v61 }
 0x6ab   :  { %13865 = vmatprep.mubr.msk.bf16.mxu1 %vm5397_vm3, %v18643_v43 }
 0x6b2   :  { %13866 = vmatmul.mubr.msk.bf16.gmra.mrb[44].mxu1 %vm5397_vm3, %v18649_v50 }
 0x6b3   :  { %13869 = vmatprep.mubr.msk.bf16.mxu1 %vm5397_vm3, %v18651_v21 }
 0x6ba   :  { %13870 = vmatmul.mubr.msk.bf16.gmra.mrb[48].mxu1 %vm5397_vm3, %v18657_v28 }
 0x6bb   :  { %13873 = vmatprep.mubr.msk.bf16.mxu1 %vm5397_vm3, %v18659_v45 }
 0x6c2   :  { %13874 = vmatmul.mubr.msk.bf16.gmra.mrb[52].mxu1 %vm5397_vm3, %v18665_v40 }
 0x6c3   :  { %13877 = vmatprep.mubr.msk.bf16.mxu1 %vm5397_vm3, %v18667_v14 }
 0x6ca   :  { %13878 = vmatmul.mubr.msk.bf16.gmra.mrb[56].mxu1 %vm5397_vm3, %v18673_v36 }
 0x6cb   :  { %13881 = vmatprep.mubr.msk.bf16.mxu1 %vm5397_vm3, %v18675_v42 }
 0x6d2   :  { %13882 = vmatmul.mubr.msk.bf16.gmra.mrb[60].mxu1 %vm5397_vm3, %v18681_v13 }
 0x6d3   :  { %13885 = vmatprep.mubr.msk.bf16.mxu1 %vm5397_vm3, %v6324_v25  ;;  %v6289_v25 = vld [vmem:[#allocation3 + $0x248] sm:$0xff] }
 0x6d4   :  { %v18704_v56 = vpack.c.bf16 %v6289_v25, %v6288_v12  ;;  %v6296_v12 = vld [vmem:[#allocation3 + $0x2a0] sm:$0xff]  ;;  %v6297_v25 = vld [vmem:[#allocation3 + $0x2a8] sm:$0xff] }
 0x6d5   :  { %v18720_v59 = vpack.c.bf16 %v6297_v25, %v6296_v12  ;;  %v6304_v12 = vld [vmem:[#allocation3 + $0x300] sm:$0xff]  ;;  %v6305_v25 = vld [vmem:[#allocation3 + $0x308] sm:$0xff] }
 0x6d6   :  { %v18736_v31 = vpack.c.bf16 %v6305_v25, %v6304_v12  ;;  %v7220_v12 = vld [vmem:[#allocation3 + $0x32] sm:$0xff]  ;;  %v7221_v25 = vld [vmem:[#allocation3 + $0x3a] sm:$0xff] }
 0x6d7   :  { %v18751_v53 = vpack.c.bf16 %v7221_v25, %v7220_v12  ;;  %v7228_v12 = vld [vmem:[#allocation3 + $0x92] sm:$0xff]  ;;  %v7229_v25 = vld [vmem:[#allocation3 + $0x9a] sm:$0xff] }
 0x6d8   :  { %v18774_v47 = vpack.c.bf16 %v7229_v25, %v7228_v12  ;;  %v7236_v12 = vld [vmem:[#allocation3 + $0xf2] sm:$0xff]  ;;  %v7237_v25 = vld [vmem:[#allocation3 + $0xfa] sm:$0xff] }
 0x6d9   :  { %v18790_v51 = vpack.c.bf16 %v7237_v25, %v7236_v12  ;;  %v7244_v12 = vld [vmem:[#allocation3 + $0x152] sm:$0xff]  ;;  %v7245_v25 = vld [vmem:[#allocation3 + $0x15a] sm:$0xff] }
 0x6da   :  { %13886 = vmatmul.mubr.msk.bf16.gmra.mrb[64].mxu1 %vm5397_vm3, %v18686_v60  ;;  %v18806_v19 = vpack.c.bf16 %v7245_v25, %v7244_v12  ;;  %v7252_v12 = vld [vmem:[#allocation3 + $0x1e2] sm:$0xff]  ;;  %v7253_v25 = vld [vmem:[#allocation3 + $0x1ea] sm:$0xff] }
 0x6db   :  { %13889 = vmatprep.mubr.msk.bf16.mxu1 %vm5397_vm3, %v18688_v54  ;;  %v18819_v39 = vpack.c.bf16 %v7253_v25, %v7252_v12  ;;  %v7260_v12 = vld [vmem:[#allocation3 + $0x242] sm:$0xff]  ;;  %v7261_v25 = vld [vmem:[#allocation3 + $0x24a] sm:$0xff] }
 0x6dc   :  { %v18835_v0 = vpack.c.bf16 %v7261_v25, %v7260_v12  ;;  %v7268_v12 = vld [vmem:[#allocation3 + $0x2a2] sm:$0xff]  ;;  %v7269_v25 = vld [vmem:[#allocation3 + $0x2aa] sm:$0xff] }
 0x6dd   :  { %v18851_v8 = vpack.c.bf16 %v7269_v25, %v7268_v12  ;;  %v7276_v12 = vld [vmem:[#allocation3 + $0x302] sm:$0xff]  ;;  %v7277_v25 = vld [vmem:[#allocation3 + $0x30a] sm:$0xff] }
 0x6df   :  { %21277 = vst [vmem:[#allocation40_spill] sm:$0xff] %v18851_v8 }
 0x6e2   :  { %13890 = vmatmul.mubr.msk.bf16.gmra.mrb[68].mxu1 %vm5397_vm3, %v18694_v37 }
 0x6e3   :  { %13893 = vmatprep.mubr.msk.bf16.mxu1 %vm5397_vm3, %v18696_v1 }
 0x6ea   :  { %13894 = vmatmul.mubr.msk.bf16.gmra.mrb[72].mxu1 %vm5397_vm3, %v18702_v17 }
 0x6eb   :  { %13897 = vmatprep.mubr.msk.bf16.mxu1 %vm5397_vm3, %v18704_v56 }
 0x6f2   :  { %13898 = vmatmul.mubr.msk.bf16.gmra.mrb[76].mxu1 %vm5397_vm3, %v18710_v41 }
 0x6f3   :  { %13901 = vmatprep.mubr.msk.bf16.mxu1 %vm5397_vm3, %v18712_v22 }
 0x6fa   :  { %13902 = vmatmul.mubr.msk.bf16.gmra.mrb[80].mxu1 %vm5397_vm3, %v18718_v2 }
 0x6fb   :  { %13905 = vmatprep.mubr.msk.bf16.mxu1 %vm5397_vm3, %v18720_v59 }
 0x702   :  { %13906 = vmatmul.mubr.msk.bf16.gmra.mrb[84].mxu1 %vm5397_vm3, %v18726_v62 }
 0x703   :  { %13909 = vmatprep.mubr.msk.bf16.mxu1 %vm5397_vm3, %v18728_v34 }
 0x70a   :  { %13910 = vmatmul.mubr.msk.bf16.gmra.mrb[88].mxu1 %vm5397_vm3, %v18734_v35 }
 0x70b   :  { %13913 = vmatprep.mubr.msk.bf16.mxu1 %vm5397_vm3, %v18736_v31 }
 0x712   :  { %13914 = vmatmul.mubr.msk.bf16.gmra.mrb[92].mxu1 %vm5397_vm3, %v18742_v30 }
 0x713   :  { %13919 = vmatprep.mubr.msk.bf16.mxu1 %vm5397_vm3, %v7280_v23  ;;  %v7222_v23 = vld [vmem:[#allocation3 + $0x4a] sm:$0xff] }
 0x714   :  { %v18764_v11 = vpack.c.bf16 %v7223_v58, %v7222_v23  ;;  %v7230_v23 = vld [vmem:[#allocation3 + $0xaa] sm:$0xff]  ;;  %v7231_v58 = vld [vmem:[#allocation3 + $0xb2] sm:$0xff] }
 0x715   :  { %v18780_v44 = vpack.c.bf16 %v7231_v58, %v7230_v23  ;;  %v7238_v23 = vld [vmem:[#allocation3 + $0x10a] sm:$0xff]  ;;  %v7239_v58 = vld [vmem:[#allocation3 + $0x112] sm:$0xff] }
 0x716   :  { %v18796_v32 = vpack.c.bf16 %v7239_v58, %v7238_v23  ;;  %v7248_v23 = vld [vmem:[#allocation3 + $0x1b2] sm:$0xff]  ;;  %v7249_v58 = vld [vmem:[#allocation3 + $0x1ba] sm:$0xff] }
 0x717   :  { %v7296_v6 = vpack.c.bf16 %v7249_v58, %v7248_v23  ;;  %v7254_v23 = vld [vmem:[#allocation3 + $0x1fa] sm:$0xff]  ;;  %v7255_v58 = vld [vmem:[#allocation3 + $0x202] sm:$0xff] }
 0x718   :  { %v18825_v3 = vpack.c.bf16 %v7255_v58, %v7254_v23  ;;  %v7262_v23 = vld [vmem:[#allocation3 + $0x25a] sm:$0xff]  ;;  %v7263_v58 = vld [vmem:[#allocation3 + $0x262] sm:$0xff] }
 0x719   :  { %v18841_v46 = vpack.c.bf16 %v7263_v58, %v7262_v23  ;;  %v7270_v23 = vld [vmem:[#allocation3 + $0x2ba] sm:$0xff]  ;;  %v7271_v58 = vld [vmem:[#allocation3 + $0x2c2] sm:$0xff] }
 0x71a   :  { %13920 = vmatmul.mubr.msk.bf16.vlgmr.msra.gmra.mrb[32].mxu1 %vm5397_vm3, %v18747_v27 }
 0x71b   :  { %13984 = vmatpush3.bf16.msra.mxu1 %v7961_v33  ;;  %13923 = vmatprep.mubr.msk.bf16.mxu1 %vm5397_vm3, %v18751_v53  ;;  %v7226_v33 = vld [vmem:[#allocation3 + $0x7a] sm:$0xff]  ;;  %21274 = vst [vmem:[#allocation26_spill] sm:$0xff] %v18841_v46 }
 0x71c   :  { %15420 = vmatprep.subr.msk.bf16.mxu1 %vm21273_vm0, %v18756_v15  ;;  %v18772_v10 = vpack.c.bf16 %v7227_v49, %v7226_v33  ;;  %v7234_v33 = vld [vmem:[#allocation3 + $0xda] sm:$0xff]  ;;  %v7235_v49 = vld [vmem:[#allocation3 + $0xe2] sm:$0xff] }
 0x71d   :  { %v18788_v48 = vpack.c.bf16 %v7235_v49, %v7234_v33  ;;  %v7242_v33 = vld [vmem:[#allocation3 + $0x13a] sm:$0xff]  ;;  %v7243_v49 = vld [vmem:[#allocation3 + $0x142] sm:$0xff] }
 0x71e   :  { %v18804_v4 = vpack.c.bf16 %v7243_v49, %v7242_v33  ;;  %v7250_v33 = vld [vmem:[#allocation3 + $0x1ca] sm:$0xff]  ;;  %v7251_v49 = vld [vmem:[#allocation3 + $0x1d2] sm:$0xff] }
 0x71f   :  { %v18817_v9 = vpack.c.bf16 %v7251_v49, %v7250_v33  ;;  %v7258_v33 = vld [vmem:[#allocation3 + $0x22a] sm:$0xff]  ;;  %v7259_v49 = vld [vmem:[#allocation3 + $0x232] sm:$0xff] }
 0x720   :  { %v18833_v57 = vpack.c.bf16 %v7259_v49, %v7258_v33  ;;  %v7266_v33 = vld [vmem:[#allocation3 + $0x28a] sm:$0xff]  ;;  %v7267_v49 = vld [vmem:[#allocation3 + $0x292] sm:$0xff] }
 0x721   :  { %v18849_v38 = vpack.c.bf16 %v7267_v49, %v7266_v33  ;;  %v7274_v33 = vld [vmem:[#allocation3 + $0x2ea] sm:$0xff]  ;;  %v7275_v49 = vld [vmem:[#allocation3 + $0x2f2] sm:$0xff] }
 0x722   :  { %13924 = vmatmul.mubr.msk.bf16.gmra.mrb[36].mxu1 %vm5397_vm3, %v18764_v11 }
 0x723   :  { %13927 = vmatprep.mubr.msk.bf16.mxu1 %vm5397_vm3, %v18766_v55  ;;  %21276 = vst [vmem:[#allocation27_spill] sm:$0xff] %v18849_v38 }
 0x72a   :  { %13928 = vmatmul.mubr.msk.bf16.gmra.mrb[40].mxu1 %vm5397_vm3, %v18772_v10 }
 0x72b   :  { %13931 = vmatprep.mubr.msk.bf16.mxu1 %vm5397_vm3, %v18774_v47 }
 0x732   :  { %13932 = vmatmul.mubr.msk.bf16.gmra.mrb[44].mxu1 %vm5397_vm3, %v18780_v44 }
 0x733   :  { %13935 = vmatprep.mubr.msk.bf16.mxu1 %vm5397_vm3, %v18782_v18 }
 0x73a   :  { %13936 = vmatmul.mubr.msk.bf16.gmra.mrb[48].mxu1 %vm5397_vm3, %v18788_v48 }
 0x73b   :  { %13939 = vmatprep.mubr.msk.bf16.mxu1 %vm5397_vm3, %v18790_v51 }
 0x742   :  { %13940 = vmatmul.mubr.msk.bf16.gmra.mrb[52].mxu1 %vm5397_vm3, %v18796_v32 }
 0x743   :  { %13943 = vmatprep.mubr.msk.bf16.mxu1 %vm5397_vm3, %v18798_v29 }
 0x74a   :  { %13944 = vmatmul.mubr.msk.bf16.gmra.mrb[56].mxu1 %vm5397_vm3, %v18804_v4 }
 0x74b   :  { %13947 = vmatprep.mubr.msk.bf16.mxu1 %vm5397_vm3, %v18806_v19 }
 0x752   :  { %13948 = vmatmul.mubr.msk.bf16.gmra.mrb[60].mxu1 %vm5397_vm3, %v18812_v24 }
 0x753   :  { %13951 = vmatprep.mubr.msk.bf16.mxu1 %vm5397_vm3, %v7296_v6  ;;  %v18827_v6 = vpack.c.bf16 %v7257_v16, %v7256_v5  ;;  %v7264_v5 = vld [vmem:[#allocation3 + $0x272] sm:$0xff]  ;;  %v7265_v16 = vld [vmem:[#allocation3 + $0x27a] sm:$0xff] }
 0x754   :  { %v18843_v7 = vpack.c.bf16 %v7265_v16, %v7264_v5  ;;  %v7272_v5 = vld [vmem:[#allocation3 + $0x2d2] sm:$0xff]  ;;  %v7273_v16 = vld [vmem:[#allocation3 + $0x2da] sm:$0xff] }
 0x756   :  { %21275 = vst [vmem:[#allocation25_spill] sm:$0xff] %v18843_v7 }
 0x75a   :  { %13952 = vmatmul.mubr.msk.bf16.gmra.mrb[64].mxu1 %vm5397_vm3, %v18817_v9 }
 0x75b   :  { %13955 = vmatprep.mubr.msk.bf16.mxu1 %vm5397_vm3, %v18819_v39 }
 0x762   :  { %13956 = vmatmul.mubr.msk.bf16.gmra.mrb[68].mxu1 %vm5397_vm3, %v18825_v3 }
 0x763   :  { %13959 = vmatprep.mubr.msk.bf16.mxu1 %vm5397_vm3, %v18827_v6 }
 0x76a   :  { %13960 = vmatmul.mubr.msk.bf16.gmra.mrb[72].mxu1 %vm5397_vm3, %v18833_v57 }
 0x76b   :  { %13963 = vmatprep.mubr.msk.bf16.mxu1 %vm5397_vm3, %v18835_v0 }
 0x772   :  { %13964 = vmatmul.mubr.msk.bf16.gmra.mrb[76].mxu1 %vm5397_vm3, %v18841_v46  ;;  %v18857_v46 = vpack.c.bf16 %v7271_v58, %v7270_v23  ;;  %v7278_v23 = vld [vmem:[#allocation3 + $0x31a] sm:$0xff]  ;;  %v7279_v58 = vld [vmem:[#allocation3 + $0x322] sm:$0xff] }
 0x773   :  { %13967 = vmatprep.mubr.msk.bf16.mxu1 %vm5397_vm3, %v18843_v7  ;;  %v18859_v7 = vpack.c.bf16 %v7273_v16, %v7272_v5  ;;  %v18873_v5 = vpack.c.bf16 %v7279_v58, %v7278_v23  ;;  %v8511_v16 = vsel %vm21278_vm14, %v18756_v15, 0  ;;  %v8331_v15 = vld [vmem:[#allocation3 + $0xc9] sm:$0xff]  ;;  %v8334_v58 = vld [vmem:[#allocation3 + $0xf1] sm:$0xff] }
 0x77a   :  { %13968 = vmatmul.mubr.msk.bf16.gmra.mrb[80].mxu1 %vm5397_vm3, %v18849_v38  ;;  %v18865_v38 = vpack.c.bf16 %v7275_v49, %v7274_v33  ;;  %v12366_v33 = vld [vmem:[%s20923_s2 + $0x14] sm:$0xf]  ;;  %v8332_v49 = vld [vmem:[#allocation3 + $0xd9] sm:$0xff] }
 0x77b   :  { %13971 = vmatprep.mubr.msk.bf16.mxu1 %vm5397_vm3, %v18851_v8  ;;  %v18867_v8 = vpack.c.bf16 %v7277_v25, %v7276_v12  ;;  %v8333_v12 = vld [vmem:[#allocation3 + $0xe1] sm:$0xff] }
 0x77c   :  { %v18986_v23 = vpack.c.bf16 %v8333_v12, %v8332_v49  ;;  %v8351_v49 = vld [vmem:[#allocation3 + $0x1e9] sm:$0xff]  ;;  %v8352_v12 = vld [vmem:[#allocation3 + $0x1f9] sm:$0xff] }
 0x782   :  { %13972 = vmatmul.mubr.msk.bf16.gmra.mrb[84].mxu1 %vm5397_vm3, %v18857_v46 }
 0x783   :  { %13975 = vmatprep.mubr.msk.bf16.mxu1 %vm5397_vm3, %v18859_v7 }
 0x78a   :  { %13976 = vmatmul.mubr.msk.bf16.gmra.mrb[88].mxu1 %vm5397_vm3, %v18865_v38 }
 0x78b   :  { %13979 = vmatprep.mubr.msk.bf16.mxu1 %vm5397_vm3, %v18867_v8 }
 0x792   :  { %13980 = vmatmul.mubr.msk.bf16.gmra.mrb[92].mxu1 %vm5397_vm3, %v18873_v5 }
 0x793   :  { %13985 = vmatprep.mubr.msk.bf16.mxu1 %vm5397_vm3, %v18616_v26  ;;  %v7796_v26 = vld [vmem:[#allocation3 + $0x180] sm:$0xff] }
 0x79a   :  { %13986 = vmatmul.mubr.msk.bf16.vlgmr.msra.gmra.mrb[32].mxu1 %vm5397_vm3, %v18620_v52  ;;  %v7797_v52 = vld [vmem:[#allocation3 + $0x188] sm:$0xff] }
 0x79b   :  { %14050 = vmatpush3.bf16.msra.mxu1 %v8511_v16  ;;  %13989 = vmatprep.mubr.msk.bf16.mxu1 %vm5397_vm3, %v18633_v20  ;;  %v18913_v20 = vpack.c.bf16 %v7797_v52, %v7796_v26  ;;  %v8335_v16 = vld [vmem:[#allocation3 + $0xf9] sm:$0xff]  ;;  %v8337_v26 = vld [vmem:[#allocation3 + $0x111] sm:$0xff] }
 0x79c   :  { %15421 = vmatprep.subr.msk.bf16.mxu1 %vm21279_vm6, %v12366_v33  ;;  %v18992_v52 = vpack.c.bf16 %v8335_v16, %v8334_v58  ;;  %v8353_v58 = vld [vmem:[#allocation3 + $0x201] sm:$0xff] }
 0x7a2   :  { %13990 = vmatmul.mubr.msk.bf16.gmra.mrb[36].mxu1 %vm5397_vm3, %v18635_v63  ;;  %v7828_v63 = vld [vmem:[#allocation3 + $0x330] sm:$0xff] }
 0x7a3   :  { %13993 = vmatprep.mubr.msk.bf16.mxu1 %vm5397_vm3, %v18641_v61  ;;  %v8316_v61 = vld [vmem:[#allocation3 + $0x19] sm:$0xff] }
 0x7aa   :  { %13994 = vmatmul.mubr.msk.bf16.gmra.mrb[40].mxu1 %vm5397_vm3, %v18643_v43  ;;  %v8317_v43 = vld [vmem:[#allocation3 + $0x21] sm:$0xff] }
 0x7ab   :  { %13997 = vmatprep.mubr.msk.bf16.mxu1 %vm5397_vm3, %v18649_v50  ;;  %v8380_v50 = vpack.c.bf16 %v8317_v43, %v8316_v61  ;;  %v8339_v61 = vld [vmem:[#allocation3 + $0x129] sm:$0xff]  ;;  %v8340_v43 = vld [vmem:[#allocation3 + $0x139] sm:$0xff] }
 0x7b2   :  { %13998 = vmatmul.mubr.msk.bf16.gmra.mrb[44].mxu1 %vm5397_vm3, %v18651_v21  ;;  %v8321_v21 = vld [vmem:[#allocation3 + $0x51] sm:$0xff] }
 0x7b3   :  { %14001 = vmatprep.mubr.msk.bf16.mxu1 %vm5397_vm3, %v18657_v28 }
 0x7ba   :  { %14002 = vmatmul.mubr.msk.bf16.gmra.mrb[48].mxu1 %vm5397_vm3, %v18659_v45  ;;  %v18960_v45 = vld [vmem:[%s20923_s2 + $0x18] sm:$0xf] }
 0x7bb   :  { %14005 = vmatprep.mubr.msk.bf16.mxu1 %vm5397_vm3, %v18665_v40  ;;  %v8322_v40 = vld [vmem:[#allocation3 + $0x61] sm:$0xff] }
 0x7c2   :  { %14006 = vmatmul.mubr.msk.bf16.gmra.mrb[52].mxu1 %vm5397_vm3, %v18667_v14  ;;  %v8323_v14 = vld [vmem:[#allocation3 + $0x69] sm:$0xff] }
 0x7c3   :  { %14009 = vmatprep.mubr.msk.bf16.mxu1 %vm5397_vm3, %v18673_v36  ;;  %v8324_v36 = vld [vmem:[#allocation3 + $0x79] sm:$0xff] }
 0x7ca   :  { %14010 = vmatmul.mubr.msk.bf16.gmra.mrb[56].mxu1 %vm5397_vm3, %v18675_v42  ;;  %v8325_v42 = vld [vmem:[#allocation3 + $0x81] sm:$0xff] }
 0x7cb   :  { %14013 = vmatprep.mubr.msk.bf16.mxu1 %vm5397_vm3, %v18681_v13  ;;  %v18968_v13 = vpack.c.bf16 %v8323_v14, %v8322_v40  ;;  %v8345_v40 = vld [vmem:[#allocation3 + $0x171] sm:$0xff] }
 0x7d2   :  { %14014 = vmatmul.mubr.msk.bf16.gmra.mrb[60].mxu1 %vm5397_vm3, %v18913_v20 }
 0x7d3   :  { %14017 = vmatprep.mubr.msk.bf16.mxu1 %vm5397_vm3, %v18686_v60  ;;  %v18970_v60 = vpack.c.bf16 %v8325_v42, %v8324_v36  ;;  %v8346_v42 = vld [vmem:[#allocation3 + $0x181] sm:$0xff] }
 0x7da   :  { %14018 = vmatmul.mubr.msk.bf16.gmra.mrb[64].mxu1 %vm5397_vm3, %v18688_v54  ;;  %v8326_v54 = vld [vmem:[#allocation3 + $0x91] sm:$0xff] }
 0x7db   :  { %14021 = vmatprep.mubr.msk.bf16.mxu1 %vm5397_vm3, %v18694_v37  ;;  %v8327_v37 = vld [vmem:[#allocation3 + $0x99] sm:$0xff] }
 0x7e2   :  { %14022 = vmatmul.mubr.msk.bf16.gmra.mrb[68].mxu1 %vm5397_vm3, %v18696_v1  ;;  %v8328_v1 = vld [vmem:[#allocation3 + $0xa9] sm:$0xff] }
 0x7e3   :  { %14025 = vmatprep.mubr.msk.bf16.mxu1 %vm5397_vm3, %v18702_v17  ;;  %v8329_v17 = vld [vmem:[#allocation3 + $0xb1] sm:$0xff] }
 0x7ea   :  { %14026 = vmatmul.mubr.msk.bf16.gmra.mrb[72].mxu1 %vm5397_vm3, %v18704_v56  ;;  %v18976_v56 = vpack.c.bf16 %v8327_v37, %v8326_v54  ;;  %v8347_v54 = vld [vmem:[#allocation3 + $0x189] sm:$0xff] }
 0x7eb   :  { %14029 = vmatprep.mubr.msk.bf16.mxu1 %vm5397_vm3, %v18710_v41  ;;  %v18978_v41 = vpack.c.bf16 %v8329_v17, %v8328_v1  ;;  %v8348_v37 = vld [vmem:[#allocation3 + $0x1c9] sm:$0xff]  ;;  %v8349_v1 = vld [vmem:[#allocation3 + $0x1d1] sm:$0xff]  ;;  %v19016_v17 = vpack.c.bf16 %v8347_v54, %v8346_v42  ;;  %v8361_v42 = vld [vmem:[#allocation3 + $0x261] sm:$0xff] }
 0x7f2   :  { %14030 = vmatmul.mubr.msk.bf16.gmra.mrb[76].mxu1 %vm5397_vm3, %v18712_v22  ;;  %v8330_v22 = vld [vmem:[#allocation3 + $0xc1] sm:$0xff] }
 0x7f3   :  { %14033 = vmatprep.mubr.msk.bf16.mxu1 %vm5397_vm3, %v18718_v2  ;;  %v7829_v2 = vld [vmem:[#allocation3 + $0x338] sm:$0xff]  ;;  %v18984_v25 = vpack.c.bf16 %v8331_v15, %v8330_v22  ;;  %v8396_v22 = vpack.c.bf16 %v8349_v1, %v8348_v37  ;;  %v8350_v15 = vld [vmem:[#allocation3 + $0x1e1] sm:$0xff] }
 0x7f4   :  { %v19021_v16 = vpack.c.bf16 %v8351_v49, %v8350_v15  ;;  %v8362_v1 = vld [vmem:[#allocation3 + $0x271] sm:$0xff]  ;;  %v8364_v15 = vld [vmem:[#allocation3 + $0x289] sm:$0xff] }
 0x7f5   :  { %v8365_v49 = vld [vmem:[#allocation3 + $0x291] sm:$0xff] }
 0x7fa   :  { %14034 = vmatmul.mubr.msk.bf16.gmra.mrb[80].mxu1 %vm5397_vm3, %v18720_v59  ;;  %v18947_v59 = vpack.c.bf16 %v7829_v2, %v7828_v63  ;;  %v8338_v2 = vld [vmem:[#allocation3 + $0x121] sm:$0xff] }
 0x7fb   :  { %14037 = vmatprep.mubr.msk.bf16.mxu1 %vm5397_vm3, %v18726_v62  ;;  %v8320_v62 = vld [vmem:[#allocation3 + $0x49] sm:$0xff] }
 0x7fc   :  { %v18955_v28 = vpack.c.bf16 %v8321_v21, %v8320_v62  ;;  %v8342_v62 = vld [vmem:[#allocation3 + $0x151] sm:$0xff]  ;;  %v8343_v21 = vld [vmem:[#allocation3 + $0x159] sm:$0xff] }
 0x7fd   :  { %v19008_v14 = vpack.c.bf16 %v8343_v21, %v8342_v62  ;;  %v8358_v21 = vld [vmem:[#allocation3 + $0x241] sm:$0xff] }
 0x802   :  { %14038 = vmatmul.mubr.msk.bf16.gmra.mrb[84].mxu1 %vm5397_vm3, %v18728_v34  ;;  %v8318_v34 = vld [vmem:[#allocation3 + $0x31] sm:$0xff] }
 0x803   :  { %14041 = vmatprep.mubr.msk.bf16.mxu1 %vm5397_vm3, %v18734_v35  ;;  %v8319_v35 = vld [vmem:[#allocation3 + $0x39] sm:$0xff] }
 0x80a   :  { %14042 = vmatmul.mubr.msk.bf16.gmra.mrb[88].mxu1 %vm5397_vm3, %v18736_v31  ;;  %v18952_v31 = vpack.c.bf16 %v8319_v35, %v8318_v34  ;;  %v19000_v34 = vpack.c.bf16 %v8339_v61, %v8338_v2  ;;  %v8355_v2 = vld [vmem:[#allocation3 + $0x219] sm:$0xff]  ;;  %v8356_v61 = vld [vmem:[#allocation3 + $0x229] sm:$0xff] }
 0x80b   :  { %14045 = vmatprep.mubr.msk.bf16.mxu1 %vm5397_vm3, %v18742_v30  ;;  %v9061_v30 = vsel %vm21280_vm10, %v12366_v33, 0  ;;  %v8336_v33 = vld [vmem:[#allocation3 + $0x109] sm:$0xff] }
 0x80c   :  { %v18994_v63 = vpack.c.bf16 %v8337_v26, %v8336_v33  ;;  %v19023_v33 = vpack.c.bf16 %v8353_v58, %v8352_v12  ;;  %v8354_v26 = vld [vmem:[#allocation3 + $0x211] sm:$0xff]  ;;  %v19047_v58 = vpack.c.bf16 %v8365_v49, %v8364_v15 }
 0x812   :  { %14046 = vmatmul.mubr.msk.bf16.gmra.mrb[92].mxu1 %vm5397_vm3, %v18947_v59 }
 0x813   :  { %14051 = vmatprep.mubr.msk.bf16.mxu1 %vm5397_vm3, %v8380_v50  ;;  %v8341_v50 = vld [vmem:[#allocation3 + $0x141] sm:$0xff] }
 0x814   :  { %v19002_v35 = vpack.c.bf16 %v8341_v50, %v8340_v43  ;;  %v8357_v43 = vld [vmem:[#allocation3 + $0x231] sm:$0xff]  ;;  %v19029_v50 = vpack.c.bf16 %v8355_v2, %v8354_v26  ;;  %v8366_v26 = vld [vmem:[#allocation3 + $0x2a1] sm:$0xff]  ;;  %v8367_v2 = vld [vmem:[#allocation3 + $0x2a9] sm:$0xff] }
 0x815   :  { %v19031_v62 = vpack.c.bf16 %v8357_v43, %v8356_v61  ;;  %v8368_v61 = vld [vmem:[#allocation3 + $0x2b9] sm:$0xff]  ;;  %v8369_v43 = vld [vmem:[#allocation3 + $0x2c1] sm:$0xff] }
 0x81a   :  { %14052 = vmatmul.mubr.msk.bf16.vlgmr.msra.gmra.mrb[32].mxu1 %vm5397_vm3, %v18952_v31 }
 0x81b   :  { %14116 = vmatpush3.bf16.msra.mxu1 %v9061_v30  ;;  %14055 = vmatprep.mubr.msk.bf16.mxu1 %vm5397_vm3, %v18955_v28  ;;  %v8344_v30 = vld [vmem:[#allocation3 + $0x169] sm:$0xff] }
 0x81c   :  { %15422 = vmatprep.subr.msk.bf16.mxu1 %vm21281_vm1, %v18960_v45  ;;  %v19010_v36 = vpack.c.bf16 %v8345_v40, %v8344_v30  ;;  %v8359_v30 = vld [vmem:[#allocation3 + $0x249] sm:$0xff]  ;;  %v8360_v40 = vld [vmem:[#allocation3 + $0x259] sm:$0xff] }
 0x81d   :  { %v19037_v54 = vpack.c.bf16 %v8359_v30, %v8358_v21  ;;  %v19039_v37 = vpack.c.bf16 %v8361_v42, %v8360_v40  ;;  %v19053_v21 = vpack.c.bf16 %v8367_v2, %v8366_v26  ;;  %v19055_v30 = vpack.c.bf16 %v8369_v43, %v8368_v61  ;;  %v8370_v40 = vld [vmem:[#allocation3 + $0x2d1] sm:$0xff]  ;;  %v8371_v42 = vld [vmem:[#allocation3 + $0x2d9] sm:$0xff]  ;;  %v8374_v26 = vld [vmem:[#allocation3 + $0x301] sm:$0xff] }
 0x81e   :  { %v19061_v15 = vpack.c.bf16 %v8371_v42, %v8370_v40  ;;  %v8375_v2 = vld [vmem:[#allocation3 + $0x309] sm:$0xff]  ;;  %v8376_v61 = vld [vmem:[#allocation3 + $0x319] sm:$0xff]  ;;  %v8377_v43 = vld [vmem:[#allocation3 + $0x321] sm:$0xff] }
 0x81f   :  { %21282 = vst [vmem:[#allocation41_spill] sm:$0xff] %v19053_v21  ;;  %21283 = vst [vmem:[#allocation42_spill] sm:$0xff] %v19055_v30  ;;  %v8378_v40 = vld [vmem:[#allocation3 + $0x331] sm:$0xff]  ;;  %v8379_v42 = vld [vmem:[#allocation3 + $0x339] sm:$0xff] }
 0x822   :  { %14056 = vmatmul.mubr.msk.bf16.gmra.mrb[36].mxu1 %vm5397_vm3, %v18968_v13 }
 0x823   :  { %14059 = vmatprep.mubr.msk.bf16.mxu1 %vm5397_vm3, %v18970_v60 }
 0x82a   :  { %14060 = vmatmul.mubr.msk.bf16.gmra.mrb[40].mxu1 %vm5397_vm3, %v18976_v56 }
 0x82b   :  { %14063 = vmatprep.mubr.msk.bf16.mxu1 %vm5397_vm3, %v18978_v41 }
 0x832   :  { %14064 = vmatmul.mubr.msk.bf16.gmra.mrb[44].mxu1 %vm5397_vm3, %v18984_v25 }
 0x833   :  { %14067 = vmatprep.mubr.msk.bf16.mxu1 %vm5397_vm3, %v18986_v23 }
 0x83a   :  { %14068 = vmatmul.mubr.msk.bf16.gmra.mrb[48].mxu1 %vm5397_vm3, %v18992_v52 }
 0x83b   :  { %14071 = vmatprep.mubr.msk.bf16.mxu1 %vm5397_vm3, %v18994_v63 }
 0x842   :  { %14072 = vmatmul.mubr.msk.bf16.gmra.mrb[52].mxu1 %vm5397_vm3, %v19000_v34 }
 0x843   :  { %14075 = vmatprep.mubr.msk.bf16.mxu1 %vm5397_vm3, %v19002_v35 }
 0x84a   :  { %14076 = vmatmul.mubr.msk.bf16.gmra.mrb[56].mxu1 %vm5397_vm3, %v19008_v14 }
 0x84b   :  { %14079 = vmatprep.mubr.msk.bf16.mxu1 %vm5397_vm3, %v19010_v36 }
 0x852   :  { %14080 = vmatmul.mubr.msk.bf16.gmra.mrb[60].mxu1 %vm5397_vm3, %v19016_v17 }
 0x853   :  { %14083 = vmatprep.mubr.msk.bf16.mxu1 %vm5397_vm3, %v8396_v22  ;;  %v8363_v22 = vld [vmem:[#allocation3 + $0x279] sm:$0xff] }
 0x854   :  { %v19045_v12 = vpack.c.bf16 %v8363_v22, %v8362_v1  ;;  %v8372_v1 = vld [vmem:[#allocation3 + $0x2e9] sm:$0xff]  ;;  %v8373_v22 = vld [vmem:[#allocation3 + $0x2f1] sm:$0xff] }
 0x855   :  { %v19063_v49 = vpack.c.bf16 %v8373_v22, %v8372_v1  ;;  %v19077_v1 = vpack.c.bf16 %v8379_v42, %v8378_v40  ;;  %v9612_v22 = vsel %vm21284_vm7, %v18960_v45, 0  ;;  %v9430_v40 = vld [vmem:[#allocation3 + $0xc8] sm:$0xff] }
 0x85a   :  { %14084 = vmatmul.mubr.msk.bf16.gmra.mrb[64].mxu1 %vm5397_vm3, %v19021_v16 }
 0x85b   :  { %14087 = vmatprep.mubr.msk.bf16.mxu1 %vm5397_vm3, %v19023_v33 }
 0x862   :  { %14088 = vmatmul.mubr.msk.bf16.gmra.mrb[68].mxu1 %vm5397_vm3, %v19029_v50 }
 0x863   :  { %14091 = vmatprep.mubr.msk.bf16.mxu1 %vm5397_vm3, %v19031_v62 }
 0x86a   :  { %14092 = vmatmul.mubr.msk.bf16.gmra.mrb[72].mxu1 %vm5397_vm3, %v19037_v54 }
 0x86b   :  { %14095 = vmatprep.mubr.msk.bf16.mxu1 %vm5397_vm3, %v19039_v37 }
 0x872   :  { %14096 = vmatmul.mubr.msk.bf16.gmra.mrb[76].mxu1 %vm5397_vm3, %v19045_v12 }
 0x873   :  { %14099 = vmatprep.mubr.msk.bf16.mxu1 %vm5397_vm3, %v19047_v58 }
 0x87a   :  { %14100 = vmatmul.mubr.msk.bf16.gmra.mrb[80].mxu1 %vm5397_vm3, %v19053_v21  ;;  %v19069_v21 = vpack.c.bf16 %v8375_v2, %v8374_v26  ;;  %v12432_v26 = vld [vmem:[%s20923_s2 + $0x1c] sm:$0xf]  ;;  %v9427_v2 = vld [vmem:[#allocation3 + $0xa8] sm:$0xff] }
 0x87b   :  { %14103 = vmatprep.mubr.msk.bf16.mxu1 %vm5397_vm3, %v19055_v30  ;;  %v19071_v30 = vpack.c.bf16 %v8377_v43, %v8376_v61  ;;  %v9428_v61 = vld [vmem:[#allocation3 + $0xb0] sm:$0xff]  ;;  %v9429_v43 = vld [vmem:[#allocation3 + $0xc0] sm:$0xff] }
 0x87c   :  { %v9486_v42 = vpack.c.bf16 %v9428_v61, %v9427_v2  ;;  %v9450_v2 = vld [vmem:[#allocation3 + $0x1e8] sm:$0xff] }
 0x882   :  { %14104 = vmatmul.mubr.msk.bf16.gmra.mrb[84].mxu1 %vm5397_vm3, %v19061_v15 }
 0x883   :  { %14107 = vmatprep.mubr.msk.bf16.mxu1 %vm5397_vm3, %v19063_v49 }
 0x88a   :  { %14108 = vmatmul.mubr.msk.bf16.gmra.mrb[88].mxu1 %vm5397_vm3, %v19069_v21 }
 0x88b   :  { %14111 = vmatprep.mubr.msk.bf16.mxu1 %vm5397_vm3, %v19071_v30 }
 0x892   :  { %14112 = vmatmul.mubr.msk.bf16.gmra.mrb[92].mxu1 %vm5397_vm3, %v19077_v1 }
 0x893   :  { %14117 = vmatprep.mubr.msk.bf16.mxu1 %vm5397_vm3, %v18747_v27  ;;  %v9423_v27 = vld [vmem:[#allocation3 + $0x78] sm:$0xff] }
 0x89a   :  { %14118 = vmatmul.mubr.msk.bf16.vlgmr.msra.gmra.mrb[32].mxu1 %vm5397_vm3, %v18751_v53  ;;  %v19160_v53 = vld [vmem:[%s20923_s2 + $0x20] sm:$0xf] }
 0x89b   :  { %14182 = vmatpush3.bf16.msra.mxu1 %v9612_v22  ;;  %14121 = vmatprep.mubr.msk.bf16.mxu1 %vm5397_vm3, %v18764_v11  ;;  %v9424_v11 = vld [vmem:[#allocation3 + $0x80] sm:$0xff]  ;;  %v9487_v22 = vpack.c.bf16 %v9430_v40, %v9429_v43  ;;  %v9451_v43 = vld [vmem:[#allocation3 + $0x1f8] sm:$0xff] }
 0x89c   :  { %15423 = vmatprep.subr.msk.bf16.mxu1 %vm21285_vm5, %v12432_v26  ;;  %v9452_v40 = vld [vmem:[#allocation3 + $0x200] sm:$0xff] }
 0x8a2   :  { %14122 = vmatmul.mubr.msk.bf16.gmra.mrb[36].mxu1 %vm5397_vm3, %v18766_v55  ;;  %v9425_v55 = vld [vmem:[#allocation3 + $0x90] sm:$0xff] }
 0x8a3   :  { %14125 = vmatprep.mubr.msk.bf16.mxu1 %vm5397_vm3, %v18772_v10 }
 0x8aa   :  { %14126 = vmatmul.mubr.msk.bf16.gmra.mrb[40].mxu1 %vm5397_vm3, %v18774_v47  ;;  %v10162_v47 = vsel %vm21290_vm15, %v12432_v26, 0  ;;  %v9431_v26 = vld [vmem:[#allocation3 + $0xd8] sm:$0xff] }
 0x8ab   :  { %14129 = vmatprep.mubr.msk.bf16.mxu1 %vm5397_vm3, %v18780_v44 }
 0x8b2   :  { %14130 = vmatmul.mubr.msk.bf16.gmra.mrb[44].mxu1 %vm5397_vm3, %v18782_v18  ;;  %v8896_v18 = vld [vmem:[#allocation3 + $0x182] sm:$0xff] }
 0x8b3   :  { %14133 = vmatprep.mubr.msk.bf16.mxu1 %vm5397_vm3, %v18788_v48  ;;  %v8897_v48 = vld [vmem:[#allocation3 + $0x18a] sm:$0xff] }
 0x8b4   :  { %v19117_v44 = vpack.c.bf16 %v8897_v48, %v8896_v18  ;;  %v9432_v18 = vld [vmem:[#allocation3 + $0xe0] sm:$0xff]  ;;  %v9433_v48 = vld [vmem:[#allocation3 + $0xf0] sm:$0xff] }
 0x8ba   :  { %14134 = vmatmul.mubr.msk.bf16.gmra.mrb[48].mxu1 %vm5397_vm3, %v18790_v51  ;;  %v9422_v51 = vld [vmem:[#allocation3 + $0x68] sm:$0xff] }
 0x8bb   :  { %14137 = vmatprep.mubr.msk.bf16.mxu1 %vm5397_vm3, %v18796_v32 }
 0x8c2   :  { %14138 = vmatmul.mubr.msk.bf16.gmra.mrb[52].mxu1 %vm5397_vm3, %v18798_v29 }
 0x8c3   :  { %14141 = vmatprep.mubr.msk.bf16.mxu1 %vm5397_vm3, %v18804_v4  ;;  %v9418_v4 = vld [vmem:[#allocation3 + $0x38] sm:$0xff] }
 0x8ca   :  { %14142 = vmatmul.mubr.msk.bf16.gmra.mrb[56].mxu1 %vm5397_vm3, %v18806_v19  ;;  %v21287_v19 = vld [vmem:[#allocation25_spill] sm:$0xff] }
 0x8cb   :  { %14145 = vmatprep.mubr.msk.bf16.mxu1 %vm5397_vm3, %v18812_v24  ;;  %v21286_v24 = vld [vmem:[#allocation26_spill] sm:$0xff] }
 0x8d2   :  { %14146 = vmatmul.mubr.msk.bf16.gmra.mrb[60].mxu1 %vm5397_vm3, %v19117_v44 }
 0x8d3   :  { %14149 = vmatprep.mubr.msk.bf16.mxu1 %vm5397_vm3, %v18817_v9  ;;  %v21288_v9 = vld [vmem:[#allocation27_spill] sm:$0xff] }
 0x8da   :  { %14150 = vmatmul.mubr.msk.bf16.gmra.mrb[64].mxu1 %vm5397_vm3, %v18819_v39  ;;  %v21289_v39 = vld [vmem:[#allocation40_spill] sm:$0xff] }
 0x8db   :  { %14153 = vmatprep.mubr.msk.bf16.mxu1 %vm5397_vm3, %v18825_v3  ;;  %v9417_v3 = vld [vmem:[#allocation3 + $0x30] sm:$0xff] }
 0x8dc   :  { %v9481_v32 = vpack.c.bf16 %v9418_v4, %v9417_v3  ;;  %v9438_v3 = vld [vmem:[#allocation3 + $0x128] sm:$0xff] }
 0x8e2   :  { %14154 = vmatmul.mubr.msk.bf16.gmra.mrb[68].mxu1 %vm5397_vm3, %v18827_v6  ;;  %v9426_v6 = vld [vmem:[#allocation3 + $0x98] sm:$0xff] }
 0x8e3   :  { %14157 = vmatprep.mubr.msk.bf16.mxu1 %vm5397_vm3, %v18833_v57  ;;  %v8929_v57 = vld [vmem:[#allocation3 + $0x33a] sm:$0xff]  ;;  %v9485_v45 = vpack.c.bf16 %v9426_v6, %v9425_v55 }
 0x8e4   :  { %v9447_v55 = vld [vmem:[#allocation3 + $0x198] sm:$0xff]  ;;  %v9448_v6 = vld [vmem:[#allocation3 + $0x1a0] sm:$0xff] }
 0x8ea   :  { %14158 = vmatmul.mubr.msk.bf16.gmra.mrb[72].mxu1 %vm5397_vm3, %v18835_v0  ;;  %v8928_v0 = vld [vmem:[#allocation3 + $0x332] sm:$0xff] }
 0x8eb   :  { %14161 = vmatprep.mubr.msk.bf16.mxu1 %vm5397_vm3, %v21286_v24  ;;  %v19151_v29 = vpack.c.bf16 %v8929_v57, %v8928_v0  ;;  %v9434_v24 = vld [vmem:[#allocation3 + $0xf8] sm:$0xff]  ;;  %v9436_v0 = vld [vmem:[#allocation3 + $0x110] sm:$0xff]  ;;  %v9437_v57 = vld [vmem:[#allocation3 + $0x120] sm:$0xff] }
 0x8f2   :  { %14162 = vmatmul.mubr.msk.bf16.gmra.mrb[76].mxu1 %vm5397_vm3, %v21287_v19  ;;  %v9488_v19 = vpack.c.bf16 %v9432_v18, %v9431_v26  ;;  %v9498_v26 = vpack.c.bf16 %v9452_v40, %v9451_v43  ;;  %v9473_v43 = vld [vmem:[#allocation3 + $0x300] sm:$0xff]  ;;  %v9474_v40 = vld [vmem:[#allocation3 + $0x308] sm:$0xff] }
 0x8f3   :  { %14165 = vmatprep.mubr.msk.bf16.mxu1 %vm5397_vm3, %v21288_v9  ;;  %v9489_v9 = vpack.c.bf16 %v9434_v24, %v9433_v48  ;;  %v9456_v48 = vld [vmem:[#allocation3 + $0x230] sm:$0xff]  ;;  %v9457_v24 = vld [vmem:[#allocation3 + $0x240] sm:$0xff] }
 0x8fa   :  { %14166 = vmatmul.mubr.msk.bf16.gmra.mrb[80].mxu1 %vm5397_vm3, %v21289_v39  ;;  %v9435_v39 = vld [vmem:[#allocation3 + $0x108] sm:$0xff] }
 0x8fb   :  { %14169 = vmatprep.mubr.msk.bf16.mxu1 %vm5397_vm3, %v18857_v46  ;;  %v9421_v46 = vld [vmem:[#allocation3 + $0x60] sm:$0xff]  ;;  %v9490_v4 = vpack.c.bf16 %v9436_v0, %v9435_v39  ;;  %v9459_v0 = vld [vmem:[#allocation3 + $0x258] sm:$0xff] }
 0x8fc   :  { %v9483_v10 = vpack.c.bf16 %v9422_v51, %v9421_v46  ;;  %v9441_v46 = vld [vmem:[#allocation3 + $0x150] sm:$0xff]  ;;  %v9442_v51 = vld [vmem:[#allocation3 + $0x158] sm:$0xff] }
 0x902   :  { %14170 = vmatmul.mubr.msk.bf16.gmra.mrb[84].mxu1 %vm5397_vm3, %v18859_v7  ;;  %v9419_v7 = vld [vmem:[#allocation3 + $0x48] sm:$0xff] }
 0x903   :  { %14173 = vmatprep.mubr.msk.bf16.mxu1 %vm5397_vm3, %v18865_v38  ;;  %v9420_v38 = vld [vmem:[#allocation3 + $0x50] sm:$0xff] }
 0x90a   :  { %14174 = vmatmul.mubr.msk.bf16.gmra.mrb[88].mxu1 %vm5397_vm3, %v18867_v8  ;;  %v9482_v8 = vpack.c.bf16 %v9420_v38, %v9419_v7  ;;  %v9439_v7 = vld [vmem:[#allocation3 + $0x138] sm:$0xff]  ;;  %v9440_v38 = vld [vmem:[#allocation3 + $0x140] sm:$0xff] }
 0x90b   :  { %14177 = vmatprep.mubr.msk.bf16.mxu1 %vm5397_vm3, %v18873_v5  ;;  %v9484_v5 = vpack.c.bf16 %v9424_v11, %v9423_v27  ;;  %v9444_v27 = vld [vmem:[#allocation3 + $0x170] sm:$0xff] }
 0x912   :  { %14178 = vmatmul.mubr.msk.bf16.gmra.mrb[92].mxu1 %vm5397_vm3, %v19151_v29 }
 0x913   :  { %14183 = vmatprep.mubr.msk.bf16.mxu1 %vm5397_vm3, %v9481_v32  ;;  %v9491_v32 = vpack.c.bf16 %v9438_v3, %v9437_v57  ;;  %v9460_v57 = vld [vmem:[#allocation3 + $0x260] sm:$0xff]  ;;  %v9461_v3 = vld [vmem:[#allocation3 + $0x270] sm:$0xff] }
 0x91a   :  { %14184 = vmatmul.mubr.msk.bf16.vlgmr.msra.gmra.mrb[32].mxu1 %vm5397_vm3, %v9482_v8  ;;  %v9492_v8 = vpack.c.bf16 %v9440_v38, %v9439_v7  ;;  %v9463_v38 = vld [vmem:[#allocation3 + $0x288] sm:$0xff] }
 0x91b   :  { %14248 = vmatpush3.bf16.msra.mxu1 %v10162_v47  ;;  %14187 = vmatprep.mubr.msk.bf16.mxu1 %vm5397_vm3, %v9483_v10  ;;  %v9493_v47 = vpack.c.bf16 %v9442_v51, %v9441_v46  ;;  %v9443_v10 = vld [vmem:[#allocation3 + $0x168] sm:$0xff]  ;;  %v9464_v46 = vld [vmem:[#allocation3 + $0x290] sm:$0xff]  ;;  %v9465_v51 = vld [vmem:[#allocation3 + $0x2a0] sm:$0xff] }
 0x91c   :  { %15424 = vmatprep.subr.msk.bf16.mxu1 %vm21291_vm8, %v19160_v53  ;;  %v9494_v11 = vpack.c.bf16 %v9444_v27, %v9443_v10  ;;  %v9467_v27 = vld [vmem:[#allocation3 + $0x2b8] sm:$0xff] }
 0x922   :  { %14188 = vmatmul.mubr.msk.bf16.gmra.mrb[36].mxu1 %vm5397_vm3, %v9484_v5  ;;  %v9496_v5 = vpack.c.bf16 %v9448_v6, %v9447_v55  ;;  %v9469_v55 = vld [vmem:[#allocation3 + $0x2d0] sm:$0xff]  ;;  %v9470_v6 = vld [vmem:[#allocation3 + $0x2d8] sm:$0xff] }
 0x923   :  { %14191 = vmatprep.mubr.msk.bf16.mxu1 %vm5397_vm3, %v9485_v45  ;;  %v9449_v45 = vld [vmem:[#allocation3 + $0x1e0] sm:$0xff] }
 0x924   :  { %v9497_v61 = vpack.c.bf16 %v9450_v2, %v9449_v45  ;;  %v9507_v45 = vpack.c.bf16 %v9470_v6, %v9469_v55  ;;  %v9471_v2 = vld [vmem:[#allocation3 + $0x2e8] sm:$0xff] }
 0x92a   :  { %14192 = vmatmul.mubr.msk.bf16.gmra.mrb[40].mxu1 %vm5397_vm3, %v9486_v42  ;;  %v9453_v42 = vld [vmem:[#allocation3 + $0x210] sm:$0xff] }
 0x92b   :  { %14195 = vmatprep.mubr.msk.bf16.mxu1 %vm5397_vm3, %v9487_v22  ;;  %v9454_v22 = vld [vmem:[#allocation3 + $0x218] sm:$0xff] }
 0x92c   :  { %v9499_v18 = vpack.c.bf16 %v9454_v22, %v9453_v42  ;;  %v9509_v22 = vpack.c.bf16 %v9474_v40, %v9473_v43  ;;  %v10548_v43 = vld [vmem:[#allocation3 + $0x1a2] sm:$0xff] }
 0x932   :  { %14196 = vmatmul.mubr.msk.bf16.gmra.mrb[44].mxu1 %vm5397_vm3, %v9488_v19  ;;  %v9458_v19 = vld [vmem:[#allocation3 + $0x248] sm:$0xff] }
 0x933   :  { %14199 = vmatprep.mubr.msk.bf16.mxu1 %vm5397_vm3, %v9489_v9  ;;  %v9501_v39 = vpack.c.bf16 %v9458_v19, %v9457_v24  ;;  %v9480_v24 = vld [vmem:[#allocation3 + $0x350] sm:$0xff] }
 0x93a   :  { %14200 = vmatmul.mubr.msk.bf16.gmra.mrb[48].mxu1 %vm5397_vm3, %v9490_v4  ;;  %v9462_v4 = vld [vmem:[#allocation3 + $0x278] sm:$0xff] }
 0x93b   :  { %14203 = vmatprep.mubr.msk.bf16.mxu1 %vm5397_vm3, %v9491_v32  ;;  %v9502_v32 = vpack.c.bf16 %v9460_v57, %v9459_v0  ;;  %v9503_v7 = vpack.c.bf16 %v9462_v4, %v9461_v3  ;;  %v10533_v0 = vld [vmem:[#allocation3 + $0xf2] sm:$0xff]  ;;  %v10534_v57 = vld [vmem:[#allocation3 + $0xfa] sm:$0xff] }
 0x93c   :  { %v10589_v4 = vpack.c.bf16 %v10534_v57, %v10533_v0  ;;  %v10579_v57 = vld [vmem:[#allocation3 + $0x34a] sm:$0xff] }
 0x942   :  { %14204 = vmatmul.mubr.msk.bf16.gmra.mrb[52].mxu1 %vm5397_vm3, %v9492_v8  ;;  %v9466_v8 = vld [vmem:[#allocation3 + $0x2a8] sm:$0xff] }
 0x943   :  { %14207 = vmatprep.mubr.msk.bf16.mxu1 %vm5397_vm3, %v9493_v47  ;;  %v9504_v47 = vpack.c.bf16 %v9464_v46, %v9463_v38  ;;  %v9505_v10 = vpack.c.bf16 %v9466_v8, %v9465_v51  ;;  %v10537_v38 = vld [vmem:[#allocation3 + $0x122] sm:$0xff]  ;;  %v10538_v46 = vld [vmem:[#allocation3 + $0x12a] sm:$0xff] }
 0x944   :  { %v10591_v8 = vpack.c.bf16 %v10538_v46, %v10537_v38 }
 0x94a   :  { %14208 = vmatmul.mubr.msk.bf16.gmra.mrb[56].mxu1 %vm5397_vm3, %v9494_v11  ;;  %v9468_v11 = vld [vmem:[#allocation3 + $0x2c0] sm:$0xff] }
 0x94b   :  { %14211 = vmatprep.mubr.msk.bf16.mxu1 %vm5397_vm3, %v18913_v20  ;;  %v9455_v20 = vld [vmem:[#allocation3 + $0x228] sm:$0xff] }
 0x94c   :  { %v9500_v9 = vpack.c.bf16 %v9456_v48, %v9455_v20  ;;  %v9479_v48 = vld [vmem:[#allocation3 + $0x348] sm:$0xff] }
 0x94d   :  { %v9512_v19 = vpack.c.bf16 %v9480_v24, %v9479_v48  ;;  %v10553_v48 = vld [vmem:[#allocation3 + $0x212] sm:$0xff]  ;;  %v10554_v24 = vld [vmem:[#allocation3 + $0x21a] sm:$0xff] }
 0x952   :  { %14212 = vmatmul.mubr.msk.bf16.gmra.mrb[60].mxu1 %vm5397_vm3, %v9496_v5  ;;  %v9506_v5 = vpack.c.bf16 %v9468_v11, %v9467_v27  ;;  %v10541_v27 = vld [vmem:[#allocation3 + $0x152] sm:$0xff]  ;;  %v10542_v11 = vld [vmem:[#allocation3 + $0x15a] sm:$0xff] }
 0x953   :  { %14215 = vmatprep.mubr.msk.bf16.mxu1 %vm5397_vm3, %v9497_v61  ;;  %v9472_v61 = vld [vmem:[#allocation3 + $0x2f0] sm:$0xff]  ;;  %v10593_v6 = vpack.c.bf16 %v10542_v11, %v10541_v27 }
 0x954   :  { %v9508_v42 = vpack.c.bf16 %v9472_v61, %v9471_v2  ;;  %v10547_v61 = vld [vmem:[#allocation3 + $0x19a] sm:$0xff] }
 0x955   :  { %v10596_v40 = vpack.c.bf16 %v10548_v43, %v10547_v61 }
 0x95a   :  { %14216 = vmatmul.mubr.msk.bf16.gmra.mrb[64].mxu1 %vm5397_vm3, %v9498_v26  ;;  %v9475_v26 = vld [vmem:[#allocation3 + $0x318] sm:$0xff] }
 0x95b   :  { %14219 = vmatprep.mubr.msk.bf16.mxu1 %vm5397_vm3, %v9499_v18  ;;  %v9476_v18 = vld [vmem:[#allocation3 + $0x320] sm:$0xff] }
 0x95c   :  { %v9510_v20 = vpack.c.bf16 %v9476_v18, %v9475_v26  ;;  %v10551_v18 = vld [vmem:[#allocation3 + $0x1fa] sm:$0xff] }
 0x962   :  { %14220 = vmatmul.mubr.msk.bf16.gmra.mrb[68].mxu1 %vm5397_vm3, %v9500_v9  ;;  %v10712_v9 = vsel %vm21292_vm2, %v19160_v53, 0  ;;  %v10531_v53 = vld [vmem:[#allocation3 + $0xda] sm:$0xff] }
 0x963   :  { %14223 = vmatprep.mubr.msk.bf16.mxu1 %vm5397_vm3, %v9501_v39  ;;  %v10532_v39 = vld [vmem:[#allocation3 + $0xe2] sm:$0xff] }
 0x964   :  { %v10588_v3 = vpack.c.bf16 %v10532_v39, %v10531_v53  ;;  %v10575_v53 = vld [vmem:[#allocation3 + $0x31a] sm:$0xff]  ;;  %v10576_v39 = vld [vmem:[#allocation3 + $0x322] sm:$0xff] }
 0x965   :  { %v10610_v0 = vpack.c.bf16 %v10576_v39, %v10575_v53 }
 0x96a   :  { %14224 = vmatmul.mubr.msk.bf16.gmra.mrb[72].mxu1 %vm5397_vm3, %v9502_v32  ;;  %v10535_v32 = vld [vmem:[#allocation3 + $0x10a] sm:$0xff] }
 0x96b   :  { %14227 = vmatprep.mubr.msk.bf16.mxu1 %vm5397_vm3, %v9503_v7  ;;  %v10536_v7 = vld [vmem:[#allocation3 + $0x112] sm:$0xff] }
 0x96c   :  { %v10590_v51 = vpack.c.bf16 %v10536_v7, %v10535_v32  ;;  %v19295_v32 = vpop.f32.mrb[64].mxu0 }
 0x96d   :  { %v19297_v7 = vpop.f32.mrb[65].mxu0 }
 0x96e   :  { %v19299_v38 = vpop.f32.mrb[66].mxu0 }
 0x96f   :  { %v19301_v46 = vpop.f32.mrb[67].mxu0 }
 0x972   :  { %14228 = vmatmul.mubr.msk.bf16.gmra.mrb[76].mxu1 %vm5397_vm3, %v9504_v47  ;;  %v10539_v47 = vld [vmem:[#allocation3 + $0x13a] sm:$0xff] }
 0x973   :  { %14231 = vmatprep.mubr.msk.bf16.mxu1 %vm5397_vm3, %v9505_v10  ;;  %v10540_v10 = vld [vmem:[#allocation3 + $0x142] sm:$0xff] }
 0x974   :  { %v10592_v55 = vpack.c.bf16 %v10540_v10, %v10539_v47 }
 0x97a   :  { %14232 = vmatmul.mubr.msk.bf16.gmra.mrb[80].mxu1 %vm5397_vm3, %v9506_v5  ;;  %v10543_v5 = vld [vmem:[#allocation3 + $0x16a] sm:$0xff] }
 0x97b   :  { %14235 = vmatprep.mubr.msk.bf16.mxu1 %vm5397_vm3, %v9507_v45  ;;  %v10544_v45 = vld [vmem:[#allocation3 + $0x172] sm:$0xff] }
 0x97c   :  { %v10594_v2 = vpack.c.bf16 %v10544_v45, %v10543_v5 }
 0x982   :  { %14236 = vmatmul.mubr.msk.bf16.gmra.mrb[84].mxu1 %vm5397_vm3, %v9508_v42  ;;  %v10549_v42 = vld [vmem:[#allocation3 + $0x1e2] sm:$0xff] }
 0x983   :  { %14239 = vmatprep.mubr.msk.bf16.mxu1 %vm5397_vm3, %v9509_v22  ;;  %v10550_v22 = vld [vmem:[#allocation3 + $0x1ea] sm:$0xff] }
 0x984   :  { %v10597_v26 = vpack.c.bf16 %v10550_v22, %v10549_v42 }
 0x98a   :  { %14240 = vmatmul.mubr.msk.bf16.gmra.mrb[88].mxu1 %vm5397_vm3, %v9510_v20  ;;  %v10552_v20 = vld [vmem:[#allocation3 + $0x202] sm:$0xff] }
 0x98b   :  { %14243 = vmatprep.mubr.msk.bf16.mxu1 %vm5397_vm3, %v18947_v59  ;;  %v9997_v59 = vld [vmem:[#allocation3 + $0x199] sm:$0xff] }
 0x992   :  { %14244 = vmatmul.mubr.msk.bf16.gmra.mrb[92].mxu1 %vm5397_vm3, %v9512_v19  ;;  %v10598_v19 = vpack.c.bf16 %v10552_v20, %v10551_v18 }
 0x993   :  { %14249 = vmatprep.mubr.msk.bf16.mxu1 %vm5397_vm3, %v18952_v31  ;;  %v9998_v31 = vld [vmem:[#allocation3 + $0x1a1] sm:$0xff] }
 0x99a   :  { %14250 = vmatmul.mubr.msk.bf16.vlgmr.msra.gmra.mrb[32].mxu1 %vm5397_vm3, %v18955_v28  ;;  %v10046_v28 = vpack.c.bf16 %v9998_v31, %v9997_v59  ;;  %v10556_v59 = vld [vmem:[#allocation3 + $0x232] sm:$0xff]  ;;  %v10557_v31 = vld [vmem:[#allocation3 + $0x242] sm:$0xff] }
 0x99b   :  { %14314 = vmatpush3.bf16.msra.mxu1 %v10712_v9  ;;  %14253 = vmatprep.mubr.msk.bf16.mxu1 %vm5397_vm3, %v18968_v13  ;;  %v21293_v13 = vld [vmem:[#allocation41_spill] sm:$0xff]  ;;  %v10599_v9 = vpack.c.bf16 %v10554_v24, %v10553_v48 }
 0x9a2   :  { %14254 = vmatmul.mubr.msk.bf16.gmra.mrb[36].mxu1 %vm5397_vm3, %v18970_v60  ;;  %v21294_v60 = vld [vmem:[#allocation42_spill] sm:$0xff] }
 0x9a3   :  { %14257 = vmatprep.mubr.msk.bf16.mxu1 %vm5397_vm3, %v18976_v56  ;;  %v10029_v56 = vld [vmem:[#allocation3 + $0x349] sm:$0xff] }
 0x9aa   :  { %14258 = vmatmul.mubr.msk.bf16.gmra.mrb[40].mxu1 %vm5397_vm3, %v18978_v41  ;;  %v10030_v41 = vld [vmem:[#allocation3 + $0x351] sm:$0xff] }
 0x9ab   :  { %14261 = vmatprep.mubr.msk.bf16.mxu1 %vm5397_vm3, %v18984_v25  ;;  %v10062_v25 = vpack.c.bf16 %v10030_v41, %v10029_v56  ;;  %v10559_v56 = vld [vmem:[#allocation3 + $0x25a] sm:$0xff]  ;;  %v10560_v41 = vld [vmem:[#allocation3 + $0x262] sm:$0xff] }
 0x9b2   :  { %14262 = vmatmul.mubr.msk.bf16.gmra.mrb[44].mxu1 %vm5397_vm3, %v18986_v23  ;;  %v10517_v23 = vld [vmem:[#allocation3 + $0x32] sm:$0xff] }
 0x9b3   :  { %14265 = vmatprep.mubr.msk.bf16.mxu1 %vm5397_vm3, %v18992_v52  ;;  %v10518_v52 = vld [vmem:[#allocation3 + $0x3a] sm:$0xff] }
 0x9ba   :  { %14266 = vmatmul.mubr.msk.bf16.gmra.mrb[48].mxu1 %vm5397_vm3, %v18994_v63  ;;  %v10581_v63 = vpack.c.bf16 %v10518_v52, %v10517_v23  ;;  %v10562_v23 = vld [vmem:[#allocation3 + $0x27a] sm:$0xff]  ;;  %v10602_v52 = vpack.c.bf16 %v10560_v41, %v10559_v56 }
 0x9bb   :  { %14269 = vmatprep.mubr.msk.bf16.mxu1 %vm5397_vm3, %v19000_v34  ;;  %v10519_v34 = vld [vmem:[#allocation3 + $0x4a] sm:$0xff] }
 0x9c2   :  { %14270 = vmatmul.mubr.msk.bf16.gmra.mrb[52].mxu1 %vm5397_vm3, %v19002_v35  ;;  %v10520_v35 = vld [vmem:[#allocation3 + $0x52] sm:$0xff] }
 0x9c3   :  { %14273 = vmatprep.mubr.msk.bf16.mxu1 %vm5397_vm3, %v19008_v14  ;;  %v10521_v14 = vld [vmem:[#allocation3 + $0x62] sm:$0xff] }
 0x9ca   :  { %14274 = vmatmul.mubr.msk.bf16.gmra.mrb[56].mxu1 %vm5397_vm3, %v19010_v36  ;;  %v10522_v36 = vld [vmem:[#allocation3 + $0x6a] sm:$0xff] }
 0x9cb   :  { %14277 = vmatprep.mubr.msk.bf16.mxu1 %vm5397_vm3, %v19016_v17  ;;  %v10582_v17 = vpack.c.bf16 %v10520_v35, %v10519_v34  ;;  %v10563_v34 = vld [vmem:[#allocation3 + $0x28a] sm:$0xff]  ;;  %v10564_v35 = vld [vmem:[#allocation3 + $0x292] sm:$0xff] }
 0x9d2   :  { %14278 = vmatmul.mubr.msk.bf16.gmra.mrb[60].mxu1 %vm5397_vm3, %v10046_v28  ;;  %v10558_v28 = vld [vmem:[#allocation3 + $0x24a] sm:$0xff] }
 0x9d3   :  { %14281 = vmatprep.mubr.msk.bf16.mxu1 %vm5397_vm3, %v19021_v16  ;;  %v10583_v16 = vpack.c.bf16 %v10522_v36, %v10521_v14  ;;  %v10565_v14 = vld [vmem:[#allocation3 + $0x2a2] sm:$0xff]  ;;  %v10566_v36 = vld [vmem:[#allocation3 + $0x2aa] sm:$0xff] }
 0x9da   :  { %14282 = vmatmul.mubr.msk.bf16.gmra.mrb[64].mxu1 %vm5397_vm3, %v19023_v33  ;;  %v10523_v33 = vld [vmem:[#allocation3 + $0x7a] sm:$0xff] }
 0x9db   :  { %14285 = vmatprep.mubr.msk.bf16.mxu1 %vm5397_vm3, %v19029_v50  ;;  %v10524_v50 = vld [vmem:[#allocation3 + $0x82] sm:$0xff] }
 0x9e2   :  { %14286 = vmatmul.mubr.msk.bf16.gmra.mrb[68].mxu1 %vm5397_vm3, %v19031_v62  ;;  %v10525_v62 = vld [vmem:[#allocation3 + $0x92] sm:$0xff] }
 0x9e3   :  { %14289 = vmatprep.mubr.msk.bf16.mxu1 %vm5397_vm3, %v19037_v54  ;;  %v10526_v54 = vld [vmem:[#allocation3 + $0x9a] sm:$0xff] }
 0x9ea   :  { %14290 = vmatmul.mubr.msk.bf16.gmra.mrb[72].mxu1 %vm5397_vm3, %v19039_v37  ;;  %v10584_v37 = vpack.c.bf16 %v10524_v50, %v10523_v33  ;;  %v10567_v33 = vld [vmem:[#allocation3 + $0x2ba] sm:$0xff]  ;;  %v10568_v50 = vld [vmem:[#allocation3 + $0x2c2] sm:$0xff] }
 0x9eb   :  { %14293 = vmatprep.mubr.msk.bf16.mxu1 %vm5397_vm3, %v19045_v12  ;;  %v10585_v12 = vpack.c.bf16 %v10526_v54, %v10525_v62  ;;  %v10569_v62 = vld [vmem:[#allocation3 + $0x2d2] sm:$0xff]  ;;  %v10570_v54 = vld [vmem:[#allocation3 + $0x2da] sm:$0xff] }
 0x9f2   :  { %14294 = vmatmul.mubr.msk.bf16.gmra.mrb[76].mxu1 %vm5397_vm3, %v19047_v58  ;;  %v10527_v58 = vld [vmem:[#allocation3 + $0xaa] sm:$0xff] }
 0x9f3   :  { %14297 = vmatprep.mubr.msk.bf16.mxu1 %vm5397_vm3, %v21293_v13 }
 0x9fa   :  { %14298 = vmatmul.mubr.msk.bf16.gmra.mrb[80].mxu1 %vm5397_vm3, %v21294_v60  ;;  %v10601_v60 = vpack.c.bf16 %v10558_v28, %v10557_v31 }
 0x9fb   :  { %14301 = vmatprep.mubr.msk.bf16.mxu1 %vm5397_vm3, %v19061_v15  ;;  %v10530_v15 = vld [vmem:[#allocation3 + $0xca] sm:$0xff] }
 0xa02   :  { %14302 = vmatmul.mubr.msk.bf16.gmra.mrb[84].mxu1 %vm5397_vm3, %v19063_v49 }
 0xa03   :  { %14305 = vmatprep.mubr.msk.bf16.mxu1 %vm5397_vm3, %v19069_v21  ;;  %v10528_v21 = vld [vmem:[#allocation3 + $0xb2] sm:$0xff] }
 0xa04   :  { %v10586_v49 = vpack.c.bf16 %v10528_v21, %v10527_v58  ;;  %v10571_v58 = vld [vmem:[#allocation3 + $0x2ea] sm:$0xff]  ;;  %v10572_v21 = vld [vmem:[#allocation3 + $0x2f2] sm:$0xff] }
 0xa0a   :  { %14306 = vmatmul.mubr.msk.bf16.gmra.mrb[88].mxu1 %vm5397_vm3, %v19071_v30  ;;  %v10529_v30 = vld [vmem:[#allocation3 + $0xc2] sm:$0xff] }
 0xa0b   :  { %14309 = vmatprep.mubr.msk.bf16.mxu1 %vm5397_vm3, %v19077_v1  ;;  %v10587_v1 = vpack.c.bf16 %v10530_v15, %v10529_v30  ;;  %v10573_v30 = vld [vmem:[#allocation3 + $0x302] sm:$0xff]  ;;  %v10574_v15 = vld [vmem:[#allocation3 + $0x30a] sm:$0xff] }
 0xa12   :  { %14310 = vmatmul.mubr.msk.bf16.gmra.mrb[92].mxu1 %vm5397_vm3, %v10062_v25  ;;  %v10561_v25 = vld [vmem:[#allocation3 + $0x272] sm:$0xff] }
 0xa13   :  { %14315 = vmatprep.mubr.msk.bf16.mxu1 %vm5397_vm3, %v10581_v63  ;;  %v10603_v63 = vpack.c.bf16 %v10562_v23, %v10561_v25 }
 0xa1a   :  { %14316 = vmatmul.mubr.msk.bf16.vlgmr.msra.gmra.mrb[32].mxu1 %vm5397_vm3, %v10582_v17  ;;  %v10604_v17 = vpack.c.bf16 %v10564_v35, %v10563_v34 }
 0xa1b   :  { %14319 = vmatprep.mubr.msk.bf16.mxu1 %vm5397_vm3, %v10583_v16  ;;  %v10605_v16 = vpack.c.bf16 %v10566_v36, %v10565_v14 }
 0xa22   :  { %14320 = vmatmul.mubr.msk.bf16.gmra.mrb[36].mxu1 %vm5397_vm3, %v10584_v37  ;;  %v10606_v37 = vpack.c.bf16 %v10568_v50, %v10567_v33 }
 0xa23   :  { %14323 = vmatprep.mubr.msk.bf16.mxu1 %vm5397_vm3, %v10585_v12  ;;  %v10607_v12 = vpack.c.bf16 %v10570_v54, %v10569_v62 }
 0xa2a   :  { %14324 = vmatmul.mubr.msk.bf16.gmra.mrb[40].mxu1 %vm5397_vm3, %v10586_v49  ;;  %v10608_v49 = vpack.c.bf16 %v10572_v21, %v10571_v58 }
 0xa2b   :  { %14327 = vmatprep.mubr.msk.bf16.mxu1 %vm5397_vm3, %v10587_v1  ;;  %v10609_v1 = vpack.c.bf16 %v10574_v15, %v10573_v30 }
 0xa32   :  { %14328 = vmatmul.mubr.msk.bf16.gmra.mrb[44].mxu1 %vm5397_vm3, %v10588_v3  ;;  %v10580_v3 = vld [vmem:[#allocation3 + $0x352] sm:$0xff] }
 0xa33   :  { %14331 = vmatprep.mubr.msk.bf16.mxu1 %vm5397_vm3, %v10589_v4  ;;  %v10612_v4 = vpack.c.bf16 %v10580_v3, %v10579_v57 }
 0xa3a   :  { %14332 = vmatmul.mubr.msk.bf16.gmra.mrb[48].mxu1 %vm5397_vm3, %v10590_v51  ;;  %v19303_v51 = vpop.f32.mrb[68].mxu0 }
 0xa3b   :  { %14335 = vmatprep.mubr.msk.bf16.mxu1 %vm5397_vm3, %v10591_v8  ;;  %v19305_v8 = vpop.f32.mrb[69].mxu0 }
 0xa3c   :  { %v19307_v47 = vpop.f32.mrb[70].mxu0 }
 0xa42   :  { %14336 = vmatmul.mubr.msk.bf16.gmra.mrb[52].mxu1 %vm5397_vm3, %v10592_v55 }
 0xa43   :  { %14339 = vmatprep.mubr.msk.bf16.mxu1 %vm5397_vm3, %v10593_v6 }
 0xa4a   :  { %14340 = vmatmul.mubr.msk.bf16.gmra.mrb[56].mxu1 %vm5397_vm3, %v10594_v2 }
 0xa4b   :  { %14343 = vmatprep.mubr.msk.bf16.mxu1 %vm5397_vm3, %v19117_v44  ;;  %v10555_v44 = vld [vmem:[#allocation3 + $0x22a] sm:$0xff] }
 0xa4c   :  { %v10600_v13 = vpack.c.bf16 %v10556_v59, %v10555_v44 }
 0xa52   :  { %14344 = vmatmul.mubr.msk.bf16.gmra.mrb[60].mxu1 %vm5397_vm3, %v10596_v40 }
 0xa53   :  { %14347 = vmatprep.mubr.msk.bf16.mxu1 %vm5397_vm3, %v10597_v26 }
 0xa5a   :  { %14348 = vmatmul.mubr.msk.bf16.gmra.mrb[64].mxu1 %vm5397_vm3, %v10598_v19 }
 0xa5b   :  { %14351 = vmatprep.mubr.msk.bf16.mxu1 %vm5397_vm3, %v10599_v9 }
 0xa62   :  { %14352 = vmatmul.mubr.msk.bf16.gmra.mrb[68].mxu1 %vm5397_vm3, %v10600_v13 }
 0xa63   :  { %14355 = vmatprep.mubr.msk.bf16.mxu1 %vm5397_vm3, %v10601_v60 }
 0xa6a   :  { %14356 = vmatmul.mubr.msk.bf16.gmra.mrb[72].mxu1 %vm5397_vm3, %v10602_v52 }
 0xa6b   :  { %14359 = vmatprep.mubr.msk.bf16.mxu1 %vm5397_vm3, %v10603_v63 }
 0xa72   :  { %14360 = vmatmul.mubr.msk.bf16.gmra.mrb[76].mxu1 %vm5397_vm3, %v10604_v17 }
 0xa73   :  { %14363 = vmatprep.mubr.msk.bf16.mxu1 %vm5397_vm3, %v10605_v16 }
 0xa7a   :  { %14364 = vmatmul.mubr.msk.bf16.gmra.mrb[80].mxu1 %vm5397_vm3, %v10606_v37 }
 0xa7b   :  { %14367 = vmatprep.mubr.msk.bf16.mxu1 %vm5397_vm3, %v10607_v12 }
 0xa82   :  { %14368 = vmatmul.mubr.msk.bf16.gmra.mrb[84].mxu1 %vm5397_vm3, %v10608_v49 }
 0xa83   :  { %14371 = vmatprep.mubr.msk.bf16.mxu1 %vm5397_vm3, %v10609_v1 }
 0xa8a   :  { %14372 = vmatmul.mubr.msk.bf16.gmra.mrb[88].mxu1 %vm5397_vm3, %v10610_v0 }
 0xa8b   :  { %14375 = vmatprep.mubr.msk.bf16.mxu1 %vm5397_vm3, %v19151_v29  ;;  %v19309_v29 = vpop.f32.mrb[71].mxu0 }
 0xa92   :  { %14376 = vmatmul.mubr.msk.bf16.gmra.mrb[92].mxu1 %vm5397_vm3, %v10612_v4 }
 0xaed   :  { %v19311_v10 = vpop.f32.mrb[32].mxu1 }
 0xaee   :  { %v19313_v27 = vpop.f32.mrb[33].mxu1  ;;  %v11204_v5 = vmul.f32 %v19311_v10, %v19311_v10  ;;  %v11072_v40 = vsel %vm5397_vm3, %v19311_v10, 0.0 }
 0xaef   :  { %v11202_v11 = vmul.f32 %v19313_v27, %v19313_v27  ;;  %v19317_v55 = vpop.f32.mrb[34].mxu1  ;;  %v11069_v45 = vsel %vm5397_vm3, %v19313_v27, 0.0 }
 0xaf0   :  { %v19319_v6 = vpop.f32.mrb[35].mxu1  ;;  %v11205_v22 = vmul.f32 %v19317_v55, %v19317_v55  ;;  %v11269_v48 = vsel %vm5397_vm3, %v11204_v5, 0.0  ;;  %v11074_v24 = vsel %vm5397_vm3, %v19317_v55, 0.0 }
 0xaf1   :  { %v11070_v2 = vsel %vm5397_vm3, %v19319_v6, 0.0  ;;  %v11203_v61 = vmul.f32 %v19319_v6, %v19319_v6  ;;  %v11266_v42 = vsel %vm5397_vm3, %v11202_v11, 0.0 }
 0xaf2   :  { %v11071_v43 = vadd.f32 %v11070_v2, %v11069_v45  ;;  %v11271_v31 = vsel %vm5397_vm3, %v11205_v22, 0.0 }
 0xaf3   :  { %v11267_v26 = vsel %vm5397_vm3, %v11203_v61, 0.0 }
 0xaf4   :  { %v11073_v18 = vadd.f32 %v11072_v40, %v11071_v43  ;;  %v11268_v20 = vadd.f32 %v11267_v26, %v11266_v42 }
 0xaf5   :  { %v19338_v19 = vpop.f32.mrb[36].mxu1 }
 0xaf6   :  { %v11270_v9 = vadd.f32 %v11269_v48, %v11268_v20  ;;  %v19340_v44 = vpop.f32.mrb[37].mxu1  ;;  %v11075_v59 = vadd.f32 %v11074_v24, %v11073_v18  ;;  %v11208_v23 = vmul.f32 %v19338_v19, %v19338_v19  ;;  %v11080_v36 = vsel %vm5397_vm3, %v19338_v19, 0.0 }
 0xaf7   :  { %v11076_v28 = vsel %vm5397_vm3, %v19340_v44, 0.0  ;;  %v11206_v13 = vmul.f32 %v19340_v44, %v19340_v44  ;;  %v19347_v60 = vpop.f32.mrb[38].mxu1 }
 0xaf8   :  { %v11077_v56 = vadd.f32 %v11076_v28, %v11075_v59  ;;  %v11272_v41 = vadd.f32 %v11271_v31, %v11270_v9  ;;  %v19349_v25 = vpop.f32.mrb[39].mxu1  ;;  %v11209_v17 = vmul.f32 %v19347_v60, %v19347_v60  ;;  %v11277_v62 = vsel %vm5397_vm3, %v11208_v23, 0.0 }
 0xaf9   :  { %v11273_v52 = vsel %vm5397_vm3, %v11206_v13, 0.0  ;;  %v11078_v63 = vsel %vm5397_vm3, %v19349_v25, 0.0  ;;  %v11207_v34 = vmul.f32 %v19349_v25, %v19349_v25  ;;  %v11082_v54 = vsel %vm5397_vm3, %v19347_v60, 0.0 }
 0xafa   :  { %v11274_v35 = vadd.f32 %v11273_v52, %v11272_v41  ;;  %v11079_v14 = vadd.f32 %v11078_v63, %v11077_v56  ;;  %v11279_v30 = vsel %vm5397_vm3, %v11209_v17, 0.0 }
 0xafb   :  { %v11275_v16 = vsel %vm5397_vm3, %v11207_v34, 0.0 }
 0xafc   :  { %v11081_v33 = vadd.f32 %v11080_v36, %v11079_v14  ;;  %v11276_v50 = vadd.f32 %v11275_v16, %v11274_v35 }
 0xafd   :  { %v19366_v37 = vpop.f32.mrb[40].mxu1 }
 0xafe   :  { %21295 = vst [vmem:[#allocation26_spill] sm:$0xff] %v19366_v37  ;;  %v11278_v12 = vadd.f32 %v11277_v62, %v11276_v50  ;;  %v19368_v58 = vpop.f32.mrb[41].mxu1  ;;  %v11083_v21 = vadd.f32 %v11082_v54, %v11081_v33  ;;  %v11212_v57 = vmul.f32 %v19366_v37, %v19366_v37  ;;  %v11088_v2 = vsel %vm5397_vm3, %v19366_v37, 0.0 }
 0xaff   :  { %21296 = vst [vmem:[#allocation25_spill] sm:$0xff] %v19368_v58  ;;  %v11084_v15 = vsel %vm5397_vm3, %v19368_v58, 0.0  ;;  %v11210_v49 = vmul.f32 %v19368_v58, %v19368_v58  ;;  %v19375_v1 = vpop.f32.mrb[42].mxu1 }
 0xb00   :  { %21297 = vst [vmem:[#allocation27_spill] sm:$0xff] %v19375_v1  ;;  %v11085_v53 = vadd.f32 %v11084_v15, %v11083_v21  ;;  %v11280_v39 = vadd.f32 %v11279_v30, %v11278_v12  ;;  %v19377_v0 = vpop.f32.mrb[43].mxu1  ;;  %v11213_v61 = vmul.f32 %v19375_v1, %v19375_v1  ;;  %v11285_v22 = vsel %vm5397_vm3, %v11212_v57, 0.0 }
 0xb01   :  { %21298 = vst [vmem:[#allocation40_spill] sm:$0xff] %v19377_v0  ;;  %v11281_v3 = vsel %vm5397_vm3, %v11210_v49, 0.0  ;;  %v11086_v4 = vsel %vm5397_vm3, %v19377_v0, 0.0  ;;  %v11211_v11 = vmul.f32 %v19377_v0, %v19377_v0  ;;  %v11090_v26 = vsel %vm5397_vm3, %v19375_v1, 0.0 }
 0xb02   :  { %v11282_v5 = vadd.f32 %v11281_v3, %v11280_v39  ;;  %v11087_v45 = vadd.f32 %v11086_v4, %v11085_v53  ;;  %v11287_v9 = vsel %vm5397_vm3, %v11213_v61, 0.0 }
 0xb03   :  { %v11283_v43 = vsel %vm5397_vm3, %v11211_v11, 0.0 }
 0xb04   :  { %v11089_v40 = vadd.f32 %v11088_v2, %v11087_v45  ;;  %v11284_v42 = vadd.f32 %v11283_v43, %v11282_v5 }
 0xb05   :  { %v19394_v18 = vpop.f32.mrb[44].mxu1 }
 0xb06   :  { %21299 = vst [vmem:[#allocation41_spill] sm:$0xff] %v19394_v18  ;;  %v11286_v20 = vadd.f32 %v11285_v22, %v11284_v42  ;;  %v19396_v48 = vpop.f32.mrb[45].mxu1  ;;  %v11091_v24 = vadd.f32 %v11090_v26, %v11089_v40  ;;  %v11216_v23 = vmul.f32 %v19394_v18, %v19394_v18  ;;  %v11096_v36 = vsel %vm5397_vm3, %v19394_v18, 0.0 }
 0xb07   :  { %21300 = vst [vmem:[#allocation42_spill] sm:$0xff] %v19396_v48  ;;  %v11092_v59 = vsel %vm5397_vm3, %v19396_v48, 0.0  ;;  %v11214_v31 = vmul.f32 %v19396_v48, %v19396_v48  ;;  %v19403_v28 = vpop.f32.mrb[46].mxu1 }
 0xb08   :  { %21301 = vst [vmem:[#allocation43_spill] sm:$0xff] %v19403_v28  ;;  %v11093_v13 = vadd.f32 %v11092_v59, %v11091_v24  ;;  %v11288_v56 = vadd.f32 %v11287_v9, %v11286_v20  ;;  %v19405_v41 = vpop.f32.mrb[47].mxu1  ;;  %v11217_v17 = vmul.f32 %v19403_v28, %v19403_v28  ;;  %v11293_v62 = vsel %vm5397_vm3, %v11216_v23, 0.0 }
 0xb09   :  { %21302 = vst [vmem:[#allocation44_spill] sm:$0xff] %v19405_v41  ;;  %v11289_v52 = vsel %vm5397_vm3, %v11214_v31, 0.0  ;;  %v11094_v63 = vsel %vm5397_vm3, %v19405_v41, 0.0  ;;  %v11215_v34 = vmul.f32 %v19405_v41, %v19405_v41  ;;  %v11098_v54 = vsel %vm5397_vm3, %v19403_v28, 0.0 }
 0xb0a   :  { %v11290_v35 = vadd.f32 %v11289_v52, %v11288_v56  ;;  %v11095_v14 = vadd.f32 %v11094_v63, %v11093_v13  ;;  %v11295_v49 = vsel %vm5397_vm3, %v11217_v17, 0.0 }
 0xb0b   :  { %v11291_v16 = vsel %vm5397_vm3, %v11215_v34, 0.0 }
 0xb0c   :  { %v11097_v33 = vadd.f32 %v11096_v36, %v11095_v14  ;;  %v11292_v50 = vadd.f32 %v11291_v16, %v11290_v35 }
 0xb0d   :  { %v19422_v12 = vpop.f32.mrb[48].mxu1 }
 0xb0e   :  { %21303 = vst [vmem:[#allocation45_spill] sm:$0xff] %v19422_v12  ;;  %v11294_v21 = vadd.f32 %v11293_v62, %v11292_v50  ;;  %v19424_v30 = vpop.f32.mrb[49].mxu1  ;;  %v11099_v15 = vadd.f32 %v11098_v54, %v11097_v33  ;;  %v11220_v5 = vmul.f32 %v19422_v12, %v19422_v12  ;;  %v11104_v42 = vsel %vm5397_vm3, %v19422_v12, 0.0 }
 0xb0f   :  { %21304 = vst [vmem:[#allocation46_spill] sm:$0xff] %v19424_v30  ;;  %v11100_v53 = vsel %vm5397_vm3, %v19424_v30, 0.0  ;;  %v11218_v39 = vmul.f32 %v19424_v30, %v19424_v30  ;;  %v19431_v57 = vpop.f32.mrb[50].mxu1 }
 0xb10   :  { %21305 = vst [vmem:[#allocation47_spill] sm:$0xff] %v19431_v57  ;;  %v11101_v3 = vadd.f32 %v11100_v53, %v11099_v15  ;;  %v11296_v4 = vadd.f32 %v11295_v49, %v11294_v21  ;;  %v19433_v11 = vpop.f32.mrb[51].mxu1  ;;  %v11221_v22 = vmul.f32 %v19431_v57, %v19431_v57  ;;  %v11301_v9 = vsel %vm5397_vm3, %v11220_v5, 0.0 }
 0xb11   :  { %21306 = vst [vmem:[#allocation48_spill] sm:$0xff] %v19433_v11  ;;  %v11297_v45 = vsel %vm5397_vm3, %v11218_v39, 0.0  ;;  %v11102_v2 = vsel %vm5397_vm3, %v19433_v11, 0.0  ;;  %v11219_v61 = vmul.f32 %v19433_v11, %v19433_v11  ;;  %v11106_v59 = vsel %vm5397_vm3, %v19431_v57, 0.0 }
 0xb12   :  { %v11298_v43 = vadd.f32 %v11297_v45, %v11296_v4  ;;  %v11103_v40 = vadd.f32 %v11102_v2, %v11101_v3  ;;  %v11303_v52 = vsel %vm5397_vm3, %v11221_v22, 0.0 }
 0xb13   :  { %v11299_v26 = vsel %vm5397_vm3, %v11219_v61, 0.0 }
 0xb14   :  { %v11105_v20 = vadd.f32 %v11104_v42, %v11103_v40  ;;  %v11300_v24 = vadd.f32 %v11299_v26, %v11298_v43 }
 0xb15   :  { %v19450_v31 = vpop.f32.mrb[52].mxu1 }
 0xb16   :  { %21307 = vst [vmem:[#allocation49_spill] sm:$0xff] %v19450_v31  ;;  %v11302_v13 = vadd.f32 %v11301_v9, %v11300_v24  ;;  %v19452_v56 = vpop.f32.mrb[53].mxu1  ;;  %v11107_v23 = vadd.f32 %v11106_v59, %v11105_v20  ;;  %v11224_v16 = vmul.f32 %v19450_v31, %v19450_v31  ;;  %v11112_v15 = vsel %vm5397_vm3, %v19450_v31, 0.0 }
 0xb17   :  { %21308 = vst [vmem:[#allocation50_spill] sm:$0xff] %v19452_v56  ;;  %v11108_v63 = vsel %vm5397_vm3, %v19452_v56, 0.0  ;;  %v11222_v34 = vmul.f32 %v19452_v56, %v19452_v56  ;;  %v19459_v35 = vpop.f32.mrb[54].mxu1  ;;  %v19671_v56 = vpop.f32.mrb[72].mxu0 }
 0xb18   :  { %21309 = vst [vmem:[#allocation51_spill] sm:$0xff] %v19459_v35  ;;  %v11109_v14 = vadd.f32 %v11108_v63, %v11107_v23  ;;  %v11304_v36 = vadd.f32 %v11303_v52, %v11302_v13  ;;  %v19461_v17 = vpop.f32.mrb[55].mxu1  ;;  %v11225_v49 = vmul.f32 %v19459_v35, %v19459_v35  ;;  %v11309_v4 = vsel %vm5397_vm3, %v11224_v16, 0.0  ;;  %21319 = vst [vmem:[#allocation61_spill] sm:$0xff] %v19671_v56  ;;  %v19689_v57 = vpop.f32.mrb[73].mxu0 }
 0xb19   :  { %21310 = vst [vmem:[#allocation52_spill] sm:$0xff] %v19461_v17  ;;  %v11305_v33 = vsel %vm5397_vm3, %v11222_v34, 0.0  ;;  %v11110_v50 = vsel %vm5397_vm3, %v19461_v17, 0.0  ;;  %v11223_v62 = vmul.f32 %v19461_v17, %v19461_v17  ;;  %v11114_v5 = vsel %vm5397_vm3, %v19459_v35, 0.0  ;;  %21320 = vst [vmem:[#allocation62_spill] sm:$0xff] %v19689_v57 }
 0xb1a   :  { %v11306_v54 = vadd.f32 %v11305_v33, %v11304_v36  ;;  %v11111_v21 = vadd.f32 %v11110_v50, %v11109_v14  ;;  %v11311_v40 = vsel %vm5397_vm3, %v11225_v49, 0.0 }
 0xb1b   :  { %v11307_v53 = vsel %vm5397_vm3, %v11223_v62, 0.0 }
 0xb1c   :  { %v11113_v39 = vadd.f32 %v11112_v15, %v11111_v21  ;;  %v11308_v3 = vadd.f32 %v11307_v53, %v11306_v54 }
 0xb1d   :  { %v19478_v45 = vpop.f32.mrb[56].mxu1 }
 0xb1e   :  { %21311 = vst [vmem:[#allocation53_spill] sm:$0xff] %v19478_v45  ;;  %v11310_v2 = vadd.f32 %v11309_v4, %v11308_v3  ;;  %v19480_v61 = vpop.f32.mrb[57].mxu1  ;;  %v11115_v43 = vadd.f32 %v11114_v5, %v11113_v39  ;;  %v11228_v59 = vmul.f32 %v19478_v45, %v19478_v45  ;;  %v11120_v14 = vsel %vm5397_vm3, %v19478_v45, 0.0 }
 0xb1f   :  { %21312 = vst [vmem:[#allocation54_spill] sm:$0xff] %v19480_v61  ;;  %v11116_v42 = vsel %vm5397_vm3, %v19480_v61, 0.0  ;;  %v11226_v22 = vmul.f32 %v19480_v61, %v19480_v61  ;;  %v19487_v26 = vpop.f32.mrb[58].mxu1 }
 0xb20   :  { %21313 = vst [vmem:[#allocation55_spill] sm:$0xff] %v19487_v26  ;;  %v11117_v20 = vadd.f32 %v11116_v42, %v11115_v43  ;;  %v11312_v24 = vadd.f32 %v11311_v40, %v11310_v2  ;;  %v19489_v9 = vpop.f32.mrb[59].mxu1  ;;  %v11229_v36 = vmul.f32 %v19487_v26, %v19487_v26  ;;  %v11317_v62 = vsel %vm5397_vm3, %v11228_v59, 0.0 }
 0xb21   :  { %21314 = vst [vmem:[#allocation56_spill] sm:$0xff] %v19489_v9  ;;  %v11313_v13 = vsel %vm5397_vm3, %v11226_v22, 0.0  ;;  %v11118_v23 = vsel %vm5397_vm3, %v19489_v9, 0.0  ;;  %v11227_v52 = vmul.f32 %v19489_v9, %v19489_v9  ;;  %v11122_v54 = vsel %vm5397_vm3, %v19487_v26, 0.0 }
 0xb22   :  { %v11314_v63 = vadd.f32 %v11313_v13, %v11312_v24  ;;  %v11119_v34 = vadd.f32 %v11118_v23, %v11117_v20  ;;  %v11319_v39 = vsel %vm5397_vm3, %v11229_v36, 0.0 }
 0xb23   :  { %v11315_v16 = vsel %vm5397_vm3, %v11227_v52, 0.0 }
 0xb24   :  { %v11121_v33 = vadd.f32 %v11120_v14, %v11119_v34  ;;  %v11316_v50 = vadd.f32 %v11315_v16, %v11314_v63 }
 0xb25   :  { %v19506_v21 = vpop.f32.mrb[60].mxu1 }
 0xb26   :  { %21315 = vst [vmem:[#allocation57_spill] sm:$0xff] %v19506_v21  ;;  %v11318_v15 = vadd.f32 %v11317_v62, %v11316_v50  ;;  %v19508_v49 = vpop.f32.mrb[61].mxu1  ;;  %v11123_v53 = vadd.f32 %v11122_v54, %v11121_v33  ;;  %v11232_v42 = vmul.f32 %v19506_v21, %v19506_v21  ;;  %v11128_v23 = vsel %vm5397_vm3, %v19506_v21, 0.0 }
 0xb27   :  { %21316 = vst [vmem:[#allocation58_spill] sm:$0xff] %v19508_v49  ;;  %v11124_v3 = vsel %vm5397_vm3, %v19508_v49, 0.0  ;;  %v11230_v4 = vmul.f32 %v19508_v49, %v19508_v49  ;;  %v19515_v5 = vpop.f32.mrb[62].mxu1 }
 0xb28   :  { %21317 = vst [vmem:[#allocation59_spill] sm:$0xff] %v19515_v5  ;;  %v11125_v2 = vadd.f32 %v11124_v3, %v11123_v53  ;;  %v11320_v43 = vadd.f32 %v11319_v39, %v11318_v15  ;;  %v19517_v40 = vpop.f32.mrb[63].mxu1  ;;  %v11233_v52 = vmul.f32 %v19515_v5, %v19515_v5  ;;  %v11325_v36 = vsel %vm5397_vm3, %v11232_v42, 0.0 }
 0xb29   :  { %21318 = vst [vmem:[#allocation60_spill] sm:$0xff] %v19517_v40  ;;  %v11321_v22 = vsel %vm5397_vm3, %v11230_v4, 0.0  ;;  %v11126_v20 = vsel %vm5397_vm3, %v19517_v40, 0.0  ;;  %v11231_v24 = vmul.f32 %v19517_v40, %v19517_v40  ;;  %v11130_v16 = vsel %vm5397_vm3, %v19515_v5, 0.0 }
 0xb2a   :  { %v11322_v59 = vadd.f32 %v11321_v22, %v11320_v43  ;;  %v11127_v13 = vadd.f32 %v11126_v20, %v11125_v2  ;;  %v11327_v15 = vsel %vm5397_vm3, %v11233_v52, 0.0 }
 0xb2b   :  { %v11323_v63 = vsel %vm5397_vm3, %v11231_v24, 0.0 }
 0xb2c   :  { %v11129_v34 = vadd.f32 %v11128_v23, %v11127_v13  ;;  %v11324_v14 = vadd.f32 %v11323_v63, %v11322_v59 }
 0xb2d   :  { %v19534_v33 = vpop.f32.mrb[64].mxu1 }
 0xb2e   :  { %v11326_v50 = vadd.f32 %v11325_v36, %v11324_v14  ;;  %v19536_v62 = vpop.f32.mrb[65].mxu1  ;;  %v11131_v54 = vadd.f32 %v11130_v16, %v11129_v34  ;;  %v11236_v42 = vmul.f32 %v19534_v33, %v19534_v33  ;;  %v11136_v23 = vsel %vm5397_vm3, %v19534_v33, 0.0 }
 0xb2f   :  { %v11132_v53 = vsel %vm5397_vm3, %v19536_v62, 0.0  ;;  %v11234_v39 = vmul.f32 %v19536_v62, %v19536_v62  ;;  %v19543_v3 = vpop.f32.mrb[66].mxu1 }
 0xb30   :  { %v11133_v4 = vadd.f32 %v11132_v53, %v11131_v54  ;;  %v11328_v2 = vadd.f32 %v11327_v15, %v11326_v50  ;;  %v19545_v43 = vpop.f32.mrb[67].mxu1  ;;  %v11237_v52 = vmul.f32 %v19543_v3, %v19543_v3  ;;  %v11333_v36 = vsel %vm5397_vm3, %v11236_v42, 0.0 }
 0xb31   :  { %v11329_v22 = vsel %vm5397_vm3, %v11234_v39, 0.0  ;;  %v11134_v20 = vsel %vm5397_vm3, %v19545_v43, 0.0  ;;  %v11235_v24 = vmul.f32 %v19545_v43, %v19545_v43  ;;  %v11138_v16 = vsel %vm5397_vm3, %v19543_v3, 0.0 }
 0xb32   :  { %v11330_v59 = vadd.f32 %v11329_v22, %v11328_v2  ;;  %v11135_v13 = vadd.f32 %v11134_v20, %v11133_v4  ;;  %v11335_v39 = vsel %vm5397_vm3, %v11237_v52, 0.0 }
 0xb33   :  { %v11331_v63 = vsel %vm5397_vm3, %v11235_v24, 0.0 }
 0xb34   :  { %v11137_v34 = vadd.f32 %v11136_v23, %v11135_v13  ;;  %v11332_v14 = vadd.f32 %v11331_v63, %v11330_v59 }
 0xb35   :  { %v19562_v50 = vpop.f32.mrb[68].mxu1 }
 0xb36   :  { %v11334_v54 = vadd.f32 %v11333_v36, %v11332_v14  ;;  %v19564_v15 = vpop.f32.mrb[69].mxu1  ;;  %v11139_v53 = vadd.f32 %v11138_v16, %v11137_v34  ;;  %v11240_v59 = vmul.f32 %v19562_v50, %v19562_v50  ;;  %v11144_v14 = vsel %vm5397_vm3, %v19562_v50, 0.0 }
 0xb37   :  { %v11140_v4 = vsel %vm5397_vm3, %v19564_v15, 0.0  ;;  %v11238_v2 = vmul.f32 %v19564_v15, %v19564_v15  ;;  %v19571_v22 = vpop.f32.mrb[70].mxu1 }
 0xb38   :  { %v11141_v42 = vadd.f32 %v11140_v4, %v11139_v53  ;;  %v11336_v20 = vadd.f32 %v11335_v39, %v11334_v54  ;;  %v19573_v24 = vpop.f32.mrb[71].mxu1  ;;  %v11241_v36 = vmul.f32 %v19571_v22, %v19571_v22  ;;  %v11341_v39 = vsel %vm5397_vm3, %v11240_v59, 0.0 }
 0xb39   :  { %v11337_v13 = vsel %vm5397_vm3, %v11238_v2, 0.0  ;;  %v11142_v23 = vsel %vm5397_vm3, %v19573_v24, 0.0  ;;  %v11239_v52 = vmul.f32 %v19573_v24, %v19573_v24  ;;  %v11146_v4 = vsel %vm5397_vm3, %v19571_v22, 0.0 }
 0xb3a   :  { %v11338_v63 = vadd.f32 %v11337_v13, %v11336_v20  ;;  %v11143_v34 = vadd.f32 %v11142_v23, %v11141_v42  ;;  %v11343_v13 = vsel %vm5397_vm3, %v11241_v36, 0.0 }
 0xb3b   :  { %v11339_v16 = vsel %vm5397_vm3, %v11239_v52, 0.0 }
 0xb3c   :  { %v11145_v54 = vadd.f32 %v11144_v14, %v11143_v34  ;;  %v11340_v53 = vadd.f32 %v11339_v16, %v11338_v63 }
 0xb3d   :  { %v19590_v2 = vpop.f32.mrb[72].mxu1 }
 0xb3e   :  { %v11342_v40 = vadd.f32 %v11341_v39, %v11340_v53  ;;  %v19592_v20 = vpop.f32.mrb[73].mxu1  ;;  %v11147_v42 = vadd.f32 %v11146_v4, %v11145_v54  ;;  %v11244_v16 = vmul.f32 %v19590_v2, %v19590_v2  ;;  %v11152_v5 = vsel %vm5397_vm3, %v19590_v2, 0.0 }
 0xb3f   :  { %v11148_v23 = vsel %vm5397_vm3, %v19592_v20, 0.0  ;;  %v11242_v52 = vmul.f32 %v19592_v20, %v19592_v20  ;;  %v19599_v63 = vpop.f32.mrb[74].mxu1 }
 0xb40   :  { %v11149_v59 = vadd.f32 %v11148_v23, %v11147_v42  ;;  %v11344_v34 = vadd.f32 %v11343_v13, %v11342_v40  ;;  %v19601_v14 = vpop.f32.mrb[75].mxu1  ;;  %v11245_v40 = vmul.f32 %v19599_v63, %v19599_v63  ;;  %v11154_v49 = vsel %vm5397_vm3, %v19599_v63, 0.0 }
 0xb41   :  { %v11345_v53 = vsel %vm5397_vm3, %v11242_v52, 0.0  ;;  %v11150_v36 = vsel %vm5397_vm3, %v19601_v14, 0.0  ;;  %v11243_v54 = vmul.f32 %v19601_v14, %v19601_v14  ;;  %v11349_v52 = vsel %vm5397_vm3, %v11244_v16, 0.0 }
 0xb42   :  { %v11346_v39 = vadd.f32 %v11345_v53, %v11344_v34  ;;  %v11151_v4 = vadd.f32 %v11150_v36, %v11149_v59  ;;  %v11351_v53 = vsel %vm5397_vm3, %v11245_v40, 0.0 }
 0xb43   :  { %v11347_v42 = vsel %vm5397_vm3, %v11243_v54, 0.0 }
 0xb44   :  { %v11153_v13 = vadd.f32 %v11152_v5, %v11151_v4  ;;  %v11348_v23 = vadd.f32 %v11347_v42, %v11346_v39 }
 0xb45   :  { %v19618_v21 = vpop.f32.mrb[76].mxu1 }
 0xb46   :  { %v11350_v9 = vadd.f32 %v11349_v52, %v11348_v23  ;;  %v19620_v34 = vpop.f32.mrb[77].mxu1  ;;  %v11155_v59 = vadd.f32 %v11154_v49, %v11153_v13  ;;  %v11248_v42 = vmul.f32 %v19618_v21, %v19618_v21  ;;  %v11160_v26 = vsel %vm5397_vm3, %v19618_v21, 0.0 }
 0xb47   :  { %v11156_v36 = vsel %vm5397_vm3, %v19620_v34, 0.0  ;;  %v11246_v5 = vmul.f32 %v19620_v34, %v19620_v34  ;;  %v19627_v54 = vpop.f32.mrb[78].mxu1 }
 0xb48   :  { %v11157_v16 = vadd.f32 %v11156_v36, %v11155_v59  ;;  %v11352_v39 = vadd.f32 %v11351_v53, %v11350_v9  ;;  %v19629_v4 = vpop.f32.mrb[79].mxu1  ;;  %v11249_v9 = vmul.f32 %v19627_v54, %v19627_v54  ;;  %v11162_v61 = vsel %vm5397_vm3, %v19627_v54, 0.0 }
 0xb49   :  { %v11353_v23 = vsel %vm5397_vm3, %v11246_v5, 0.0  ;;  %v11158_v49 = vsel %vm5397_vm3, %v19629_v4, 0.0  ;;  %v11247_v40 = vmul.f32 %v19629_v4, %v19629_v4  ;;  %v11357_v5 = vsel %vm5397_vm3, %v11248_v42, 0.0 }
 0xb4a   :  { %v11354_v13 = vadd.f32 %v11353_v23, %v11352_v39  ;;  %v11159_v52 = vadd.f32 %v11158_v49, %v11157_v16  ;;  %v11359_v23 = vsel %vm5397_vm3, %v11249_v9, 0.0 }
 0xb4b   :  { %v11355_v59 = vsel %vm5397_vm3, %v11247_v40, 0.0 }
 0xb4c   :  { %v11161_v53 = vadd.f32 %v11160_v26, %v11159_v52  ;;  %v11356_v36 = vadd.f32 %v11355_v59, %v11354_v13 }
 0xb4d   :  { %v19646_v45 = vpop.f32.mrb[80].mxu1 }
 0xb4e   :  { %v11358_v17 = vadd.f32 %v11357_v5, %v11356_v36  ;;  %v19648_v39 = vpop.f32.mrb[81].mxu1  ;;  %v11163_v16 = vadd.f32 %v11162_v61, %v11161_v53  ;;  %v11252_v59 = vmul.f32 %v19646_v45, %v19646_v45  ;;  %v11168_v35 = vsel %vm5397_vm3, %v19646_v45, 0.0 }
 0xb4f   :  { %v11164_v49 = vsel %vm5397_vm3, %v19648_v39, 0.0  ;;  %v11250_v26 = vmul.f32 %v19648_v39, %v19648_v39  ;;  %v19655_v40 = vpop.f32.mrb[82].mxu1 }
 0xb50   :  { %v11165_v42 = vadd.f32 %v11164_v49, %v11163_v16  ;;  %v11360_v13 = vadd.f32 %v11359_v23, %v11358_v17  ;;  %v19657_v52 = vpop.f32.mrb[83].mxu1  ;;  %v11253_v17 = vmul.f32 %v19655_v40, %v19655_v40  ;;  %v11170_v31 = vsel %vm5397_vm3, %v19655_v40, 0.0 }
 0xb51   :  { %v11361_v36 = vsel %vm5397_vm3, %v11250_v26, 0.0  ;;  %v11166_v61 = vsel %vm5397_vm3, %v19657_v52, 0.0  ;;  %v11251_v9 = vmul.f32 %v19657_v52, %v19657_v52  ;;  %v11365_v26 = vsel %vm5397_vm3, %v11252_v59, 0.0 }
 0xb52   :  { %v11362_v53 = vadd.f32 %v11361_v36, %v11360_v13  ;;  %v11167_v5 = vadd.f32 %v11166_v61, %v11165_v42  ;;  %v11367_v61 = vsel %vm5397_vm3, %v11253_v17, 0.0 }
 0xb53   :  { %v11363_v16 = vsel %vm5397_vm3, %v11251_v9, 0.0 }
 0xb54   :  { %v11169_v23 = vadd.f32 %v11168_v35, %v11167_v5  ;;  %v11364_v49 = vadd.f32 %v11363_v16, %v11362_v53 }
 0xb55   :  { %v19676_v11 = vpop.f32.mrb[84].mxu1 }
 0xb56   :  { %v11366_v42 = vadd.f32 %v11365_v26, %v11364_v49  ;;  %v19678_v13 = vpop.f32.mrb[85].mxu1  ;;  %v11171_v36 = vadd.f32 %v11170_v31, %v11169_v23  ;;  %v11256_v49 = vmul.f32 %v19676_v11, %v19676_v11  ;;  %v19698_v26 = vpop.f32.mrb[74].mxu0 }
 0xb57   :  { %v11172_v9 = vsel %vm5397_vm3, %v19678_v13, 0.0  ;;  %v11254_v35 = vmul.f32 %v19678_v13, %v19678_v13  ;;  %v19685_v53 = vpop.f32.mrb[86].mxu1  ;;  %21321 = vst [vmem:[#allocation63_spill] sm:$0xff] %v19698_v26  ;;  %v19705_v12 = vpop.f32.mrb[75].mxu0 }
 0xb58   :  { %v11173_v59 = vadd.f32 %v11172_v9, %v11171_v36  ;;  %v11368_v5 = vadd.f32 %v11367_v61, %v11366_v42  ;;  %v19687_v16 = vpop.f32.mrb[87].mxu1  ;;  %v11176_v42 = vsel %vm5397_vm3, %v19676_v11, 0.0  ;;  %v11257_v61 = vmul.f32 %v19685_v53, %v19685_v53  ;;  %21322 = vst [vmem:[#allocation64_spill] sm:$0xff] %v19705_v12  ;;  %v19707_v28 = vpop.f32.mrb[76].mxu0 }
 0xb59   :  { %v11369_v31 = vsel %vm5397_vm3, %v11254_v35, 0.0  ;;  %v11174_v17 = vsel %vm5397_vm3, %v19687_v16, 0.0  ;;  %v11255_v23 = vmul.f32 %v19687_v16, %v19687_v16  ;;  %21323 = vst [vmem:[#allocation65_spill] sm:$0xff] %v19707_v28  ;;  %v11373_v57 = vsel %vm5397_vm3, %v11256_v49, 0.0 }
 0xb5a   :  { %v11370_v30 = vadd.f32 %v11369_v31, %v11368_v5  ;;  %v11175_v36 = vadd.f32 %v11174_v17, %v11173_v59  ;;  %v11178_v5 = vsel %vm5397_vm3, %v19685_v53, 0.0  ;;  %v19714_v31 = vpop.f32.mrb[77].mxu0 }
 0xb5b   :  { %v11371_v9 = vsel %vm5397_vm3, %v11255_v23, 0.0  ;;  %21324 = vst [vmem:[#allocation66_spill] sm:$0xff] %v19714_v31  ;;  %v19718_v23 = vpop.f32.mrb[78].mxu0 }
 0xb5c   :  { %v11177_v35 = vadd.f32 %v11176_v42, %v11175_v36  ;;  %v11372_v41 = vadd.f32 %v11371_v9, %v11370_v30  ;;  %21325 = vst [vmem:[#allocation67_spill] sm:$0xff] %v19718_v23  ;;  %v11375_v36 = vsel %vm5397_vm3, %v11257_v61, 0.0 }
 0xb5d   :  { %v19712_v59 = vpop.f32.mrb[88].mxu1 }
 0xb5e   :  { %v11374_v17 = vadd.f32 %v11373_v57, %v11372_v41  ;;  %v19716_v26 = vpop.f32.mrb[89].mxu1  ;;  %v11179_v56 = vadd.f32 %v11178_v5, %v11177_v35  ;;  %v11260_v41 = vmul.f32 %v19712_v59, %v19712_v59  ;;  %v19736_v5 = vpop.f32.mrb[79].mxu0 }
 0xb5f   :  { %v11180_v30 = vsel %vm5397_vm3, %v19716_v26, 0.0  ;;  %v11258_v49 = vmul.f32 %v19716_v26, %v19716_v26  ;;  %v19725_v42 = vpop.f32.mrb[90].mxu1  ;;  %21326 = vst [vmem:[#allocation68_spill] sm:$0xff] %v19736_v5  ;;  %v19738_v48 = vpop.f32.mrb[80].mxu0 }
 0xb60   :  { %v11181_v9 = vadd.f32 %v11180_v30, %v11179_v56  ;;  %v11376_v28 = vadd.f32 %v11375_v36, %v11374_v17  ;;  %v19727_v12 = vpop.f32.mrb[91].mxu1  ;;  %21327 = vst [vmem:[#allocation69_spill] sm:$0xff] %v19738_v48  ;;  %v11184_v56 = vsel %vm5397_vm3, %v19712_v59, 0.0  ;;  %v11261_v17 = vmul.f32 %v19725_v42, %v19725_v42  ;;  %v19745_v18 = vpop.f32.mrb[81].mxu0 }
 0xb61   :  { %v11377_v57 = vsel %vm5397_vm3, %v11258_v49, 0.0  ;;  %v11182_v61 = vsel %vm5397_vm3, %v19727_v12, 0.0  ;;  %v11259_v35 = vmul.f32 %v19727_v12, %v19727_v12  ;;  %21328 = vst [vmem:[#allocation70_spill] sm:$0xff] %v19745_v18  ;;  %v11381_v0 = vsel %vm5397_vm3, %v11260_v41, 0.0 }
 0xb62   :  { %v11378_v23 = vadd.f32 %v11377_v57, %v11376_v28  ;;  %v11183_v31 = vadd.f32 %v11182_v61, %v11181_v9  ;;  %v11186_v28 = vsel %vm5397_vm3, %v19725_v42, 0.0  ;;  %v19752_v57 = vpop.f32.mrb[82].mxu0  ;;  %v11383_v1 = vsel %vm5397_vm3, %v11261_v17, 0.0 }
 0xb63   :  { %v11379_v36 = vsel %vm5397_vm3, %v11259_v35, 0.0  ;;  %21330 = vst [vmem:[#allocation72_spill] sm:$0xff] %v19752_v57  ;;  %v19763_v35 = vpop.f32.mrb[83].mxu0 }
 0xb64   :  { %v11185_v30 = vadd.f32 %v11184_v56, %v11183_v31  ;;  %v11380_v49 = vadd.f32 %v11379_v36, %v11378_v23  ;;  %21333 = vst [vmem:[#allocation75_spill] sm:$0xff] %v19763_v35 }
 0xb65   :  { %v19750_v9 = vpop.f32.mrb[92].mxu1 }
 0xb66   :  { %21329 = vst [vmem:[#allocation71_spill] sm:$0xff] %v19750_v9  ;;  %v11382_v61 = vadd.f32 %v11381_v0, %v11380_v49  ;;  %v19754_v48 = vpop.f32.mrb[93].mxu1  ;;  %v11187_v5 = vadd.f32 %v11186_v28, %v11185_v30  ;;  %v19767_v0 = vpop.f32.mrb[84].mxu0  ;;  %v11264_v30 = vmul.f32 %v19750_v9, %v19750_v9 }
 0xb67   :  { %21331 = vst [vmem:[#allocation73_spill] sm:$0xff] %v19754_v48  ;;  %v11188_v31 = vsel %vm5397_vm3, %v19754_v48, 0.0  ;;  %v11262_v23 = vmul.f32 %v19754_v48, %v19754_v48  ;;  %v19761_v41 = vpop.f32.mrb[94].mxu1  ;;  %21335 = vst [vmem:[#allocation77_spill] sm:$0xff] %v19767_v0  ;;  %v19776_v57 = vpop.f32.mrb[85].mxu0 }
 0xb68   :  { %21332 = vst [vmem:[#allocation74_spill] sm:$0xff] %v19761_v41  ;;  %v11189_v56 = vadd.f32 %v11188_v31, %v11187_v5  ;;  %v11384_v36 = vadd.f32 %v11383_v1, %v11382_v61  ;;  %v19765_v18 = vpop.f32.mrb[95].mxu1  ;;  %21336 = vst [vmem:[#allocation78_spill] sm:$0xff] %v19776_v57  ;;  %v19778_v1 = vpop.f32.mrb[86].mxu0  ;;  %v11192_v61 = vsel %vm5397_vm3, %v19750_v9, 0.0  ;;  %v11265_v31 = vmul.f32 %v19761_v41, %v19761_v41 }
 0xb69   :  { %21334 = vst [vmem:[#allocation76_spill] sm:$0xff] %v19765_v18  ;;  %v11385_v17 = vsel %vm5397_vm3, %v11262_v23, 0.0  ;;  %v11190_v49 = vsel %vm5397_vm3, %v19765_v18, 0.0  ;;  %v11263_v28 = vmul.f32 %v19765_v18, %v19765_v18  ;;  %21337 = vst [vmem:[#allocation79_spill] sm:$0xff] %v19778_v1  ;;  %v11389_v37 = vsel %vm5397_vm3, %v11264_v30, 0.0  ;;  %v19788_v57 = vpop.f32.mrb[87].mxu0 }
 0xb6a   :  { %v11386_v35 = vadd.f32 %v11385_v17, %v11384_v36  ;;  %v11191_v5 = vadd.f32 %v11190_v49, %v11189_v56  ;;  %v11194_v18 = vsel %vm5397_vm3, %v19761_v41, 0.0  ;;  %21338 = vst [vmem:[#allocation80_spill] sm:$0xff] %v19788_v57  ;;  %v19790_v17 = vpop.f32.mrb[88].mxu0  ;;  %v11391_v49 = vsel %vm5397_vm3, %v11265_v31, 0.0 }
 0xb6b   :  { %v11387_v23 = vsel %vm5397_vm3, %v11263_v28, 0.0  ;;  %21339 = vst [vmem:[#allocation81_spill] sm:$0xff] %v19790_v17  ;;  %v19793_v48 = vpop.f32.mrb[89].mxu0 }
 0xb6c   :  { %v11193_v0 = vadd.f32 %v11192_v61, %v11191_v5  ;;  %v11388_v58 = vadd.f32 %v11387_v23, %v11386_v35  ;;  %21340 = vst [vmem:[#allocation82_spill] sm:$0xff] %v19793_v48  ;;  %v19795_v28 = vpop.f32.mrb[90].mxu0 }
 0xb6d   :  { %21341 = vst [vmem:[#allocation83_spill] sm:$0xff] %v19795_v28  ;;  %v19797_v30 = vpop.f32.mrb[91].mxu0 }
 0xb6e   :  { %v11195_v56 = vadd.f32 %v11194_v18, %v11193_v0  ;;  %v11390_v36 = vadd.f32 %v11389_v37, %v11388_v58  ;;  %21342 = vst [vmem:[#allocation84_spill] sm:$0xff] %v19797_v30  ;;  %v19799_v41 = vpop.f32.mrb[92].mxu0 }
 0xb6f   :  { %21343 = vst [vmem:[#allocation85_spill] sm:$0xff] %v19799_v41  ;;  %v19801_v18 = vpop.f32.mrb[93].mxu0  ;;  %v21369_v41 = vld [vmem:[#allocation33_spill] sm:$0xff] }
 0xb70   :  { %v11196_v1 = vrot.slane %v11195_v56, 4  ;;  %v11392_v9 = vadd.f32 %v11391_v49, %v11390_v36  ;;  %21344 = vst [vmem:[#allocation86_spill] sm:$0xff] %v19801_v18  ;;  %v19803_v0 = vpop.f32.mrb[94].mxu0  ;;  %v21367_v18 = vld [vmem:[#allocation32_spill] sm:$0xff] }
 0xb71   :  { %21345 = vst [vmem:[#allocation87_spill] sm:$0xff] %v19803_v0  ;;  %v19805_v49 = vpop.f32.mrb[95].mxu0  ;;  %v21365_v0 = vld [vmem:[#allocation12_spill] sm:$0xff] }
 0xb72   :  { %v11197_v35 = vadd.f32 %v11196_v1, %v11195_v56  ;;  %v11393_v5 = vrot.slane %v11392_v9, 4  ;;  %21346 = vst [vmem:[#allocation88_spill] sm:$0xff] %v19805_v49  ;;  %v21363_v49 = vld [vmem:[#allocation31_spill] sm:$0xff] }
 0xb74   :  { %v11198_v61 = vrot.slane %v11197_v35, 2  ;;  %v11394_v23 = vadd.f32 %v11393_v5, %v11392_v9 }
 0xb76   :  { %v11199_v37 = vadd.f32 %v11198_v61, %v11197_v35  ;;  %v11395_v58 = vrot.slane %v11394_v23, 2  ;;  %v19810_v35 = vld [vmem:[%s20926_s4] ss:$0 sm:$0xff] }
 0xb77   :  { %21347 = vst [vmem:[#allocation89_spill] sm:$0xff] %v19810_v35  ;;  %v21348_v61 = vld [vmem:[#allocation28_spill] sm:$0xff] }
 0xb78   :  { %v11200_v31 = vrot.slane %v11199_v37, 1  ;;  %v11396_v36 = vadd.f32 %v11395_v58, %v11394_v23  ;;  %v19814_v23 = vadd.f32 %v21348_v61, %v19810_v35  ;;  %v21349_v58 = vld [vmem:[#allocation23_spill] sm:$0xff]  ;;  %v21359_v61 = vld [vmem:[#allocation8_spill] sm:$0xff] }
 0xb7a   :  { %v11201_v48 = vadd.f32 %v11200_v31, %v11199_v37  ;;  %v11397_v28 = vrot.slane %v11396_v36, 1  ;;  %v19818_v37 = vadd.f32 %v19810_v35, %v21349_v58  ;;  %v19842_v58 = vadd.f32 %v19810_v35, %v21359_v61 }
 0xb7b   :  { %v19862_v61 = vadd.f32 %v21369_v41, %v19810_v35 }
 0xb7c   :  { %v11398_v1 = vadd.f32 %v11397_v28, %v11396_v36  ;;  %v11399_v56 = vmul.f32 0.001953125, %v11201_v48  ;;  %v21350_v48 = vld [vmem:[#allocation4_spill] sm:$0xff]  ;;  %v21355_v36 = vld [vmem:[#allocation5_spill] sm:$0xff] }
 0xb7d   :  { %v19822_v28 = vadd.f32 %v21350_v48, %v19810_v35  ;;  %v21361_v48 = vld [vmem:[#allocation30_spill] sm:$0xff]  ;;  %21370 = vst [vmem:[#allocation31_spill] sm:$0xff] %v19862_v61  ;;  %v21381_v61 = vld [vmem:[#allocation35_spill] sm:$0xff] }
 0xb7e   :  { %v11400_v17 = vmul.f32 0.001953125, %v11398_v1  ;;  %v11401_v30 = vmul.f32 %v11399_v56, %v11399_v56  ;;  %v19834_v1 = vadd.f32 %v19810_v35, %v21355_v36  ;;  %v19854_v36 = vadd.f32 %v21365_v0, %v19810_v35 }
 0xb7f   :  { %21351 = vst [vmem:[#allocation28_spill] sm:$0xff] %v19822_v28  ;;  %v21422_v28 = vld [vmem:[#allocation40_spill] sm:$0xff] }
 0xb80   :  { %v11402_v57 = vsub.f32 %v11400_v17, %v11401_v30  ;;  %v21353_v30 = vld [vmem:[#allocation9_spill] sm:$0xff]  ;;  %21356 = vst [vmem:[#allocation4_spill] sm:$0xff] %v19834_v1  ;;  %21366 = vst [vmem:[#allocation8_spill] sm:$0xff] %v19854_v36  ;;  %v21377_v36 = vld [vmem:[#allocation14_spill] sm:$0xff] }
 0xb81   :  { %v19830_v31 = vadd.f32 %v21353_v30, %v19810_v35  ;;  %21360 = vst [vmem:[#allocation9_spill] sm:$0xff] %v19842_v58  ;;  %v19850_v30 = vadd.f32 %v19810_v35, %v21363_v49  ;;  %v21395_v58 = vld [vmem:[#allocation17_spill] sm:$0xff] }
 0xb82   :  { %v11403_v9 = vmax.f32 %v11402_v57, 0.0  ;;  %v21352_v57 = vld [vmem:[#allocation6_spill] sm:$0xff]  ;;  %v21407_v1 = vld [vmem:[#allocation21_spill] sm:$0xff] }
 0xb83   :  { %v19826_v17 = vadd.f32 %v19810_v35, %v21352_v57  ;;  %21354 = vst [vmem:[#allocation23_spill] sm:$0xff] %v19830_v31  ;;  %v19846_v57 = vadd.f32 %v21361_v48, %v19810_v35 }
 0xb84   :  { %v11404_v5 = vadd.f32 1e-05, %v11403_v9  ;;  %v21357_v9 = vld [vmem:[#allocation7_spill] sm:$0xff] }
 0xb85   :  { %21362 = vst [vmem:[#allocation5_spill] sm:$0xff] %v19846_v57  ;;  %21364 = vst [vmem:[#allocation7_spill] sm:$0xff] %v19850_v30  ;;  %v21373_v57 = vld [vmem:[#allocation10_spill] sm:$0xff]  ;;  %v21375_v30 = vld [vmem:[#allocation11_spill] sm:$0xff] }
 0xb86   :  { %15428 = vrsqrt.f32 %v11404_v5  ;;  %v19838_v5 = vadd.f32 %v21357_v9, %v19810_v35  ;;  %v19858_v9 = vadd.f32 %v19810_v35, %v21367_v18  ;;  %v19870_v49 = vadd.f32 %v21373_v57, %v19810_v35  ;;  %v11067_v57 = vld [vmem:[%s20927_s7] sm:$0x1] }
 0xb87   :  { %v19874_v0 = vadd.f32 %v19810_v35, %v21375_v30  ;;  %v19878_v18 = vadd.f32 %v21377_v36, %v19810_v35 }
 0xb88   :  { %21358 = vst [vmem:[#allocation6_spill] sm:$0xff] %v19838_v5  ;;  %21368 = vst [vmem:[#allocation30_spill] sm:$0xff] %v19858_v9  ;;  %v21371_v5 = vld [vmem:[#allocation34_spill] sm:$0xff]  ;;  %v21379_v9 = vld [vmem:[#allocation16_spill] sm:$0xff] }
 0xb89   :  { %v19866_v48 = vadd.f32 %v19810_v35, %v21371_v5  ;;  %21374 = vst [vmem:[#allocation32_spill] sm:$0xff] %v19870_v49  ;;  %21376 = vst [vmem:[#allocation33_spill] sm:$0xff] %v19874_v0  ;;  %v19882_v41 = vadd.f32 %v19810_v35, %v21379_v9  ;;  %v19886_v5 = vadd.f32 %v21381_v61, %v19810_v35  ;;  %v21383_v49 = vld [vmem:[#allocation13_spill] sm:$0xff]  ;;  %v21385_v0 = vld [vmem:[#allocation36_spill] sm:$0xff] }
 0xb8a   :  { %21378 = vst [vmem:[#allocation34_spill] sm:$0xff] %v19878_v18  ;;  %v19893_v30 = vadd.f32 %v19810_v35, %v21383_v49  ;;  %v19897_v36 = vadd.f32 %v21385_v0, %v19810_v35  ;;  %v21387_v18 = vld [vmem:[#allocation15_spill] sm:$0xff]  ;;  %v21393_v49 = vld [vmem:[#allocation20_spill] sm:$0xff]  ;;  %v19917_v0 = vadd.f32 %v19810_v35, %v21395_v58 }
 0xb8b   :  { %21372 = vst [vmem:[#allocation12_spill] sm:$0xff] %v19866_v48  ;;  %21380 = vst [vmem:[#allocation10_spill] sm:$0xff] %v19882_v41  ;;  %v19901_v9 = vadd.f32 %v19810_v35, %v21387_v18  ;;  %v21389_v41 = vld [vmem:[#allocation18_spill] sm:$0xff]  ;;  %v21391_v48 = vld [vmem:[#allocation37_spill] sm:$0xff] }
 0xb8c   :  { %21382 = vst [vmem:[#allocation11_spill] sm:$0xff] %v19886_v5  ;;  %21384 = vst [vmem:[#allocation14_spill] sm:$0xff] %v19893_v30  ;;  %v19905_v61 = vadd.f32 %v21389_v41, %v19810_v35  ;;  %v19909_v31 = vadd.f32 %v19810_v35, %v21391_v48  ;;  %v19913_v30 = vadd.f32 %v21393_v49, %v19810_v35  ;;  %v21397_v18 = vld [vmem:[#allocation38_spill] sm:$0xff]  ;;  %v21405_v58 = vld [vmem:[#allocation24_spill] sm:$0xff] }
 0xb8d   :  { %21386 = vst [vmem:[#allocation16_spill] sm:$0xff] %v19897_v36  ;;  %21388 = vst [vmem:[#allocation35_spill] sm:$0xff] %v19901_v9  ;;  %v19921_v36 = vadd.f32 %v21397_v18, %v19810_v35  ;;  %v21399_v9 = vld [vmem:[#allocation19_spill] sm:$0xff]  ;;  %v19941_v18 = vadd.f32 %v19810_v35, %v21407_v1  ;;  %v19960_v1 = vadd.f32 %v19810_v35, %v19301_v46 }
 0xb8e   :  { %21390 = vst [vmem:[#allocation13_spill] sm:$0xff] %v19905_v61  ;;  %21392 = vst [vmem:[#allocation36_spill] sm:$0xff] %v19909_v31  ;;  %v19925_v41 = vadd.f32 %v19810_v35, %v21399_v9  ;;  %v21401_v61 = vld [vmem:[#allocation22_spill] sm:$0xff]  ;;  %v21403_v31 = vld [vmem:[#allocation39_spill] sm:$0xff]  ;;  %v19945_v9 = vadd.f32 %v19295_v32, %v19810_v35  ;;  %v19979_v46 = vadd.f32 %v19810_v35, %v19309_v29 }
 0xb8f   :  { %21394 = vst [vmem:[#allocation15_spill] sm:$0xff] %v19913_v30  ;;  %21396 = vst [vmem:[#allocation18_spill] sm:$0xff] %v19917_v0  ;;  %v19929_v48 = vadd.f32 %v21401_v61, %v19810_v35  ;;  %v19933_v49 = vadd.f32 %v19810_v35, %v21403_v31  ;;  %v19937_v0 = vadd.f32 %v21405_v58, %v19810_v35  ;;  %v11068_v31 = vld [vmem:[%s20928_s8] sm:$0x1]  ;;  %v21409_v58 = vld [vmem:[#allocation29_spill] sm:$0xff] }
 0xb90   :  { %v15429_v5 = vpop.eup %15428  ;;  %21398 = vst [vmem:[#allocation37_spill] sm:$0xff] %v19921_v36  ;;  %21400 = vst [vmem:[#allocation20_spill] sm:$0xff] %v19925_v41  ;;  %v19949_v61 = vadd.f32 %v19810_v35, %v19297_v7  ;;  %v19967_v7 = vadd.f32 %v19303_v51, %v19810_v35 }
 0xb91   :  { %21402 = vst [vmem:[#allocation17_spill] sm:$0xff] %v19929_v48  ;;  %21404 = vst [vmem:[#allocation38_spill] sm:$0xff] %v19933_v49  ;;  %v11406_v30 = vmul.f32 %v15429_v5, %v11067_v57  ;;  %v19956_v5 = vadd.f32 %v19299_v38, %v19810_v35  ;;  %v19975_v38 = vadd.f32 %v19307_v47, %v19810_v35 }
 0xb92   :  { %21406 = vst [vmem:[#allocation19_spill] sm:$0xff] %v19937_v0  ;;  %21408 = vst [vmem:[#allocation22_spill] sm:$0xff] %v19941_v18  ;;  %v19971_v0 = vadd.f32 %v19810_v35, %v19305_v8  ;;  %v21412_v35 = vld [vmem:[#allocation76_spill] sm:$0xff] }
 0xb93   :  { %v11407_v57 = vmul.f32 %v11406_v30, %v11399_v56  ;;  %v19963_v32 = vrot.slane %v11406_v30, %v21409_v58 }
 0xb95   :  { %21410 = vst [vmem:[#allocation39_spill] sm:$0xff] %v19963_v32  ;;  %v11408_v56 = vsub.f32 %v11068_v31, %v11407_v57  ;;  %v11415_v30 = vmul.f32 %v19963_v32, %v19313_v27  ;;  %v11416_v51 = vmul.f32 %v19963_v32, %v19319_v6  ;;  %v11417_v48 = vmul.f32 %v19311_v10, %v19963_v32  ;;  %v21411_v57 = vld [vmem:[#allocation73_spill] sm:$0xff] }
 0xb96   :  { %v11418_v8 = vmul.f32 %v19317_v55, %v19963_v32  ;;  %v11419_v47 = vmul.f32 %v19963_v32, %v19340_v44  ;;  %v11420_v29 = vmul.f32 %v19963_v32, %v19349_v25  ;;  %v11421_v31 = vmul.f32 %v19338_v19, %v19963_v32 }
 0xb97   :  { %v11422_v27 = vmul.f32 %v19347_v60, %v19963_v32  ;;  %v11447_v6 = vmul.f32 %v19963_v32, %v19536_v62  ;;  %v11448_v10 = vmul.f32 %v19963_v32, %v19545_v43  ;;  %v11449_v55 = vmul.f32 %v19534_v33, %v19963_v32 }
 0xb98   :  { %v11450_v44 = vmul.f32 %v19543_v3, %v19963_v32  ;;  %v11451_v25 = vmul.f32 %v19963_v32, %v19564_v15  ;;  %v11452_v19 = vmul.f32 %v19963_v32, %v19573_v24  ;;  %v11453_v60 = vmul.f32 %v19562_v50, %v19963_v32 }
 0xb99   :  { %v11454_v62 = vmul.f32 %v19571_v22, %v19963_v32  ;;  %v11455_v43 = vmul.f32 %v19963_v32, %v19592_v20  ;;  %v11456_v33 = vmul.f32 %v19963_v32, %v19601_v14  ;;  %v11457_v3 = vmul.f32 %v19590_v2, %v19963_v32 }
 0xb9a   :  { %v11458_v15 = vmul.f32 %v19599_v63, %v19963_v32  ;;  %v11459_v24 = vmul.f32 %v19963_v32, %v19620_v34  ;;  %v11460_v50 = vmul.f32 %v19963_v32, %v19629_v4  ;;  %v11461_v22 = vmul.f32 %v19618_v21, %v19963_v32 }
 0xb9b   :  { %v11462_v20 = vmul.f32 %v19627_v54, %v19963_v32  ;;  %v11463_v14 = vmul.f32 %v19963_v32, %v19648_v39  ;;  %v11464_v2 = vmul.f32 %v19963_v32, %v19657_v52  ;;  %v11465_v63 = vmul.f32 %v19646_v45, %v19963_v32 }
 0xb9c   :  { %v11466_v34 = vmul.f32 %v19655_v40, %v19963_v32  ;;  %v11467_v4 = vmul.f32 %v19963_v32, %v19678_v13  ;;  %v11468_v21 = vmul.f32 %v19963_v32, %v19687_v16  ;;  %v11469_v54 = vmul.f32 %v19676_v11, %v19963_v32 }
 0xb9d   :  { %v11470_v39 = vmul.f32 %v19685_v53, %v19963_v32  ;;  %v11471_v52 = vmul.f32 %v19963_v32, %v19716_v26  ;;  %v11472_v45 = vmul.f32 %v19963_v32, %v19727_v12  ;;  %v11473_v40 = vmul.f32 %v19712_v59, %v19963_v32  ;;  %v21413_v53 = vld [vmem:[#allocation71_spill] sm:$0xff]  ;;  %v21414_v26 = vld [vmem:[#allocation74_spill] sm:$0xff] }
 0xb9e   :  { %v11474_v13 = vmul.f32 %v19725_v42, %v19963_v32  ;;  %v11475_v16 = vmul.f32 %v19963_v32, %v21411_v57  ;;  %v11476_v11 = vmul.f32 %v19963_v32, %v21412_v35  ;;  %v11477_v18 = vmul.f32 %v21413_v53, %v19963_v32  ;;  %v21416_v59 = vld [vmem:[#allocation26_spill] sm:$0xff]  ;;  %v21418_v42 = vld [vmem:[#allocation25_spill] sm:$0xff]  ;;  %v21420_v57 = vld [vmem:[#allocation27_spill] sm:$0xff] }
 0xb9f   :  { %v11478_v49 = vmul.f32 %v21414_v26, %v19963_v32  ;;  %v20062_v12 = vrot.slane %v11408_v56, %v21409_v58  ;;  %v20066_v36 = vmul.f32 %v21416_v59, %v19963_v32  ;;  %v20070_v41 = vmul.f32 %v19963_v32, %v21418_v42  ;;  %v21424_v26 = vld [vmem:[#allocation41_spill] sm:$0xff]  ;;  %v21426_v56 = vld [vmem:[#allocation42_spill] sm:$0xff] }
 0xba0   :  { %v20074_v35 = vmul.f32 %v21420_v57, %v19963_v32  ;;  %v20078_v53 = vmul.f32 %v19963_v32, %v21422_v28  ;;  %v20082_v58 = vmul.f32 %v21424_v26, %v19963_v32  ;;  %v20086_v59 = vmul.f32 %v19963_v32, %v21426_v56 }
 0xba1   :  { %21415 = vst [vmem:[#allocation24_spill] sm:$0xff] %v20062_v12  ;;  %21417 = vst [vmem:[#allocation21_spill] sm:$0xff] %v20066_v36  ;;  %v11485_v36 = vadd.f32 %v20062_v12, %v11415_v30  ;;  %v11486_v42 = vadd.f32 %v20062_v12, %v11416_v51  ;;  %v11488_v57 = vadd.f32 %v20062_v12, %v11418_v8 }
 0xba2   :  { %21419 = vst [vmem:[#allocation29_spill] sm:$0xff] %v20070_v41  ;;  %21421 = vst [vmem:[#allocation73_spill] sm:$0xff] %v20074_v35  ;;  %v11487_v41 = vadd.f32 %v20062_v12, %v11417_v48  ;;  %v11489_v35 = vadd.f32 %v20062_v12, %v11419_v47  ;;  %v11490_v28 = vadd.f32 %v20062_v12, %v11420_v29 }
 0xba3   :  { %21423 = vst [vmem:[#allocation76_spill] sm:$0xff] %v20078_v53  ;;  %21425 = vst [vmem:[#allocation71_spill] sm:$0xff] %v20082_v58  ;;  %v11491_v53 = vadd.f32 %v20062_v12, %v11421_v31  ;;  %v11492_v26 = vadd.f32 %v20062_v12, %v11422_v27  ;;  %v11517_v58 = vadd.f32 %v20062_v12, %v11447_v6 }
 0xba4   :  { %21427 = vst [vmem:[#allocation74_spill] sm:$0xff] %v20086_v59  ;;  %v11518_v56 = vadd.f32 %v20062_v12, %v11448_v10  ;;  %v11519_v30 = vadd.f32 %v20062_v12, %v11449_v55  ;;  %v11520_v51 = vadd.f32 %v20062_v12, %v11450_v44  ;;  %v11521_v48 = vadd.f32 %v20062_v12, %v11451_v25 }
 0xba5   :  { %v11522_v8 = vadd.f32 %v20062_v12, %v11452_v19  ;;  %v11523_v47 = vadd.f32 %v20062_v12, %v11453_v60  ;;  %v11524_v29 = vadd.f32 %v20062_v12, %v11454_v62  ;;  %v11525_v31 = vadd.f32 %v20062_v12, %v11455_v43 }
 0xba6   :  { %v11526_v27 = vadd.f32 %v20062_v12, %v11456_v33  ;;  %v11527_v6 = vadd.f32 %v20062_v12, %v11457_v3  ;;  %v11528_v10 = vadd.f32 %v20062_v12, %v11458_v15  ;;  %v11529_v55 = vadd.f32 %v20062_v12, %v11459_v24 }
 0xba7   :  { %v11530_v44 = vadd.f32 %v20062_v12, %v11460_v50  ;;  %v11531_v25 = vadd.f32 %v20062_v12, %v11461_v22  ;;  %v11532_v19 = vadd.f32 %v20062_v12, %v11462_v20  ;;  %v11533_v60 = vadd.f32 %v20062_v12, %v11463_v14 }
 0xba8   :  { %v11534_v62 = vadd.f32 %v20062_v12, %v11464_v2  ;;  %v11535_v43 = vadd.f32 %v20062_v12, %v11465_v63  ;;  %v11536_v33 = vadd.f32 %v20062_v12, %v11466_v34  ;;  %v11537_v3 = vadd.f32 %v20062_v12, %v11467_v4 }
 0xba9   :  { %v11538_v15 = vadd.f32 %v20062_v12, %v11468_v21  ;;  %v11539_v24 = vadd.f32 %v20062_v12, %v11469_v54  ;;  %v11540_v50 = vadd.f32 %v20062_v12, %v11470_v39  ;;  %v11541_v22 = vadd.f32 %v20062_v12, %v11471_v52 }
 0xbaa   :  { %v11542_v20 = vadd.f32 %v20062_v12, %v11472_v45  ;;  %v11543_v14 = vadd.f32 %v20062_v12, %v11473_v40  ;;  %v11544_v2 = vadd.f32 %v20062_v12, %v11474_v13  ;;  %v11545_v63 = vadd.f32 %v20062_v12, %v11475_v16 }
 0xbab   :  { %v11546_v34 = vadd.f32 %v20062_v12, %v11476_v11  ;;  %v11547_v4 = vadd.f32 %v20062_v12, %v11477_v18  ;;  %v11548_v21 = vadd.f32 %v20062_v12, %v11478_v49  ;;  %v20129_v54 = vadd.f32 %v11485_v36, %v19949_v61 }
 0xbac   :  { %v20132_v39 = vadd.f32 %v11486_v42, %v19960_v1  ;;  %v20135_v52 = vadd.f32 %v11487_v41, %v19945_v9  ;;  %v20138_v45 = vadd.f32 %v11488_v57, %v19956_v5  ;;  %v20141_v40 = vadd.f32 %v11489_v35, %v19971_v0  ;;  %v21428_v0 = vld [vmem:[#allocation28_spill] sm:$0xff] }
 0xbad   :  { %v20144_v13 = vadd.f32 %v11490_v28, %v19979_v46  ;;  %v20147_v49 = vadd.f32 %v11491_v53, %v19967_v7  ;;  %v20150_v36 = vadd.f32 %v11492_v26, %v19975_v38  ;;  %v20153_v18 = vadd.f32 %v11517_v58, %v19818_v37  ;;  %v21429_v5 = vld [vmem:[#allocation4_spill] sm:$0xff]  ;;  %v21430_v7 = vld [vmem:[#allocation9_spill] sm:$0xff]  ;;  %v21431_v38 = vld [vmem:[#allocation23_spill] sm:$0xff] }
 0xbae   :  { %v20156_v41 = vadd.f32 %v11518_v56, %v19826_v17  ;;  %v20159_v9 = vadd.f32 %v11519_v30, %v19814_v23  ;;  %v20162_v61 = vadd.f32 %v11520_v51, %v21428_v0  ;;  %v20165_v1 = vadd.f32 %v11521_v48, %v21429_v5  ;;  %v21432_v37 = vld [vmem:[#allocation6_spill] sm:$0xff]  ;;  %v21433_v17 = vld [vmem:[#allocation7_spill] sm:$0xff]  ;;  %v21435_v58 = vld [vmem:[#allocation5_spill] sm:$0xff] }
 0xbaf   :  { %v20168_v46 = vadd.f32 %v11522_v8, %v21430_v7  ;;  %v20171_v16 = vadd.f32 %v11523_v47, %v21431_v38  ;;  %v20174_v11 = vadd.f32 %v11524_v29, %v21432_v37  ;;  %v20177_v35 = vadd.f32 %v11525_v31, %v21433_v17  ;;  %v21434_v23 = vld [vmem:[#allocation30_spill] sm:$0xff]  ;;  %v21436_v57 = vld [vmem:[#allocation8_spill] sm:$0xff]  ;;  %v21438_v30 = vld [vmem:[#allocation33_spill] sm:$0xff] }
 0xbb0   :  { %v20180_v53 = vadd.f32 %v11526_v27, %v21434_v23  ;;  %v20183_v42 = vadd.f32 %v11527_v6, %v21435_v58  ;;  %v20186_v28 = vadd.f32 %v11528_v10, %v21436_v57  ;;  %v21437_v26 = vld [vmem:[#allocation12_spill] sm:$0xff]  ;;  %v20192_v51 = vadd.f32 %v11530_v44, %v21438_v30  ;;  %v21439_v48 = vld [vmem:[#allocation31_spill] sm:$0xff]  ;;  %v21441_v31 = vld [vmem:[#allocation10_spill] sm:$0xff] }
 0xbb1   :  { %v20189_v56 = vadd.f32 %v11529_v55, %v21437_v26  ;;  %v20195_v8 = vadd.f32 %v11531_v25, %v21439_v48  ;;  %v21440_v47 = vld [vmem:[#allocation32_spill] sm:$0xff]  ;;  %v20201_v27 = vadd.f32 %v11533_v60, %v21441_v31  ;;  %v21442_v6 = vld [vmem:[#allocation14_spill] sm:$0xff]  ;;  %v21444_v55 = vld [vmem:[#allocation11_spill] sm:$0xff]  ;;  %vm11613_vm11 = vcmp.gt.f32.partialorder %v20129_v54, 0.0 }
 0xbb2   :  { %v20198_v29 = vadd.f32 %v11532_v19, %v21440_v47  ;;  %v20204_v0 = vadd.f32 %v11534_v62, %v21442_v6  ;;  %v21443_v10 = vld [vmem:[#allocation34_spill] sm:$0xff]  ;;  %v20210_v7 = vadd.f32 %v11536_v33, %v21444_v55  ;;  %v21445_v44 = vld [vmem:[#allocation35_spill] sm:$0xff]  ;;  %v21446_v25 = vld [vmem:[#allocation36_spill] sm:$0xff]  ;;  %vm11614_vm9 = vcmp.gt.f32.partialorder %v20132_v39, 0.0 }
 0xbb3   :  { %v20207_v5 = vadd.f32 %v11535_v43, %v21443_v10  ;;  %v20213_v38 = vadd.f32 %v11537_v3, %v21445_v44  ;;  %v20216_v37 = vadd.f32 %v11538_v15, %v21446_v25  ;;  %v21447_v19 = vld [vmem:[#allocation16_spill] sm:$0xff]  ;;  %v21448_v60 = vld [vmem:[#allocation13_spill] sm:$0xff]  ;;  %v21449_v62 = vld [vmem:[#allocation18_spill] sm:$0xff]  ;;  %vm11615_vm12 = vcmp.gt.f32.partialorder %v20135_v52, 0.0 }
 0xbb4   :  { %v20219_v17 = vadd.f32 %v11539_v24, %v21447_v19  ;;  %v20222_v23 = vadd.f32 %v11540_v50, %v21448_v60  ;;  %v20225_v58 = vadd.f32 %v11541_v22, %v21449_v62  ;;  %v21450_v43 = vld [vmem:[#allocation20_spill] sm:$0xff]  ;;  %v21451_v33 = vld [vmem:[#allocation15_spill] sm:$0xff]  ;;  %v21452_v3 = vld [vmem:[#allocation37_spill] sm:$0xff]  ;;  %vm11616_vm13 = vcmp.gt.f32.partialorder %v20138_v45, 0.0 }
 0xbb5   :  { %v20228_v57 = vadd.f32 %v11542_v20, %v21450_v43  ;;  %v20231_v26 = vadd.f32 %v11543_v14, %v21451_v33  ;;  %v20234_v30 = vadd.f32 %v11544_v2, %v21452_v3  ;;  %v21453_v15 = vld [vmem:[#allocation38_spill] sm:$0xff]  ;;  %v21455_v50 = vld [vmem:[#allocation17_spill] sm:$0xff]  ;;  %v21456_v22 = vld [vmem:[#allocation19_spill] sm:$0xff]  ;;  %vm11617_vm4 = vcmp.gt.f32.partialorder %v20141_v40, 0.0 }
 0xbb6   :  { %v20237_v48 = vadd.f32 %v11545_v63, %v21453_v15  ;;  %v21454_v24 = vld [vmem:[#allocation22_spill] sm:$0xff]  ;;  %v20243_v31 = vadd.f32 %v11547_v4, %v21455_v50  ;;  %v20246_v6 = vadd.f32 %v11548_v21, %v21456_v22  ;;  %v21457_v20 = vld [vmem:[#allocation89_spill] sm:$0xff]  ;;  %v21462_v63 = vld [vmem:[#allocation63_spill] sm:$0xff]  ;;  %vm11618_vm0 = vcmp.gt.f32.partialorder %v20144_v13, 0.0 }
 0xbb7   :  { %v20240_v47 = vadd.f32 %v11546_v34, %v21454_v24  ;;  %v21458_v10 = vld [vmem:[#allocation61_spill] sm:$0xff]  ;;  %v21460_v14 = vld [vmem:[#allocation62_spill] sm:$0xff]  ;;  %v20258_v44 = vadd.f32 %v21462_v63, %v21457_v20  ;;  %v21464_v34 = vld [vmem:[#allocation64_spill] sm:$0xff]  ;;  %vm11619_vm14 = vcmp.gt.f32.partialorder %v20147_v49, 0.0  ;;  %vm11620_vm6 = vcmp.gt.f32.partialorder %v20150_v36, 0.0 }
 0xbb8   :  { %v20250_v55 = vadd.f32 %v21458_v10, %v21457_v20  ;;  %v20254_v2 = vadd.f32 %v21457_v20, %v21460_v14  ;;  %v20262_v25 = vadd.f32 %v21457_v20, %v21464_v34  ;;  %v21466_v4 = vld [vmem:[#allocation65_spill] sm:$0xff]  ;;  %v21468_v19 = vld [vmem:[#allocation66_spill] sm:$0xff]  ;;  %v21470_v62 = vld [vmem:[#allocation67_spill] sm:$0xff]  ;;  %vm11645_vm10 = vcmp.gt.f32.partialorder %v20153_v18, 0.0 }
 0xbb9   :  { %21463 = vst [vmem:[#allocation27_spill] sm:$0xff] %v20258_v44  ;;  %v20266_v21 = vadd.f32 %v21466_v4, %v21457_v20  ;;  %v20270_v60 = vadd.f32 %v21457_v20, %v21468_v19  ;;  %v20274_v43 = vadd.f32 %v21470_v62, %v21457_v20  ;;  %v21472_v33 = vld [vmem:[#allocation68_spill] sm:$0xff]  ;;  %v21474_v15 = vld [vmem:[#allocation69_spill] sm:$0xff]  ;;  %v21476_v50 = vld [vmem:[#allocation70_spill] sm:$0xff]  ;;  %vm11646_vm1 = vcmp.gt.f32.partialorder %v20156_v41, 0.0 }
 0xbba   :  { %21459 = vst [vmem:[#allocation26_spill] sm:$0xff] %v20250_v55  ;;  %21461 = vst [vmem:[#allocation25_spill] sm:$0xff] %v20254_v2  ;;  %v20278_v3 = vadd.f32 %v21457_v20, %v21472_v33  ;;  %v20282_v24 = vadd.f32 %v21474_v15, %v21457_v20  ;;  %v20286_v22 = vadd.f32 %v21457_v20, %v21476_v50  ;;  %v21478_v10 = vld [vmem:[#allocation72_spill] sm:$0xff]  ;;  %v21480_v63 = vld [vmem:[#allocation75_spill] sm:$0xff]  ;;  %vm11647_vm7 = vcmp.gt.f32.partialorder %v20159_v9, 0.0 }
 0xbbb   :  { %21465 = vst [vmem:[#allocation40_spill] sm:$0xff] %v20262_v25  ;;  %21467 = vst [vmem:[#allocation41_spill] sm:$0xff] %v20266_v21  ;;  %v20290_v14 = vadd.f32 %v21478_v10, %v21457_v20  ;;  %v20294_v34 = vadd.f32 %v21457_v20, %v21480_v63  ;;  %v21482_v4 = vld [vmem:[#allocation77_spill] sm:$0xff]  ;;  %v21484_v62 = vld [vmem:[#allocation78_spill] sm:$0xff]  ;;  %vm11651_vm2 = vcmp.gt.f32.partialorder %v20171_v16, 0.0  ;;  %vm11672_vm5 = vcmp.gt.f32.partialorder %v20234_v30, 0.0 }
 0xbbc   :  { %21469 = vst [vmem:[#allocation42_spill] sm:$0xff] %v20270_v60  ;;  %21471 = vst [vmem:[#allocation28_spill] sm:$0xff] %v20274_v43  ;;  %v20298_v19 = vadd.f32 %v21482_v4, %v21457_v20  ;;  %v20302_v33 = vadd.f32 %v21457_v20, %v21484_v62  ;;  %v21486_v15 = vld [vmem:[#allocation79_spill] sm:$0xff]  ;;  %v20393_v43 = vmul.f32 0.2, %v20162_v61  ;;  %vm11674_vm8 = vcmp.gt.f32.partialorder %v20240_v47, 0.0 }
 0xbbd   :  { %21473 = vst [vmem:[#allocation4_spill] sm:$0xff] %v20278_v3  ;;  %21475 = vst [vmem:[#allocation9_spill] sm:$0xff] %v20282_v24  ;;  %v20306_v50 = vadd.f32 %v21486_v15, %v21457_v20  ;;  %v20390_v3 = vmul.f32 0.2, %v20159_v9  ;;  %v20410_v32 = vmul.f32 0.2, %v20168_v46 }
 0xbbe   :  { %21477 = vst [vmem:[#allocation23_spill] sm:$0xff] %v20286_v22  ;;  %21479 = vst [vmem:[#allocation6_spill] sm:$0xff] %v20290_v14  ;;  %v21488_v22 = vld [vmem:[#allocation80_spill] sm:$0xff]  ;;  %v21490_v14 = vld [vmem:[#allocation81_spill] sm:$0xff]  ;;  %v11717_v60 = vmul.f32 0.2, %v20177_v35 }
 0xbbf   :  { %21481 = vst [vmem:[#allocation7_spill] sm:$0xff] %v20294_v34  ;;  %21483 = vst [vmem:[#allocation30_spill] sm:$0xff] %v20298_v19  ;;  %v20310_v10 = vadd.f32 %v21457_v20, %v21488_v22  ;;  %v20314_v63 = vadd.f32 %v21490_v14, %v21457_v20  ;;  %v21492_v34 = vld [vmem:[#allocation82_spill] sm:$0xff]  ;;  %v21494_v19 = vld [vmem:[#allocation83_spill] sm:$0xff]  ;;  %v11718_v21 = vmul.f32 0.2, %v20180_v53  ;;  %v11775_v55 = vsel %vm11647_vm7, %v20159_v9, %v20390_v3 }
 0xbc0   :  { %21485 = vst [vmem:[#allocation5_spill] sm:$0xff] %v20302_v33  ;;  %21487 = vst [vmem:[#allocation8_spill] sm:$0xff] %v20306_v50  ;;  %v20318_v4 = vadd.f32 %v21457_v20, %v21492_v34  ;;  %v20322_v62 = vadd.f32 %v21494_v19, %v21457_v20  ;;  %v21496_v33 = vld [vmem:[#allocation84_spill] sm:$0xff]  ;;  %v21498_v50 = vld [vmem:[#allocation85_spill] sm:$0xff]  ;;  %v11721_v25 = vmul.f32 0.2, %v20189_v56 }
 0xbc1   :  { %21489 = vst [vmem:[#allocation12_spill] sm:$0xff] %v20310_v10  ;;  %21491 = vst [vmem:[#allocation33_spill] sm:$0xff] %v20314_v63  ;;  %v20326_v15 = vadd.f32 %v21457_v20, %v21496_v33  ;;  %v20330_v22 = vadd.f32 %v21498_v50, %v21457_v20  ;;  %v21500_v14 = vld [vmem:[#allocation86_spill] sm:$0xff]  ;;  %v21502_v34 = vld [vmem:[#allocation87_spill] sm:$0xff]  ;;  %v11678_v33 = vmul.f32 0.2, %v20132_v39 }
 0xbc2   :  { %21493 = vst [vmem:[#allocation31_spill] sm:$0xff] %v20318_v4  ;;  %21495 = vst [vmem:[#allocation32_spill] sm:$0xff] %v20322_v62  ;;  %v20335_v63 = vadd.f32 %v21457_v20, %v21500_v14  ;;  %v20339_v4 = vadd.f32 %v21502_v34, %v21457_v20  ;;  %v21504_v19 = vld [vmem:[#allocation88_spill] sm:$0xff]  ;;  %v11679_v50 = vmul.f32 0.2, %v20135_v52  ;;  %v21506_v14 = vld [vmem:[#allocation21_spill] sm:$0xff] }
 0xbc3   :  { %21497 = vst [vmem:[#allocation10_spill] sm:$0xff] %v20326_v15  ;;  %21499 = vst [vmem:[#allocation14_spill] sm:$0xff] %v20330_v22  ;;  %v20343_v62 = vadd.f32 %v21457_v20, %v21504_v19  ;;  %v11677_v20 = vmul.f32 0.2, %v20129_v54  ;;  %v20359_v34 = vadd.f32 %v20062_v12, %v21506_v14  ;;  %v11680_v19 = vmul.f32 0.2, %v20138_v45 }
 0xbc4   :  { %21501 = vst [vmem:[#allocation34_spill] sm:$0xff] %v20335_v63  ;;  %21503 = vst [vmem:[#allocation11_spill] sm:$0xff] %v20339_v4  ;;  %v11682_v4 = vmul.f32 0.2, %v20144_v13  ;;  %v21508_v63 = vld [vmem:[#allocation29_spill] sm:$0xff]  ;;  %vm11676_vm15 = vcmp.gt.f32.partialorder %v20246_v6, 0.0 }
 0xbc5   :  { %21505 = vst [vmem:[#allocation35_spill] sm:$0xff] %v20343_v62  ;;  %21507 = vst [vmem:[#allocation36_spill] sm:$0xff] %v20359_v34  ;;  %v11681_v62 = vmul.f32 0.2, %v20141_v40  ;;  %v20367_v22 = vadd.f32 %v20062_v12, %v21508_v63  ;;  %v11683_v14 = vmul.f32 0.2, %v20147_v49  ;;  %v11741_v24 = vsel %vm11613_vm11, %v20129_v54, %v11677_v20 }
 0xbc6   :  { %v20374_v15 = vmul.f32 0.2, %v20150_v36  ;;  %v20377_v10 = vmul.f32 0.2, %v20153_v18  ;;  %v20387_v63 = vmul.f32 0.2, %v20156_v41  ;;  %v11742_v54 = vsel %vm11614_vm9, %v20132_v39, %v11678_v33 }
 0xbc7   :  { %21509 = vst [vmem:[#allocation16_spill] sm:$0xff] %v20367_v22  ;;  %11805 = vst.msk [vmem:[%s20929_s9] sm:$0xff] %vm5397_vm3, %v11741_v24  ;;  %vm11655_vm11 = vcmp.gt.f32.partialorder %v20183_v42, 0.0  ;;  %v20407_v20 = vmul.f32 0.2, %v20165_v1  ;;  %v11743_v24 = vsel %vm11615_vm12, %v20135_v52, %v11679_v50  ;;  %vm11659_vm9 = vcmp.gt.f32.partialorder %v20195_v8, 0.0 }
 0xbc8   :  { %v20413_v39 = vmul.f32 0.2, %v20171_v16  ;;  %11806 = vst.msk [vmem:[%s20929_s9 + $0x8] sm:$0xff] %vm5397_vm3, %v11742_v54  ;;  %v11716_v33 = vmul.f32 0.2, %v20174_v11  ;;  %v11744_v52 = vsel %vm11616_vm13, %v20138_v45, %v11680_v19  ;;  %11807 = vst.msk [vmem:[%s20929_s9 + $0x10] sm:$0xff] %vm5397_vm3, %v11743_v24  ;;  %v11745_v45 = vsel %vm11617_vm4, %v20141_v40, %v11681_v62 }
 0xbc9   :  { %vm11663_vm12 = vcmp.gt.f32.partialorder %v20207_v5, 0.0  ;;  %v11719_v50 = vmul.f32 0.2, %v20183_v42  ;;  %v11720_v54 = vmul.f32 0.2, %v20186_v28  ;;  %11808 = vst.msk [vmem:[%s20929_s9 + $0x18] sm:$0xff] %vm5397_vm3, %v11744_v52  ;;  %v11746_v40 = vsel %vm11618_vm0, %v20144_v13, %v11682_v4 }
 0xbca   :  { %vm11667_vm13 = vcmp.gt.f32.partialorder %v20219_v17, 0.0  ;;  %v11722_v19 = vmul.f32 0.2, %v20192_v51  ;;  %v11723_v24 = vmul.f32 0.2, %v20195_v8  ;;  %11809 = vst.msk [vmem:[%s20929_s9 + $0x20] sm:$0xff] %vm5397_vm3, %v11745_v45  ;;  %v11747_v13 = vsel %vm11619_vm14, %v20147_v49, %v11683_v14 }
 0xbcb   :  { %v11724_v44 = vmul.f32 0.2, %v20198_v29  ;;  %vm11671_vm4 = vcmp.gt.f32.partialorder %v20231_v26, 0.0  ;;  %v11725_v62 = vmul.f32 0.2, %v20201_v27  ;;  %11810 = vst.msk [vmem:[%s20929_s9 + $0x28] sm:$0xff] %vm5397_vm3, %v11746_v40  ;;  %v11748_v49 = vsel %vm11620_vm6, %v20150_v36, %v20374_v15 }
 0xbcc   :  { %v11726_v52 = vmul.f32 0.2, %v20204_v0  ;;  %v11727_v59 = vmul.f32 0.2, %v20207_v5  ;;  %vm11675_vm0 = vcmp.gt.f32.partialorder %v20243_v31, 0.0  ;;  %11811 = vst.msk [vmem:[%s20929_s9 + $0x30] sm:$0xff] %vm5397_vm3, %v11747_v13  ;;  %v11773_v2 = vsel %vm11645_vm10, %v20153_v18, %v20377_v10 }
 0xbcd   :  { %v11728_v4 = vmul.f32 0.2, %v20210_v7  ;;  %v11729_v45 = vmul.f32 0.2, %v20213_v38  ;;  %v11730_v12 = vmul.f32 0.2, %v20216_v37  ;;  %v11774_v34 = vsel %vm11646_vm1, %v20156_v41, %v20387_v63 }
 0xbce   :  { %v11731_v14 = vmul.f32 0.2, %v20219_v17  ;;  %v11732_v40 = vmul.f32 0.2, %v20222_v23  ;;  %v11733_v22 = vmul.f32 0.2, %v20225_v58 }
 0xbcf   :  { %11812 = vst.msk [vmem:[%s20929_s9 + $0x38] sm:$0xff] %vm5397_vm3, %v11748_v49  ;;  %v11734_v36 = vmul.f32 0.2, %v20228_v57  ;;  %v11735_v15 = vmul.f32 0.2, %v20231_v26  ;;  %11837 = vst.msk [vmem:[%s20929_s9 + $0x100] sm:$0xff] %vm5397_vm3, %v11773_v2 }
 0xbd0   :  { %v11736_v13 = vmul.f32 0.2, %v20234_v30  ;;  %v11737_v18 = vmul.f32 0.2, %v20237_v48  ;;  %v11738_v10 = vmul.f32 0.2, %v20240_v47 }
 0xbd1   :  { %v11739_v49 = vmul.f32 0.2, %v20243_v31  ;;  %11838 = vst.msk [vmem:[%s20929_s9 + $0x108] sm:$0xff] %vm5397_vm3, %v11774_v34  ;;  %v11740_v41 = vmul.f32 0.2, %v20246_v6  ;;  %vm21510_vm14 = vcmp.gt.f32.partialorder %v20162_v61, 0.0 }
 0xbd2   :  { %v11776_v2 = vsel %vm21510_vm14, %v20162_v61, %v20393_v43  ;;  %vm21511_vm6 = vcmp.gt.f32.partialorder %v20165_v1, 0.0  ;;  %vm21512_vm10 = vcmp.gt.f32.partialorder %v20168_v46, 0.0  ;;  %11839 = vst.msk [vmem:[%s20929_s9 + $0x110] sm:$0xff] %vm5397_vm3, %v11775_v55  ;;  %v11779_v61 = vsel %vm11651_vm2, %v20171_v16, %v20413_v39  ;;  %v21534_v55 = vld [vmem:[#allocation24_spill] sm:$0xff] }
 0xbd3   :  { %v11777_v63 = vsel %vm21511_vm6, %v20165_v1, %v20407_v20  ;;  %v11778_v9 = vsel %vm21512_vm10, %v20168_v46, %v20410_v32  ;;  %vm21513_vm1 = vcmp.gt.f32.partialorder %v20174_v11, 0.0  ;;  %vm21514_vm7 = vcmp.gt.f32.partialorder %v20177_v35, 0.0  ;;  %11840 = vst.msk [vmem:[%s20929_s9 + $0x118] sm:$0xff] %vm5397_vm3, %v11776_v2  ;;  %11843 = vst.msk [vmem:[%s20929_s9 + $0x130] sm:$0xff] %vm5397_vm3, %v11779_v61 }
 0xbd4   :  { %v11780_v43 = vsel %vm21513_vm1, %v20174_v11, %v11716_v33  ;;  %v11781_v1 = vsel %vm21514_vm7, %v20177_v35, %v11717_v60  ;;  %vm21515_vm14 = vcmp.gt.f32.partialorder %v20180_v53, 0.0  ;;  %11841 = vst.msk [vmem:[%s20929_s9 + $0x120] sm:$0xff] %vm5397_vm3, %v11777_v63  ;;  %11842 = vst.msk [vmem:[%s20929_s9 + $0x128] sm:$0xff] %vm5397_vm3, %v11778_v9  ;;  %v11783_v46 = vsel %vm11655_vm11, %v20183_v42, %v11719_v50  ;;  %v21536_v60 = vld [vmem:[#allocation71_spill] sm:$0xff] }
 0xbd5   :  { %v11782_v32 = vsel %vm21515_vm14, %v20180_v53, %v11718_v21  ;;  %vm21516_vm2 = vcmp.gt.f32.partialorder %v20186_v28, 0.0  ;;  %vm21517_vm6 = vcmp.gt.f32.partialorder %v20189_v56, 0.0  ;;  %vm21518_vm10 = vcmp.gt.f32.partialorder %v20192_v51, 0.0  ;;  %11844 = vst.msk [vmem:[%s20929_s9 + $0x138] sm:$0xff] %vm5397_vm3, %v11780_v43  ;;  %11845 = vst.msk [vmem:[%s20929_s9 + $0x140] sm:$0xff] %vm5397_vm3, %v11781_v1  ;;  %v21538_v33 = vld [vmem:[#allocation27_spill] sm:$0xff] }
 0xbd6   :  { %v11784_v16 = vsel %vm21516_vm2, %v20186_v28, %v11720_v54  ;;  %v11785_v11 = vsel %vm21517_vm6, %v20189_v56, %v11721_v25  ;;  %v11786_v35 = vsel %vm21518_vm10, %v20192_v51, %v11722_v19  ;;  %11846 = vst.msk [vmem:[%s20929_s9 + $0x148] sm:$0xff] %vm5397_vm3, %v11782_v32  ;;  %v11787_v53 = vsel %vm11659_vm9, %v20195_v8, %v11723_v24  ;;  %v21535_v25 = vld [vmem:[#allocation76_spill] sm:$0xff]  ;;  %v21540_v24 = vld [vmem:[#allocation41_spill] sm:$0xff] }
 0xbd7   :  { %vm21519_vm11 = vcmp.gt.f32.partialorder %v20198_v29, 0.0  ;;  %vm21520_vm1 = vcmp.gt.f32.partialorder %v20201_v27, 0.0  ;;  %vm21521_vm7 = vcmp.gt.f32.partialorder %v20204_v0, 0.0  ;;  %11847 = vst.msk [vmem:[%s20929_s9 + $0x150] sm:$0xff] %vm5397_vm3, %v11783_v46  ;;  %11848 = vst.msk [vmem:[%s20929_s9 + $0x158] sm:$0xff] %vm5397_vm3, %v11784_v16  ;;  %v11791_v51 = vsel %vm11663_vm12, %v20207_v5, %v11727_v59  ;;  %v21539_v54 = vld [vmem:[#allocation40_spill] sm:$0xff] }
 0xbd8   :  { %v11788_v42 = vsel %vm21519_vm11, %v20198_v29, %v11724_v44  ;;  %v11789_v28 = vsel %vm21520_vm1, %v20201_v27, %v11725_v62  ;;  %v11790_v56 = vsel %vm21521_vm7, %v20204_v0, %v11726_v52  ;;  %11849 = vst.msk [vmem:[%s20929_s9 + $0x160] sm:$0xff] %vm5397_vm3, %v11785_v11  ;;  %11850 = vst.msk [vmem:[%s20929_s9 + $0x168] sm:$0xff] %vm5397_vm3, %v11786_v35  ;;  %vm21522_vm9 = vcmp.gt.f32.partialorder %v20210_v7, 0.0  ;;  %v21541_v52 = vld [vmem:[#allocation42_spill] sm:$0xff]  ;;  %v21545_v46 = vld [vmem:[#allocation45_spill] sm:$0xff] }
 0xbd9   :  { %v11792_v8 = vsel %vm21522_vm9, %v20210_v7, %v11728_v4  ;;  %vm21523_vm14 = vcmp.gt.f32.partialorder %v20213_v38, 0.0  ;;  %vm21524_vm2 = vcmp.gt.f32.partialorder %v20216_v37, 0.0  ;;  %11851 = vst.msk [vmem:[%s20929_s9 + $0x170] sm:$0xff] %vm5397_vm3, %v11787_v53  ;;  %11852 = vst.msk [vmem:[%s20929_s9 + $0x178] sm:$0xff] %vm5397_vm3, %v11788_v42  ;;  %vm21525_vm12 = vcmp.gt.f32.partialorder %v20222_v23, 0.0  ;;  %v21546_v11 = vld [vmem:[#allocation46_spill] sm:$0xff] }
 0xbda   :  { %v11793_v29 = vsel %vm21523_vm14, %v20213_v38, %v11729_v45  ;;  %v11794_v27 = vsel %vm21524_vm2, %v20216_v37, %v11730_v12  ;;  %11853 = vst.msk [vmem:[%s20929_s9 + $0x180] sm:$0xff] %vm5397_vm3, %v11789_v28  ;;  %11854 = vst.msk [vmem:[%s20929_s9 + $0x188] sm:$0xff] %vm5397_vm3, %v11790_v56  ;;  %v11795_v12 = vsel %vm11667_vm13, %v20219_v17, %v11731_v14  ;;  %vm21526_vm6 = vcmp.gt.f32.partialorder %v20225_v58, 0.0  ;;  %v21547_v53 = vld [vmem:[#allocation28_spill] sm:$0xff] }
 0xbdb   :  { %v11796_v59 = vsel %vm21525_vm12, %v20222_v23, %v11732_v40  ;;  %v11797_v0 = vsel %vm21526_vm6, %v20225_v58, %v11733_v22  ;;  %vm21527_vm10 = vcmp.gt.f32.partialorder %v20228_v57, 0.0  ;;  %11855 = vst.msk [vmem:[%s20929_s9 + $0x190] sm:$0xff] %vm5397_vm3, %v11791_v51  ;;  %11856 = vst.msk [vmem:[%s20929_s9 + $0x198] sm:$0xff] %vm5397_vm3, %v11792_v8  ;;  %v11799_v7 = vsel %vm11671_vm4, %v20231_v26, %v11735_v15  ;;  %v21530_v26 = vld [vmem:[#allocation36_spill] sm:$0xff]  ;;  %v21537_v22 = vld [vmem:[#allocation74_spill] sm:$0xff] }
 0xbdc   :  { %v11798_v5 = vsel %vm21527_vm10, %v20228_v57, %v11734_v36  ;;  %11857 = vst.msk [vmem:[%s20929_s9 + $0x1a0] sm:$0xff] %vm5397_vm3, %v11793_v29  ;;  %11858 = vst.msk [vmem:[%s20929_s9 + $0x1a8] sm:$0xff] %vm5397_vm3, %v11794_v27  ;;  %v11800_v38 = vsel %vm11672_vm5, %v20234_v30, %v11736_v13  ;;  %vm21528_vm13 = vcmp.gt.f32.partialorder %v20237_v48, 0.0  ;;  %v11802_v17 = vsel %vm11674_vm8, %v20240_v47, %v11738_v10  ;;  %v21529_v57 = vld [vmem:[#allocation26_spill] sm:$0xff]  ;;  %v21532_v47 = vld [vmem:[#allocation16_spill] sm:$0xff] }
 0xbdd   :  { %v11801_v37 = vsel %vm21528_vm13, %v20237_v48, %v11737_v18  ;;  %11859 = vst.msk [vmem:[%s20929_s9 + $0x1b0] sm:$0xff] %vm5397_vm3, %v11795_v12  ;;  %11860 = vst.msk [vmem:[%s20929_s9 + $0x1b8] sm:$0xff] %vm5397_vm3, %v11796_v59  ;;  %v11803_v23 = vsel %vm11675_vm0, %v20243_v31, %v11739_v49  ;;  %v11804_v58 = vsel %vm11676_vm15, %v20246_v6, %v11740_v41  ;;  %v21531_v48 = vld [vmem:[#allocation25_spill] sm:$0xff]  ;;  %v21542_v40 = vld [vmem:[#allocation39_spill] sm:$0xff] }
 0xbde   :  { %11861 = vst.msk [vmem:[%s20929_s9 + $0x1c0] sm:$0xff] %vm5397_vm3, %v11797_v0  ;;  %11862 = vst.msk [vmem:[%s20929_s9 + $0x1c8] sm:$0xff] %vm5397_vm3, %v11798_v5  ;;  %v11559_v30 = vadd.f32 %v21530_v26, %v21529_v57  ;;  %v11557_v31 = vadd.f32 %v21532_v47, %v21531_v48  ;;  %v21533_v6 = vld [vmem:[#allocation73_spill] sm:$0xff]  ;;  %v11494_v21 = vadd.f32 %v21534_v55, %v21535_v25  ;;  %v21543_v36 = vld [vmem:[#allocation43_spill] sm:$0xff] }
 0xbdf   :  { %11863 = vst.msk [vmem:[%s20929_s9 + $0x1d0] sm:$0xff] %vm5397_vm3, %v11799_v7  ;;  %11864 = vst.msk [vmem:[%s20929_s9 + $0x1d8] sm:$0xff] %vm5397_vm3, %v11800_v38  ;;  %v11496_v44 = vadd.f32 %v21534_v55, %v21533_v6  ;;  %v11499_v3 = vadd.f32 %v21534_v55, %v21536_v60  ;;  %v11497_v34 = vadd.f32 %v21534_v55, %v21537_v22  ;;  %v21544_v13 = vld [vmem:[#allocation44_spill] sm:$0xff]  ;;  %v21549_v51 = vld [vmem:[#allocation47_spill] sm:$0xff] }
 0xbe0   :  { %11865 = vst.msk [vmem:[%s20929_s9 + $0x1e0] sm:$0xff] %vm5397_vm3, %v11801_v37  ;;  %11866 = vst.msk [vmem:[%s20929_s9 + $0x1e8] sm:$0xff] %vm5397_vm3, %v11802_v17  ;;  %vm11623_vm5 = vcmp.gt.f32.partialorder %v11559_v30, 0.0  ;;  %v11687_v20 = vmul.f32 0.2, %v11559_v30  ;;  %vm11621_vm15 = vcmp.gt.f32.partialorder %v11557_v31, 0.0  ;;  %v11558_v19 = vadd.f32 %v11494_v21, %v21539_v54 }
 0xbe1   :  { %11867 = vst.msk [vmem:[%s20929_s9 + $0x1f0] sm:$0xff] %vm5397_vm3, %v11803_v23  ;;  %11868 = vst.msk [vmem:[%s20929_s9 + $0x1f8] sm:$0xff] %vm5397_vm3, %v11804_v58  ;;  %v11685_v39 = vmul.f32 0.2, %v11557_v31  ;;  %v11560_v50 = vadd.f32 %v11496_v44, %v21538_v33  ;;  %v11563_v62 = vadd.f32 %v11499_v3, %v21540_v24  ;;  %v11561_v4 = vadd.f32 %v11497_v34, %v21541_v52  ;;  %v21548_v28 = vld [vmem:[#allocation4_spill] sm:$0xff]  ;;  %v21551_v0 = vld [vmem:[#allocation49_spill] sm:$0xff] }
 0xbe2   :  { %v11751_v45 = vsel %vm11623_vm5, %v11559_v30, %v11687_v20  ;;  %v11430_v15 = vmul.f32 %v21543_v36, %v21542_v40  ;;  %v11428_v18 = vmul.f32 %v21542_v40, %v21544_v13  ;;  %vm11622_vm4 = vcmp.gt.f32.partialorder %v11558_v19, 0.0  ;;  %v21550_v29 = vld [vmem:[#allocation48_spill] sm:$0xff]  ;;  %v21552_v7 = vld [vmem:[#allocation50_spill] sm:$0xff]  ;;  %v21553_v23 = vld [vmem:[#allocation9_spill] sm:$0xff] }
 0xbe3   :  { %v11749_v14 = vsel %vm11621_vm15, %v11557_v31, %v11685_v39  ;;  %11815 = vst.msk [vmem:[%s20929_s9 + $0x50] sm:$0xff] %vm5397_vm3, %v11751_v45  ;;  %vm11624_vm8 = vcmp.gt.f32.partialorder %v11560_v50, 0.0  ;;  %v11688_v10 = vmul.f32 0.2, %v11560_v50  ;;  %v11686_v49 = vmul.f32 0.2, %v11558_v19 }
 0xbe4   :  { %11813 = vst.msk [vmem:[%s20929_s9 + $0x40] sm:$0xff] %vm5397_vm3, %v11749_v14  ;;  %vm11627_vm0 = vcmp.gt.f32.partialorder %v11563_v62, 0.0  ;;  %v11691_v41 = vmul.f32 0.2, %v11563_v62  ;;  %vm11625_vm11 = vcmp.gt.f32.partialorder %v11561_v4, 0.0  ;;  %v11500_v61 = vadd.f32 %v21534_v55, %v11430_v15  ;;  %v21554_v57 = vld [vmem:[#allocation23_spill] sm:$0xff] }
 0xbe5   :  { %v11689_v2 = vmul.f32 0.2, %v11561_v4  ;;  %v11752_v63 = vsel %vm11624_vm8, %v11560_v50, %v11688_v10  ;;  %v11750_v9 = vsel %vm11622_vm4, %v11558_v19, %v11686_v49  ;;  %v11498_v43 = vadd.f32 %v21534_v55, %v11428_v18  ;;  %v21555_v60 = vld [vmem:[#allocation6_spill] sm:$0xff]  ;;  %v21556_v22 = vld [vmem:[#allocation7_spill] sm:$0xff]  ;;  %v21558_v33 = vld [vmem:[#allocation5_spill] sm:$0xff] }
 0xbe6   :  { %11816 = vst.msk [vmem:[%s20929_s9 + $0x58] sm:$0xff] %vm5397_vm3, %v11752_v63  ;;  %11814 = vst.msk [vmem:[%s20929_s9 + $0x48] sm:$0xff] %vm5397_vm3, %v11750_v9  ;;  %v11755_v1 = vsel %vm11627_vm0, %v11563_v62, %v11691_v41  ;;  %v11433_v16 = vmul.f32 %v21545_v46, %v21542_v40  ;;  %v11431_v35 = vmul.f32 %v21542_v40, %v21546_v11  ;;  %v21557_v20 = vld [vmem:[#allocation30_spill] sm:$0xff]  ;;  %v21559_v24 = vld [vmem:[#allocation51_spill] sm:$0xff] }
 0xbe7   :  { %v11753_v32 = vsel %vm11625_vm11, %v11561_v4, %v11689_v2  ;;  %11819 = vst.msk [vmem:[%s20929_s9 + $0x70] sm:$0xff] %vm5397_vm3, %v11755_v1  ;;  %v11564_v42 = vadd.f32 %v11500_v61, %v21547_v53  ;;  %v11562_v56 = vadd.f32 %v11498_v43, %v21548_v28  ;;  %v11434_v8 = vmul.f32 %v21549_v51, %v21542_v40  ;;  %v21560_v52 = vld [vmem:[#allocation52_spill] sm:$0xff]  ;;  %v21561_v63 = vld [vmem:[#allocation53_spill] sm:$0xff]  ;;  %v21562_v61 = vld [vmem:[#allocation54_spill] sm:$0xff] }
 0xbe8   :  { %11817 = vst.msk [vmem:[%s20929_s9 + $0x60] sm:$0xff] %vm5397_vm3, %v11753_v32  ;;  %v11432_v27 = vmul.f32 %v21542_v40, %v21550_v29  ;;  %v11503_v12 = vadd.f32 %v21534_v55, %v11433_v16  ;;  %v11501_v59 = vadd.f32 %v21534_v55, %v11431_v35  ;;  %v11437_v5 = vmul.f32 %v21551_v0, %v21542_v40  ;;  %v21563_v1 = vld [vmem:[#allocation8_spill] sm:$0xff]  ;;  %v21565_v11 = vld [vmem:[#allocation55_spill] sm:$0xff]  ;;  %v21567_v51 = vld [vmem:[#allocation57_spill] sm:$0xff] }
 0xbe9   :  { %v11435_v38 = vmul.f32 %v21542_v40, %v21552_v7  ;;  %vm11628_vm1 = vcmp.gt.f32.partialorder %v11564_v42, 0.0  ;;  %v11692_v37 = vmul.f32 0.2, %v11564_v42  ;;  %vm11626_vm7 = vcmp.gt.f32.partialorder %v11562_v56, 0.0  ;;  %v21564_v46 = vld [vmem:[#allocation12_spill] sm:$0xff]  ;;  %v21568_v29 = vld [vmem:[#allocation58_spill] sm:$0xff] }
 0xbea   :  { %v11690_v17 = vmul.f32 0.2, %v11562_v56  ;;  %v11567_v58 = vadd.f32 %v11503_v12, %v21553_v23  ;;  %v11565_v26 = vadd.f32 %v11501_v59, %v21554_v57  ;;  %v11504_v30 = vadd.f32 %v21534_v55, %v11434_v8  ;;  %v21566_v53 = vld [vmem:[#allocation56_spill] sm:$0xff]  ;;  %v21569_v0 = vld [vmem:[#allocation33_spill] sm:$0xff]  ;;  %v21570_v7 = vld [vmem:[#allocation31_spill] sm:$0xff] }
 0xbeb   :  { %v11502_v48 = vadd.f32 %v21534_v55, %v11432_v27  ;;  %v11756_v47 = vsel %vm11628_vm1, %v11564_v42, %v11692_v37  ;;  %v11507_v6 = vadd.f32 %v21534_v55, %v11437_v5  ;;  %v11505_v44 = vadd.f32 %v21534_v55, %v11435_v38 }
 0xbec   :  { %v11754_v31 = vsel %vm11626_vm7, %v11562_v56, %v11690_v17  ;;  %11820 = vst.msk [vmem:[%s20929_s9 + $0x78] sm:$0xff] %vm5397_vm3, %v11756_v47  ;;  %vm11631_vm9 = vcmp.gt.f32.partialorder %v11567_v58, 0.0  ;;  %v11695_v25 = vmul.f32 0.2, %v11567_v58  ;;  %vm11629_vm14 = vcmp.gt.f32.partialorder %v11565_v26, 0.0  ;;  %v21571_v47 = vld [vmem:[#allocation32_spill] sm:$0xff] }
 0xbed   :  { %11818 = vst.msk [vmem:[%s20929_s9 + $0x68] sm:$0xff] %vm5397_vm3, %v11754_v31  ;;  %v11693_v21 = vmul.f32 0.2, %v11565_v26  ;;  %v11568_v3 = vadd.f32 %v11504_v30, %v21555_v60  ;;  %v11566_v34 = vadd.f32 %v11502_v48, %v21556_v22  ;;  %v11571_v39 = vadd.f32 %v11507_v6, %v21557_v20  ;;  %v21572_v6 = vld [vmem:[#allocation10_spill] sm:$0xff]  ;;  %v21575_v20 = vld [vmem:[#allocation59_spill] sm:$0xff] }
 0xbee   :  { %v11569_v50 = vadd.f32 %v11505_v44, %v21558_v33  ;;  %v11759_v54 = vsel %vm11631_vm9, %v11567_v58, %v11695_v25  ;;  %v11438_v62 = vmul.f32 %v21559_v24, %v21542_v40  ;;  %v11436_v4 = vmul.f32 %v21542_v40, %v21560_v52  ;;  %v21573_v25 = vld [vmem:[#allocation14_spill] sm:$0xff]  ;;  %v21576_v33 = vld [vmem:[#allocation60_spill] sm:$0xff] }
 0xbef   :  { %v11757_v19 = vsel %vm11629_vm14, %v11565_v26, %v11693_v21  ;;  %11823 = vst.msk [vmem:[%s20929_s9 + $0x90] sm:$0xff] %vm5397_vm3, %v11759_v54  ;;  %vm11632_vm2 = vcmp.gt.f32.partialorder %v11568_v3, 0.0  ;;  %v11696_v45 = vmul.f32 0.2, %v11568_v3  ;;  %vm11630_vm12 = vcmp.gt.f32.partialorder %v11566_v34, 0.0  ;;  %v21574_v60 = vld [vmem:[#allocation34_spill] sm:$0xff] }
 0xbf0   :  { %11821 = vst.msk [vmem:[%s20929_s9 + $0x80] sm:$0xff] %vm5397_vm3, %v11757_v19  ;;  %v11694_v14 = vmul.f32 0.2, %v11566_v34  ;;  %vm11635_vm6 = vcmp.gt.f32.partialorder %v11571_v39, 0.0  ;;  %v11699_v36 = vmul.f32 0.2, %v11571_v39  ;;  %v11508_v10 = vadd.f32 %v21534_v55, %v11438_v62 }
 0xbf1   :  { %vm11633_vm10 = vcmp.gt.f32.partialorder %v11569_v50, 0.0  ;;  %v11697_v15 = vmul.f32 0.2, %v11569_v50  ;;  %v11760_v13 = vsel %vm11632_vm2, %v11568_v3, %v11696_v45  ;;  %v11506_v49 = vadd.f32 %v21534_v55, %v11436_v4 }
 0xbf2   :  { %v11758_v18 = vsel %vm11630_vm12, %v11566_v34, %v11694_v14  ;;  %11824 = vst.msk [vmem:[%s20929_s9 + $0x98] sm:$0xff] %vm5397_vm3, %v11760_v13  ;;  %v11763_v41 = vsel %vm11635_vm6, %v11571_v39, %v11699_v36  ;;  %v11441_v9 = vmul.f32 %v21561_v63, %v21542_v40  ;;  %v11439_v43 = vmul.f32 %v21542_v40, %v21562_v61  ;;  %v21578_v13 = vld [vmem:[#allocation35_spill] sm:$0xff] }
 0xbf3   :  { %11822 = vst.msk [vmem:[%s20929_s9 + $0x88] sm:$0xff] %vm5397_vm3, %v11758_v18  ;;  %v11761_v2 = vsel %vm11633_vm10, %v11569_v50, %v11697_v15  ;;  %11827 = vst.msk [vmem:[%s20929_s9 + $0xb0] sm:$0xff] %vm5397_vm3, %v11763_v41  ;;  %v11572_v32 = vadd.f32 %v11508_v10, %v21563_v1  ;;  %v11570_v16 = vadd.f32 %v11506_v49, %v21564_v46 }
 0xbf4   :  { %11825 = vst.msk [vmem:[%s20929_s9 + $0xa0] sm:$0xff] %vm5397_vm3, %v11761_v2  ;;  %v11442_v35 = vmul.f32 %v21565_v11, %v21542_v40  ;;  %v11440_v42 = vmul.f32 %v21542_v40, %v21566_v53  ;;  %v11511_v28 = vadd.f32 %v21534_v55, %v11441_v9  ;;  %v11509_v56 = vadd.f32 %v21534_v55, %v11439_v43 }
 0xbf5   :  { %v11445_v8 = vmul.f32 %v21567_v51, %v21542_v40  ;;  %v11443_v27 = vmul.f32 %v21542_v40, %v21568_v29  ;;  %vm11636_vm13 = vcmp.gt.f32.partialorder %v11572_v32, 0.0  ;;  %v11700_v12 = vmul.f32 0.2, %v11572_v32 }
 0xbf6   :  { %vm11634_vm5 = vcmp.gt.f32.partialorder %v11570_v16, 0.0  ;;  %v11698_v59 = vmul.f32 0.2, %v11570_v16  ;;  %v11575_v5 = vadd.f32 %v11511_v28, %v21569_v0  ;;  %v11573_v38 = vadd.f32 %v11509_v56, %v21570_v7 }
 0xbf7   :  { %v11512_v37 = vadd.f32 %v21534_v55, %v11442_v35  ;;  %v11510_v17 = vadd.f32 %v21534_v55, %v11440_v42  ;;  %v11764_v23 = vsel %vm11636_vm13, %v11572_v32, %v11700_v12  ;;  %v11515_v57 = vadd.f32 %v21534_v55, %v11445_v8 }
 0xbf8   :  { %v11762_v58 = vsel %vm11634_vm5, %v11570_v16, %v11698_v59  ;;  %v11513_v26 = vadd.f32 %v21534_v55, %v11443_v27  ;;  %11828 = vst.msk [vmem:[%s20929_s9 + $0xb8] sm:$0xff] %vm5397_vm3, %v11764_v23  ;;  %vm11639_vm15 = vcmp.gt.f32.partialorder %v11575_v5, 0.0  ;;  %v11703_v30 = vmul.f32 0.2, %v11575_v5 }
 0xbf9   :  { %11826 = vst.msk [vmem:[%s20929_s9 + $0xa8] sm:$0xff] %vm5397_vm3, %v11762_v58  ;;  %vm11637_vm8 = vcmp.gt.f32.partialorder %v11573_v38, 0.0  ;;  %v11701_v48 = vmul.f32 0.2, %v11573_v38  ;;  %v11576_v31 = vadd.f32 %v11512_v37, %v21571_v47  ;;  %v11574_v44 = vadd.f32 %v11510_v17, %v21572_v6 }
 0xbfa   :  { %v11579_v21 = vadd.f32 %v11515_v57, %v21573_v25  ;;  %v11577_v3 = vadd.f32 %v11513_v26, %v21574_v60  ;;  %v11767_v22 = vsel %vm11639_vm15, %v11575_v5, %v11703_v30  ;;  %v11446_v39 = vmul.f32 %v21575_v20, %v21542_v40 }
 0xbfb   :  { %v11765_v34 = vsel %vm11637_vm8, %v11573_v38, %v11701_v48  ;;  %v11444_v50 = vmul.f32 %v21542_v40, %v21576_v33  ;;  %11831 = vst.msk [vmem:[%s20929_s9 + $0xd0] sm:$0xff] %vm5397_vm3, %v11767_v22  ;;  %vm11640_vm4 = vcmp.gt.f32.partialorder %v11576_v31, 0.0  ;;  %v11704_v54 = vmul.f32 0.2, %v11576_v31 }
 0xbfc   :  { %11829 = vst.msk [vmem:[%s20929_s9 + $0xc0] sm:$0xff] %vm5397_vm3, %v11765_v34  ;;  %vm11638_vm0 = vcmp.gt.f32.partialorder %v11574_v44, 0.0  ;;  %v11702_v19 = vmul.f32 0.2, %v11574_v44  ;;  %vm11643_vm11 = vcmp.gt.f32.partialorder %v11579_v21, 0.0  ;;  %vm11641_vm1 = vcmp.gt.f32.partialorder %v11577_v3, 0.0 }
 0xbfd   :  { %v11707_v24 = vmul.f32 0.2, %v11579_v21  ;;  %v11705_v62 = vmul.f32 0.2, %v11577_v3  ;;  %v11768_v52 = vsel %vm11640_vm4, %v11576_v31, %v11704_v54  ;;  %v11516_v4 = vadd.f32 %v21534_v55, %v11446_v39 }
 0xbfe   :  { %v11766_v40 = vsel %vm11638_vm0, %v11574_v44, %v11702_v19  ;;  %v11514_v45 = vadd.f32 %v21534_v55, %v11444_v50  ;;  %11832 = vst.msk [vmem:[%s20929_s9 + $0xd8] sm:$0xff] %vm5397_vm3, %v11768_v52  ;;  %v21577_v55 = vld [vmem:[#allocation11_spill] sm:$0xff] }
 0xbff   :  { %11830 = vst.msk [vmem:[%s20929_s9 + $0xc8] sm:$0xff] %vm5397_vm3, %v11766_v40  ;;  %v11771_v14 = vsel %vm11643_vm11, %v11579_v21, %v11707_v24  ;;  %v11769_v36 = vsel %vm11641_vm1, %v11577_v3, %v11705_v62  ;;  %v11580_v15 = vadd.f32 %v11516_v4, %v21577_v55 }
 0xc00   :  { %11835 = vst.msk [vmem:[%s20929_s9 + $0xf0] sm:$0xff] %vm5397_vm3, %v11771_v14  ;;  %11833 = vst.msk [vmem:[%s20929_s9 + $0xe0] sm:$0xff] %vm5397_vm3, %v11769_v36  ;;  %v11578_v18 = vadd.f32 %v11514_v45, %v21578_v13 }
 0xc01   :  { %vm11644_vm7 = vcmp.gt.f32.partialorder %v11580_v15, 0.0  ;;  %v11708_v10 = vmul.f32 0.2, %v11580_v15 }
 0xc02   :  { %vm11642_vm9 = vcmp.gt.f32.partialorder %v11578_v18, 0.0  ;;  %v11706_v49 = vmul.f32 0.2, %v11578_v18 }
 0xc03   :  { %v11772_v41 = vsel %vm11644_vm7, %v11580_v15, %v11708_v10 }
 0xc04   :  { %v11770_v2 = vsel %vm11642_vm9, %v11578_v18, %v11706_v49  ;;  %11836 = vst.msk [vmem:[%s20929_s9 + $0xf8] sm:$0xff] %vm5397_vm3, %v11772_v41 }
 0xc05   :  { %11834 = vst.msk [vmem:[%s20929_s9 + $0xe8] sm:$0xff] %vm5397_vm3, %v11770_v2 }

</bundles_post_ra>
